<compile_context>
chip_gen: v6e
topology: v6e:2x2x1
jax: 0.10.0
libtpu: 0.0.40
codegen_flags: <defaults>
</compile_context>

<pallas_src>
import functools

import numpy as np
import jax
import jax.numpy as jnp
from jax.experimental import pallas as pl
from jax.experimental.pallas import tpu as pltpu

# ---- model dims (from the PyTorch module) ----
D_IN = 2830
ENC_DIMS = [(D_IN, 512), (512, 256), (256, 32)]
DEC_DIMS = [(32, 256), (256, 512), (512, D_IN)]
LAYER_DIMS = ENC_DIMS + DEC_DIMS

# shapes of the (pre-transposed) parameters fed to the kernel: w_i (in,out), b_i (1,out)
PARAM_SHAPES = []
for _fin, _fout in LAYER_DIMS:
    PARAM_SHAPES += [(_fin, _fout), (1, _fout)]


def _round_up(x, m):
    return (x + m - 1) // m * m


def ae_kernel(x_ref,
              w1, b1, w2, b2, w3, b3,      # encoder
              w4, b4, w5, b5, w6, b6,      # decoder
              enc_ref, dec_ref):
    bf16 = jnp.bfloat16
    x = x_ref[...].astype(bf16)                           # (TB, 2830) f32 -> bf16 (VPU)

    # encoder: Linear -> ReLU -> Linear -> ReLU -> Linear
    h = jnp.dot(x, w1[...], preferred_element_type=jnp.float32) + b1[...]
    h = jnp.maximum(h, 0.0).astype(bf16)
    h = jnp.dot(h, w2[...], preferred_element_type=jnp.float32) + b2[...]
    h = jnp.maximum(h, 0.0).astype(bf16)
    enc = jnp.dot(h, w3[...], preferred_element_type=jnp.float32) + b3[...]
    enc_ref[...] = enc                                    # (TB, 32) f32

    # decoder: Linear -> ReLU -> Linear -> Linear  (no ReLU after 256->512, no final act)
    h = jnp.dot(enc.astype(bf16), w4[...], preferred_element_type=jnp.float32) + b4[...]
    h = jnp.maximum(h, 0.0).astype(bf16)
    h = jnp.dot(h, w5[...], preferred_element_type=jnp.float32) + b5[...]
    h = h.astype(bf16)
    dec_ref[...] = jnp.dot(h, w6[...], preferred_element_type=jnp.float32) + b6[...]


def make_params(key):
    """Deterministic f32 params, PyTorch-Linear-style uniform(-1/sqrt(in), 1/sqrt(in)).

    Weights are stored pre-transposed as (in_features, out_features)."""
    params = []
    for (fin, fout) in LAYER_DIMS:
        key, kw, kb = jax.random.split(key, 3)
        bound = 1.0 / float(np.sqrt(fin))
        w = jax.random.uniform(kw, (fin, fout), jnp.float32, -bound, bound)
        b = jax.random.uniform(kb, (1, fout), jnp.float32, -bound, bound)
        params += [w, b]
    return params


def prepare_params(params):
    """Cast weights to bf16 (MXU path); biases stay f32 (add into f32 accumulator)."""
    out = []
    for i, p in enumerate(params):
        out.append(p.astype(jnp.bfloat16) if i % 2 == 0 else p)
    return out


def _choose_tile(B):
    """Batch tile: aim for >= ~8 grid steps (>= 4 per TC on v7x) for large B,
    cap at 512 (good MXU M, fits 48 MiB VMEM), never exceed the batch itself."""
    bp8 = _round_up(B, 8)
    tb = min(512, max(128, _round_up(max(bp8 // 8, 1), 8)))
    return min(tb, bp8)


@functools.partial(jax.jit, static_argnames=("tb",))
def ae_forward(x, *params, tb=None):
    """x: (B, 2830) f32.  params: output of prepare_params().  Returns (enc, dec)."""
    B = x.shape[0]
    TB = _choose_tile(B) if tb is None else min(tb, _round_up(B, 8))
    Bp = _round_up(B, TB)
    grid = (Bp // TB,)

    # only pad batch rows (no dtype cast, no feature padding)
    xp = x if Bp == B else jnp.pad(x, ((0, Bp - B), (0, 0)))

    # BlockSpecs: activations tiled along batch; weights/biases VMEM-resident
    # (constant index_map -> fetched once, no re-DMA across grid steps).
    x_spec = pl.BlockSpec((TB, D_IN), lambda i: (i, 0))
    w_specs = [pl.BlockSpec(shape, lambda i: (0, 0)) for shape in PARAM_SHAPES]
    enc_spec = pl.BlockSpec((TB, 32), lambda i: (i, 0))
    dec_spec = pl.BlockSpec((TB, D_IN), lambda i: (i, 0))

    # cost hint for XLA's scheduler
    flops = 2 * Bp * sum(fin * fout for fin, fout in LAYER_DIMS)
    param_bytes = sum(2 * fin * fout + 4 * fout for fin, fout in LAYER_DIMS)
    bytes_accessed = (Bp * D_IN * 4          # x (f32 in)
                      + param_bytes          # bf16 weights + f32 biases
                      + Bp * 32 * 4          # enc (f32 out)
                      + Bp * D_IN * 4)       # dec (f32 out)
    cost = pl.CostEstimate(flops=flops, transcendentals=0,
                           bytes_accessed=bytes_accessed)

    enc, dec = pl.pallas_call(
        ae_kernel,
        grid=grid,
        in_specs=[x_spec] + w_specs,
        out_specs=(enc_spec, dec_spec),
        out_shape=(
            jax.ShapeDtypeStruct((Bp, 32), jnp.float32),    # encoded
            jax.ShapeDtypeStruct((Bp, D_IN), jnp.float32),  # decoded (real width)
        ),
        compiler_params=pltpu.CompilerParams(
            dimension_semantics=("parallel",),   # v7x: 2 TCs split the batch grid
            vmem_limit_bytes=48 << 20,           # < 64 MiB physical on v7x
        ),
        cost_estimate=cost,
    )(xp, *params)

    if Bp != B:   # only slice (extra copy) when batch padding was required
        enc, dec = enc[:B], dec[:B]
    return enc, dec


def ae_reference_bf16(x, prepared):
    """Pure-JAX reference mirroring the kernel numerics (bf16 weights/acts, f32 acc)."""
    (w1, b1, w2, b2, w3, b3, w4, b4, w5, b5, w6, b6) = prepared
    bf16 = jnp.bfloat16
    h = jnp.maximum(jnp.dot(x.astype(bf16), w1, preferred_element_type=jnp.float32) + b1, 0.0)
    h = jnp.maximum(jnp.dot(h.astype(bf16), w2, preferred_element_type=jnp.float32) + b2, 0.0)
    enc = jnp.dot(h.astype(bf16), w3, preferred_element_type=jnp.float32) + b3
    h = jnp.maximum(jnp.dot(enc.astype(bf16), w4, preferred_element_type=jnp.float32) + b4, 0.0)
    h = jnp.dot(h.astype(bf16), w5, preferred_element_type=jnp.float32) + b5
    dec = jnp.dot(h.astype(bf16), w6, preferred_element_type=jnp.float32) + b6
    return enc, dec


def ae_reference_f32(x, params_f32):
    """Structure-exact f32 reference of the original PyTorch AE.forward."""
    (w1, b1, w2, b2, w3, b3, w4, b4, w5, b5, w6, b6) = params_f32
    h = jax.nn.relu(x @ w1 + b1)
    h = jax.nn.relu(h @ w2 + b2)
    enc = h @ w3 + b3
    h = jax.nn.relu(enc @ w4 + b4)
    h = h @ w5 + b5
    dec = h @ w6 + b6
    return enc, dec


if __name__ == "__main__":
    key = jax.random.PRNGKey(0)
    kx, kp = jax.random.split(key)

    B = 8  # small demo batch
    x = jax.random.normal(kx, (B, D_IN), jnp.float32)
    params_f32 = make_params(kp)
    params = prepare_params(params_f32)

    enc, dec = ae_forward(x, *params)
    jax.block_until_ready((enc, dec))
    assert enc.shape == (B, 32) and dec.shape == (B, D_IN)

    # numerics check vs a pure-JAX reference with the same bf16 weights
    enc_bf, dec_bf = ae_reference_bf16(x, params)
    assert jnp.allclose(enc, enc_bf, atol=2e-2, rtol=2e-2)
    assert jnp.allclose(dec, dec_bf, atol=2e-2, rtol=2e-2)

    # structure check vs the exact f32 PyTorch forward (loose tol: bf16 weights/acts)
    enc_f32, dec_f32 = ae_reference_f32(x, params_f32)
    assert jnp.allclose(enc, enc_f32, atol=1e-1, rtol=1e-1)
    assert jnp.allclose(dec, dec_f32, atol=1e-1, rtol=1e-1)

    print("KERNEL_OK")
</pallas_src>

<mosaic_0001>
module attributes {stable_mosaic.version = 11 : i64} {
  func.func @ae_kernel(%arg0: i32, %arg1: memref<8x2830xf32, #tpu.memory_space<vmem>>, %arg2: memref<2830x512xbf16, #tpu.memory_space<vmem>>, %arg3: memref<1x512xf32, #tpu.memory_space<vmem>>, %arg4: memref<512x256xbf16, #tpu.memory_space<vmem>>, %arg5: memref<1x256xf32, #tpu.memory_space<vmem>>, %arg6: memref<256x32xbf16, #tpu.memory_space<vmem>>, %arg7: memref<1x32xf32, #tpu.memory_space<vmem>>, %arg8: memref<32x256xbf16, #tpu.memory_space<vmem>>, %arg9: memref<1x256xf32, #tpu.memory_space<vmem>>, %arg10: memref<256x512xbf16, #tpu.memory_space<vmem>>, %arg11: memref<1x512xf32, #tpu.memory_space<vmem>>, %arg12: memref<512x2830xbf16, #tpu.memory_space<vmem>>, %arg13: memref<1x2830xf32, #tpu.memory_space<vmem>>, %arg14: memref<8x32xf32, #tpu.memory_space<vmem>>, %arg15: memref<8x2830xf32, #tpu.memory_space<vmem>>) attributes {dimension_semantics = [#tpu.dimension_semantics<parallel>], iteration_bounds = array<i64: 1>, scalar_prefetch = 0 : i64, scratch_operands = 0 : i64, tpu.core_type = #tpu.core_type<tc>, window_params = [{transform_indices = @transform_0, window_bounds = array<i64: 8, 2830>}, {pipeline_mode = #tpu.pipeline_mode<synchronous>, transform_indices = @transform_1, window_bounds = array<i64: 2830, 512>}, {pipeline_mode = #tpu.pipeline_mode<synchronous>, transform_indices = @transform_2, window_bounds = array<i64: 1, 512>}, {pipeline_mode = #tpu.pipeline_mode<synchronous>, transform_indices = @transform_3, window_bounds = array<i64: 512, 256>}, {pipeline_mode = #tpu.pipeline_mode<synchronous>, transform_indices = @transform_4, window_bounds = array<i64: 1, 256>}, {pipeline_mode = #tpu.pipeline_mode<synchronous>, transform_indices = @transform_5, window_bounds = array<i64: 256, 32>}, {pipeline_mode = #tpu.pipeline_mode<synchronous>, transform_indices = @transform_6, window_bounds = array<i64: 1, 32>}, {pipeline_mode = #tpu.pipeline_mode<synchronous>, transform_indices = @transform_7, window_bounds = array<i64: 32, 256>}, {pipeline_mode = #tpu.pipeline_mode<synchronous>, transform_indices = @transform_8, window_bounds = array<i64: 1, 256>}, {pipeline_mode = #tpu.pipeline_mode<synchronous>, transform_indices = @transform_9, window_bounds = array<i64: 256, 512>}, {pipeline_mode = #tpu.pipeline_mode<synchronous>, transform_indices = @transform_10, window_bounds = array<i64: 1, 512>}, {pipeline_mode = #tpu.pipeline_mode<synchronous>, transform_indices = @transform_11, window_bounds = array<i64: 512, 2830>}, {pipeline_mode = #tpu.pipeline_mode<synchronous>, transform_indices = @transform_12, window_bounds = array<i64: 1, 2830>}, {transform_indices = @transform_13, window_bounds = array<i64: 8, 32>}, {transform_indices = @transform_14, window_bounds = array<i64: 8, 2830>}]} {
    %c0 = arith.constant 0 : index
    %c0_0 = arith.constant 0 : index
    %0 = vector.load %arg1[%c0, %c0_0] : memref<8x2830xf32, #tpu.memory_space<vmem>>, vector<8x2830xf32>
    %1 = arith.truncf %0 : vector<8x2830xf32> to vector<8x2830xbf16>
    %c0_1 = arith.constant 0 : index
    %c0_2 = arith.constant 0 : index
    %2 = vector.load %arg2[%c0_1, %c0_2] : memref<2830x512xbf16, #tpu.memory_space<vmem>>, vector<2830x512xbf16>
    %cst = arith.constant dense<0.000000e+00> : vector<8x512xf32>
    %3 = tpu.matmul %1, %2, %cst {dimension_numbers = #tpu.dot_dimension_numbers<[1], [0], [0], [1], [0, 0, 1, 1], [], []>} : vector<8x2830xbf16>, vector<2830x512xbf16>, vector<8x512xf32> -> vector<8x512xf32>
    %c0_3 = arith.constant 0 : index
    %c0_4 = arith.constant 0 : index
    %4 = vector.load %arg3[%c0_3, %c0_4] : memref<1x512xf32, #tpu.memory_space<vmem>>, vector<1x512xf32>
    %5 = vector.broadcast %4 : vector<1x512xf32> to vector<8x512xf32>
    %6 = arith.addf %3, %5 : vector<8x512xf32>
    %cst_5 = arith.constant 0.000000e+00 : f32
    %7 = vector.broadcast %cst_5 : f32 to vector<8x512xf32>
    %8 = arith.maximumf %6, %7 : vector<8x512xf32>
    %9 = arith.truncf %8 : vector<8x512xf32> to vector<8x512xbf16>
    %c0_6 = arith.constant 0 : index
    %c0_7 = arith.constant 0 : index
    %10 = vector.load %arg4[%c0_6, %c0_7] : memref<512x256xbf16, #tpu.memory_space<vmem>>, vector<512x256xbf16>
    %cst_8 = arith.constant dense<0.000000e+00> : vector<8x256xf32>
    %11 = tpu.matmul %9, %10, %cst_8 {dimension_numbers = #tpu.dot_dimension_numbers<[1], [0], [0], [1], [0, 0, 1, 1], [], []>} : vector<8x512xbf16>, vector<512x256xbf16>, vector<8x256xf32> -> vector<8x256xf32>
    %c0_9 = arith.constant 0 : index
    %c0_10 = arith.constant 0 : index
    %12 = vector.load %arg5[%c0_9, %c0_10] : memref<1x256xf32, #tpu.memory_space<vmem>>, vector<1x256xf32>
    %13 = vector.broadcast %12 : vector<1x256xf32> to vector<8x256xf32>
    %14 = arith.addf %11, %13 : vector<8x256xf32>
    %cst_11 = arith.constant 0.000000e+00 : f32
    %15 = vector.broadcast %cst_11 : f32 to vector<8x256xf32>
    %16 = arith.maximumf %14, %15 : vector<8x256xf32>
    %17 = arith.truncf %16 : vector<8x256xf32> to vector<8x256xbf16>
    %c0_12 = arith.constant 0 : index
    %c0_13 = arith.constant 0 : index
    %18 = vector.load %arg6[%c0_12, %c0_13] : memref<256x32xbf16, #tpu.memory_space<vmem>>, vector<256x32xbf16>
    %cst_14 = arith.constant dense<0.000000e+00> : vector<8x32xf32>
    %19 = tpu.matmul %17, %18, %cst_14 {dimension_numbers = #tpu.dot_dimension_numbers<[1], [0], [0], [1], [0, 0, 1, 1], [], []>} : vector<8x256xbf16>, vector<256x32xbf16>, vector<8x32xf32> -> vector<8x32xf32>
    %c0_15 = arith.constant 0 : index
    %c0_16 = arith.constant 0 : index
    %20 = vector.load %arg7[%c0_15, %c0_16] : memref<1x32xf32, #tpu.memory_space<vmem>>, vector<1x32xf32>
    %21 = vector.broadcast %20 : vector<1x32xf32> to vector<8x32xf32>
    %22 = arith.addf %19, %21 : vector<8x32xf32>
    %c0_17 = arith.constant 0 : index
    %c0_18 = arith.constant 0 : index
    %23 = vector.load %arg14[%c0_17, %c0_18] : memref<8x32xf32, #tpu.memory_space<vmem>>, vector<8x32xf32>
    tpu.vector_store %arg14[%c0_17, %c0_18], %22 {strides = array<i32>} : memref<8x32xf32, #tpu.memory_space<vmem>>, vector<8x32xf32>,
    %24 = arith.truncf %22 : vector<8x32xf32> to vector<8x32xbf16>
    %c0_19 = arith.constant 0 : index
    %c0_20 = arith.constant 0 : index
    %25 = vector.load %arg8[%c0_19, %c0_20] : memref<32x256xbf16, #tpu.memory_space<vmem>>, vector<32x256xbf16>
    %cst_21 = arith.constant dense<0.000000e+00> : vector<8x256xf32>
    %26 = tpu.matmul %24, %25, %cst_21 {dimension_numbers = #tpu.dot_dimension_numbers<[1], [0], [0], [1], [0, 0, 1, 1], [], []>} : vector<8x32xbf16>, vector<32x256xbf16>, vector<8x256xf32> -> vector<8x256xf32>
    %c0_22 = arith.constant 0 : index
    %c0_23 = arith.constant 0 : index
    %27 = vector.load %arg9[%c0_22, %c0_23] : memref<1x256xf32, #tpu.memory_space<vmem>>, vector<1x256xf32>
    %28 = vector.broadcast %27 : vector<1x256xf32> to vector<8x256xf32>
    %29 = arith.addf %26, %28 : vector<8x256xf32>
    %cst_24 = arith.constant 0.000000e+00 : f32
    %30 = vector.broadcast %cst_24 : f32 to vector<8x256xf32>
    %31 = arith.maximumf %29, %30 : vector<8x256xf32>
    %32 = arith.truncf %31 : vector<8x256xf32> to vector<8x256xbf16>
    %c0_25 = arith.constant 0 : index
    %c0_26 = arith.constant 0 : index
    %33 = vector.load %arg10[%c0_25, %c0_26] : memref<256x512xbf16, #tpu.memory_space<vmem>>, vector<256x512xbf16>
    %cst_27 = arith.constant dense<0.000000e+00> : vector<8x512xf32>
    %34 = tpu.matmul %32, %33, %cst_27 {dimension_numbers = #tpu.dot_dimension_numbers<[1], [0], [0], [1], [0, 0, 1, 1], [], []>} : vector<8x256xbf16>, vector<256x512xbf16>, vector<8x512xf32> -> vector<8x512xf32>
    %c0_28 = arith.constant 0 : index
    %c0_29 = arith.constant 0 : index
    %35 = vector.load %arg11[%c0_28, %c0_29] : memref<1x512xf32, #tpu.memory_space<vmem>>, vector<1x512xf32>
    %36 = vector.broadcast %35 : vector<1x512xf32> to vector<8x512xf32>
    %37 = arith.addf %34, %36 : vector<8x512xf32>
    %38 = arith.truncf %37 : vector<8x512xf32> to vector<8x512xbf16>
    %c0_30 = arith.constant 0 : index
    %c0_31 = arith.constant 0 : index
    %39 = vector.load %arg12[%c0_30, %c0_31] : memref<512x2830xbf16, #tpu.memory_space<vmem>>, vector<512x2830xbf16>
    %cst_32 = arith.constant dense<0.000000e+00> : vector<8x2830xf32>
    %40 = tpu.matmul %38, %39, %cst_32 {dimension_numbers = #tpu.dot_dimension_numbers<[1], [0], [0], [1], [0, 0, 1, 1], [], []>} : vector<8x512xbf16>, vector<512x2830xbf16>, vector<8x2830xf32> -> vector<8x2830xf32>
    %c0_33 = arith.constant 0 : index
    %c0_34 = arith.constant 0 : index
    %41 = vector.load %arg13[%c0_33, %c0_34] : memref<1x2830xf32, #tpu.memory_space<vmem>>, vector<1x2830xf32>
    %42 = vector.broadcast %41 : vector<1x2830xf32> to vector<8x2830xf32>
    %43 = arith.addf %40, %42 : vector<8x2830xf32>
    %c0_35 = arith.constant 0 : index
    %c0_36 = arith.constant 0 : index
    %44 = vector.load %arg15[%c0_35, %c0_36] : memref<8x2830xf32, #tpu.memory_space<vmem>>, vector<8x2830xf32>
    tpu.vector_store %arg15[%c0_35, %c0_36], %43 {strides = array<i32>} : memref<8x2830xf32, #tpu.memory_space<vmem>>, vector<8x2830xf32>,
    return
  }
  func.func @transform_0(%arg0: i32) -> (i32, i32) {
    %c0_i32 = arith.constant 0 : i32
    %c0_i32_0 = arith.constant 0 : i32
    return %arg0, %c0_i32 : i32, i32
  }
  func.func @transform_1(%arg0: i32) -> (i32, i32) {
    %c0_i32 = arith.constant 0 : i32
    %c0_i32_0 = arith.constant 0 : i32
    %c0_i32_1 = arith.constant 0 : i32
    return %c0_i32, %c0_i32_0 : i32, i32
  }
  func.func @transform_2(%arg0: i32) -> (i32, i32) {
    %c0_i32 = arith.constant 0 : i32
    %c0_i32_0 = arith.constant 0 : i32
    %c0_i32_1 = arith.constant 0 : i32
    return %c0_i32, %c0_i32_0 : i32, i32
  }
  func.func @transform_3(%arg0: i32) -> (i32, i32) {
    %c0_i32 = arith.constant 0 : i32
    %c0_i32_0 = arith.constant 0 : i32
    %c0_i32_1 = arith.constant 0 : i32
    return %c0_i32, %c0_i32_0 : i32, i32
  }
  func.func @transform_4(%arg0: i32) -> (i32, i32) {
    %c0_i32 = arith.constant 0 : i32
    %c0_i32_0 = arith.constant 0 : i32
    %c0_i32_1 = arith.constant 0 : i32
    return %c0_i32, %c0_i32_0 : i32, i32
  }
  func.func @transform_5(%arg0: i32) -> (i32, i32) {
    %c0_i32 = arith.constant 0 : i32
    %c0_i32_0 = arith.constant 0 : i32
    %c0_i32_1 = arith.constant 0 : i32
    return %c0_i32, %c0_i32_0 : i32, i32
  }
  func.func @transform_6(%arg0: i32) -> (i32, i32) {
    %c0_i32 = arith.constant 0 : i32
    %c0_i32_0 = arith.constant 0 : i32
    %c0_i32_1 = arith.constant 0 : i32
    return %c0_i32, %c0_i32_0 : i32, i32
  }
  func.func @transform_7(%arg0: i32) -> (i32, i32) {
    %c0_i32 = arith.constant 0 : i32
    %c0_i32_0 = arith.constant 0 : i32
    %c0_i32_1 = arith.constant 0 : i32
    return %c0_i32, %c0_i32_0 : i32, i32
  }
  func.func @transform_8(%arg0: i32) -> (i32, i32) {
    %c0_i32 = arith.constant 0 : i32
    %c0_i32_0 = arith.constant 0 : i32
    %c0_i32_1 = arith.constant 0 : i32
    return %c0_i32, %c0_i32_0 : i32, i32
  }
  func.func @transform_9(%arg0: i32) -> (i32, i32) {
    %c0_i32 = arith.constant 0 : i32
    %c0_i32_0 = arith.constant 0 : i32
    %c0_i32_1 = arith.constant 0 : i32
    return %c0_i32, %c0_i32_0 : i32, i32
  }
  func.func @transform_10(%arg0: i32) -> (i32, i32) {
    %c0_i32 = arith.constant 0 : i32
    %c0_i32_0 = arith.constant 0 : i32
    %c0_i32_1 = arith.constant 0 : i32
    return %c0_i32, %c0_i32_0 : i32, i32
  }
  func.func @transform_11(%arg0: i32) -> (i32, i32) {
    %c0_i32 = arith.constant 0 : i32
    %c0_i32_0 = arith.constant 0 : i32
    %c0_i32_1 = arith.constant 0 : i32
    return %c0_i32, %c0_i32_0 : i32, i32
  }
  func.func @transform_12(%arg0: i32) -> (i32, i32) {
    %c0_i32 = arith.constant 0 : i32
    %c0_i32_0 = arith.constant 0 : i32
    %c0_i32_1 = arith.constant 0 : i32
    return %c0_i32, %c0_i32_0 : i32, i32
  }
  func.func @transform_13(%arg0: i32) -> (i32, i32) {
    %c0_i32 = arith.constant 0 : i32
    %c0_i32_0 = arith.constant 0 : i32
    return %arg0, %c0_i32 : i32, i32
  }
  func.func @transform_14(%arg0: i32) -> (i32, i32) {
    %c0_i32 = arith.constant 0 : i32
    %c0_i32_0 = arith.constant 0 : i32
    return %arg0, %c0_i32 : i32, i32
  }
}

</mosaic_0001>

<bundles_post_ra>
// kernel: ae_forward.1
= control target key start
LH: loop header
LB: loop body
LE: loop exit
PB: predicated region body
PF: predicated region fallthrough
CT: control target
= control target key end

     0   :  { %20 = vsyncpa [#allocation3], 0  ;;  %vm4365_vm0 = vcmask 1046528   ;;  %vm4361_vm1 = vcmask 113664   ;;  %s21580_s0 = inlined_call_operand.vmem [shape: f32[8,2830], index: 0, kind: input, shape index: {}]   ;;  %s21581_s1 = inlined_call_operand.vmem [shape: bf16[2830,512], index: 1, kind: input, shape index: {}]   ;;  %s21582_s2 = inlined_call_operand.vmem [shape: f32[1,512], index: 2, kind: input, shape index: {}]   ;;  %s21583_s3 = inlined_call_operand.vmem [shape: bf16[512,256], index: 3, kind: input, shape index: {}]   ;;  %s21584_s4 = inlined_call_operand.vmem [shape: f32[1,256], index: 4, kind: input, shape index: {}]   ;;  %s21585_s5 = inlined_call_operand.vmem [shape: bf16[256,32], index: 5, kind: input, shape index: {}]   ;;  %s21586_s6 = inlined_call_operand.vmem [shape: f32[1,32], index: 6, kind: input, shape index: {}]   ;;  %s21587_s7 = inlined_call_operand.vmem [shape: bf16[32,256], index: 7, kind: input, shape index: {}]   ;;  %s21588_s8 = inlined_call_operand.vmem [shape: f32[1,256], index: 8, kind: input, shape index: {}]   ;;  %s21589_s9 = inlined_call_operand.vmem [shape: bf16[256,512], index: 9, kind: input, shape index: {}]   ;;  %s21590_s10 = inlined_call_operand.vmem [shape: f32[1,512], index: 10, kind: input, shape index: {}]   ;;  %s21591_s11 = inlined_call_operand.vmem [shape: bf16[512,2830], index: 11, kind: input, shape index: {}]   ;;  %s21592_s12 = inlined_call_operand.vmem [shape: f32[1,2830], index: 12, kind: input, shape index: {}]   ;;  %s21593_s13 = inlined_call_operand.hbm [shape: f32[8,32], index: 13, kind: output, shape index: {0}]   ;;  %s21594_s14 = inlined_call_operand.hbm [shape: f32[8,2830], index: 14, kind: output, shape index: {1}]  }
   0x1   :  { %v13907_v0 = vld [vmem:[%s21581_s1 + $0xe4] ss:$16 sps:$4 sm:$0xff]   ;;  %v13911_v2 = vld [vmem:[%s21581_s1 + $0xe0] ss:$16 sps:$4 sm:$0xff]   ;;  %v50_v46 = vld [vmem:[%s21580_s0 + $0x8] sm:$0xff] }
   0x2   :  { %v13909_v1 = vld [vmem:[%s21581_s1 + $0x2e4] ss:$16 sps:$4 sm:$0xff]   ;;  %4378 = vmatprep.subr.bf16.mxu0 %v13907_v0  ;;  %v13912_v3 = vld [vmem:[%s21581_s1 + $0x2e0] ss:$16 sps:$4 sm:$0xff]   ;;  %v16541_v49 = vpack.c.bf16 %v50_v46, %v50_v46  ;;  %v52_v50 = vld [vmem:[%s21580_s0 + $0x18] sm:$0xff] }
   0x3   :  { %4419 = vmatprep.subr.bf16.mxu1 %v13909_v1  ;;  %v13913_v4 = vld [vmem:[%s21581_s1 + $0xc4] ss:$16 sps:$4 sm:$0xff]   ;;  %4379 = vmatpush1.bf16.msra.mxu0 %v13911_v2  ;;  %v13917_v6 = vld [vmem:[%s21581_s1 + $0xc0] ss:$16 sps:$4 sm:$0xff]   ;;  %v16549_v52 = vpack.c.bf16 %v52_v50, %v52_v50 }
   0x4   :  { %4420 = vmatpush1.bf16.msra.mxu1 %v13912_v3  ;;  %v13915_v5 = vld [vmem:[%s21581_s1 + $0x2c4] ss:$16 sps:$4 sm:$0xff]   ;;  %4380 = vmatprep.subr.bf16.mxu0 %v13913_v4  ;;  %v13918_v7 = vld [vmem:[%s21581_s1 + $0x2c0] ss:$16 sps:$4 sm:$0xff]  }
   0x5   :  { %4421 = vmatprep.subr.bf16.mxu1 %v13915_v5  ;;  %v13919_v8 = vld [vmem:[%s21581_s1 + $0xa4] ss:$16 sps:$4 sm:$0xff]   ;;  %v13923_v10 = vld [vmem:[%s21581_s1 + $0xa0] ss:$16 sps:$4 sm:$0xff]   ;;  %4410 = vmatprep.mubr.bf16.mxu0 %v16541_v49 }
   0x6   :  { %v13921_v9 = vld [vmem:[%s21581_s1 + $0x2a4] ss:$16 sps:$4 sm:$0xff]   ;;  %v13924_v11 = vld [vmem:[%s21581_s1 + $0x2a0] ss:$16 sps:$4 sm:$0xff]   ;;  %4451 = vmatprep.mubr.bf16.mxu1 %v16549_v52 }
   0x7   :  { %4381 = vmatpush1.bf16.msra.mxu0 %v13917_v6  ;;  %v13925_v12 = vld [vmem:[%s21581_s1 + $0x84] ss:$16 sps:$4 sm:$0xff]   ;;  %v13929_v14 = vld [vmem:[%s21581_s1 + $0x80] ss:$16 sps:$4 sm:$0xff]  }
   0x8   :  { %4422 = vmatpush1.bf16.msra.mxu1 %v13918_v7  ;;  %4382 = vmatprep.subr.bf16.mxu0 %v13919_v8  ;;  %v13927_v13 = vld [vmem:[%s21581_s1 + $0x284] ss:$16 sps:$4 sm:$0xff]   ;;  %v13930_v15 = vld [vmem:[%s21581_s1 + $0x280] ss:$16 sps:$4 sm:$0xff]  }
   0x9   :  { %4423 = vmatprep.subr.bf16.mxu1 %v13921_v9  ;;  %v13931_v16 = vld [vmem:[%s21581_s1 + $0x64] ss:$16 sps:$4 sm:$0xff]   ;;  %v13935_v18 = vld [vmem:[%s21581_s1 + $0x60] ss:$16 sps:$4 sm:$0xff]  }
   0xa   :  { %v13933_v17 = vld [vmem:[%s21581_s1 + $0x264] ss:$16 sps:$4 sm:$0xff]   ;;  %v13936_v19 = vld [vmem:[%s21581_s1 + $0x260] ss:$16 sps:$4 sm:$0xff]  }
   0xb   :  { %4383 = vmatpush1.bf16.msra.mxu0 %v13923_v10  ;;  %v13937_v20 = vld [vmem:[%s21581_s1 + $0x44] ss:$16 sps:$4 sm:$0xff]   ;;  %v13941_v22 = vld [vmem:[%s21581_s1 + $0x40] ss:$16 sps:$4 sm:$0xff]  }
   0xc   :  { %4424 = vmatpush1.bf16.msra.mxu1 %v13924_v11  ;;  %4384 = vmatprep.subr.bf16.mxu0 %v13925_v12  ;;  %v13939_v21 = vld [vmem:[%s21581_s1 + $0x244] ss:$16 sps:$4 sm:$0xff]   ;;  %v13942_v23 = vld [vmem:[%s21581_s1 + $0x240] ss:$16 sps:$4 sm:$0xff]  }
   0xd   :  { %4425 = vmatprep.subr.bf16.mxu1 %v13927_v13  ;;  %v13943_v24 = vld [vmem:[%s21581_s1 + $0x24] ss:$16 sps:$4 sm:$0xff]   ;;  %v13947_v26 = vld [vmem:[%s21581_s1 + $0x20] ss:$16 sps:$4 sm:$0xff]  }
   0xe   :  { %v13945_v25 = vld [vmem:[%s21581_s1 + $0x224] ss:$16 sps:$4 sm:$0xff]   ;;  %v13948_v27 = vld [vmem:[%s21581_s1 + $0x220] ss:$16 sps:$4 sm:$0xff]  }
   0xf   :  { %4385 = vmatpush1.bf16.msra.mxu0 %v13929_v14  ;;  %v13949_v28 = vld [vmem:[%s21581_s1 + $0x4] ss:$16 sps:$4 sm:$0xff]   ;;  %v13953_v30 = vld [vmem:[%s21581_s1] ss:$16 sps:$4 sm:$0xff]  }
  0x10   :  { %4426 = vmatpush1.bf16.msra.mxu1 %v13930_v15  ;;  %4386 = vmatprep.subr.bf16.mxu0 %v13931_v16  ;;  %v13951_v29 = vld [vmem:[%s21581_s1 + $0x204] ss:$16 sps:$4 sm:$0xff]   ;;  %v13954_v31 = vld [vmem:[%s21581_s1 + $0x200] ss:$16 sps:$4 sm:$0xff]  }
  0x11   :  { %4427 = vmatprep.subr.bf16.mxu1 %v13933_v17  ;;  %v13955_v32 = vld [vmem:[%s21581_s1 + $0x1e4] ss:$16 sps:$4 sm:$0xff]   ;;  %v13959_v34 = vld [vmem:[%s21581_s1 + $0x1e0] ss:$16 sps:$4 sm:$0xff]  }
  0x12   :  { %v13957_v33 = vld [vmem:[%s21581_s1 + $0x3e4] ss:$16 sps:$4 sm:$0xff]   ;;  %v13960_v35 = vld [vmem:[%s21581_s1 + $0x3e0] ss:$16 sps:$4 sm:$0xff]  }
  0x13   :  { %4387 = vmatpush1.bf16.msra.mxu0 %v13935_v18  ;;  %v13961_v36 = vld [vmem:[%s21581_s1 + $0x1c4] ss:$16 sps:$4 sm:$0xff]   ;;  %v13965_v38 = vld [vmem:[%s21581_s1 + $0x1c0] ss:$16 sps:$4 sm:$0xff]  }
  0x14   :  { %4428 = vmatpush1.bf16.msra.mxu1 %v13936_v19  ;;  %4388 = vmatprep.subr.bf16.mxu0 %v13937_v20  ;;  %v13963_v37 = vld [vmem:[%s21581_s1 + $0x3c4] ss:$16 sps:$4 sm:$0xff]   ;;  %v13966_v39 = vld [vmem:[%s21581_s1 + $0x3c0] ss:$16 sps:$4 sm:$0xff]  }
  0x15   :  { %4429 = vmatprep.subr.bf16.mxu1 %v13939_v21  ;;  %v13967_v40 = vld [vmem:[%s21581_s1 + $0x1a4] ss:$16 sps:$4 sm:$0xff]   ;;  %v13971_v42 = vld [vmem:[%s21581_s1 + $0x1a0] ss:$16 sps:$4 sm:$0xff]  }
  0x16   :  { %v13969_v41 = vld [vmem:[%s21581_s1 + $0x3a4] ss:$16 sps:$4 sm:$0xff]   ;;  %v13972_v43 = vld [vmem:[%s21581_s1 + $0x3a0] ss:$16 sps:$4 sm:$0xff]  }
  0x17   :  { %4389 = vmatpush1.bf16.msra.mxu0 %v13941_v22  ;;  %v13973_v44 = vld [vmem:[%s21581_s1 + $0x184] ss:$16 sps:$4 sm:$0xff]   ;;  %v13977_v47 = vld [vmem:[%s21581_s1 + $0x180] ss:$16 sps:$4 sm:$0xff]  }
  0x18   :  { %4430 = vmatpush1.bf16.msra.mxu1 %v13942_v23  ;;  %4390 = vmatprep.subr.bf16.mxu0 %v13943_v24  ;;  %v13975_v45 = vld [vmem:[%s21581_s1 + $0x384] ss:$16 sps:$4 sm:$0xff]   ;;  %v13978_v48 = vld [vmem:[%s21581_s1 + $0x380] ss:$16 sps:$4 sm:$0xff]  }
  0x19   :  { %4431 = vmatprep.subr.bf16.mxu1 %v13945_v25  ;;  %v13979_v51 = vld [vmem:[%s21581_s1 + $0x164] ss:$16 sps:$4 sm:$0xff]   ;;  %v13983_v54 = vld [vmem:[%s21581_s1 + $0x160] ss:$16 sps:$4 sm:$0xff]  }
  0x1a   :  { %v13981_v53 = vld [vmem:[%s21581_s1 + $0x364] ss:$16 sps:$4 sm:$0xff]   ;;  %v13984_v55 = vld [vmem:[%s21581_s1 + $0x360] ss:$16 sps:$4 sm:$0xff]  }
  0x1b   :  { %4391 = vmatpush1.bf16.msra.mxu0 %v13947_v26  ;;  %v13985_v56 = vld [vmem:[%s21581_s1 + $0x144] ss:$16 sps:$4 sm:$0xff]   ;;  %v13989_v58 = vld [vmem:[%s21581_s1 + $0x140] ss:$16 sps:$4 sm:$0xff]  }
  0x1c   :  { %4432 = vmatpush1.bf16.msra.mxu1 %v13948_v27  ;;  %4392 = vmatprep.subr.bf16.mxu0 %v13949_v28  ;;  %v13987_v57 = vld [vmem:[%s21581_s1 + $0x344] ss:$16 sps:$4 sm:$0xff]   ;;  %v13990_v59 = vld [vmem:[%s21581_s1 + $0x340] ss:$16 sps:$4 sm:$0xff]  }
  0x1d   :  { %4433 = vmatprep.subr.bf16.mxu1 %v13951_v29  ;;  %v13991_v60 = vld [vmem:[%s21581_s1 + $0x124] ss:$16 sps:$4 sm:$0xff]   ;;  %v13995_v62 = vld [vmem:[%s21581_s1 + $0x120] ss:$16 sps:$4 sm:$0xff]  }
  0x1e   :  { %v13993_v61 = vld [vmem:[%s21581_s1 + $0x324] ss:$16 sps:$4 sm:$0xff]   ;;  %v13996_v63 = vld [vmem:[%s21581_s1 + $0x320] ss:$16 sps:$4 sm:$0xff]  }
  0x1f   :  { %4393 = vmatpush1.bf16.msra.mxu0 %v13953_v30  ;;  %v13997_v0 = vld [vmem:[%s21581_s1 + $0x104] ss:$16 sps:$4 sm:$0xff]   ;;  %v14001_v2 = vld [vmem:[%s21581_s1 + $0x100] ss:$16 sps:$4 sm:$0xff]  }
  0x20   :  { %4434 = vmatpush1.bf16.msra.mxu1 %v13954_v31  ;;  %4394 = vmatprep.subr.bf16.mxu0 %v13955_v32  ;;  %v13999_v1 = vld [vmem:[%s21581_s1 + $0x304] ss:$16 sps:$4 sm:$0xff]   ;;  %v14002_v3 = vld [vmem:[%s21581_s1 + $0x300] ss:$16 sps:$4 sm:$0xff]  }
  0x21   :  { %4435 = vmatprep.subr.bf16.mxu1 %v13957_v33  ;;  %v49_v4 = vld [vmem:[%s21580_s0] sm:$0xff]  ;;  %v51_v5 = vld [vmem:[%s21580_s0 + $0x10] sm:$0xff] }
  0x22   :  { %v14005_v6 = vld [vmem:[%s21581_s1 + $0x4e4] ss:$16 sps:$4 sm:$0xff]   ;;  %v16610_v8 = vpack.c.bf16 %v49_v4, %v49_v4  ;;  %v16612_v9 = vpack.c.bf16 %v51_v5, %v51_v5  ;;  %v14003_v10 = vld [vmem:[%s21581_s1 + $0x4e0] ss:$16 sps:$4 sm:$0xff]  }
  0x23   :  { %4395 = vmatpush2.bf16.msra.mxu0 %v13959_v34  ;;  %v14008_v7 = vld [vmem:[%s21581_s1 + $0x6e4] ss:$16 sps:$4 sm:$0xff]   ;;  %v14006_v11 = vld [vmem:[%s21581_s1 + $0x6e0] ss:$16 sps:$4 sm:$0xff]   ;;  %v54_v34 = vld [vmem:[%s21580_s0 + $0x28] sm:$0xff] }
  0x24   :  { %4436 = vmatpush2.bf16.msra.mxu1 %v13960_v35  ;;  %4396 = vmatprep.subr.bf16.mxu0 %v13961_v36  ;;  %v14011_v12 = vld [vmem:[%s21581_s1 + $0x4c4] ss:$16 sps:$4 sm:$0xff]   ;;  %v14009_v14 = vld [vmem:[%s21581_s1 + $0x4c0] ss:$16 sps:$4 sm:$0xff]  }
  0x25   :  { %4437 = vmatprep.subr.bf16.mxu1 %v13963_v37  ;;  %v14014_v13 = vld [vmem:[%s21581_s1 + $0x6c4] ss:$16 sps:$4 sm:$0xff]   ;;  %v14012_v15 = vld [vmem:[%s21581_s1 + $0x6c0] ss:$16 sps:$4 sm:$0xff]   ;;  %v16697_v37 = vpack.c.bf16 %v54_v34, %v54_v34 }
  0x26   :  { %v14017_v16 = vld [vmem:[%s21581_s1 + $0x4a4] ss:$16 sps:$4 sm:$0xff]   ;;  %v14015_v18 = vld [vmem:[%s21581_s1 + $0x4a0] ss:$16 sps:$4 sm:$0xff]  }
  0x27   :  { %4397 = vmatpush2.bf16.msra.mxu0 %v13965_v38  ;;  %v14020_v17 = vld [vmem:[%s21581_s1 + $0x6a4] ss:$16 sps:$4 sm:$0xff]   ;;  %v14018_v19 = vld [vmem:[%s21581_s1 + $0x6a0] ss:$16 sps:$4 sm:$0xff]   ;;  %v56_v38 = vld [vmem:[%s21580_s0 + $0x38] sm:$0xff] }
  0x28   :  { %4438 = vmatpush2.bf16.msra.mxu1 %v13966_v39  ;;  %4398 = vmatprep.subr.bf16.mxu0 %v13967_v40  ;;  %v14023_v20 = vld [vmem:[%s21581_s1 + $0x484] ss:$16 sps:$4 sm:$0xff]   ;;  %v14021_v22 = vld [vmem:[%s21581_s1 + $0x480] ss:$16 sps:$4 sm:$0xff]   ;;  %v16705_v40 = vpack.c.bf16 %v56_v38, %v56_v38 }
  0x29   :  { %4439 = vmatprep.subr.bf16.mxu1 %v13969_v41  ;;  %v14026_v21 = vld [vmem:[%s21581_s1 + $0x684] ss:$16 sps:$4 sm:$0xff]   ;;  %v14024_v23 = vld [vmem:[%s21581_s1 + $0x680] ss:$16 sps:$4 sm:$0xff]  }
  0x2a   :  { %v14029_v24 = vld [vmem:[%s21581_s1 + $0x464] ss:$16 sps:$4 sm:$0xff]   ;;  %v14027_v26 = vld [vmem:[%s21581_s1 + $0x460] ss:$16 sps:$4 sm:$0xff]  }
  0x2b   :  { %4399 = vmatpush2.bf16.msra.mxu0 %v13971_v42  ;;  %v14032_v25 = vld [vmem:[%s21581_s1 + $0x664] ss:$16 sps:$4 sm:$0xff]   ;;  %v14030_v27 = vld [vmem:[%s21581_s1 + $0x660] ss:$16 sps:$4 sm:$0xff]  }
  0x2c   :  { %4440 = vmatpush2.bf16.msra.mxu1 %v13972_v43  ;;  %4400 = vmatprep.subr.bf16.mxu0 %v13973_v44  ;;  %v14035_v28 = vld [vmem:[%s21581_s1 + $0x444] ss:$16 sps:$4 sm:$0xff]   ;;  %v14033_v30 = vld [vmem:[%s21581_s1 + $0x440] ss:$16 sps:$4 sm:$0xff]  }
  0x2d   :  { %4441 = vmatprep.subr.bf16.mxu1 %v13975_v45  ;;  %v14038_v29 = vld [vmem:[%s21581_s1 + $0x644] ss:$16 sps:$4 sm:$0xff]   ;;  %v14036_v31 = vld [vmem:[%s21581_s1 + $0x640] ss:$16 sps:$4 sm:$0xff]  }
  0x2e   :  { %v14041_v32 = vld [vmem:[%s21581_s1 + $0x424] ss:$16 sps:$4 sm:$0xff]   ;;  %v14039_v35 = vld [vmem:[%s21581_s1 + $0x420] ss:$16 sps:$4 sm:$0xff]  }
  0x2f   :  { %4401 = vmatpush2.bf16.msra.mxu0 %v13977_v47  ;;  %v14044_v33 = vld [vmem:[%s21581_s1 + $0x624] ss:$16 sps:$4 sm:$0xff]   ;;  %v14042_v36 = vld [vmem:[%s21581_s1 + $0x620] ss:$16 sps:$4 sm:$0xff]  }
  0x30   :  { %4442 = vmatpush2.bf16.msra.mxu1 %v13978_v48  ;;  %4402 = vmatprep.subr.bf16.mxu0 %v13979_v51  ;;  %v14047_v39 = vld [vmem:[%s21581_s1 + $0x404] ss:$16 sps:$4 sm:$0xff]   ;;  %v14045_v42 = vld [vmem:[%s21581_s1 + $0x400] ss:$16 sps:$4 sm:$0xff]  }
  0x31   :  { %4443 = vmatprep.subr.bf16.mxu1 %v13981_v53  ;;  %v14050_v41 = vld [vmem:[%s21581_s1 + $0x604] ss:$16 sps:$4 sm:$0xff]   ;;  %v14048_v43 = vld [vmem:[%s21581_s1 + $0x600] ss:$16 sps:$4 sm:$0xff]  }
  0x32   :  { %v14053_v44 = vld [vmem:[%s21581_s1 + $0x5e4] ss:$16 sps:$4 sm:$0xff]   ;;  %v14051_v46 = vld [vmem:[%s21581_s1 + $0x5e0] ss:$16 sps:$4 sm:$0xff]  }
  0x33   :  { %4403 = vmatpush2.bf16.msra.mxu0 %v13983_v54  ;;  %v14056_v45 = vld [vmem:[%s21581_s1 + $0x7e4] ss:$16 sps:$4 sm:$0xff]   ;;  %v14054_v47 = vld [vmem:[%s21581_s1 + $0x7e0] ss:$16 sps:$4 sm:$0xff]  }
  0x34   :  { %4444 = vmatpush2.bf16.msra.mxu1 %v13984_v55  ;;  %4404 = vmatprep.subr.bf16.mxu0 %v13985_v56  ;;  %v14059_v48 = vld [vmem:[%s21581_s1 + $0x5c4] ss:$16 sps:$4 sm:$0xff]   ;;  %v14057_v51 = vld [vmem:[%s21581_s1 + $0x5c0] ss:$16 sps:$4 sm:$0xff]  }
  0x35   :  { %4445 = vmatprep.subr.bf16.mxu1 %v13987_v57  ;;  %v14062_v50 = vld [vmem:[%s21581_s1 + $0x7c4] ss:$16 sps:$4 sm:$0xff]   ;;  %v14060_v53 = vld [vmem:[%s21581_s1 + $0x7c0] ss:$16 sps:$4 sm:$0xff]  }
  0x36   :  { %v14065_v54 = vld [vmem:[%s21581_s1 + $0x5a4] ss:$16 sps:$4 sm:$0xff]   ;;  %v14063_v56 = vld [vmem:[%s21581_s1 + $0x5a0] ss:$16 sps:$4 sm:$0xff]  }
  0x37   :  { %4405 = vmatpush2.bf16.msra.mxu0 %v13989_v58  ;;  %v14068_v55 = vld [vmem:[%s21581_s1 + $0x7a4] ss:$16 sps:$4 sm:$0xff]   ;;  %v14066_v57 = vld [vmem:[%s21581_s1 + $0x7a0] ss:$16 sps:$4 sm:$0xff]  }
  0x38   :  { %4446 = vmatpush2.bf16.msra.mxu1 %v13990_v59  ;;  %4406 = vmatprep.subr.bf16.mxu0 %v13991_v60  ;;  %v14071_v58 = vld [vmem:[%s21581_s1 + $0x584] ss:$16 sps:$4 sm:$0xff]   ;;  %v14069_v60 = vld [vmem:[%s21581_s1 + $0x580] ss:$16 sps:$4 sm:$0xff]  }
  0x39   :  { %4447 = vmatprep.subr.bf16.mxu1 %v13993_v61  ;;  %v14074_v59 = vld [vmem:[%s21581_s1 + $0x784] ss:$16 sps:$4 sm:$0xff]   ;;  %v14072_v61 = vld [vmem:[%s21581_s1 + $0x780] ss:$16 sps:$4 sm:$0xff]  }
  0x3a   :  { %v14081_v4 = vld [vmem:[%s21581_s1 + $0x540] ss:$16 sps:$4 sm:$0xff]   ;;  %v14122_v38 = vld [vmem:[%s21581_s1 + $0xa84] ss:$16 sps:$4 sm:$0xff]  }
  0x3b   :  { %4407 = vmatpush2.bf16.msra.mxu0 %v13995_v62  ;;  %v14077_v62 = vld [vmem:[%s21581_s1 + $0x564] ss:$16 sps:$4 sm:$0xff]   ;;  %v14084_v5 = vld [vmem:[%s21581_s1 + $0x740] ss:$16 sps:$4 sm:$0xff]  }
  0x3c   :  { %4448 = vmatpush2.bf16.msra.mxu1 %v13996_v63  ;;  %4408 = vmatprep.subr.bf16.mxu0 %v13997_v0  ;;  %v14080_v63 = vld [vmem:[%s21581_s1 + $0x764] ss:$16 sps:$4 sm:$0xff]   ;;  %v14075_v0 = vld [vmem:[%s21581_s1 + $0x560] ss:$16 sps:$4 sm:$0xff]  }
  0x3d   :  { %4449 = vmatprep.subr.bf16.mxu1 %v13999_v1  ;;  %v14078_v1 = vld [vmem:[%s21581_s1 + $0x760] ss:$16 sps:$4 sm:$0xff]  }
  0x3e   :  { %v14111_v34 = vld [vmem:[%s21581_s1 + $0x8a0] ss:$16 sps:$4 sm:$0xff]  }
  0x3f   :  { %4409 = vmatpush2.bf16.msra.mxu0 %v14001_v2  ;;  %v14083_v2 = vld [vmem:[%s21581_s1 + $0x544] ss:$16 sps:$4 sm:$0xff]  }
  0x40   :  { %4450 = vmatpush2.bf16.msra.mxu1 %v14002_v3  ;;  %4460 = vmatprep.subr.bf16.mxu0 %v14005_v6  ;;  %v14086_v3 = vld [vmem:[%s21581_s1 + $0x744] ss:$16 sps:$4 sm:$0xff]  }
  0x41   :  { %4501 = vmatprep.subr.bf16.mxu1 %v14008_v7  ;;  %v14089_v6 = vld [vmem:[%s21581_s1 + $0x524] ss:$16 sps:$4 sm:$0xff]  }
  0x42   :  { %4411 = vmatmul.mubr.bf16.vlgmr.msra.gmra.mxu0 %v16610_v8  ;;  %v14092_v7 = vld [vmem:[%s21581_s1 + $0x724] ss:$16 sps:$4 sm:$0xff]  }
  0x43   :  { %4452 = vmatmul.mubr.bf16.vlgmr.msra.gmra.mxu1 %v16612_v9  ;;  %4461 = vmatpush1.bf16.msra.mxu0 %v14003_v10  ;;  %v14087_v10 = vld [vmem:[%s21581_s1 + $0x520] ss:$16 sps:$4 sm:$0xff]  }
  0x44   :  { %4502 = vmatpush1.bf16.msra.mxu1 %v14006_v11  ;;  %4462 = vmatprep.subr.bf16.mxu0 %v14011_v12  ;;  %v14090_v11 = vld [vmem:[%s21581_s1 + $0x720] ss:$16 sps:$4 sm:$0xff]   ;;  %v14095_v12 = vld [vmem:[%s21581_s1 + $0x504] ss:$16 sps:$4 sm:$0xff]  }
  0x45   :  { %4503 = vmatprep.subr.bf16.mxu1 %v14014_v13  ;;  %4492 = vmatprep.mubr.bf16.mxu0 %v16697_v37  ;;  %v14098_v13 = vld [vmem:[%s21581_s1 + $0x704] ss:$16 sps:$4 sm:$0xff]  }
  0x46   :  { %4533 = vmatprep.mubr.bf16.mxu1 %v16705_v40 }
  0x47   :  { %4463 = vmatpush1.bf16.msra.mxu0 %v14009_v14  ;;  %v14093_v14 = vld [vmem:[%s21581_s1 + $0x500] ss:$16 sps:$4 sm:$0xff]  }
  0x48   :  { %4504 = vmatpush1.bf16.msra.mxu1 %v14012_v15  ;;  %4464 = vmatprep.subr.bf16.mxu0 %v14017_v16  ;;  %v14096_v15 = vld [vmem:[%s21581_s1 + $0x700] ss:$16 sps:$4 sm:$0xff]  }
  0x49   :  { %4505 = vmatprep.subr.bf16.mxu1 %v14020_v17  ;;  %v53_v16 = vld [vmem:[%s21580_s0 + $0x20] sm:$0xff]  ;;  %v55_v17 = vld [vmem:[%s21580_s0 + $0x30] sm:$0xff] }
  0x4b   :  { %4465 = vmatpush1.bf16.msra.mxu0 %v14015_v18  ;;  %v14101_v18 = vld [vmem:[%s21581_s1 + $0x8e4] ss:$16 sps:$4 sm:$0xff]  }
  0x4c   :  { %4506 = vmatpush1.bf16.msra.mxu1 %v14018_v19  ;;  %4466 = vmatprep.subr.bf16.mxu0 %v14023_v20  ;;  %v14104_v19 = vld [vmem:[%s21581_s1 + $0xae4] ss:$16 sps:$4 sm:$0xff]   ;;  %v16826_v20 = vpack.c.bf16 %v53_v16, %v53_v16  ;;  %v14171_v16 = vld [vmem:[%s21581_s1 + $0x960] ss:$16 sps:$4 sm:$0xff]  }
  0x4d   :  { %4507 = vmatprep.subr.bf16.mxu1 %v14026_v21  ;;  %v16828_v21 = vpack.c.bf16 %v55_v17, %v55_v17  ;;  %v14174_v17 = vld [vmem:[%s21581_s1 + $0xb60] ss:$16 sps:$4 sm:$0xff]  }
  0x4f   :  { %4467 = vmatpush1.bf16.msra.mxu0 %v14021_v22  ;;  %v14099_v22 = vld [vmem:[%s21581_s1 + $0x8e0] ss:$16 sps:$4 sm:$0xff]  }
  0x50   :  { %4508 = vmatpush1.bf16.msra.mxu1 %v14024_v23  ;;  %4468 = vmatprep.subr.bf16.mxu0 %v14029_v24  ;;  %v14102_v23 = vld [vmem:[%s21581_s1 + $0xae0] ss:$16 sps:$4 sm:$0xff]   ;;  %v14107_v24 = vld [vmem:[%s21581_s1 + $0x8c4] ss:$16 sps:$4 sm:$0xff]  }
  0x51   :  { %4509 = vmatprep.subr.bf16.mxu1 %v14032_v25  ;;  %v14110_v25 = vld [vmem:[%s21581_s1 + $0xac4] ss:$16 sps:$4 sm:$0xff]  }
  0x53   :  { %4469 = vmatpush1.bf16.msra.mxu0 %v14027_v26  ;;  %v58_v26 = vld [vmem:[%s21580_s0 + $0x48] sm:$0xff] }
  0x54   :  { %4510 = vmatpush1.bf16.msra.mxu1 %v14030_v27  ;;  %4470 = vmatprep.subr.bf16.mxu0 %v14035_v28  ;;  %v14105_v27 = vld [vmem:[%s21581_s1 + $0x8c0] ss:$16 sps:$4 sm:$0xff]  }
  0x55   :  { %4511 = vmatprep.subr.bf16.mxu1 %v14038_v29  ;;  %v14108_v28 = vld [vmem:[%s21581_s1 + $0xac0] ss:$16 sps:$4 sm:$0xff]   ;;  %v16853_v29 = vpack.c.bf16 %v58_v26, %v58_v26 }
  0x56   :  { %v14183_v26 = vld [vmem:[%s21581_s1 + $0x920] ss:$16 sps:$4 sm:$0xff]  }
  0x57   :  { %4471 = vmatpush1.bf16.msra.mxu0 %v14033_v30  ;;  %v60_v30 = vld [vmem:[%s21580_s0 + $0x58] sm:$0xff] }
  0x58   :  { %4512 = vmatpush1.bf16.msra.mxu1 %v14036_v31  ;;  %4472 = vmatprep.subr.bf16.mxu0 %v14041_v32  ;;  %v14113_v31 = vld [vmem:[%s21581_s1 + $0x8a4] ss:$16 sps:$4 sm:$0xff]   ;;  %v16861_v32 = vpack.c.bf16 %v60_v30, %v60_v30 }
  0x59   :  { %4513 = vmatprep.subr.bf16.mxu1 %v14044_v33  ;;  %v14116_v33 = vld [vmem:[%s21581_s1 + $0xaa4] ss:$16 sps:$4 sm:$0xff]  }
  0x5a   :  { %v14194_v30 = vld [vmem:[%s21581_s1 + $0xb04] ss:$16 sps:$4 sm:$0xff]  }
  0x5b   :  { %4473 = vmatpush1.bf16.msra.mxu0 %v14039_v35  ;;  %v14114_v35 = vld [vmem:[%s21581_s1 + $0xaa0] ss:$16 sps:$4 sm:$0xff]  }
  0x5c   :  { %4514 = vmatpush1.bf16.msra.mxu1 %v14042_v36  ;;  %4474 = vmatprep.subr.bf16.mxu0 %v14047_v39  ;;  %v14119_v36 = vld [vmem:[%s21581_s1 + $0x884] ss:$16 sps:$4 sm:$0xff]   ;;  %v14117_v39 = vld [vmem:[%s21581_s1 + $0x880] ss:$16 sps:$4 sm:$0xff]  }
  0x5d   :  { %4515 = vmatprep.subr.bf16.mxu1 %v14050_v41  ;;  %v14120_v41 = vld [vmem:[%s21581_s1 + $0xa80] ss:$16 sps:$4 sm:$0xff]  }
  0x5f   :  { %4475 = vmatpush1.bf16.msra.mxu0 %v14045_v42  ;;  %v14125_v42 = vld [vmem:[%s21581_s1 + $0x864] ss:$16 sps:$4 sm:$0xff]  }
  0x60   :  { %4516 = vmatpush1.bf16.msra.mxu1 %v14048_v43  ;;  %4476 = vmatprep.subr.bf16.mxu0 %v14053_v44  ;;  %v14128_v43 = vld [vmem:[%s21581_s1 + $0xa64] ss:$16 sps:$4 sm:$0xff]   ;;  %v14123_v44 = vld [vmem:[%s21581_s1 + $0x860] ss:$16 sps:$4 sm:$0xff]  }
  0x61   :  { %4517 = vmatprep.subr.bf16.mxu1 %v14056_v45  ;;  %v14126_v45 = vld [vmem:[%s21581_s1 + $0xa60] ss:$16 sps:$4 sm:$0xff]  }
  0x63   :  { %4477 = vmatpush2.bf16.msra.mxu0 %v14051_v46  ;;  %v14131_v46 = vld [vmem:[%s21581_s1 + $0x844] ss:$16 sps:$4 sm:$0xff]  }
  0x64   :  { %4518 = vmatpush2.bf16.msra.mxu1 %v14054_v47  ;;  %4478 = vmatprep.subr.bf16.mxu0 %v14059_v48  ;;  %v14134_v47 = vld [vmem:[%s21581_s1 + $0xa44] ss:$16 sps:$4 sm:$0xff]   ;;  %v14129_v48 = vld [vmem:[%s21581_s1 + $0x840] ss:$16 sps:$4 sm:$0xff]  }
  0x65   :  { %4519 = vmatprep.subr.bf16.mxu1 %v14062_v50  ;;  %v14132_v50 = vld [vmem:[%s21581_s1 + $0xa40] ss:$16 sps:$4 sm:$0xff]  }
  0x67   :  { %4479 = vmatpush2.bf16.msra.mxu0 %v14057_v51  ;;  %v14137_v51 = vld [vmem:[%s21581_s1 + $0x824] ss:$16 sps:$4 sm:$0xff]  }
  0x68   :  { %4520 = vmatpush2.bf16.msra.mxu1 %v14060_v53  ;;  %4480 = vmatprep.subr.bf16.mxu0 %v14065_v54  ;;  %v14140_v53 = vld [vmem:[%s21581_s1 + $0xa24] ss:$16 sps:$4 sm:$0xff]   ;;  %v14135_v54 = vld [vmem:[%s21581_s1 + $0x820] ss:$16 sps:$4 sm:$0xff]  }
  0x69   :  { %4521 = vmatprep.subr.bf16.mxu1 %v14068_v55  ;;  %v14138_v55 = vld [vmem:[%s21581_s1 + $0xa20] ss:$16 sps:$4 sm:$0xff]  }
  0x6b   :  { %4481 = vmatpush2.bf16.msra.mxu0 %v14063_v56  ;;  %v14143_v56 = vld [vmem:[%s21581_s1 + $0x804] ss:$16 sps:$4 sm:$0xff]  }
  0x6c   :  { %4522 = vmatpush2.bf16.msra.mxu1 %v14066_v57  ;;  %4482 = vmatprep.subr.bf16.mxu0 %v14071_v58  ;;  %v14146_v57 = vld [vmem:[%s21581_s1 + $0xa04] ss:$16 sps:$4 sm:$0xff]   ;;  %v14141_v58 = vld [vmem:[%s21581_s1 + $0x800] ss:$16 sps:$4 sm:$0xff]  }
  0x6d   :  { %4523 = vmatprep.subr.bf16.mxu1 %v14074_v59  ;;  %v14144_v59 = vld [vmem:[%s21581_s1 + $0xa00] ss:$16 sps:$4 sm:$0xff]  }
  0x6f   :  { %4483 = vmatpush2.bf16.msra.mxu0 %v14069_v60  ;;  %v14149_v60 = vld [vmem:[%s21581_s1 + $0x9e4] ss:$16 sps:$4 sm:$0xff]  }
  0x70   :  { %4524 = vmatpush2.bf16.msra.mxu1 %v14072_v61  ;;  %4484 = vmatprep.subr.bf16.mxu0 %v14077_v62  ;;  %v14152_v61 = vld [vmem:[%s21581_s1 + $0xbe4] ss:$16 sps:$4 sm:$0xff]   ;;  %v14147_v62 = vld [vmem:[%s21581_s1 + $0x9e0] ss:$16 sps:$4 sm:$0xff]  }
  0x71   :  { %4525 = vmatprep.subr.bf16.mxu1 %v14080_v63  ;;  %v14150_v63 = vld [vmem:[%s21581_s1 + $0xbe0] ss:$16 sps:$4 sm:$0xff]  }
  0x73   :  { %4485 = vmatpush2.bf16.msra.mxu0 %v14075_v0  ;;  %v14155_v0 = vld [vmem:[%s21581_s1 + $0x9c4] ss:$16 sps:$4 sm:$0xff]  }
  0x74   :  { %4526 = vmatpush2.bf16.msra.mxu1 %v14078_v1  ;;  %4486 = vmatprep.subr.bf16.mxu0 %v14083_v2  ;;  %v14158_v1 = vld [vmem:[%s21581_s1 + $0xbc4] ss:$16 sps:$4 sm:$0xff]   ;;  %v14153_v2 = vld [vmem:[%s21581_s1 + $0x9c0] ss:$16 sps:$4 sm:$0xff]  }
  0x75   :  { %4527 = vmatprep.subr.bf16.mxu1 %v14086_v3  ;;  %v14156_v3 = vld [vmem:[%s21581_s1 + $0xbc0] ss:$16 sps:$4 sm:$0xff]  }
  0x77   :  { %4487 = vmatpush2.bf16.msra.mxu0 %v14081_v4  ;;  %v14161_v4 = vld [vmem:[%s21581_s1 + $0x9a4] ss:$16 sps:$4 sm:$0xff]  }
  0x78   :  { %4528 = vmatpush2.bf16.msra.mxu1 %v14084_v5  ;;  %4488 = vmatprep.subr.bf16.mxu0 %v14089_v6  ;;  %v14164_v5 = vld [vmem:[%s21581_s1 + $0xba4] ss:$16 sps:$4 sm:$0xff]   ;;  %v14159_v6 = vld [vmem:[%s21581_s1 + $0x9a0] ss:$16 sps:$4 sm:$0xff]  }
  0x79   :  { %4529 = vmatprep.subr.bf16.mxu1 %v14092_v7  ;;  %v14162_v7 = vld [vmem:[%s21581_s1 + $0xba0] ss:$16 sps:$4 sm:$0xff]  }
  0x7b   :  { %4489 = vmatpush2.bf16.msra.mxu0 %v14087_v10  ;;  %v14167_v10 = vld [vmem:[%s21581_s1 + $0x984] ss:$16 sps:$4 sm:$0xff]  }
  0x7c   :  { %4530 = vmatpush2.bf16.msra.mxu1 %v14090_v11  ;;  %4490 = vmatprep.subr.bf16.mxu0 %v14095_v12  ;;  %v14170_v11 = vld [vmem:[%s21581_s1 + $0xb84] ss:$16 sps:$4 sm:$0xff]   ;;  %v14165_v12 = vld [vmem:[%s21581_s1 + $0x980] ss:$16 sps:$4 sm:$0xff]  }
  0x7d   :  { %4531 = vmatprep.subr.bf16.mxu1 %v14098_v13  ;;  %v14168_v13 = vld [vmem:[%s21581_s1 + $0xb80] ss:$16 sps:$4 sm:$0xff]  }
  0x7f   :  { %4491 = vmatpush2.bf16.msra.mxu0 %v14093_v14  ;;  %v14173_v14 = vld [vmem:[%s21581_s1 + $0x964] ss:$16 sps:$4 sm:$0xff]  }
  0x80   :  { %4532 = vmatpush2.bf16.msra.mxu1 %v14096_v15  ;;  %4542 = vmatprep.subr.bf16.mxu0 %v14101_v18  ;;  %v14176_v15 = vld [vmem:[%s21581_s1 + $0xb64] ss:$16 sps:$4 sm:$0xff]  }
  0x81   :  { %4583 = vmatprep.subr.bf16.mxu1 %v14104_v19  ;;  %v14179_v18 = vld [vmem:[%s21581_s1 + $0x944] ss:$16 sps:$4 sm:$0xff]  }
  0x82   :  { %4493 = vmatmul.mubr.bf16.vlgmr.msra.gmra.mxu0 %v16826_v20  ;;  %v14182_v19 = vld [vmem:[%s21581_s1 + $0xb44] ss:$16 sps:$4 sm:$0xff]  }
  0x83   :  { %4534 = vmatmul.mubr.bf16.vlgmr.msra.gmra.mxu1 %v16828_v21  ;;  %4543 = vmatpush1.bf16.msra.mxu0 %v14099_v22  ;;  %v14177_v22 = vld [vmem:[%s21581_s1 + $0x940] ss:$16 sps:$4 sm:$0xff]  }
  0x84   :  { %4584 = vmatpush1.bf16.msra.mxu1 %v14102_v23  ;;  %4544 = vmatprep.subr.bf16.mxu0 %v14107_v24  ;;  %v14180_v23 = vld [vmem:[%s21581_s1 + $0xb40] ss:$16 sps:$4 sm:$0xff]   ;;  %v14185_v24 = vld [vmem:[%s21581_s1 + $0x924] ss:$16 sps:$4 sm:$0xff]  }
  0x85   :  { %4585 = vmatprep.subr.bf16.mxu1 %v14110_v25  ;;  %4574 = vmatprep.mubr.bf16.mxu0 %v16853_v29  ;;  %v14188_v25 = vld [vmem:[%s21581_s1 + $0xb24] ss:$16 sps:$4 sm:$0xff]  }
  0x86   :  { %4615 = vmatprep.mubr.bf16.mxu1 %v16861_v32 }
  0x87   :  { %4545 = vmatpush1.bf16.msra.mxu0 %v14105_v27  ;;  %v14186_v27 = vld [vmem:[%s21581_s1 + $0xb20] ss:$16 sps:$4 sm:$0xff]  }
  0x88   :  { %4586 = vmatpush1.bf16.msra.mxu1 %v14108_v28  ;;  %4546 = vmatprep.subr.bf16.mxu0 %v14113_v31  ;;  %v14191_v28 = vld [vmem:[%s21581_s1 + $0x904] ss:$16 sps:$4 sm:$0xff]   ;;  %v14189_v31 = vld [vmem:[%s21581_s1 + $0x900] ss:$16 sps:$4 sm:$0xff]  }
  0x89   :  { %4587 = vmatprep.subr.bf16.mxu1 %v14116_v33  ;;  %v14192_v33 = vld [vmem:[%s21581_s1 + $0xb00] ss:$16 sps:$4 sm:$0xff]  }
  0x8b   :  { %4547 = vmatpush1.bf16.msra.mxu0 %v14111_v34  ;;  %v57_v34 = vld [vmem:[%s21580_s0 + $0x40] sm:$0xff] }
  0x8c   :  { %4588 = vmatpush1.bf16.msra.mxu1 %v14114_v35  ;;  %4548 = vmatprep.subr.bf16.mxu0 %v14119_v36  ;;  %v59_v35 = vld [vmem:[%s21580_s0 + $0x50] sm:$0xff] }
  0x8d   :  { %4589 = vmatprep.subr.bf16.mxu1 %v14122_v38  ;;  %v14197_v36 = vld [vmem:[%s21581_s1 + $0xce4] ss:$16 sps:$4 sm:$0xff]  }
  0x8e   :  { %v14200_v38 = vld [vmem:[%s21581_s1 + $0xee4] ss:$16 sps:$4 sm:$0xff]  }
  0x8f   :  { %4549 = vmatpush1.bf16.msra.mxu0 %v14117_v39  ;;  %v14195_v39 = vld [vmem:[%s21581_s1 + $0xce0] ss:$16 sps:$4 sm:$0xff]  }
  0x90   :  { %4590 = vmatpush1.bf16.msra.mxu1 %v14120_v41  ;;  %4550 = vmatprep.subr.bf16.mxu0 %v14125_v42  ;;  %v62_v41 = vld [vmem:[%s21580_s0 + $0x68] sm:$0xff]  ;;  %v17048_v42 = vpack.c.bf16 %v57_v34, %v57_v34  ;;  %v14261_v34 = vld [vmem:[%s21581_s1 + $0xd80] ss:$16 sps:$4 sm:$0xff]  }
  0x91   :  { %4591 = vmatprep.subr.bf16.mxu1 %v14128_v43  ;;  %v17050_v43 = vpack.c.bf16 %v59_v35, %v59_v35  ;;  %v14264_v35 = vld [vmem:[%s21581_s1 + $0xf80] ss:$16 sps:$4 sm:$0xff]  }
  0x93   :  { %4551 = vmatpush1.bf16.msra.mxu0 %v14123_v44  ;;  %v64_v44 = vld [vmem:[%s21580_s0 + $0x78] sm:$0xff] }
  0x94   :  { %4592 = vmatpush1.bf16.msra.mxu1 %v14126_v45  ;;  %4552 = vmatprep.subr.bf16.mxu0 %v14131_v46  ;;  %v14198_v45 = vld [vmem:[%s21581_s1 + $0xee0] ss:$16 sps:$4 sm:$0xff]   ;;  %v14203_v46 = vld [vmem:[%s21581_s1 + $0xcc4] ss:$16 sps:$4 sm:$0xff]  }
  0x95   :  { %4593 = vmatprep.subr.bf16.mxu1 %v14134_v47  ;;  %v14206_v47 = vld [vmem:[%s21581_s1 + $0xec4] ss:$16 sps:$4 sm:$0xff]  }
  0x97   :  { %4553 = vmatpush1.bf16.msra.mxu0 %v14129_v48  ;;  %v17064_v48 = vpack.c.bf16 %v62_v41, %v62_v41  ;;  %v14270_v41 = vld [vmem:[%s21581_s1 + $0xf60] ss:$16 sps:$4 sm:$0xff]  }
  0x98   :  { %4594 = vmatpush1.bf16.msra.mxu1 %v14132_v50  ;;  %4554 = vmatprep.subr.bf16.mxu0 %v14137_v51  ;;  %v17066_v50 = vpack.c.bf16 %v64_v44, %v64_v44  ;;  %v14201_v51 = vld [vmem:[%s21581_s1 + $0xcc0] ss:$16 sps:$4 sm:$0xff]   ;;  %v14275_v44 = vld [vmem:[%s21581_s1 + $0xd44] ss:$16 sps:$4 sm:$0xff]  }
  0x99   :  { %4595 = vmatprep.subr.bf16.mxu1 %v14140_v53  ;;  %v14204_v53 = vld [vmem:[%s21581_s1 + $0xec0] ss:$16 sps:$4 sm:$0xff]  }
  0x9b   :  { %4555 = vmatpush1.bf16.msra.mxu0 %v14135_v54  ;;  %v14209_v54 = vld [vmem:[%s21581_s1 + $0xca4] ss:$16 sps:$4 sm:$0xff]  }
  0x9c   :  { %4596 = vmatpush1.bf16.msra.mxu1 %v14138_v55  ;;  %4556 = vmatprep.subr.bf16.mxu0 %v14143_v56  ;;  %v14212_v55 = vld [vmem:[%s21581_s1 + $0xea4] ss:$16 sps:$4 sm:$0xff]   ;;  %v14207_v56 = vld [vmem:[%s21581_s1 + $0xca0] ss:$16 sps:$4 sm:$0xff]  }
  0x9d   :  { %4597 = vmatprep.subr.bf16.mxu1 %v14146_v57  ;;  %v14210_v57 = vld [vmem:[%s21581_s1 + $0xea0] ss:$16 sps:$4 sm:$0xff]  }
  0x9f   :  { %4557 = vmatpush1.bf16.msra.mxu0 %v14141_v58  ;;  %v14215_v58 = vld [vmem:[%s21581_s1 + $0xc84] ss:$16 sps:$4 sm:$0xff]  }
  0xa0   :  { %4598 = vmatpush1.bf16.msra.mxu1 %v14144_v59  ;;  %4558 = vmatprep.subr.bf16.mxu0 %v14149_v60  ;;  %v14218_v59 = vld [vmem:[%s21581_s1 + $0xe84] ss:$16 sps:$4 sm:$0xff]   ;;  %v14213_v60 = vld [vmem:[%s21581_s1 + $0xc80] ss:$16 sps:$4 sm:$0xff]  }
  0xa1   :  { %4599 = vmatprep.subr.bf16.mxu1 %v14152_v61  ;;  %v14216_v61 = vld [vmem:[%s21581_s1 + $0xe80] ss:$16 sps:$4 sm:$0xff]  }
  0xa3   :  { %4559 = vmatpush2.bf16.msra.mxu0 %v14147_v62  ;;  %v14221_v62 = vld [vmem:[%s21581_s1 + $0xc64] ss:$16 sps:$4 sm:$0xff]  }
  0xa4   :  { %4600 = vmatpush2.bf16.msra.mxu1 %v14150_v63  ;;  %4560 = vmatprep.subr.bf16.mxu0 %v14155_v0  ;;  %v14224_v63 = vld [vmem:[%s21581_s1 + $0xe64] ss:$16 sps:$4 sm:$0xff]   ;;  %v14219_v0 = vld [vmem:[%s21581_s1 + $0xc60] ss:$16 sps:$4 sm:$0xff]  }
  0xa5   :  { %4601 = vmatprep.subr.bf16.mxu1 %v14158_v1  ;;  %v14222_v1 = vld [vmem:[%s21581_s1 + $0xe60] ss:$16 sps:$4 sm:$0xff]  }
  0xa7   :  { %4561 = vmatpush2.bf16.msra.mxu0 %v14153_v2  ;;  %v14227_v2 = vld [vmem:[%s21581_s1 + $0xc44] ss:$16 sps:$4 sm:$0xff]  }
  0xa8   :  { %4602 = vmatpush2.bf16.msra.mxu1 %v14156_v3  ;;  %4562 = vmatprep.subr.bf16.mxu0 %v14161_v4  ;;  %v14230_v3 = vld [vmem:[%s21581_s1 + $0xe44] ss:$16 sps:$4 sm:$0xff]   ;;  %v14225_v4 = vld [vmem:[%s21581_s1 + $0xc40] ss:$16 sps:$4 sm:$0xff]  }
  0xa9   :  { %4603 = vmatprep.subr.bf16.mxu1 %v14164_v5  ;;  %v14228_v5 = vld [vmem:[%s21581_s1 + $0xe40] ss:$16 sps:$4 sm:$0xff]  }
  0xab   :  { %4563 = vmatpush2.bf16.msra.mxu0 %v14159_v6  ;;  %v14233_v6 = vld [vmem:[%s21581_s1 + $0xc24] ss:$16 sps:$4 sm:$0xff]  }
  0xac   :  { %4604 = vmatpush2.bf16.msra.mxu1 %v14162_v7  ;;  %4564 = vmatprep.subr.bf16.mxu0 %v14167_v10  ;;  %v14236_v7 = vld [vmem:[%s21581_s1 + $0xe24] ss:$16 sps:$4 sm:$0xff]   ;;  %v14231_v10 = vld [vmem:[%s21581_s1 + $0xc20] ss:$16 sps:$4 sm:$0xff]  }
  0xad   :  { %4605 = vmatprep.subr.bf16.mxu1 %v14170_v11  ;;  %v14234_v11 = vld [vmem:[%s21581_s1 + $0xe20] ss:$16 sps:$4 sm:$0xff]  }
  0xaf   :  { %4565 = vmatpush2.bf16.msra.mxu0 %v14165_v12  ;;  %v14239_v12 = vld [vmem:[%s21581_s1 + $0xc04] ss:$16 sps:$4 sm:$0xff]  }
  0xb0   :  { %4606 = vmatpush2.bf16.msra.mxu1 %v14168_v13  ;;  %4566 = vmatprep.subr.bf16.mxu0 %v14173_v14  ;;  %v14242_v13 = vld [vmem:[%s21581_s1 + $0xe04] ss:$16 sps:$4 sm:$0xff]   ;;  %v14237_v14 = vld [vmem:[%s21581_s1 + $0xc00] ss:$16 sps:$4 sm:$0xff]  }
  0xb1   :  { %4607 = vmatprep.subr.bf16.mxu1 %v14176_v15  ;;  %v14240_v15 = vld [vmem:[%s21581_s1 + $0xe00] ss:$16 sps:$4 sm:$0xff]  }
  0xb3   :  { %4567 = vmatpush2.bf16.msra.mxu0 %v14171_v16  ;;  %v14245_v16 = vld [vmem:[%s21581_s1 + $0xde4] ss:$16 sps:$4 sm:$0xff]  }
  0xb4   :  { %4608 = vmatpush2.bf16.msra.mxu1 %v14174_v17  ;;  %4568 = vmatprep.subr.bf16.mxu0 %v14179_v18  ;;  %v14248_v17 = vld [vmem:[%s21581_s1 + $0xfe4] ss:$16 sps:$4 sm:$0xff]   ;;  %v14243_v18 = vld [vmem:[%s21581_s1 + $0xde0] ss:$16 sps:$4 sm:$0xff]  }
  0xb5   :  { %4609 = vmatprep.subr.bf16.mxu1 %v14182_v19  ;;  %v14246_v19 = vld [vmem:[%s21581_s1 + $0xfe0] ss:$16 sps:$4 sm:$0xff]  }
  0xb7   :  { %4569 = vmatpush2.bf16.msra.mxu0 %v14177_v22  ;;  %v14251_v22 = vld [vmem:[%s21581_s1 + $0xdc4] ss:$16 sps:$4 sm:$0xff]  }
  0xb8   :  { %4610 = vmatpush2.bf16.msra.mxu1 %v14180_v23  ;;  %4570 = vmatprep.subr.bf16.mxu0 %v14185_v24  ;;  %v14254_v23 = vld [vmem:[%s21581_s1 + $0xfc4] ss:$16 sps:$4 sm:$0xff]   ;;  %v14249_v24 = vld [vmem:[%s21581_s1 + $0xdc0] ss:$16 sps:$4 sm:$0xff]  }
  0xb9   :  { %4611 = vmatprep.subr.bf16.mxu1 %v14188_v25  ;;  %v14252_v25 = vld [vmem:[%s21581_s1 + $0xfc0] ss:$16 sps:$4 sm:$0xff]  }
  0xbb   :  { %4571 = vmatpush2.bf16.msra.mxu0 %v14183_v26  ;;  %v14257_v26 = vld [vmem:[%s21581_s1 + $0xda4] ss:$16 sps:$4 sm:$0xff]  }
  0xbc   :  { %4612 = vmatpush2.bf16.msra.mxu1 %v14186_v27  ;;  %4572 = vmatprep.subr.bf16.mxu0 %v14191_v28  ;;  %v14260_v27 = vld [vmem:[%s21581_s1 + $0xfa4] ss:$16 sps:$4 sm:$0xff]   ;;  %v14255_v28 = vld [vmem:[%s21581_s1 + $0xda0] ss:$16 sps:$4 sm:$0xff]  }
  0xbd   :  { %4613 = vmatprep.subr.bf16.mxu1 %v14194_v30  ;;  %v14258_v30 = vld [vmem:[%s21581_s1 + $0xfa0] ss:$16 sps:$4 sm:$0xff]  }
  0xbf   :  { %4573 = vmatpush2.bf16.msra.mxu0 %v14189_v31  ;;  %v14263_v31 = vld [vmem:[%s21581_s1 + $0xd84] ss:$16 sps:$4 sm:$0xff]  }
  0xc0   :  { %4614 = vmatpush2.bf16.msra.mxu1 %v14192_v33  ;;  %4624 = vmatprep.subr.bf16.mxu0 %v14197_v36  ;;  %v14266_v33 = vld [vmem:[%s21581_s1 + $0xf84] ss:$16 sps:$4 sm:$0xff]  }
  0xc1   :  { %4665 = vmatprep.subr.bf16.mxu1 %v14200_v38  ;;  %v14269_v36 = vld [vmem:[%s21581_s1 + $0xd64] ss:$16 sps:$4 sm:$0xff]  }
  0xc2   :  { %4575 = vmatmul.mubr.bf16.vlgmr.msra.gmra.mxu0 %v17048_v42  ;;  %v14272_v38 = vld [vmem:[%s21581_s1 + $0xf64] ss:$16 sps:$4 sm:$0xff]  }
  0xc3   :  { %4616 = vmatmul.mubr.bf16.vlgmr.msra.gmra.mxu1 %v17050_v43  ;;  %4625 = vmatpush1.bf16.msra.mxu0 %v14195_v39  ;;  %v14267_v39 = vld [vmem:[%s21581_s1 + $0xd60] ss:$16 sps:$4 sm:$0xff]  }
  0xc4   :  { %4666 = vmatpush1.bf16.msra.mxu1 %v14198_v45  ;;  %4626 = vmatprep.subr.bf16.mxu0 %v14203_v46  ;;  %v14278_v45 = vld [vmem:[%s21581_s1 + $0xf44] ss:$16 sps:$4 sm:$0xff]   ;;  %v14273_v46 = vld [vmem:[%s21581_s1 + $0xd40] ss:$16 sps:$4 sm:$0xff]  }
  0xc5   :  { %4667 = vmatprep.subr.bf16.mxu1 %v14206_v47  ;;  %4656 = vmatprep.mubr.bf16.mxu0 %v17064_v48  ;;  %v14276_v47 = vld [vmem:[%s21581_s1 + $0xf40] ss:$16 sps:$4 sm:$0xff]  }
  0xc6   :  { %4697 = vmatprep.mubr.bf16.mxu1 %v17066_v50 }
  0xc7   :  { %4627 = vmatpush1.bf16.msra.mxu0 %v14201_v51  ;;  %v805_v51 = vlaneseq }
  0xc8   :  { %4668 = vmatpush1.bf16.msra.mxu1 %v14204_v53  ;;  %4628 = vmatprep.subr.bf16.mxu0 %v14209_v54  ;;  %v14281_v53 = vld [vmem:[%s21581_s1 + $0xd24] ss:$16 sps:$4 sm:$0xff]  }
  0xc9   :  { %4669 = vmatprep.subr.bf16.mxu1 %v14212_v55  ;;  %v14284_v54 = vld [vmem:[%s21581_s1 + $0xf24] ss:$16 sps:$4 sm:$0xff]   ;;  %v14279_v55 = vld [vmem:[%s21581_s1 + $0xd20] ss:$16 sps:$4 sm:$0xff]  }
  0xcb   :  { %4629 = vmatpush1.bf16.msra.mxu0 %v14207_v56  ;;  %v14282_v56 = vld [vmem:[%s21581_s1 + $0xf20] ss:$16 sps:$4 sm:$0xff]  }
  0xcc   :  { %4670 = vmatpush1.bf16.msra.mxu1 %v14210_v57  ;;  %4630 = vmatprep.subr.bf16.mxu0 %v14215_v58  ;;  %v17234_v57 = vshrl.u32 %v805_v51, 7  ;;  %v14287_v58 = vld [vmem:[%s21581_s1 + $0xd04] ss:$16 sps:$4 sm:$0xff]   ;;  %v14312_v51 = vld [vmem:[%s21581_s1 + $0x1280] ss:$16 sps:$4 sm:$0xff]  }
  0xcd   :  { %4671 = vmatprep.subr.bf16.mxu1 %v14218_v59  ;;  %v14290_v59 = vld [vmem:[%s21581_s1 + $0xf04] ss:$16 sps:$4 sm:$0xff]  }
  0xcf   :  { %4631 = vmatpush1.bf16.msra.mxu0 %v14213_v60  ;;  %v14285_v60 = vld [vmem:[%s21581_s1 + $0xd00] ss:$16 sps:$4 sm:$0xff]  }
  0xd0   :  { %4672 = vmatpush1.bf16.msra.mxu1 %v14216_v61  ;;  %4632 = vmatprep.subr.bf16.mxu0 %v14221_v62  ;;  %v14288_v61 = vld [vmem:[%s21581_s1 + $0xf00] ss:$16 sps:$4 sm:$0xff]  }
  0xd1   :  { %4673 = vmatprep.subr.bf16.mxu1 %v14224_v63  ;;  %v803_v62 = vld [vmem:[%s21582_s2] sm:$0xf]  ;;  %v17252_v63 = vsub.s32 0, %v17234_v57 }
  0xd3   :  { %4633 = vmatpush1.bf16.msra.mxu0 %v14219_v0  ;;  %v61_v0 = vld [vmem:[%s21580_s0 + $0x60] sm:$0xff] }
  0xd4   :  { %4674 = vmatpush1.bf16.msra.mxu1 %v14222_v1  ;;  %4634 = vmatprep.subr.bf16.mxu0 %v14227_v2  ;;  %v63_v1 = vld [vmem:[%s21580_s0 + $0x70] sm:$0xff] }
  0xd5   :  { %4675 = vmatprep.subr.bf16.mxu1 %v14230_v3  ;;  %v14293_v2 = vld [vmem:[%s21581_s1 + $0x10e4] ss:$16 sps:$4 sm:$0xff]  }
  0xd6   :  { %v14296_v3 = vld [vmem:[%s21581_s1 + $0x12e4] ss:$16 sps:$4 sm:$0xff]  }
  0xd7   :  { %4635 = vmatpush1.bf16.msra.mxu0 %v14225_v4  ;;  %v17267_v4 = vsub.s32 1, %v17234_v57 }
  0xd8   :  { %4676 = vmatpush1.bf16.msra.mxu1 %v14228_v5  ;;  %4636 = vmatprep.subr.bf16.mxu0 %v14233_v6  ;;  %v66_v5 = vld [vmem:[%s21580_s0 + $0x88] sm:$0xff]  ;;  %v17272_v6 = vpack.c.bf16 %v61_v0, %v61_v0  ;;  %v14332_v0 = vld [vmem:[%s21581_s1 + $0x1224] ss:$16 sps:$4 sm:$0xff]  }
  0xd9   :  { %4677 = vmatprep.subr.bf16.mxu1 %v14236_v7  ;;  %v17274_v7 = vpack.c.bf16 %v63_v1, %v63_v1  ;;  %v14327_v1 = vld [vmem:[%s21581_s1 + $0x1020] ss:$16 sps:$4 sm:$0xff]  }
  0xdb   :  { %4637 = vmatpush1.bf16.msra.mxu0 %v14231_v10  ;;  %v68_v10 = vld [vmem:[%s21580_s0 + $0x98] sm:$0xff] }
  0xdc   :  { %4678 = vmatpush1.bf16.msra.mxu1 %v14234_v11  ;;  %4638 = vmatprep.subr.bf16.mxu0 %v14239_v12  ;;  %v808_v11 = vrot.slane %v803_v62, %v17252_v63  ;;  %v14291_v12 = vld [vmem:[%s21581_s1 + $0x10e0] ss:$16 sps:$4 sm:$0xff]  }
  0xdd   :  { %4679 = vmatprep.subr.bf16.mxu1 %v14242_v13  ;;  %v14294_v13 = vld [vmem:[%s21581_s1 + $0x12e0] ss:$16 sps:$4 sm:$0xff]  }
  0xdf   :  { %4639 = vmatpush1.bf16.msra.mxu0 %v14237_v14  ;;  %v14299_v14 = vld [vmem:[%s21581_s1 + $0x10c4] ss:$16 sps:$4 sm:$0xff]  }
  0xe0   :  { %4680 = vmatpush1.bf16.msra.mxu1 %v14240_v15  ;;  %4640 = vmatprep.subr.bf16.mxu0 %v14245_v16  ;;  %v14302_v15 = vld [vmem:[%s21581_s1 + $0x12c4] ss:$16 sps:$4 sm:$0xff]   ;;  %v812_v16 = vrot.slane %v803_v62, %v17267_v4 }
  0xe1   :  { %4681 = vmatprep.subr.bf16.mxu1 %v14248_v17  ;;  %v17293_v17 = vpack.c.bf16 %v66_v5, %v66_v5  ;;  %v14329_v62 = vld [vmem:[%s21581_s1 + $0x1024] ss:$16 sps:$4 sm:$0xff]  }
  0xe2   :  { %v14338_v5 = vld [vmem:[%s21581_s1 + $0x1204] ss:$16 sps:$4 sm:$0xff]  }
  0xe3   :  { %4641 = vmatpush2.bf16.msra.mxu0 %v14243_v18  ;;  %v17295_v18 = vpack.c.bf16 %v68_v10, %v68_v10  ;;  %v14333_v10 = vld [vmem:[%s21581_s1 + $0x1000] ss:$16 sps:$4 sm:$0xff]  }
  0xe4   :  { %4682 = vmatpush2.bf16.msra.mxu1 %v14246_v19  ;;  %4642 = vmatprep.subr.bf16.mxu0 %v14251_v22 }
  0xe5   :  { %4683 = vmatprep.subr.bf16.mxu1 %v14254_v23 }
  0xe7   :  { %4643 = vmatpush2.bf16.msra.mxu0 %v14249_v24  ;;  %v14297_v24 = vld [vmem:[%s21581_s1 + $0x10c0] ss:$16 sps:$4 sm:$0xff]  }
  0xe8   :  { %4684 = vmatpush2.bf16.msra.mxu1 %v14252_v25  ;;  %4644 = vmatprep.subr.bf16.mxu0 %v14257_v26  ;;  %v14300_v25 = vld [vmem:[%s21581_s1 + $0x12c0] ss:$16 sps:$4 sm:$0xff]  }
  0xe9   :  { %4685 = vmatprep.subr.bf16.mxu1 %v14260_v27 }
  0xeb   :  { %4645 = vmatpush2.bf16.msra.mxu0 %v14255_v28  ;;  %v14305_v28 = vld [vmem:[%s21581_s1 + $0x10a4] ss:$16 sps:$4 sm:$0xff]  }
  0xec   :  { %4686 = vmatpush2.bf16.msra.mxu1 %v14258_v30  ;;  %4646 = vmatprep.subr.bf16.mxu0 %v14263_v31  ;;  %v14308_v30 = vld [vmem:[%s21581_s1 + $0x12a4] ss:$16 sps:$4 sm:$0xff]  }
  0xed   :  { %4687 = vmatprep.subr.bf16.mxu1 %v14266_v33 }
  0xef   :  { %4647 = vmatpush2.bf16.msra.mxu0 %v14261_v34 }
  0xf0   :  { %4688 = vmatpush2.bf16.msra.mxu1 %v14264_v35  ;;  %4648 = vmatprep.subr.bf16.mxu0 %v14269_v36  ;;  %v14303_v35 = vld [vmem:[%s21581_s1 + $0x10a0] ss:$16 sps:$4 sm:$0xff]  }
  0xf1   :  { %4689 = vmatprep.subr.bf16.mxu1 %v14272_v38  ;;  %v14306_v36 = vld [vmem:[%s21581_s1 + $0x12a0] ss:$16 sps:$4 sm:$0xff]  }
  0xf3   :  { %4649 = vmatpush2.bf16.msra.mxu0 %v14267_v39 }
  0xf4   :  { %4690 = vmatpush2.bf16.msra.mxu1 %v14270_v41  ;;  %4650 = vmatprep.subr.bf16.mxu0 %v14275_v44  ;;  %v14311_v41 = vld [vmem:[%s21581_s1 + $0x1084] ss:$16 sps:$4 sm:$0xff]  }
  0xf5   :  { %4691 = vmatprep.subr.bf16.mxu1 %v14278_v45  ;;  %v14314_v45 = vld [vmem:[%s21581_s1 + $0x1284] ss:$16 sps:$4 sm:$0xff]  }
  0xf7   :  { %4651 = vmatpush2.bf16.msra.mxu0 %v14273_v46 }
  0xf8   :  { %4692 = vmatpush2.bf16.msra.mxu1 %v14276_v47  ;;  %4652 = vmatprep.subr.bf16.mxu0 %v14281_v53  ;;  %v14309_v47 = vld [vmem:[%s21581_s1 + $0x1080] ss:$16 sps:$4 sm:$0xff]   ;;  %v14317_v53 = vld [vmem:[%s21581_s1 + $0x1064] ss:$16 sps:$4 sm:$0xff]  }
  0xf9   :  { %4693 = vmatprep.subr.bf16.mxu1 %v14284_v54  ;;  %v14320_v54 = vld [vmem:[%s21581_s1 + $0x1264] ss:$16 sps:$4 sm:$0xff]  }
  0xfb   :  { %4653 = vmatpush2.bf16.msra.mxu0 %v14279_v55  ;;  %v14315_v55 = vld [vmem:[%s21581_s1 + $0x1060] ss:$16 sps:$4 sm:$0xff]  }
  0xfc   :  { %4694 = vmatpush2.bf16.msra.mxu1 %v14282_v56  ;;  %4654 = vmatprep.subr.bf16.mxu0 %v14287_v58  ;;  %v14318_v56 = vld [vmem:[%s21581_s1 + $0x1260] ss:$16 sps:$4 sm:$0xff]   ;;  %v14323_v58 = vld [vmem:[%s21581_s1 + $0x1044] ss:$16 sps:$4 sm:$0xff]  }
  0xfd   :  { %4695 = vmatprep.subr.bf16.mxu1 %v14290_v59  ;;  %v14326_v59 = vld [vmem:[%s21581_s1 + $0x1244] ss:$16 sps:$4 sm:$0xff]  }
  0xff   :  { %4655 = vmatpush2.bf16.msra.mxu0 %v14285_v60  ;;  %v14321_v60 = vld [vmem:[%s21581_s1 + $0x1040] ss:$16 sps:$4 sm:$0xff]  }
 0x100   :  { %4696 = vmatpush2.bf16.msra.mxu1 %v14288_v61  ;;  %4706 = vmatprep.subr.bf16.mxu0 %v14293_v2  ;;  %v14324_v61 = vld [vmem:[%s21581_s1 + $0x1240] ss:$16 sps:$4 sm:$0xff]  }
 0x101   :  { %4747 = vmatprep.subr.bf16.mxu1 %v14296_v3  ;;  %v14330_v2 = vld [vmem:[%s21581_s1 + $0x1220] ss:$16 sps:$4 sm:$0xff]   ;;  %v14335_v3 = vld [vmem:[%s21581_s1 + $0x1004] ss:$16 sps:$4 sm:$0xff]  }
 0x102   :  { %v4412_v19 = vpop.f32.mrf.mxu0  ;;  %4657 = vmatmul.mubr.bf16.vlgmr.msra.gmra.mxu0 %v17272_v6 }
 0x103   :  { %v4453_v22 = vpop.f32.mrf.mxu1  ;;  %4698 = vmatmul.mubr.bf16.vlgmr.msra.gmra.mxu1 %v17274_v7  ;;  %v4413_v23 = vadd.f32 %v4412_v19, %v808_v11  ;;  %4707 = vmatpush1.bf16.msra.mxu0 %v14291_v12  ;;  %v14336_v11 = vld [vmem:[%s21581_s1 + $0x1200] ss:$16 sps:$4 sm:$0xff]   ;;  %v14341_v12 = vld [vmem:[%s21581_s1 + $0x11e4] ss:$16 sps:$4 sm:$0xff]  }
 0x104   :  { %4748 = vmatpush1.bf16.msra.mxu1 %v14294_v13  ;;  %v4414_v26 = vpop.f32.mrf.mxu0  ;;  %4708 = vmatprep.subr.bf16.mxu0 %v14299_v14  ;;  %v14344_v13 = vld [vmem:[%s21581_s1 + $0x13e4] ss:$16 sps:$4 sm:$0xff]   ;;  %v14339_v14 = vld [vmem:[%s21581_s1 + $0x11e0] ss:$16 sps:$4 sm:$0xff]  }
 0x105   :  { %v4455_v27 = vpop.f32.mrf.mxu1  ;;  %4749 = vmatprep.subr.bf16.mxu1 %v14302_v15  ;;  %v17311_v31 = vadd.f32 %v4453_v22, %v4413_v23  ;;  %v4415_v33 = vadd.f32 %v4414_v26, %v812_v16  ;;  %4738 = vmatprep.mubr.bf16.mxu0 %v17293_v17  ;;  %v14342_v15 = vld [vmem:[%s21581_s1 + $0x13e0] ss:$16 sps:$4 sm:$0xff]   ;;  %v14347_v16 = vld [vmem:[%s21581_s1 + $0x11c4] ss:$16 sps:$4 sm:$0xff]  }
 0x106   :  { %4779 = vmatprep.mubr.bf16.mxu1 %v17295_v18  ;;  %v4416_v38 = vpop.f32.mrf.mxu0  ;;  %v14350_v19 = vld [vmem:[%s21581_s1 + $0x13c4] ss:$16 sps:$4 sm:$0xff]   ;;  %v14345_v22 = vld [vmem:[%s21581_s1 + $0x11c0] ss:$16 sps:$4 sm:$0xff]  }
 0x107   :  { %v4457_v34 = vpop.f32.mrf.mxu1  ;;  %v17321_v39 = vadd.f32 %v4455_v27, %v4415_v33  ;;  %4709 = vmatpush1.bf16.msra.mxu0 %v14297_v24  ;;  %v14348_v23 = vld [vmem:[%s21581_s1 + $0x13c0] ss:$16 sps:$4 sm:$0xff]   ;;  %v14353_v24 = vld [vmem:[%s21581_s1 + $0x11a4] ss:$16 sps:$4 sm:$0xff]  }
 0x108   :  { %4750 = vmatpush1.bf16.msra.mxu1 %v14300_v25  ;;  %4710 = vmatprep.subr.bf16.mxu0 %v14305_v28  ;;  %v4417_v46 = vpop.f32.mrf.mxu0  ;;  %v14356_v25 = vld [vmem:[%s21581_s1 + $0x13a4] ss:$16 sps:$4 sm:$0xff]   ;;  %v14351_v26 = vld [vmem:[%s21581_s1 + $0x11a0] ss:$16 sps:$4 sm:$0xff]  }
 0x109   :  { %v4458_v44 = vpop.f32.mrf.mxu1  ;;  %4751 = vmatprep.subr.bf16.mxu1 %v14308_v30  ;;  %v14354_v27 = vld [vmem:[%s21581_s1 + $0x13a0] ss:$16 sps:$4 sm:$0xff]   ;;  %v14359_v28 = vld [vmem:[%s21581_s1 + $0x1184] ss:$16 sps:$4 sm:$0xff]  }
 0x10a   :  { %v14362_v30 = vld [vmem:[%s21581_s1 + $0x1384] ss:$16 sps:$4 sm:$0xff]   ;;  %v14357_v33 = vld [vmem:[%s21581_s1 + $0x1180] ss:$16 sps:$4 sm:$0xff]  }
 0x10b   :  { %4711 = vmatpush1.bf16.msra.mxu0 %v14303_v35  ;;  %v14360_v34 = vld [vmem:[%s21581_s1 + $0x1380] ss:$16 sps:$4 sm:$0xff]   ;;  %v14365_v35 = vld [vmem:[%s21581_s1 + $0x1164] ss:$16 sps:$4 sm:$0xff]  }
 0x10c   :  { %4752 = vmatpush1.bf16.msra.mxu1 %v14306_v36  ;;  %4712 = vmatprep.subr.bf16.mxu0 %v14311_v41  ;;  %v14368_v36 = vld [vmem:[%s21581_s1 + $0x1364] ss:$16 sps:$4 sm:$0xff]   ;;  %v14363_v38 = vld [vmem:[%s21581_s1 + $0x1160] ss:$16 sps:$4 sm:$0xff]  }
 0x10d   :  { %4753 = vmatprep.subr.bf16.mxu1 %v14314_v45  ;;  %v14366_v41 = vld [vmem:[%s21581_s1 + $0x1360] ss:$16 sps:$4 sm:$0xff]   ;;  %v14371_v44 = vld [vmem:[%s21581_s1 + $0x1144] ss:$16 sps:$4 sm:$0xff]  }
 0x10e   :  { %v14374_v45 = vld [vmem:[%s21581_s1 + $0x1344] ss:$16 sps:$4 sm:$0xff]   ;;  %v14369_v46 = vld [vmem:[%s21581_s1 + $0x1140] ss:$16 sps:$4 sm:$0xff]  }
 0x10f   :  { %4713 = vmatpush1.bf16.msra.mxu0 %v14309_v47  ;;  %v14372_v47 = vld [vmem:[%s21581_s1 + $0x1340] ss:$16 sps:$4 sm:$0xff]  }
 0x110   :  { %4754 = vmatpush1.bf16.msra.mxu1 %v14312_v51  ;;  %4714 = vmatprep.subr.bf16.mxu0 %v14317_v53  ;;  %v14377_v51 = vld [vmem:[%s21581_s1 + $0x1124] ss:$16 sps:$4 sm:$0xff]  }
 0x111   :  { %4755 = vmatprep.subr.bf16.mxu1 %v14320_v54  ;;  %v14380_v53 = vld [vmem:[%s21581_s1 + $0x1324] ss:$16 sps:$4 sm:$0xff]   ;;  %v14375_v54 = vld [vmem:[%s21581_s1 + $0x1120] ss:$16 sps:$4 sm:$0xff]  }
 0x113   :  { %4715 = vmatpush1.bf16.msra.mxu0 %v14315_v55  ;;  %v14378_v55 = vld [vmem:[%s21581_s1 + $0x1320] ss:$16 sps:$4 sm:$0xff]  }
 0x114   :  { %4756 = vmatpush1.bf16.msra.mxu1 %v14318_v56  ;;  %4716 = vmatprep.subr.bf16.mxu0 %v14323_v58  ;;  %v14383_v56 = vld [vmem:[%s21581_s1 + $0x1104] ss:$16 sps:$4 sm:$0xff]  }
 0x115   :  { %4757 = vmatprep.subr.bf16.mxu1 %v14326_v59  ;;  %v14386_v58 = vld [vmem:[%s21581_s1 + $0x1304] ss:$16 sps:$4 sm:$0xff]   ;;  %v14381_v59 = vld [vmem:[%s21581_s1 + $0x1100] ss:$16 sps:$4 sm:$0xff]  }
 0x117   :  { %4717 = vmatpush1.bf16.msra.mxu0 %v14321_v60  ;;  %v14384_v60 = vld [vmem:[%s21581_s1 + $0x1300] ss:$16 sps:$4 sm:$0xff]  }
 0x118   :  { %4758 = vmatpush1.bf16.msra.mxu1 %v14324_v61  ;;  %4718 = vmatprep.subr.bf16.mxu0 %v14329_v62  ;;  %v65_v61 = vld [vmem:[%s21580_s0 + $0x80] sm:$0xff]  ;;  %v67_v62 = vld [vmem:[%s21580_s0 + $0x90] sm:$0xff] }
 0x119   :  { %4759 = vmatprep.subr.bf16.mxu1 %v14332_v0  ;;  %v14389_v0 = vld [vmem:[%s21581_s1 + $0x14e4] ss:$16 sps:$4 sm:$0xff]  }
 0x11b   :  { %4719 = vmatpush1.bf16.msra.mxu0 %v14327_v1  ;;  %v14390_v1 = vld [vmem:[%s21581_s1 + $0x1604] ss:$16 sps:$4 sm:$0x7f]  }
 0x11c   :  { %4760 = vmatpush1.bf16.msra.mxu1 %v14330_v2  ;;  %4720 = vmatprep.subr.bf16.mxu0 %v14335_v3  ;;  %v14392_v2 = vld [vmem:[%s21581_s1 + $0x1600] ss:$16 sps:$4 sm:$0x7f]   ;;  %v70_v3 = vld [vmem:[%s21580_s0 + $0xa8] sm:$0xff] }
 0x11d   :  { %4761 = vmatprep.subr.bf16.mxu1 %v14338_v5  ;;  %v17497_v5 = vpack.c.bf16 %v65_v61, %v65_v61  ;;  %v14422_v61 = vld [vmem:[%s21581_s1 + $0x6c] ss:$16 sps:$4 sm:$0xff]  }
 0x11f   :  { %4721 = vmatpush1.bf16.msra.mxu0 %v14333_v10  ;;  %v17499_v10 = vpack.c.bf16 %v67_v62, %v67_v62  ;;  %v14425_v62 = vld [vmem:[%s21581_s1 + $0x1424] ss:$16 sps:$4 sm:$0xff]  }
 0x120   :  { %4762 = vmatpush1.bf16.msra.mxu1 %v14336_v11  ;;  %4722 = vmatprep.subr.bf16.mxu0 %v14341_v12  ;;  %v14387_v11 = vld [vmem:[%s21581_s1 + $0x14e0] ss:$16 sps:$4 sm:$0xff]   ;;  %v14395_v12 = vld [vmem:[%s21581_s1 + $0x14c4] ss:$16 sps:$4 sm:$0xff]  }
 0x121   :  { %4763 = vmatprep.subr.bf16.mxu1 %v14344_v13  ;;  %v4367_v13 = vsel %vm4365_vm0, %v14392_v2, 0  ;;  %v14428_v2 = vld [vmem:[%s21581_s1 + $0x4c] ss:$16 sps:$4 sm:$0xff]  }
 0x123   :  { %4723 = vmatpush2.bf16.msra.mxu0 %v14339_v14  ;;  %v14393_v14 = vld [vmem:[%s21581_s1 + $0x14c0] ss:$16 sps:$4 sm:$0xff]  }
 0x124   :  { %4764 = vmatpush2.bf16.msra.mxu1 %v14342_v15  ;;  %4724 = vmatprep.subr.bf16.mxu0 %v14347_v16  ;;  %v14398_v15 = vld [vmem:[%s21581_s1 + $0xec] ss:$16 sps:$4 sm:$0xff]   ;;  %v17515_v16 = vpack.c.bf16 %v70_v3, %v70_v3  ;;  %v14431_v3 = vld [vmem:[%s21581_s1 + $0x1404] ss:$16 sps:$4 sm:$0xff]  }
 0x125   :  { %4765 = vmatprep.subr.bf16.mxu1 %v14350_v19 }
 0x127   :  { %4725 = vmatpush2.bf16.msra.mxu0 %v14345_v22 }
 0x128   :  { %4766 = vmatpush2.bf16.msra.mxu1 %v14348_v23  ;;  %4726 = vmatprep.subr.bf16.mxu0 %v14353_v24  ;;  %v71_v23 = vld [vmem:[%s21580_s0 + $0xb0] sm:$0xff] }
 0x129   :  { %4767 = vmatprep.subr.bf16.mxu1 %v14356_v25 }
 0x12b   :  { %4727 = vmatpush2.bf16.msra.mxu0 %v14351_v26 }
 0x12c   :  { %4768 = vmatpush2.bf16.msra.mxu1 %v14354_v27  ;;  %4728 = vmatprep.subr.bf16.mxu0 %v14359_v28  ;;  %v16316_v27 = vmov 0   ;;  %v14401_v28 = vld [vmem:[%s21581_s1 + $0x14a4] ss:$16 sps:$4 sm:$0xff]  }
 0x12d   :  { %4769 = vmatprep.subr.bf16.mxu1 %v14362_v30 }
 0x12f   :  { %4729 = vmatpush2.bf16.msra.mxu0 %v14357_v33 }
 0x130   :  { %4770 = vmatpush2.bf16.msra.mxu1 %v14360_v34  ;;  %4730 = vmatprep.subr.bf16.mxu0 %v14365_v35  ;;  %v14399_v34 = vld [vmem:[%s21581_s1 + $0x14a0] ss:$16 sps:$4 sm:$0xff]  }
 0x131   :  { %4771 = vmatprep.subr.bf16.mxu1 %v14368_v36  ;;  %v17537_v36 = vpack.c.bf16 %v71_v23, %v71_v23  ;;  %v14443_v23 = vld [vmem:[%s21581_s1 + $0x15c4] ss:$16 sps:$4 sm:$0xff]  }
 0x133   :  { %4731 = vmatpush2.bf16.msra.mxu0 %v14363_v38 }
 0x134   :  { %4772 = vmatpush2.bf16.msra.mxu1 %v14366_v41  ;;  %4732 = vmatprep.subr.bf16.mxu0 %v14371_v44  ;;  %v14404_v41 = vld [vmem:[%s21581_s1 + $0xcc] ss:$16 sps:$4 sm:$0xff]  }
 0x135   :  { %4773 = vmatprep.subr.bf16.mxu1 %v14374_v45  ;;  %v14407_v45 = vld [vmem:[%s21581_s1 + $0x1484] ss:$16 sps:$4 sm:$0xff]  }
 0x137   :  { %4733 = vmatpush2.bf16.msra.mxu0 %v14369_v46 }
 0x138   :  { %4774 = vmatpush2.bf16.msra.mxu1 %v14372_v47  ;;  %4734 = vmatprep.subr.bf16.mxu0 %v14377_v51  ;;  %v14402_v47 = vld [vmem:[%s21581_s1 + $0xc8] ss:$16 sps:$4 sm:$0xff]   ;;  %v14405_v51 = vld [vmem:[%s21581_s1 + $0x1480] ss:$16 sps:$4 sm:$0xff]  }
 0x139   :  { %4775 = vmatprep.subr.bf16.mxu1 %v14380_v53  ;;  %v14410_v53 = vld [vmem:[%s21581_s1 + $0xac] ss:$16 sps:$4 sm:$0xff]  }
 0x13b   :  { %4735 = vmatpush2.bf16.msra.mxu0 %v14375_v54  ;;  %v14413_v54 = vld [vmem:[%s21581_s1 + $0x1464] ss:$16 sps:$4 sm:$0xff]  }
 0x13c   :  { %4776 = vmatpush2.bf16.msra.mxu1 %v14378_v55  ;;  %4736 = vmatprep.subr.bf16.mxu0 %v14383_v56  ;;  %v14408_v55 = vld [vmem:[%s21581_s1 + $0xa8] ss:$16 sps:$4 sm:$0xff]   ;;  %v14411_v56 = vld [vmem:[%s21581_s1 + $0x1460] ss:$16 sps:$4 sm:$0xff]  }
 0x13d   :  { %4777 = vmatprep.subr.bf16.mxu1 %v14386_v58  ;;  %v14416_v58 = vld [vmem:[%s21581_s1 + $0x8c] ss:$16 sps:$4 sm:$0xff]  }
 0x13f   :  { %4737 = vmatpush2.bf16.msra.mxu0 %v14381_v59  ;;  %v14414_v59 = vld [vmem:[%s21581_s1 + $0x88] ss:$16 sps:$4 sm:$0xff]  }
 0x140   :  { %4778 = vmatpush2.bf16.msra.mxu1 %v14384_v60  ;;  %4788 = vmatprep.subr.bf16.mxu0 %v14389_v0  ;;  %v14417_v60 = vld [vmem:[%s21581_s1 + $0x1440] ss:$16 sps:$4 sm:$0xff]   ;;  %v14420_v0 = vld [vmem:[%s21581_s1 + $0x68] ss:$16 sps:$4 sm:$0xff]  }
 0x141   :  { %12948 = vmatprep.subr.msk.bf16.mxu1 %vm4365_vm0, %v14390_v1  ;;  %v14423_v1 = vld [vmem:[%s21581_s1 + $0x1420] ss:$16 sps:$4 sm:$0xff]  }
 0x142   :  { %v4494_v19 = vpop.f32.mrf.mxu0  ;;  %4739 = vmatmul.mubr.bf16.vlgmr.msra.gmra.mxu0 %v17497_v5 }
 0x143   :  { %v4535_v22 = vpop.f32.mrf.mxu1  ;;  %4780 = vmatmul.mubr.bf16.vlgmr.msra.gmra.mxu1 %v17499_v10  ;;  %v4495_v24 = vadd.f32 %v4494_v19, %v17311_v31  ;;  %4789 = vmatpush1.bf16.msra.mxu0 %v14387_v11  ;;  %v14396_v31 = vld [vmem:[%s21581_s1 + $0xe8] ss:$16 sps:$4 sm:$0xff]   ;;  %v14435_v19 = vld [vmem:[%s21581_s1 + $0x15e0] ss:$16 sps:$4 sm:$0xff]  }
 0x144   :  { %4844 = vmatpush1.bf16.msra.mxu1 %v4367_v13  ;;  %v4496_v25 = vpop.f32.mrf.mxu0  ;;  %4790 = vmatprep.subr.bf16.mxu0 %v14395_v12  ;;  %v14426_v11 = vld [vmem:[%s21581_s1 + $0x48] ss:$16 sps:$4 sm:$0xff]   ;;  %v14429_v12 = vld [vmem:[%s21581_s1 + $0x1400] ss:$16 sps:$4 sm:$0xff]   ;;  %v14434_v13 = vld [vmem:[%s21581_s1 + $0x2c] ss:$16 sps:$4 sm:$0xff]  }
 0x145   :  { %v4537_v26 = vpop.f32.mrf.mxu1  ;;  %4861 = vmatprep.mubr.bf16.mxu1 %v16316_v27  ;;  %v17527_v30 = vadd.f32 %v4535_v22, %v4495_v24  ;;  %v4497_v33 = vadd.f32 %v4496_v25, %v17321_v39  ;;  %4870 = vmatprep.subr.bf16.mxu1 %v14398_v15  ;;  %v14432_v15 = vld [vmem:[%s21581_s1 + $0x28] ss:$16 sps:$4 sm:$0xff]   ;;  %v14440_v22 = vld [vmem:[%s21581_s1 + $0xc] ss:$16 sps:$4 sm:$0xff]   ;;  %v14441_v25 = vld [vmem:[%s21581_s1 + $0x15c0] ss:$16 sps:$4 sm:$0xff]  }
 0x146   :  { %4820 = vmatprep.mubr.bf16.mxu0 %v17515_v16  ;;  %v4498_v38 = vpop.f32.mrf.mxu0  ;;  %v14438_v24 = vld [vmem:[%s21581_s1 + $0x8] ss:$16 sps:$4 sm:$0xff]  }
 0x147   :  { %v4539_v35 = vpop.f32.mrf.mxu1  ;;  %v17542_v39 = vadd.f32 %v4537_v26, %v4497_v33  ;;  %4791 = vmatpush1.bf16.msra.mxu0 %v14393_v14  ;;  %v14437_v14 = vld [vmem:[%s21581_s1 + $0x15e4] ss:$16 sps:$4 sm:$0xff]   ;;  %v14446_v26 = vld [vmem:[%s21581_s1 + $0x1ec] ss:$16 sps:$4 sm:$0xff]   ;;  %v14444_v33 = vld [vmem:[%s21581_s1 + $0x1e8] ss:$16 sps:$4 sm:$0xff]  }
 0x148   :  { %4792 = vmatprep.subr.bf16.mxu0 %v14401_v28  ;;  %v4499_v46 = vpop.f32.mrf.mxu0  ;;  %v14449_v28 = vld [vmem:[%s21581_s1 + $0x15a4] ss:$16 sps:$4 sm:$0xff]   ;;  %v14450_v38 = vld [vmem:[%s21581_s1 + $0x1c8] ss:$16 sps:$4 sm:$0xff]  }
 0x149   :  { %v4540_v44 = vpop.f32.mrf.mxu1  ;;  %v14455_v35 = vld [vmem:[%s21581_s1 + $0x1584] ss:$16 sps:$4 sm:$0xff]   ;;  %v14456_v46 = vld [vmem:[%s21581_s1 + $0x1a8] ss:$16 sps:$4 sm:$0xff]  }
 0x14a   :  { %v14458_v44 = vld [vmem:[%s21581_s1 + $0x1ac] ss:$16 sps:$4 sm:$0xff]  }
 0x14b   :  { %12949 = vmatmul.mubr.msk.bf16.vlgmr.msra.gmra.mxu1 %vm4361_vm1, %v17537_v36  ;;  %4793 = vmatpush1.bf16.msra.mxu0 %v14399_v34  ;;  %v14452_v34 = vld [vmem:[%s21581_s1 + $0x1cc] ss:$16 sps:$4 sm:$0xff]  }
 0x14c   :  { %4871 = vmatpush1.bf16.msra.mxu1 %v14396_v31  ;;  %4794 = vmatprep.subr.bf16.mxu0 %v14407_v45  ;;  %v14447_v31 = vld [vmem:[%s21581_s1 + $0x15a0] ss:$16 sps:$4 sm:$0xff]   ;;  %v14461_v45 = vld [vmem:[%s21581_s1 + $0x1564] ss:$16 sps:$4 sm:$0xff]  }
 0x14d   :  { %4872 = vmatprep.subr.bf16.mxu1 %v14404_v41  ;;  %4902 = vmatprep.mubr.bf16.mxu1 %v16541_v49  ;;  %v14419_v49 = vld [vmem:[%s21581_s1 + $0x1444] ss:$16 sps:$4 sm:$0xff]   ;;  %v14453_v41 = vld [vmem:[%s21581_s1 + $0x1580] ss:$16 sps:$4 sm:$0xff]  }
 0x14f   :  { %4795 = vmatpush1.bf16.msra.mxu0 %v14405_v51  ;;  %v14464_v51 = vld [vmem:[%s21581_s1 + $0x18c] ss:$16 sps:$4 sm:$0xff]  }
 0x150   :  { %4873 = vmatpush1.bf16.msra.mxu1 %v14402_v47  ;;  %4796 = vmatprep.subr.bf16.mxu0 %v14413_v54  ;;  %v14459_v47 = vld [vmem:[%s21581_s1 + $0x1560] ss:$16 sps:$4 sm:$0xff]   ;;  %v14462_v54 = vld [vmem:[%s21581_s1 + $0x188] ss:$16 sps:$4 sm:$0xff]  }
 0x151   :  { %4874 = vmatprep.subr.bf16.mxu1 %v14410_v53  ;;  %v14467_v53 = vld [vmem:[%s21581_s1 + $0x1544] ss:$16 sps:$4 sm:$0xff]  }
 0x153   :  { %4797 = vmatpush1.bf16.msra.mxu0 %v14411_v56  ;;  %v14470_v56 = vld [vmem:[%s21581_s1 + $0x16c] ss:$16 sps:$4 sm:$0xff]  }
 0x154   :  { %4875 = vmatpush1.bf16.msra.mxu1 %v14408_v55  ;;  %4798 = vmatprep.subr.bf16.mxu0 %v14419_v49  ;;  %v14465_v55 = vld [vmem:[%s21581_s1 + $0x1540] ss:$16 sps:$4 sm:$0xff]   ;;  %v14468_v49 = vld [vmem:[%s21581_s1 + $0x168] ss:$16 sps:$4 sm:$0xff]  }
 0x155   :  { %4876 = vmatprep.subr.bf16.mxu1 %v14416_v58  ;;  %v14473_v58 = vld [vmem:[%s21581_s1 + $0x1524] ss:$16 sps:$4 sm:$0xff]  }
 0x157   :  { %4799 = vmatpush1.bf16.msra.mxu0 %v14417_v60  ;;  %v14476_v60 = vld [vmem:[%s21581_s1 + $0x14c] ss:$16 sps:$4 sm:$0xff]  }
 0x158   :  { %4877 = vmatpush1.bf16.msra.mxu1 %v14414_v59  ;;  %4800 = vmatprep.subr.bf16.mxu0 %v14425_v62  ;;  %v14471_v59 = vld [vmem:[%s21581_s1 + $0x1520] ss:$16 sps:$4 sm:$0xff]   ;;  %v14474_v62 = vld [vmem:[%s21581_s1 + $0x148] ss:$16 sps:$4 sm:$0xff]  }
 0x159   :  { %4878 = vmatprep.subr.bf16.mxu1 %v14422_v61  ;;  %v14479_v61 = vld [vmem:[%s21581_s1 + $0x1504] ss:$16 sps:$4 sm:$0xff]  }
 0x15b   :  { %4801 = vmatpush1.bf16.msra.mxu0 %v14423_v1  ;;  %v69_v1 = vld [vmem:[%s21580_s0 + $0xa0] sm:$0xff] }
 0x15c   :  { %4879 = vmatpush1.bf16.msra.mxu1 %v14420_v0  ;;  %4802 = vmatprep.subr.bf16.mxu0 %v14431_v3  ;;  %v14477_v0 = vld [vmem:[%s21581_s1 + $0x1500] ss:$16 sps:$4 sm:$0xff]   ;;  %v14485_v3 = vld [vmem:[%s21581_s1 + $0x2ec] ss:$16 sps:$4 sm:$0xff]  }
 0x15d   :  { %4880 = vmatprep.subr.bf16.mxu1 %v14428_v2  ;;  %v14482_v2 = vld [vmem:[%s21581_s1 + $0x12c] ss:$16 sps:$4 sm:$0xff]  }
 0x15f   :  { %4803 = vmatpush1.bf16.msra.mxu0 %v14429_v12  ;;  %v14483_v12 = vld [vmem:[%s21581_s1 + $0x2e8] ss:$16 sps:$4 sm:$0xff]  }
 0x160   :  { %4881 = vmatpush1.bf16.msra.mxu1 %v14426_v11  ;;  %4804 = vmatprep.subr.bf16.mxu0 %v14437_v14  ;;  %v14480_v11 = vld [vmem:[%s21581_s1 + $0x128] ss:$16 sps:$4 sm:$0xff]   ;;  %v14488_v14 = vld [vmem:[%s21581_s1 + $0x10c] ss:$16 sps:$4 sm:$0xff]  }
 0x161   :  { %4882 = vmatprep.subr.bf16.mxu1 %v14434_v13  ;;  %v17715_v13 = vpack.c.bf16 %v69_v1, %v69_v1  ;;  %v14524_v1 = vld [vmem:[%s21581_s1 + $0x44c] ss:$16 sps:$4 sm:$0xff]  }
 0x163   :  { %4805 = vmatpush2.bf16.msra.mxu0 %v14435_v19  ;;  %v14486_v19 = vld [vmem:[%s21581_s1 + $0x108] ss:$16 sps:$4 sm:$0xff]  }
 0x164   :  { %4883 = vmatpush1.bf16.msra.mxu1 %v14432_v15  ;;  %4806 = vmatprep.subr.bf16.mxu0 %v14443_v23  ;;  %v14491_v15 = vld [vmem:[%s21581_s1 + $0x2cc] ss:$16 sps:$4 sm:$0xff]  }
 0x165   :  { %4884 = vmatprep.subr.bf16.mxu1 %v14440_v22  ;;  %v14489_v22 = vld [vmem:[%s21581_s1 + $0x2c8] ss:$16 sps:$4 sm:$0xff]  }
 0x167   :  { %4807 = vmatpush2.bf16.msra.mxu0 %v14441_v25  ;;  %v14494_v25 = vld [vmem:[%s21581_s1 + $0x4ec] ss:$16 sps:$4 sm:$0xff]  }
 0x168   :  { %4885 = vmatpush1.bf16.msra.mxu1 %v14438_v24  ;;  %4808 = vmatprep.subr.bf16.mxu0 %v14449_v28 }
 0x169   :  { %4886 = vmatprep.subr.bf16.mxu1 %v14446_v26 }
 0x16b   :  { %4809 = vmatpush2.bf16.msra.mxu0 %v14447_v31  ;;  %v14497_v31 = vld [vmem:[%s21581_s1 + $0x2ac] ss:$16 sps:$4 sm:$0xff]  }
 0x16c   :  { %4887 = vmatpush2.bf16.msra.mxu1 %v14444_v33  ;;  %4810 = vmatprep.subr.bf16.mxu0 %v14455_v35 }
 0x16d   :  { %4888 = vmatprep.subr.bf16.mxu1 %v14452_v34 }
 0x16f   :  { %4811 = vmatpush2.bf16.msra.mxu0 %v14453_v41 }
 0x170   :  { %4889 = vmatpush2.bf16.msra.mxu1 %v14450_v38  ;;  %4812 = vmatprep.subr.bf16.mxu0 %v14461_v45  ;;  %v14492_v38 = vld [vmem:[%s21581_s1 + $0x4e8] ss:$16 sps:$4 sm:$0xff]   ;;  %v14500_v45 = vld [vmem:[%s21581_s1 + $0x4cc] ss:$16 sps:$4 sm:$0xff]  }
 0x171   :  { %4890 = vmatprep.subr.bf16.mxu1 %v14458_v44 }
 0x173   :  { %4813 = vmatpush2.bf16.msra.mxu0 %v14459_v47  ;;  %v14503_v47 = vld [vmem:[%s21581_s1 + $0x28c] ss:$16 sps:$4 sm:$0xff]  }
 0x174   :  { %4891 = vmatpush2.bf16.msra.mxu1 %v14456_v46  ;;  %4814 = vmatprep.subr.bf16.mxu0 %v14467_v53  ;;  %v14501_v53 = vld [vmem:[%s21581_s1 + $0x288] ss:$16 sps:$4 sm:$0xff]  }
 0x175   :  { %4892 = vmatprep.subr.bf16.mxu1 %v14464_v51 }
 0x177   :  { %4815 = vmatpush2.bf16.msra.mxu0 %v14465_v55  ;;  %v14509_v55 = vld [vmem:[%s21581_s1 + $0x26c] ss:$16 sps:$4 sm:$0xff]  }
 0x178   :  { %4893 = vmatpush2.bf16.msra.mxu1 %v14462_v54  ;;  %4816 = vmatprep.subr.bf16.mxu0 %v14473_v58  ;;  %v14506_v54 = vld [vmem:[%s21581_s1 + $0x4ac] ss:$16 sps:$4 sm:$0xff]  }
 0x179   :  { %4894 = vmatprep.subr.bf16.mxu1 %v14470_v56  ;;  %v14507_v56 = vld [vmem:[%s21581_s1 + $0x268] ss:$16 sps:$4 sm:$0xff]   ;;  %v14512_v58 = vld [vmem:[%s21581_s1 + $0x48c] ss:$16 sps:$4 sm:$0xff]  }
 0x17b   :  { %4817 = vmatpush2.bf16.msra.mxu0 %v14471_v59  ;;  %v14513_v59 = vld [vmem:[%s21581_s1 + $0x248] ss:$16 sps:$4 sm:$0xff]  }
 0x17c   :  { %4895 = vmatpush2.bf16.msra.mxu1 %v14468_v49  ;;  %4818 = vmatprep.subr.bf16.mxu0 %v14479_v61  ;;  %v14515_v49 = vld [vmem:[%s21581_s1 + $0x24c] ss:$16 sps:$4 sm:$0xff]  }
 0x17d   :  { %4896 = vmatprep.subr.bf16.mxu1 %v14476_v60  ;;  %v14518_v60 = vld [vmem:[%s21581_s1 + $0x46c] ss:$16 sps:$4 sm:$0xff]  }
 0x17e   :  { %v14521_v61 = vld [vmem:[%s21581_s1 + $0x22c] ss:$16 sps:$4 sm:$0xff]  }
 0x17f   :  { %4819 = vmatpush2.bf16.msra.mxu0 %v14477_v0  ;;  %v14519_v0 = vld [vmem:[%s21581_s1 + $0x228] ss:$16 sps:$4 sm:$0xff]  }
 0x180   :  { %4897 = vmatpush2.bf16.msra.mxu1 %v14474_v62  ;;  %4911 = vmatprep.subr.bf16.mxu0 %v14485_v3  ;;  %v14516_v62 = vld [vmem:[%s21581_s1 + $0x468] ss:$16 sps:$4 sm:$0xff]  }
 0x181   :  { %4898 = vmatprep.subr.bf16.mxu1 %v14482_v2  ;;  %v14527_v2 = vld [vmem:[%s21581_s1 + $0x20c] ss:$16 sps:$4 sm:$0xff]   ;;  %v14522_v3 = vld [vmem:[%s21581_s1 + $0x448] ss:$16 sps:$4 sm:$0xff]  }
 0x182   :  { %v4576_v23 = vpop.f32.mrf.mxu0  ;;  %4821 = vmatmul.mubr.bf16.vlgmr.msra.gmra.mxu0 %v17715_v13 }
 0x183   :  { %v4617_v24 = vpop.f32.mrf.mxu1  ;;  %v4577_v26 = vadd.f32 %v4576_v23, %v17527_v30  ;;  %4912 = vmatpush1.bf16.msra.mxu0 %v14483_v12  ;;  %v14495_v30 = vld [vmem:[%s21581_s1 + $0x2a8] ss:$16 sps:$4 sm:$0xff]   ;;  %4943 = vmatprep.mubr.bf16.mxu0 %v16549_v52  ;;  %v14530_v12 = vld [vmem:[%s21581_s1 + $0x42c] ss:$16 sps:$4 sm:$0xff]  }
 0x184   :  { %4899 = vmatpush2.bf16.msra.mxu1 %v14480_v11  ;;  %v4578_v28 = vpop.f32.mrf.mxu0  ;;  %4913 = vmatprep.subr.bf16.mxu0 %v14491_v15  ;;  %v14498_v52 = vld [vmem:[%s21581_s1 + $0x4c8] ss:$16 sps:$4 sm:$0xff]   ;;  %v14539_v23 = vld [vmem:[%s21581_s1 + $0x3cc] ss:$16 sps:$4 sm:$0xff]  }
 0x185   :  { %v4619_v33 = vpop.f32.mrf.mxu1  ;;  %4900 = vmatprep.subr.bf16.mxu1 %v14488_v14  ;;  %v17737_v34 = vadd.f32 %v4617_v24, %v4577_v26  ;;  %v4579_v35 = vadd.f32 %v4578_v28, %v17542_v39  ;;  %v14525_v11 = vld [vmem:[%s21581_s1 + $0x208] ss:$16 sps:$4 sm:$0xff]   ;;  %v14533_v14 = vld [vmem:[%s21581_s1 + $0x3ec] ss:$16 sps:$4 sm:$0xff]  }
 0x186   :  { %v4580_v44 = vpop.f32.mrf.mxu0  ;;  %v14528_v15 = vld [vmem:[%s21581_s1 + $0x428] ss:$16 sps:$4 sm:$0xff]   ;;  %v14542_v26 = vld [vmem:[%s21581_s1 + $0x5ec] ss:$16 sps:$4 sm:$0xff]  }
 0x187   :  { %v4621_v41 = vpop.f32.mrf.mxu1  ;;  %v17750_v46 = vadd.f32 %v4619_v33, %v4579_v35  ;;  %4914 = vmatpush1.bf16.msra.mxu0 %v14489_v22  ;;  %v14536_v22 = vld [vmem:[%s21581_s1 + $0x40c] ss:$16 sps:$4 sm:$0xff]   ;;  %v14534_v24 = vld [vmem:[%s21581_s1 + $0x408] ss:$16 sps:$4 sm:$0xff]  }
 0x188   :  { %4901 = vmatpush2.bf16.msra.mxu1 %v14486_v19  ;;  %4915 = vmatprep.subr.bf16.mxu0 %v14497_v31  ;;  %v4581_v51 = vpop.f32.mrf.mxu0  ;;  %v14531_v19 = vld [vmem:[%s21581_s1 + $0x3e8] ss:$16 sps:$4 sm:$0xff]   ;;  %v14545_v28 = vld [vmem:[%s21581_s1 + $0x3ac] ss:$16 sps:$4 sm:$0xff]  }
 0x189   :  { %v4622_v39 = vpop.f32.mrf.mxu1  ;;  %4952 = vmatprep.subr.bf16.mxu1 %v14494_v25  ;;  %v14537_v25 = vld [vmem:[%s21581_s1 + $0x3c8] ss:$16 sps:$4 sm:$0xff]   ;;  %v14548_v35 = vld [vmem:[%s21581_s1 + $0x5cc] ss:$16 sps:$4 sm:$0xff]  }
 0x18a   :  { %v14540_v33 = vld [vmem:[%s21581_s1 + $0x5e8] ss:$16 sps:$4 sm:$0xff]   ;;  %v14554_v44 = vld [vmem:[%s21581_s1 + $0x5ac] ss:$16 sps:$4 sm:$0xff]  }
 0x18b   :  { %4903 = vmatmul.mubr.bf16.vlgmr.msra.gmra.mxu1 %v16610_v8  ;;  %4916 = vmatpush1.bf16.msra.mxu0 %v14495_v30  ;;  %v14504_v8 = vld [vmem:[%s21581_s1 + $0x4a8] ss:$16 sps:$4 sm:$0xff]   ;;  %v14560_v51 = vld [vmem:[%s21581_s1 + $0x58c] ss:$16 sps:$4 sm:$0xff]  }
 0x18c   :  { %4953 = vmatpush1.bf16.msra.mxu1 %v14492_v38  ;;  %4917 = vmatprep.subr.bf16.mxu0 %v14503_v47  ;;  %v14543_v31 = vld [vmem:[%s21581_s1 + $0x3a8] ss:$16 sps:$4 sm:$0xff]   ;;  %v14551_v38 = vld [vmem:[%s21581_s1 + $0x38c] ss:$16 sps:$4 sm:$0xff]  }
 0x18d   :  { %4954 = vmatprep.subr.bf16.mxu1 %v14500_v45  ;;  %4984 = vmatprep.mubr.bf16.mxu1 %v16697_v37  ;;  %v14510_v37 = vld [vmem:[%s21581_s1 + $0x488] ss:$16 sps:$4 sm:$0xff]   ;;  %v14557_v45 = vld [vmem:[%s21581_s1 + $0x36c] ss:$16 sps:$4 sm:$0xff]  }
 0x18e   :  { %v14546_v30 = vld [vmem:[%s21581_s1 + $0x5c8] ss:$16 sps:$4 sm:$0xff]  }
 0x18f   :  { %4918 = vmatpush1.bf16.msra.mxu0 %v14501_v53  ;;  %v14549_v41 = vld [vmem:[%s21581_s1 + $0x388] ss:$16 sps:$4 sm:$0xff]  }
 0x190   :  { %4955 = vmatpush1.bf16.msra.mxu1 %v14498_v52  ;;  %4919 = vmatprep.subr.bf16.mxu0 %v14509_v55  ;;  %v14552_v39 = vld [vmem:[%s21581_s1 + $0x5a8] ss:$16 sps:$4 sm:$0xff]   ;;  %v14563_v52 = vld [vmem:[%s21581_s1 + $0x34c] ss:$16 sps:$4 sm:$0xff]  }
 0x191   :  { %4956 = vmatprep.subr.bf16.mxu1 %v14506_v54  ;;  %v14555_v47 = vld [vmem:[%s21581_s1 + $0x368] ss:$16 sps:$4 sm:$0xff]   ;;  %v14566_v55 = vld [vmem:[%s21581_s1 + $0x56c] ss:$16 sps:$4 sm:$0xff]  }
 0x192   :  { %v14558_v53 = vld [vmem:[%s21581_s1 + $0x588] ss:$16 sps:$4 sm:$0xff]  }
 0x193   :  { %4920 = vmatpush1.bf16.msra.mxu0 %v14507_v56  ;;  %v14561_v54 = vld [vmem:[%s21581_s1 + $0x348] ss:$16 sps:$4 sm:$0xff]  }
 0x194   :  { %4957 = vmatpush1.bf16.msra.mxu1 %v14504_v8  ;;  %4921 = vmatprep.subr.bf16.mxu0 %v14515_v49  ;;  %v14569_v8 = vld [vmem:[%s21581_s1 + $0x32c] ss:$16 sps:$4 sm:$0xff]   ;;  %v14564_v56 = vld [vmem:[%s21581_s1 + $0x568] ss:$16 sps:$4 sm:$0xff]  }
 0x195   :  { %4958 = vmatprep.subr.bf16.mxu1 %v14512_v58  ;;  %v14567_v58 = vld [vmem:[%s21581_s1 + $0x328] ss:$16 sps:$4 sm:$0xff]   ;;  %v14572_v49 = vld [vmem:[%s21581_s1 + $0x54c] ss:$16 sps:$4 sm:$0xff]  }
 0x197   :  { %4922 = vmatpush1.bf16.msra.mxu0 %v14513_v59  ;;  %v14570_v59 = vld [vmem:[%s21581_s1 + $0x548] ss:$16 sps:$4 sm:$0xff]  }
 0x198   :  { %4959 = vmatpush1.bf16.msra.mxu1 %v14510_v37  ;;  %4923 = vmatprep.subr.bf16.mxu0 %v14521_v61  ;;  %v14575_v37 = vld [vmem:[%s21581_s1 + $0x30c] ss:$16 sps:$4 sm:$0xff]  }
 0x199   :  { %4960 = vmatprep.subr.bf16.mxu1 %v14518_v60  ;;  %v14573_v60 = vld [vmem:[%s21581_s1 + $0x308] ss:$16 sps:$4 sm:$0xff]   ;;  %v14578_v61 = vld [vmem:[%s21581_s1 + $0x52c] ss:$16 sps:$4 sm:$0xff]  }
 0x19b   :  { %4924 = vmatpush1.bf16.msra.mxu0 %v14519_v0  ;;  %v14576_v0 = vld [vmem:[%s21581_s1 + $0x528] ss:$16 sps:$4 sm:$0xff]  }
 0x19c   :  { %4961 = vmatpush1.bf16.msra.mxu1 %v14516_v62  ;;  %4925 = vmatprep.subr.bf16.mxu0 %v14527_v2  ;;  %v14581_v62 = vld [vmem:[%s21581_s1 + $0x6ec] ss:$16 sps:$4 sm:$0xff]  }
 0x19d   :  { %4962 = vmatprep.subr.bf16.mxu1 %v14524_v1  ;;  %v14579_v1 = vld [vmem:[%s21581_s1 + $0x6e8] ss:$16 sps:$4 sm:$0xff]   ;;  %v14584_v2 = vld [vmem:[%s21581_s1 + $0x50c] ss:$16 sps:$4 sm:$0xff]  }
 0x19f   :  { %4926 = vmatpush1.bf16.msra.mxu0 %v14525_v11  ;;  %v14582_v11 = vld [vmem:[%s21581_s1 + $0x508] ss:$16 sps:$4 sm:$0xff]  }
 0x1a0   :  { %4963 = vmatpush1.bf16.msra.mxu1 %v14522_v3  ;;  %4927 = vmatprep.subr.bf16.mxu0 %v14533_v14  ;;  %v14587_v3 = vld [vmem:[%s21581_s1 + $0x6cc] ss:$16 sps:$4 sm:$0xff]  }
 0x1a1   :  { %4964 = vmatprep.subr.bf16.mxu1 %v14530_v12  ;;  %v14585_v12 = vld [vmem:[%s21581_s1 + $0x6c8] ss:$16 sps:$4 sm:$0xff]  }
 0x1a3   :  { %4928 = vmatpush2.bf16.msra.mxu0 %v14531_v19  ;;  %v14590_v19 = vld [vmem:[%s21581_s1 + $0x8ec] ss:$16 sps:$4 sm:$0xff]  }
 0x1a4   :  { %4965 = vmatpush1.bf16.msra.mxu1 %v14528_v15  ;;  %4929 = vmatprep.subr.bf16.mxu0 %v14539_v23 }
 0x1a5   :  { %4966 = vmatprep.subr.bf16.mxu1 %v14536_v22 }
 0x1a7   :  { %4930 = vmatpush2.bf16.msra.mxu0 %v14537_v25  ;;  %v14593_v25 = vld [vmem:[%s21581_s1 + $0x6ac] ss:$16 sps:$4 sm:$0xff]  }
 0x1a8   :  { %4967 = vmatpush1.bf16.msra.mxu1 %v14534_v24  ;;  %4931 = vmatprep.subr.bf16.mxu0 %v14545_v28  ;;  %v14588_v28 = vld [vmem:[%s21581_s1 + $0x8e8] ss:$16 sps:$4 sm:$0xff]  }
 0x1a9   :  { %4968 = vmatprep.subr.bf16.mxu1 %v14542_v26 }
 0x1ab   :  { %4932 = vmatpush2.bf16.msra.mxu0 %v14543_v31 }
 0x1ac   :  { %4969 = vmatpush2.bf16.msra.mxu1 %v14540_v33  ;;  %4933 = vmatprep.subr.bf16.mxu0 %v14551_v38 }
 0x1ad   :  { %4970 = vmatprep.subr.bf16.mxu1 %v14548_v35  ;;  %v14596_v35 = vld [vmem:[%s21581_s1 + $0x8cc] ss:$16 sps:$4 sm:$0xff]  }
 0x1af   :  { %4934 = vmatpush2.bf16.msra.mxu0 %v14549_v41 }
 0x1b0   :  { %4971 = vmatpush2.bf16.msra.mxu1 %v14546_v30  ;;  %4935 = vmatprep.subr.bf16.mxu0 %v14557_v45  ;;  %v14599_v30 = vld [vmem:[%s21581_s1 + $0x68c] ss:$16 sps:$4 sm:$0xff]  }
 0x1b1   :  { %4972 = vmatprep.subr.bf16.mxu1 %v14554_v44  ;;  %v14597_v44 = vld [vmem:[%s21581_s1 + $0x688] ss:$16 sps:$4 sm:$0xff]   ;;  %v14602_v45 = vld [vmem:[%s21581_s1 + $0x8ac] ss:$16 sps:$4 sm:$0xff]  }
 0x1b3   :  { %4936 = vmatpush2.bf16.msra.mxu0 %v14555_v47  ;;  %v14600_v47 = vld [vmem:[%s21581_s1 + $0x8a8] ss:$16 sps:$4 sm:$0xff]  }
 0x1b4   :  { %4973 = vmatpush2.bf16.msra.mxu1 %v14552_v39  ;;  %4937 = vmatprep.subr.bf16.mxu0 %v14563_v52  ;;  %v14605_v39 = vld [vmem:[%s21581_s1 + $0x66c] ss:$16 sps:$4 sm:$0xff]  }
 0x1b5   :  { %4974 = vmatprep.subr.bf16.mxu1 %v14560_v51  ;;  %v14608_v51 = vld [vmem:[%s21581_s1 + $0x88c] ss:$16 sps:$4 sm:$0xff]  }
 0x1b6   :  { %v14611_v52 = vld [vmem:[%s21581_s1 + $0x64c] ss:$16 sps:$4 sm:$0xff]  }
 0x1b7   :  { %4938 = vmatpush2.bf16.msra.mxu0 %v14561_v54  ;;  %v14614_v54 = vld [vmem:[%s21581_s1 + $0x86c] ss:$16 sps:$4 sm:$0xff]  }
 0x1b8   :  { %4975 = vmatpush2.bf16.msra.mxu1 %v14558_v53  ;;  %4939 = vmatprep.subr.bf16.mxu0 %v14569_v8  ;;  %v14609_v53 = vld [vmem:[%s21581_s1 + $0x648] ss:$16 sps:$4 sm:$0xff]  }
 0x1b9   :  { %4976 = vmatprep.subr.bf16.mxu1 %v14566_v55  ;;  %v14617_v55 = vld [vmem:[%s21581_s1 + $0x62c] ss:$16 sps:$4 sm:$0xff]   ;;  %v14612_v8 = vld [vmem:[%s21581_s1 + $0x868] ss:$16 sps:$4 sm:$0xff]  }
 0x1bb   :  { %4940 = vmatpush2.bf16.msra.mxu0 %v14567_v58  ;;  %v14620_v58 = vld [vmem:[%s21581_s1 + $0x84c] ss:$16 sps:$4 sm:$0xff]  }
 0x1bc   :  { %4977 = vmatpush2.bf16.msra.mxu1 %v14564_v56  ;;  %4941 = vmatprep.subr.bf16.mxu0 %v14575_v37  ;;  %v14615_v56 = vld [vmem:[%s21581_s1 + $0x628] ss:$16 sps:$4 sm:$0xff]  }
 0x1bd   :  { %4978 = vmatprep.subr.bf16.mxu1 %v14572_v49  ;;  %v14623_v49 = vld [vmem:[%s21581_s1 + $0x60c] ss:$16 sps:$4 sm:$0xff]   ;;  %v14618_v37 = vld [vmem:[%s21581_s1 + $0x848] ss:$16 sps:$4 sm:$0xff]  }
 0x1bf   :  { %4942 = vmatpush2.bf16.msra.mxu0 %v14573_v60  ;;  %v14626_v60 = vld [vmem:[%s21581_s1 + $0x82c] ss:$16 sps:$4 sm:$0xff]  }
 0x1c0   :  { %4979 = vmatpush2.bf16.msra.mxu1 %v14570_v59  ;;  %4993 = vmatprep.subr.bf16.mxu0 %v14581_v62  ;;  %v14621_v59 = vld [vmem:[%s21581_s1 + $0x608] ss:$16 sps:$4 sm:$0xff]  }
 0x1c1   :  { %4980 = vmatprep.subr.bf16.mxu1 %v14578_v61  ;;  %v14629_v61 = vld [vmem:[%s21581_s1 + $0x7ec] ss:$16 sps:$4 sm:$0xff]   ;;  %v14624_v62 = vld [vmem:[%s21581_s1 + $0x828] ss:$16 sps:$4 sm:$0xff]  }
 0x1c2   :  { %v4658_v14 = vpop.f32.mrf.mxu0  ;;  %4944 = vmatmul.mubr.bf16.vlgmr.msra.gmra.mxu0 %v16612_v9 }
 0x1c3   :  { %v4699_v15 = vpop.f32.mrf.mxu1  ;;  %v4659_v22 = vadd.f32 %v4658_v14, %v17737_v34  ;;  %4994 = vmatpush1.bf16.msra.mxu0 %v14579_v1  ;;  %v14591_v34 = vld [vmem:[%s21581_s1 + $0x6a8] ss:$16 sps:$4 sm:$0xff]   ;;  %5025 = vmatprep.mubr.bf16.mxu0 %v16705_v40  ;;  %v14632_v1 = vld [vmem:[%s21581_s1 + $0x80c] ss:$16 sps:$4 sm:$0xff]  }
 0x1c4   :  { %4981 = vmatpush2.bf16.msra.mxu1 %v14576_v0  ;;  %v4660_v23 = vpop.f32.mrf.mxu0  ;;  %4995 = vmatprep.subr.bf16.mxu0 %v14587_v3  ;;  %v14594_v40 = vld [vmem:[%s21581_s1 + $0x8c8] ss:$16 sps:$4 sm:$0xff]   ;;  %v14641_v14 = vld [vmem:[%s21581_s1 + $0x7ac] ss:$16 sps:$4 sm:$0xff]  }
 0x1c5   :  { %v4701_v24 = vpop.f32.mrf.mxu1  ;;  %4982 = vmatprep.subr.bf16.mxu1 %v14584_v2  ;;  %v17939_v26 = vadd.f32 %v4699_v15, %v4659_v22  ;;  %v4661_v9 = vadd.f32 %v4660_v23, %v17750_v46  ;;  %v14627_v0 = vld [vmem:[%s21581_s1 + $0x7e8] ss:$16 sps:$4 sm:$0xff]   ;;  %v14635_v2 = vld [vmem:[%s21581_s1 + $0x7cc] ss:$16 sps:$4 sm:$0xff]  }
 0x1c6   :  { %v4662_v31 = vpop.f32.mrf.mxu0  ;;  %v14630_v3 = vld [vmem:[%s21581_s1 + $0x808] ss:$16 sps:$4 sm:$0xff]   ;;  %v14644_v22 = vld [vmem:[%s21581_s1 + $0x9cc] ss:$16 sps:$4 sm:$0xff]  }
 0x1c7   :  { %v4703_v33 = vpop.f32.mrf.mxu1  ;;  %v17952_v38 = vadd.f32 %v4701_v24, %v4661_v9  ;;  %4996 = vmatpush1.bf16.msra.mxu0 %v14585_v12  ;;  %v14638_v12 = vld [vmem:[%s21581_s1 + $0x9ec] ss:$16 sps:$4 sm:$0xff]   ;;  %v14636_v15 = vld [vmem:[%s21581_s1 + $0x9e8] ss:$16 sps:$4 sm:$0xff]  }
 0x1c8   :  { %4983 = vmatpush2.bf16.msra.mxu1 %v14582_v11  ;;  %4997 = vmatprep.subr.bf16.mxu0 %v14593_v25  ;;  %v4663_v41 = vpop.f32.mrf.mxu0  ;;  %v14633_v11 = vld [vmem:[%s21581_s1 + $0x7c8] ss:$16 sps:$4 sm:$0xff]   ;;  %v14647_v23 = vld [vmem:[%s21581_s1 + $0x78c] ss:$16 sps:$4 sm:$0xff]  }
 0x1c9   :  { %v4704_v46 = vpop.f32.mrf.mxu1  ;;  %5034 = vmatprep.subr.bf16.mxu1 %v14590_v19  ;;  %v14639_v19 = vld [vmem:[%s21581_s1 + $0x7a8] ss:$16 sps:$4 sm:$0xff]   ;;  %v14650_v9 = vld [vmem:[%s21581_s1 + $0x9ac] ss:$16 sps:$4 sm:$0xff]  }
 0x1ca   :  { %v14642_v24 = vld [vmem:[%s21581_s1 + $0x9c8] ss:$16 sps:$4 sm:$0xff]   ;;  %v14656_v31 = vld [vmem:[%s21581_s1 + $0x98c] ss:$16 sps:$4 sm:$0xff]  }
 0x1cb   :  { %4985 = vmatmul.mubr.bf16.vlgmr.msra.gmra.mxu1 %v16826_v20  ;;  %4998 = vmatpush1.bf16.msra.mxu0 %v14591_v34  ;;  %v14603_v20 = vld [vmem:[%s21581_s1 + $0x668] ss:$16 sps:$4 sm:$0xff]   ;;  %v14662_v41 = vld [vmem:[%s21581_s1 + $0x96c] ss:$16 sps:$4 sm:$0xff]  }
 0x1cc   :  { %5035 = vmatpush1.bf16.msra.mxu1 %v14588_v28  ;;  %4999 = vmatprep.subr.bf16.mxu0 %v14599_v30  ;;  %v14645_v25 = vld [vmem:[%s21581_s1 + $0x788] ss:$16 sps:$4 sm:$0xff]   ;;  %v14653_v28 = vld [vmem:[%s21581_s1 + $0x76c] ss:$16 sps:$4 sm:$0xff]  }
 0x1cd   :  { %5036 = vmatprep.subr.bf16.mxu1 %v14596_v35  ;;  %5066 = vmatprep.mubr.bf16.mxu1 %v16853_v29  ;;  %v14606_v29 = vld [vmem:[%s21581_s1 + $0x888] ss:$16 sps:$4 sm:$0xff]   ;;  %v14659_v35 = vld [vmem:[%s21581_s1 + $0x74c] ss:$16 sps:$4 sm:$0xff]  }
 0x1ce   :  { %v14648_v34 = vld [vmem:[%s21581_s1 + $0x9a8] ss:$16 sps:$4 sm:$0xff]  }
 0x1cf   :  { %5000 = vmatpush1.bf16.msra.mxu0 %v14597_v44  ;;  %v14651_v33 = vld [vmem:[%s21581_s1 + $0x768] ss:$16 sps:$4 sm:$0xff]  }
 0x1d0   :  { %5037 = vmatpush1.bf16.msra.mxu1 %v14594_v40  ;;  %5001 = vmatprep.subr.bf16.mxu0 %v14605_v39  ;;  %v14654_v46 = vld [vmem:[%s21581_s1 + $0x988] ss:$16 sps:$4 sm:$0xff]   ;;  %v14665_v40 = vld [vmem:[%s21581_s1 + $0x72c] ss:$16 sps:$4 sm:$0xff]  }
 0x1d1   :  { %5038 = vmatprep.subr.bf16.mxu1 %v14602_v45  ;;  %v14657_v30 = vld [vmem:[%s21581_s1 + $0x748] ss:$16 sps:$4 sm:$0xff]   ;;  %v14668_v39 = vld [vmem:[%s21581_s1 + $0x94c] ss:$16 sps:$4 sm:$0xff]  }
 0x1d2   :  { %v14660_v44 = vld [vmem:[%s21581_s1 + $0x968] ss:$16 sps:$4 sm:$0xff]  }
 0x1d3   :  { %5002 = vmatpush1.bf16.msra.mxu0 %v14603_v20  ;;  %v14663_v45 = vld [vmem:[%s21581_s1 + $0x728] ss:$16 sps:$4 sm:$0xff]  }
 0x1d4   :  { %5039 = vmatpush1.bf16.msra.mxu1 %v14600_v47  ;;  %5003 = vmatprep.subr.bf16.mxu0 %v14611_v52  ;;  %v14671_v47 = vld [vmem:[%s21581_s1 + $0x70c] ss:$16 sps:$4 sm:$0xff]   ;;  %v14666_v20 = vld [vmem:[%s21581_s1 + $0x948] ss:$16 sps:$4 sm:$0xff]  }
 0x1d5   :  { %5040 = vmatprep.subr.bf16.mxu1 %v14608_v51  ;;  %v14669_v51 = vld [vmem:[%s21581_s1 + $0x708] ss:$16 sps:$4 sm:$0xff]   ;;  %v14674_v52 = vld [vmem:[%s21581_s1 + $0x92c] ss:$16 sps:$4 sm:$0xff]  }
 0x1d7   :  { %5004 = vmatpush1.bf16.msra.mxu0 %v14609_v53  ;;  %v14672_v53 = vld [vmem:[%s21581_s1 + $0x928] ss:$16 sps:$4 sm:$0xff]  }
 0x1d8   :  { %5041 = vmatpush1.bf16.msra.mxu1 %v14606_v29  ;;  %5005 = vmatprep.subr.bf16.mxu0 %v14617_v55  ;;  %v14677_v29 = vld [vmem:[%s21581_s1 + $0xaec] ss:$16 sps:$4 sm:$0xff]  }
 0x1d9   :  { %5042 = vmatprep.subr.bf16.mxu1 %v14614_v54  ;;  %v14675_v54 = vld [vmem:[%s21581_s1 + $0xae8] ss:$16 sps:$4 sm:$0xff]   ;;  %v14680_v55 = vld [vmem:[%s21581_s1 + $0x90c] ss:$16 sps:$4 sm:$0xff]  }
 0x1db   :  { %5006 = vmatpush1.bf16.msra.mxu0 %v14615_v56  ;;  %v14678_v56 = vld [vmem:[%s21581_s1 + $0x908] ss:$16 sps:$4 sm:$0xff]  }
 0x1dc   :  { %5043 = vmatpush1.bf16.msra.mxu1 %v14612_v8  ;;  %5007 = vmatprep.subr.bf16.mxu0 %v14623_v49  ;;  %v14683_v8 = vld [vmem:[%s21581_s1 + $0xacc] ss:$16 sps:$4 sm:$0xff]  }
 0x1dd   :  { %5044 = vmatprep.subr.bf16.mxu1 %v14620_v58  ;;  %v14681_v58 = vld [vmem:[%s21581_s1 + $0xac8] ss:$16 sps:$4 sm:$0xff]  }
 0x1df   :  { %5008 = vmatpush1.bf16.msra.mxu0 %v14621_v59  ;;  %v14686_v59 = vld [vmem:[%s21581_s1 + $0xcec] ss:$16 sps:$4 sm:$0xff]  }
 0x1e0   :  { %5045 = vmatpush1.bf16.msra.mxu1 %v14618_v37  ;;  %5009 = vmatprep.subr.bf16.mxu0 %v14629_v61 }
 0x1e1   :  { %5046 = vmatprep.subr.bf16.mxu1 %v14626_v60 }
 0x1e3   :  { %5010 = vmatpush2.bf16.msra.mxu0 %v14627_v0  ;;  %v14689_v0 = vld [vmem:[%s21581_s1 + $0xaac] ss:$16 sps:$4 sm:$0xff]  }
 0x1e4   :  { %5047 = vmatpush1.bf16.msra.mxu1 %v14624_v62  ;;  %5011 = vmatprep.subr.bf16.mxu0 %v14635_v2  ;;  %v14684_v2 = vld [vmem:[%s21581_s1 + $0xce8] ss:$16 sps:$4 sm:$0xff]  }
 0x1e5   :  { %5048 = vmatprep.subr.bf16.mxu1 %v14632_v1 }
 0x1e7   :  { %5012 = vmatpush2.bf16.msra.mxu0 %v14633_v11 }
 0x1e8   :  { %5049 = vmatpush1.bf16.msra.mxu1 %v14630_v3  ;;  %5013 = vmatprep.subr.bf16.mxu0 %v14641_v14 }
 0x1e9   :  { %5050 = vmatprep.subr.bf16.mxu1 %v14638_v12  ;;  %v14692_v12 = vld [vmem:[%s21581_s1 + $0xccc] ss:$16 sps:$4 sm:$0xff]  }
 0x1eb   :  { %5014 = vmatpush2.bf16.msra.mxu0 %v14639_v19 }
 0x1ec   :  { %5051 = vmatpush2.bf16.msra.mxu1 %v14636_v15  ;;  %5015 = vmatprep.subr.bf16.mxu0 %v14647_v23  ;;  %v14695_v15 = vld [vmem:[%s21581_s1 + $0xa8c] ss:$16 sps:$4 sm:$0xff]  }
 0x1ed   :  { %5052 = vmatprep.subr.bf16.mxu1 %v14644_v22  ;;  %v14693_v22 = vld [vmem:[%s21581_s1 + $0xa88] ss:$16 sps:$4 sm:$0xff]  }
 0x1ef   :  { %5016 = vmatpush2.bf16.msra.mxu0 %v14645_v25 }
 0x1f0   :  { %5053 = vmatpush2.bf16.msra.mxu1 %v14642_v24  ;;  %5017 = vmatprep.subr.bf16.mxu0 %v14653_v28  ;;  %v14698_v24 = vld [vmem:[%s21581_s1 + $0xcac] ss:$16 sps:$4 sm:$0xff]  }
 0x1f1   :  { %5054 = vmatprep.subr.bf16.mxu1 %v14650_v9  ;;  %v14701_v9 = vld [vmem:[%s21581_s1 + $0xa6c] ss:$16 sps:$4 sm:$0xff]  }
 0x1f3   :  { %5018 = vmatpush2.bf16.msra.mxu0 %v14651_v33 }
 0x1f4   :  { %5055 = vmatpush2.bf16.msra.mxu1 %v14648_v34  ;;  %5019 = vmatprep.subr.bf16.mxu0 %v14659_v35  ;;  %v14699_v34 = vld [vmem:[%s21581_s1 + $0xa68] ss:$16 sps:$4 sm:$0xff]   ;;  %v14707_v35 = vld [vmem:[%s21581_s1 + $0xa4c] ss:$16 sps:$4 sm:$0xff]  }
 0x1f5   :  { %5056 = vmatprep.subr.bf16.mxu1 %v14656_v31  ;;  %v14704_v31 = vld [vmem:[%s21581_s1 + $0xc8c] ss:$16 sps:$4 sm:$0xff]  }
 0x1f7   :  { %5020 = vmatpush2.bf16.msra.mxu0 %v14657_v30  ;;  %v14710_v30 = vld [vmem:[%s21581_s1 + $0xc6c] ss:$16 sps:$4 sm:$0xff]  }
 0x1f8   :  { %5057 = vmatpush2.bf16.msra.mxu1 %v14654_v46  ;;  %5021 = vmatprep.subr.bf16.mxu0 %v14665_v40  ;;  %v14705_v46 = vld [vmem:[%s21581_s1 + $0xa48] ss:$16 sps:$4 sm:$0xff]  }
 0x1f9   :  { %5058 = vmatprep.subr.bf16.mxu1 %v14662_v41  ;;  %v14713_v41 = vld [vmem:[%s21581_s1 + $0xa2c] ss:$16 sps:$4 sm:$0xff]   ;;  %v14708_v40 = vld [vmem:[%s21581_s1 + $0xc68] ss:$16 sps:$4 sm:$0xff]  }
 0x1fb   :  { %5022 = vmatpush2.bf16.msra.mxu0 %v14663_v45  ;;  %v14716_v45 = vld [vmem:[%s21581_s1 + $0xc4c] ss:$16 sps:$4 sm:$0xff]  }
 0x1fc   :  { %5059 = vmatpush2.bf16.msra.mxu1 %v14660_v44  ;;  %5023 = vmatprep.subr.bf16.mxu0 %v14671_v47  ;;  %v14711_v44 = vld [vmem:[%s21581_s1 + $0xa28] ss:$16 sps:$4 sm:$0xff]  }
 0x1fd   :  { %5060 = vmatprep.subr.bf16.mxu1 %v14668_v39  ;;  %v14719_v39 = vld [vmem:[%s21581_s1 + $0xa0c] ss:$16 sps:$4 sm:$0xff]   ;;  %v14714_v47 = vld [vmem:[%s21581_s1 + $0xc48] ss:$16 sps:$4 sm:$0xff]  }
 0x1ff   :  { %5024 = vmatpush2.bf16.msra.mxu0 %v14669_v51  ;;  %v14722_v51 = vld [vmem:[%s21581_s1 + $0xc2c] ss:$16 sps:$4 sm:$0xff]  }
 0x200   :  { %5061 = vmatpush2.bf16.msra.mxu1 %v14666_v20  ;;  %5075 = vmatprep.subr.bf16.mxu0 %v14677_v29  ;;  %v14717_v20 = vld [vmem:[%s21581_s1 + $0xa08] ss:$16 sps:$4 sm:$0xff]  }
 0x201   :  { %5062 = vmatprep.subr.bf16.mxu1 %v14674_v52  ;;  %v14725_v52 = vld [vmem:[%s21581_s1 + $0xbec] ss:$16 sps:$4 sm:$0xff]   ;;  %v14720_v29 = vld [vmem:[%s21581_s1 + $0xc28] ss:$16 sps:$4 sm:$0xff]  }
 0x202   :  { %v4740_v49 = vpop.f32.mrf.mxu0  ;;  %5026 = vmatmul.mubr.bf16.vlgmr.msra.gmra.mxu0 %v16828_v21 }
 0x203   :  { %v4781_v37 = vpop.f32.mrf.mxu1  ;;  %v4741_v60 = vadd.f32 %v4740_v49, %v17939_v26  ;;  %5076 = vmatpush1.bf16.msra.mxu0 %v14675_v54  ;;  %v14687_v26 = vld [vmem:[%s21581_s1 + $0xaa8] ss:$16 sps:$4 sm:$0xff]   ;;  %5107 = vmatprep.mubr.bf16.mxu0 %v16861_v32  ;;  %v14728_v54 = vld [vmem:[%s21581_s1 + $0xc0c] ss:$16 sps:$4 sm:$0xff]  }
 0x204   :  { %5063 = vmatpush2.bf16.msra.mxu1 %v14672_v53  ;;  %v4742_v61 = vpop.f32.mrf.mxu0  ;;  %5077 = vmatprep.subr.bf16.mxu0 %v14683_v8  ;;  %v14690_v32 = vld [vmem:[%s21581_s1 + $0xcc8] ss:$16 sps:$4 sm:$0xff]   ;;  %v14737_v49 = vld [vmem:[%s21581_s1 + $0xbac] ss:$16 sps:$4 sm:$0xff]  }
 0x205   :  { %v4783_v62 = vpop.f32.mrf.mxu1  ;;  %5064 = vmatprep.subr.bf16.mxu1 %v14680_v55  ;;  %v18141_v1 = vadd.f32 %v4781_v37, %v4741_v60  ;;  %v4743_v21 = vadd.f32 %v4742_v61, %v17952_v38  ;;  %v14723_v53 = vld [vmem:[%s21581_s1 + $0xbe8] ss:$16 sps:$4 sm:$0xff]   ;;  %v14731_v55 = vld [vmem:[%s21581_s1 + $0xbcc] ss:$16 sps:$4 sm:$0xff]  }
 0x206   :  { %v4744_v11 = vpop.f32.mrf.mxu0  ;;  %v14726_v8 = vld [vmem:[%s21581_s1 + $0xc08] ss:$16 sps:$4 sm:$0xff]   ;;  %v14740_v60 = vld [vmem:[%s21581_s1 + $0xdcc] ss:$16 sps:$4 sm:$0xff]  }
 0x207   :  { %v4785_v3 = vpop.f32.mrf.mxu1  ;;  %v18154_v14 = vadd.f32 %v4783_v62, %v4743_v21  ;;  %5078 = vmatpush1.bf16.msra.mxu0 %v14681_v58  ;;  %v14734_v58 = vld [vmem:[%s21581_s1 + $0xdec] ss:$16 sps:$4 sm:$0xff]   ;;  %v14732_v37 = vld [vmem:[%s21581_s1 + $0xde8] ss:$16 sps:$4 sm:$0xff]  }
 0x208   :  { %5065 = vmatpush2.bf16.msra.mxu1 %v14678_v56  ;;  %5079 = vmatprep.subr.bf16.mxu0 %v14689_v0  ;;  %v4745_v19 = vpop.f32.mrf.mxu0  ;;  %v14729_v56 = vld [vmem:[%s21581_s1 + $0xbc8] ss:$16 sps:$4 sm:$0xff]   ;;  %v14743_v61 = vld [vmem:[%s21581_s1 + $0xb8c] ss:$16 sps:$4 sm:$0xff]  }
 0x209   :  { %v4786_v38 = vpop.f32.mrf.mxu1  ;;  %5116 = vmatprep.subr.bf16.mxu1 %v14686_v59  ;;  %v14735_v59 = vld [vmem:[%s21581_s1 + $0xba8] ss:$16 sps:$4 sm:$0xff]   ;;  %v14746_v21 = vld [vmem:[%s21581_s1 + $0xdac] ss:$16 sps:$4 sm:$0xff]  }
 0x20a   :  { %v14738_v62 = vld [vmem:[%s21581_s1 + $0xdc8] ss:$16 sps:$4 sm:$0xff]   ;;  %v14752_v11 = vld [vmem:[%s21581_s1 + $0xd8c] ss:$16 sps:$4 sm:$0xff]  }
 0x20b   :  { %5067 = vmatmul.mubr.bf16.vlgmr.msra.gmra.mxu1 %v17048_v42  ;;  %v18166_v23 = vpop.f32.mrf.mxu1  ;;  %5080 = vmatpush1.bf16.msra.mxu0 %v14687_v26  ;;  %v14696_v42 = vld [vmem:[%s21581_s1 + $0xca8] ss:$16 sps:$4 sm:$0xff]   ;;  %v14758_v19 = vld [vmem:[%s21581_s1 + $0xd6c] ss:$16 sps:$4 sm:$0xff]  }
 0x20c   :  { %5117 = vmatpush1.bf16.msra.mxu1 %v14684_v2  ;;  %5081 = vmatprep.subr.bf16.mxu0 %v14695_v15  ;;  %v14741_v0 = vld [vmem:[%s21581_s1 + $0xb88] ss:$16 sps:$4 sm:$0xff]   ;;  %v14749_v2 = vld [vmem:[%s21581_s1 + $0xb6c] ss:$16 sps:$4 sm:$0xff]  }
 0x20d   :  { %v18171_v25 = vpop.f32.mrf.mxu1  ;;  %5118 = vmatprep.subr.bf16.mxu1 %v14692_v12  ;;  %5148 = vmatprep.mubr.bf16.mxu1 %v17064_v48  ;;  %v14702_v48 = vld [vmem:[%s21581_s1 + $0xc88] ss:$16 sps:$4 sm:$0xff]   ;;  %v14755_v12 = vld [vmem:[%s21581_s1 + $0xb4c] ss:$16 sps:$4 sm:$0xff]  }
 0x20e   :  { %v14744_v26 = vld [vmem:[%s21581_s1 + $0xda8] ss:$16 sps:$4 sm:$0xff]  }
 0x20f   :  { %v4867_v28 = vpop.f32.mrf.mxu1  ;;  %5082 = vmatpush1.bf16.msra.mxu0 %v14693_v22  ;;  %v14747_v3 = vld [vmem:[%s21581_s1 + $0xb68] ss:$16 sps:$4 sm:$0xff]  }
 0x210   :  { %5119 = vmatpush1.bf16.msra.mxu1 %v14690_v32  ;;  %5083 = vmatprep.subr.bf16.mxu0 %v14701_v9  ;;  %v14750_v38 = vld [vmem:[%s21581_s1 + $0xd88] ss:$16 sps:$4 sm:$0xff]   ;;  %v14761_v32 = vld [vmem:[%s21581_s1 + $0xb2c] ss:$16 sps:$4 sm:$0xff]  }
 0x211   :  { %v4868_v33 = vpop.f32.mrf.mxu1  ;;  %5120 = vmatprep.subr.bf16.mxu1 %v14698_v24  ;;  %v14753_v15 = vld [vmem:[%s21581_s1 + $0xb48] ss:$16 sps:$4 sm:$0xff]   ;;  %v14764_v9 = vld [vmem:[%s21581_s1 + $0xd4c] ss:$16 sps:$4 sm:$0xff]  }
 0x212   :  { %v14756_v22 = vld [vmem:[%s21581_s1 + $0xd68] ss:$16 sps:$4 sm:$0xff]   ;;  %v14770_v33 = vld [vmem:[%s21581_s1 + $0xd2c] ss:$16 sps:$4 sm:$0xff]  }
 0x213   :  { %5084 = vmatpush1.bf16.msra.mxu0 %v14699_v34  ;;  %v14759_v24 = vld [vmem:[%s21581_s1 + $0xb28] ss:$16 sps:$4 sm:$0xff]  }
 0x214   :  { %5121 = vmatpush1.bf16.msra.mxu1 %v14696_v42  ;;  %5085 = vmatprep.subr.bf16.mxu0 %v14707_v35  ;;  %v14767_v42 = vld [vmem:[%s21581_s1 + $0xb0c] ss:$16 sps:$4 sm:$0xff]   ;;  %v14762_v28 = vld [vmem:[%s21581_s1 + $0xd48] ss:$16 sps:$4 sm:$0xff]  }
 0x215   :  { %5122 = vmatprep.subr.bf16.mxu1 %v14704_v31  ;;  %v14765_v34 = vld [vmem:[%s21581_s1 + $0xb08] ss:$16 sps:$4 sm:$0xff]   ;;  %v14773_v31 = vld [vmem:[%s21581_s1 + $0xeec] ss:$16 sps:$4 sm:$0xff]  }
 0x216   :  { %v14768_v35 = vld [vmem:[%s21581_s1 + $0xd28] ss:$16 sps:$4 sm:$0xff]  }
 0x217   :  { %5086 = vmatpush1.bf16.msra.mxu0 %v14705_v46  ;;  %v14776_v46 = vld [vmem:[%s21581_s1 + $0xd0c] ss:$16 sps:$4 sm:$0xff]  }
 0x218   :  { %5123 = vmatpush1.bf16.msra.mxu1 %v14702_v48  ;;  %5087 = vmatprep.subr.bf16.mxu0 %v14713_v41  ;;  %v14771_v48 = vld [vmem:[%s21581_s1 + $0xee8] ss:$16 sps:$4 sm:$0xff]  }
 0x219   :  { %5124 = vmatprep.subr.bf16.mxu1 %v14710_v30  ;;  %v14779_v30 = vld [vmem:[%s21581_s1 + $0xecc] ss:$16 sps:$4 sm:$0xff]   ;;  %v14774_v41 = vld [vmem:[%s21581_s1 + $0xd08] ss:$16 sps:$4 sm:$0xff]  }
 0x21b   :  { %5088 = vmatpush1.bf16.msra.mxu0 %v14711_v44 }
 0x21c   :  { %5125 = vmatpush1.bf16.msra.mxu1 %v14708_v40  ;;  %5089 = vmatprep.subr.bf16.mxu0 %v14719_v39  ;;  %v14777_v40 = vld [vmem:[%s21581_s1 + $0xec8] ss:$16 sps:$4 sm:$0xff]  }
 0x21d   :  { %5126 = vmatprep.subr.bf16.mxu1 %v14716_v45  ;;  %v14782_v45 = vld [vmem:[%s21581_s1 + $0x10ec] ss:$16 sps:$4 sm:$0xff]  }
 0x21f   :  { %5090 = vmatpush1.bf16.msra.mxu0 %v14717_v20  ;;  %v14785_v20 = vld [vmem:[%s21581_s1 + $0xeac] ss:$16 sps:$4 sm:$0xff]  }
 0x220   :  { %5127 = vmatpush1.bf16.msra.mxu1 %v14714_v47  ;;  %5091 = vmatprep.subr.bf16.mxu0 %v14725_v52  ;;  %v14780_v52 = vld [vmem:[%s21581_s1 + $0x10e8] ss:$16 sps:$4 sm:$0xff]  }
 0x221   :  { %5128 = vmatprep.subr.bf16.mxu1 %v14722_v51 }
 0x223   :  { %5092 = vmatpush2.bf16.msra.mxu0 %v14723_v53  ;;  %v14788_v53 = vld [vmem:[%s21581_s1 + $0x10cc] ss:$16 sps:$4 sm:$0xff]  }
 0x224   :  { %5129 = vmatpush1.bf16.msra.mxu1 %v14720_v29  ;;  %5093 = vmatprep.subr.bf16.mxu0 %v14731_v55 }
 0x225   :  { %5130 = vmatprep.subr.bf16.mxu1 %v14728_v54 }
 0x227   :  { %5094 = vmatpush2.bf16.msra.mxu0 %v14729_v56  ;;  %v14797_v56 = vld [vmem:[%s21581_s1 + $0xe6c] ss:$16 sps:$4 sm:$0xff]  }
 0x228   :  { %5131 = vmatpush1.bf16.msra.mxu1 %v14726_v8  ;;  %5095 = vmatprep.subr.bf16.mxu0 %v14737_v49  ;;  %v14794_v8 = vld [vmem:[%s21581_s1 + $0x10ac] ss:$16 sps:$4 sm:$0xff]   ;;  %v14795_v49 = vld [vmem:[%s21581_s1 + $0xe68] ss:$16 sps:$4 sm:$0xff]  }
 0x229   :  { %5132 = vmatprep.subr.bf16.mxu1 %v14734_v58 }
 0x22b   :  { %5096 = vmatpush2.bf16.msra.mxu0 %v14735_v59  ;;  %v14800_v59 = vld [vmem:[%s21581_s1 + $0x108c] ss:$16 sps:$4 sm:$0xff]  }
 0x22c   :  { %5133 = vmatpush2.bf16.msra.mxu1 %v14732_v37  ;;  %5097 = vmatprep.subr.bf16.mxu0 %v14743_v61 }
 0x22d   :  { %5134 = vmatprep.subr.bf16.mxu1 %v14740_v60  ;;  %v14803_v60 = vld [vmem:[%s21581_s1 + $0xe4c] ss:$16 sps:$4 sm:$0xff]  }
 0x22f   :  { %5098 = vmatpush2.bf16.msra.mxu0 %v14741_v0  ;;  %v14806_v0 = vld [vmem:[%s21581_s1 + $0x106c] ss:$16 sps:$4 sm:$0xff]  }
 0x230   :  { %5135 = vmatpush2.bf16.msra.mxu1 %v14738_v62  ;;  %5099 = vmatprep.subr.bf16.mxu0 %v14749_v2  ;;  %v14798_v62 = vld [vmem:[%s21581_s1 + $0x1088] ss:$16 sps:$4 sm:$0xff]  }
 0x231   :  { %5136 = vmatprep.subr.bf16.mxu1 %v14746_v21  ;;  %v14809_v21 = vld [vmem:[%s21581_s1 + $0xe2c] ss:$16 sps:$4 sm:$0xff]   ;;  %v14804_v2 = vld [vmem:[%s21581_s1 + $0x1068] ss:$16 sps:$4 sm:$0xff]  }
 0x233   :  { %5100 = vmatpush2.bf16.msra.mxu0 %v14747_v3  ;;  %v14812_v3 = vld [vmem:[%s21581_s1 + $0x104c] ss:$16 sps:$4 sm:$0xff]  }
 0x234   :  { %5137 = vmatpush2.bf16.msra.mxu1 %v14744_v26  ;;  %5101 = vmatprep.subr.bf16.mxu0 %v14755_v12  ;;  %v14807_v26 = vld [vmem:[%s21581_s1 + $0xe28] ss:$16 sps:$4 sm:$0xff]  }
 0x235   :  { %5138 = vmatprep.subr.bf16.mxu1 %v14752_v11  ;;  %v14815_v11 = vld [vmem:[%s21581_s1 + $0xe0c] ss:$16 sps:$4 sm:$0xff]   ;;  %v14810_v12 = vld [vmem:[%s21581_s1 + $0x1048] ss:$16 sps:$4 sm:$0xff]  }
 0x237   :  { %5102 = vmatpush2.bf16.msra.mxu0 %v14753_v15  ;;  %v14818_v15 = vld [vmem:[%s21581_s1 + $0x102c] ss:$16 sps:$4 sm:$0xff]  }
 0x238   :  { %5139 = vmatpush2.bf16.msra.mxu1 %v14750_v38  ;;  %5103 = vmatprep.subr.bf16.mxu0 %v14761_v32  ;;  %v14813_v38 = vld [vmem:[%s21581_s1 + $0xe08] ss:$16 sps:$4 sm:$0xff]  }
 0x239   :  { %5140 = vmatprep.subr.bf16.mxu1 %v14758_v19  ;;  %v14821_v19 = vld [vmem:[%s21581_s1 + $0xfec] ss:$16 sps:$4 sm:$0xff]   ;;  %v14816_v32 = vld [vmem:[%s21581_s1 + $0x1028] ss:$16 sps:$4 sm:$0xff]  }
 0x23b   :  { %5104 = vmatpush2.bf16.msra.mxu0 %v14759_v24  ;;  %v14824_v24 = vld [vmem:[%s21581_s1 + $0x100c] ss:$16 sps:$4 sm:$0xff]  }
 0x23c   :  { %5141 = vmatpush2.bf16.msra.mxu1 %v14756_v22  ;;  %5105 = vmatprep.subr.bf16.mxu0 %v14767_v42  ;;  %v14819_v22 = vld [vmem:[%s21581_s1 + $0xfe8] ss:$16 sps:$4 sm:$0xff]  }
 0x23d   :  { %5142 = vmatprep.subr.bf16.mxu1 %v14764_v9  ;;  %v14827_v9 = vld [vmem:[%s21581_s1 + $0xfcc] ss:$16 sps:$4 sm:$0xff]   ;;  %v14822_v42 = vld [vmem:[%s21581_s1 + $0x1008] ss:$16 sps:$4 sm:$0xff]  }
 0x23f   :  { %5106 = vmatpush2.bf16.msra.mxu0 %v14765_v34  ;;  %v14830_v34 = vld [vmem:[%s21581_s1 + $0x11ec] ss:$16 sps:$4 sm:$0xff]  }
 0x240   :  { %5143 = vmatpush2.bf16.msra.mxu1 %v14762_v28  ;;  %5157 = vmatprep.subr.bf16.mxu0 %v14773_v31  ;;  %v14825_v28 = vld [vmem:[%s21581_s1 + $0xfc8] ss:$16 sps:$4 sm:$0xff]  }
 0x241   :  { %5144 = vmatprep.subr.bf16.mxu1 %v14770_v33  ;;  %v14833_v33 = vld [vmem:[%s21581_s1 + $0xfac] ss:$16 sps:$4 sm:$0xff]   ;;  %v14828_v31 = vld [vmem:[%s21581_s1 + $0x11e8] ss:$16 sps:$4 sm:$0xff]  }
 0x242   :  { %v4822_v44 = vpop.f32.mrf.mxu0  ;;  %5108 = vmatmul.mubr.bf16.vlgmr.msra.gmra.mxu0 %v17050_v43 }
 0x243   :  { %v4823_v39 = vadd.f32 %v4822_v44, %v18141_v1  ;;  %5158 = vmatpush1.bf16.msra.mxu0 %v14771_v48  ;;  %v14783_v1 = vld [vmem:[%s21581_s1 + $0xea8] ss:$16 sps:$4 sm:$0xff]   ;;  %5189 = vmatprep.mubr.bf16.mxu0 %v17066_v50  ;;  %v14836_v48 = vld [vmem:[%s21581_s1 + $0x11cc] ss:$16 sps:$4 sm:$0xff]  }
 0x244   :  { %5145 = vmatpush2.bf16.msra.mxu1 %v14768_v35  ;;  %v4824_v47 = vpop.f32.mrf.mxu0  ;;  %5159 = vmatprep.subr.bf16.mxu0 %v14779_v30  ;;  %v14786_v50 = vld [vmem:[%s21581_s1 + $0x10c8] ss:$16 sps:$4 sm:$0xff]   ;;  %v14845_v44 = vld [vmem:[%s21581_s1 + $0xf6c] ss:$16 sps:$4 sm:$0xff]  }
 0x245   :  { %5146 = vmatprep.subr.bf16.mxu1 %v14776_v46  ;;  %v18348_v51 = vadd.f32 %v18166_v23, %v4823_v39  ;;  %v4825_v43 = vadd.f32 %v4824_v47, %v18154_v14  ;;  %v14791_v23 = vld [vmem:[%s21581_s1 + $0xe8c] ss:$16 sps:$4 sm:$0xff]   ;;  %v14831_v35 = vld [vmem:[%s21581_s1 + $0xfa8] ss:$16 sps:$4 sm:$0xff]  }
 0x246   :  { %v4826_v29 = vpop.f32.mrf.mxu0  ;;  %v14839_v46 = vld [vmem:[%s21581_s1 + $0xf8c] ss:$16 sps:$4 sm:$0xff]   ;;  %v14834_v30 = vld [vmem:[%s21581_s1 + $0x11c8] ss:$16 sps:$4 sm:$0xff]  }
 0x247   :  { %v18365_v14 = vadd.f32 %v18171_v25, %v4825_v43  ;;  %5160 = vmatpush1.bf16.msra.mxu0 %v14777_v40  ;;  %v14789_v25 = vld [vmem:[%s21581_s1 + $0xe88] ss:$16 sps:$4 sm:$0xff]   ;;  %v14842_v40 = vld [vmem:[%s21581_s1 + $0x11ac] ss:$16 sps:$4 sm:$0xff]  }
 0x248   :  { %5147 = vmatpush2.bf16.msra.mxu1 %v14774_v41  ;;  %5161 = vmatprep.subr.bf16.mxu0 %v14785_v20  ;;  %v4827_v54 = vpop.f32.mrf.mxu0  ;;  %v14837_v41 = vld [vmem:[%s21581_s1 + $0xf88] ss:$16 sps:$4 sm:$0xff]   ;;  %v14848_v47 = vld [vmem:[%s21581_s1 + $0x118c] ss:$16 sps:$4 sm:$0xff]  }
 0x249   :  { %5198 = vmatprep.subr.bf16.mxu1 %v14782_v45  ;;  %v14840_v45 = vld [vmem:[%s21581_s1 + $0x11a8] ss:$16 sps:$4 sm:$0xff]   ;;  %v14851_v20 = vld [vmem:[%s21581_s1 + $0xf4c] ss:$16 sps:$4 sm:$0xff]  }
 0x24a   :  { %v14843_v39 = vld [vmem:[%s21581_s1 + $0xf68] ss:$16 sps:$4 sm:$0xff]   ;;  %v14857_v29 = vld [vmem:[%s21581_s1 + $0xf2c] ss:$16 sps:$4 sm:$0xff]  }
 0x24b   :  { %v18367_v55 = vpop.f32.mrf.mxu1  ;;  %5149 = vmatmul.mubr.bf16.vlgmr.msra.gmra.mxu1 %v17272_v6  ;;  %5162 = vmatpush1.bf16.msra.mxu0 %v14783_v1  ;;  %v14792_v6 = vld [vmem:[%s21581_s1 + $0x10a8] ss:$16 sps:$4 sm:$0xff]   ;;  %v14854_v1 = vld [vmem:[%s21581_s1 + $0x116c] ss:$16 sps:$4 sm:$0xff]  }
 0x24c   :  { %5199 = vmatpush1.bf16.msra.mxu1 %v14780_v52  ;;  %5163 = vmatprep.subr.bf16.mxu0 %v14791_v23  ;;  %v14846_v43 = vld [vmem:[%s21581_s1 + $0x1188] ss:$16 sps:$4 sm:$0xff]   ;;  %v14860_v54 = vld [vmem:[%s21581_s1 + $0x114c] ss:$16 sps:$4 sm:$0xff]  }
 0x24d   :  { %v18382_v58 = vpop.f32.mrf.mxu1  ;;  %5200 = vmatprep.subr.bf16.mxu1 %v14788_v53  ;;  %5230 = vmatprep.mubr.bf16.mxu1 %v17293_v17  ;;  %v14801_v17 = vld [vmem:[%s21581_s1 + $0xe48] ss:$16 sps:$4 sm:$0xff]  }
 0x24e   :  { %v14849_v52 = vld [vmem:[%s21581_s1 + $0xf48] ss:$16 sps:$4 sm:$0xff]  }
 0x24f   :  { %v4908_v37 = vpop.f32.mrf.mxu1  ;;  %5164 = vmatpush1.bf16.msra.mxu0 %v14789_v25  ;;  %v14852_v53 = vld [vmem:[%s21581_s1 + $0x1168] ss:$16 sps:$4 sm:$0xff]   ;;  %v18518_v25 = vsub.s32 2, %v17234_v57 }
 0x250   :  { %5201 = vmatpush1.bf16.msra.mxu1 %v14786_v50  ;;  %5165 = vmatprep.subr.bf16.mxu0 %v14797_v56  ;;  %v14855_v23 = vld [vmem:[%s21581_s1 + $0xf28] ss:$16 sps:$4 sm:$0xff]   ;;  %v14863_v50 = vld [vmem:[%s21581_s1 + $0xf0c] ss:$16 sps:$4 sm:$0xff]  }
 0x251   :  { %v4909_v61 = vpop.f32.mrf.mxu1  ;;  %5202 = vmatprep.subr.bf16.mxu1 %v14794_v8  ;;  %v14858_v8 = vld [vmem:[%s21581_s1 + $0x1148] ss:$16 sps:$4 sm:$0xff]   ;;  %v14869_v37 = vld [vmem:[%s21581_s1 + $0x12ec] ss:$16 sps:$4 sm:$0xff]  }
 0x252   :  { %v14861_v56 = vld [vmem:[%s21581_s1 + $0xf08] ss:$16 sps:$4 sm:$0xff]  }
 0x253   :  { %5166 = vmatpush1.bf16.msra.mxu0 %v14795_v49  ;;  %v14866_v49 = vld [vmem:[%s21581_s1 + $0x112c] ss:$16 sps:$4 sm:$0xff]   ;;  %v14864_v61 = vld [vmem:[%s21581_s1 + $0x1128] ss:$16 sps:$4 sm:$0xff]  }
 0x254   :  { %5203 = vmatpush1.bf16.msra.mxu1 %v14792_v6  ;;  %5167 = vmatprep.subr.bf16.mxu0 %v14803_v60  ;;  %v18527_v6 = vsub.s32 3, %v17234_v57 }
 0x255   :  { %5204 = vmatprep.subr.bf16.mxu1 %v14800_v59  ;;  %v16271_v59 = vld [vmem:[%s21582_s2] sm:$0xf] }
 0x256   :  { %v816_v60 = vrot.slane %v16271_v59, %v18518_v25 }
 0x257   :  { %5168 = vmatpush1.bf16.msra.mxu0 %v14801_v17  ;;  %v14872_v17 = vld [vmem:[%s21581_s1 + $0x110c] ss:$16 sps:$4 sm:$0xff]  }
 0x258   :  { %5205 = vmatpush1.bf16.msra.mxu1 %v14798_v62  ;;  %5169 = vmatprep.subr.bf16.mxu0 %v14809_v21  ;;  %v14867_v62 = vld [vmem:[%s21581_s1 + $0x12e8] ss:$16 sps:$4 sm:$0xff]   ;;  %v820_v21 = vrot.slane %v16271_v59, %v18527_v6 }
 0x259   :  { %5206 = vmatprep.subr.bf16.mxu1 %v14806_v0  ;;  %v14875_v0 = vld [vmem:[%s21581_s1 + $0x12cc] ss:$16 sps:$4 sm:$0xff]   ;;  %v14918_v59 = vld [vmem:[%s21581_s1 + $0x1408] ss:$16 sps:$4 sm:$0xff]  }
 0x25b   :  { %5170 = vmatpush1.bf16.msra.mxu0 %v14807_v26  ;;  %v14870_v26 = vld [vmem:[%s21581_s1 + $0x1108] ss:$16 sps:$4 sm:$0xff]  }
 0x25c   :  { %5207 = vmatpush1.bf16.msra.mxu1 %v14804_v2  ;;  %5171 = vmatprep.subr.bf16.mxu0 %v14815_v11  ;;  %v4905_v2 = vadd.f32 %v18367_v55, %v816_v60  ;;  %v4907_v55 = vadd.f32 %v18382_v58, %v820_v21  ;;  %v14884_v58 = vld [vmem:[%s21581_s1 + $0x14cc] ss:$16 sps:$4 sm:$0xff]   ;;  %v14921_v60 = vld [vmem:[%s21581_s1 + $0x13c8] ss:$16 sps:$4 sm:$0xff]  }
 0x25d   :  { %5208 = vmatprep.subr.bf16.mxu1 %v14812_v3  ;;  %v14873_v3 = vld [vmem:[%s21581_s1 + $0x12c8] ss:$16 sps:$4 sm:$0xff]   ;;  %v14932_v21 = vld [vmem:[%s21581_s1 + $0x15cc] ss:$16 sps:$4 sm:$0xff]  }
 0x25f   :  { %5172 = vmatpush1.bf16.msra.mxu0 %v14813_v38  ;;  %v14881_v38 = vld [vmem:[%s21581_s1 + $0x12ac] ss:$16 sps:$4 sm:$0xff]  }
 0x260   :  { %5209 = vmatpush1.bf16.msra.mxu1 %v14810_v12  ;;  %5173 = vmatprep.subr.bf16.mxu0 %v14821_v19  ;;  %v14878_v12 = vld [vmem:[%s21581_s1 + $0x14ec] ss:$16 sps:$4 sm:$0xff]  }
 0x261   :  { %5210 = vmatprep.subr.bf16.mxu1 %v14818_v15 }
 0x263   :  { %5174 = vmatpush2.bf16.msra.mxu0 %v14819_v22  ;;  %v14879_v22 = vld [vmem:[%s21581_s1 + $0x12a8] ss:$16 sps:$4 sm:$0xff]  }
 0x264   :  { %5211 = vmatpush1.bf16.msra.mxu1 %v14816_v32  ;;  %5175 = vmatprep.subr.bf16.mxu0 %v14827_v9  ;;  %v14887_v9 = vld [vmem:[%s21581_s1 + $0x128c] ss:$16 sps:$4 sm:$0xff]  }
 0x265   :  { %5212 = vmatprep.subr.bf16.mxu1 %v14824_v24 }
 0x267   :  { %5176 = vmatpush2.bf16.msra.mxu0 %v14825_v28  ;;  %v14882_v28 = vld [vmem:[%s21581_s1 + $0x14c8] ss:$16 sps:$4 sm:$0xff]  }
 0x268   :  { %5213 = vmatpush1.bf16.msra.mxu1 %v14822_v42  ;;  %5177 = vmatprep.subr.bf16.mxu0 %v14833_v33  ;;  %v14890_v33 = vld [vmem:[%s21581_s1 + $0x14ac] ss:$16 sps:$4 sm:$0xff]  }
 0x269   :  { %5214 = vmatprep.subr.bf16.mxu1 %v14830_v34 }
 0x26b   :  { %5178 = vmatpush2.bf16.msra.mxu0 %v14831_v35 }
 0x26c   :  { %5215 = vmatpush2.bf16.msra.mxu1 %v14828_v31  ;;  %5179 = vmatprep.subr.bf16.mxu0 %v14839_v46  ;;  %v14893_v31 = vld [vmem:[%s21581_s1 + $0x126c] ss:$16 sps:$4 sm:$0xff]  }
 0x26d   :  { %5216 = vmatprep.subr.bf16.mxu1 %v14836_v48 }
 0x26f   :  { %5180 = vmatpush2.bf16.msra.mxu0 %v14837_v41 }
 0x270   :  { %5217 = vmatpush2.bf16.msra.mxu1 %v14834_v30  ;;  %5181 = vmatprep.subr.bf16.mxu0 %v14845_v44  ;;  %v14891_v30 = vld [vmem:[%s21581_s1 + $0x1268] ss:$16 sps:$4 sm:$0xff]   ;;  %v14899_v44 = vld [vmem:[%s21581_s1 + $0x124c] ss:$16 sps:$4 sm:$0xff]  }
 0x271   :  { %5218 = vmatprep.subr.bf16.mxu1 %v14842_v40  ;;  %v14896_v40 = vld [vmem:[%s21581_s1 + $0x148c] ss:$16 sps:$4 sm:$0xff]  }
 0x273   :  { %5182 = vmatpush2.bf16.msra.mxu0 %v14843_v39  ;;  %v14894_v39 = vld [vmem:[%s21581_s1 + $0x1488] ss:$16 sps:$4 sm:$0xff]  }
 0x274   :  { %5219 = vmatpush2.bf16.msra.mxu1 %v14840_v45  ;;  %5183 = vmatprep.subr.bf16.mxu0 %v14851_v20  ;;  %v14905_v20 = vld [vmem:[%s21581_s1 + $0x122c] ss:$16 sps:$4 sm:$0xff]  }
 0x275   :  { %5220 = vmatprep.subr.bf16.mxu1 %v14848_v47  ;;  %v14902_v47 = vld [vmem:[%s21581_s1 + $0x146c] ss:$16 sps:$4 sm:$0xff]  }
 0x277   :  { %5184 = vmatpush2.bf16.msra.mxu0 %v14849_v52  ;;  %v14903_v52 = vld [vmem:[%s21581_s1 + $0x1228] ss:$16 sps:$4 sm:$0xff]  }
 0x278   :  { %5221 = vmatpush2.bf16.msra.mxu1 %v14846_v43  ;;  %5185 = vmatprep.subr.bf16.mxu0 %v14857_v29  ;;  %v14900_v43 = vld [vmem:[%s21581_s1 + $0x1468] ss:$16 sps:$4 sm:$0xff]   ;;  %v14911_v29 = vld [vmem:[%s21581_s1 + $0x120c] ss:$16 sps:$4 sm:$0xff]  }
 0x279   :  { %5222 = vmatprep.subr.bf16.mxu1 %v14854_v1  ;;  %v14908_v1 = vld [vmem:[%s21581_s1 + $0x144c] ss:$16 sps:$4 sm:$0xff]  }
 0x27b   :  { %5186 = vmatpush2.bf16.msra.mxu0 %v14855_v23  ;;  %v14909_v23 = vld [vmem:[%s21581_s1 + $0x1208] ss:$16 sps:$4 sm:$0xff]  }
 0x27c   :  { %5223 = vmatpush2.bf16.msra.mxu1 %v14852_v53  ;;  %5187 = vmatprep.subr.bf16.mxu0 %v14863_v50  ;;  %v14906_v53 = vld [vmem:[%s21581_s1 + $0x1448] ss:$16 sps:$4 sm:$0xff]   ;;  %v14917_v50 = vld [vmem:[%s21581_s1 + $0x13ec] ss:$16 sps:$4 sm:$0xff]  }
 0x27d   :  { %5224 = vmatprep.subr.bf16.mxu1 %v14860_v54  ;;  %v14914_v54 = vld [vmem:[%s21581_s1 + $0x142c] ss:$16 sps:$4 sm:$0xff]  }
 0x27f   :  { %5188 = vmatpush2.bf16.msra.mxu0 %v14861_v56  ;;  %v14915_v56 = vld [vmem:[%s21581_s1 + $0x13e8] ss:$16 sps:$4 sm:$0xff]  }
 0x280   :  { %5225 = vmatpush2.bf16.msra.mxu1 %v14858_v8  ;;  %5239 = vmatprep.subr.bf16.mxu0 %v14869_v37  ;;  %v14912_v8 = vld [vmem:[%s21581_s1 + $0x1428] ss:$16 sps:$4 sm:$0xff]   ;;  %v14923_v37 = vld [vmem:[%s21581_s1 + $0x13cc] ss:$16 sps:$4 sm:$0xff]  }
 0x281   :  { %5226 = vmatprep.subr.bf16.mxu1 %v14866_v49  ;;  %v14920_v49 = vld [vmem:[%s21581_s1 + $0x140c] ss:$16 sps:$4 sm:$0xff]  }
 0x282   :  { %v4945_v11 = vpop.f32.mrf.mxu0  ;;  %5190 = vmatmul.mubr.bf16.vlgmr.msra.gmra.mxu0 %v17274_v7  ;;  %v14876_v7 = vld [vmem:[%s21581_s1 + $0x14e8] ss:$16 sps:$4 sm:$0xff]  }
 0x283   :  { %v4946_v15 = vadd.f32 %v4945_v11, %v4905_v2  ;;  %5240 = vmatpush1.bf16.msra.mxu0 %v14867_v62  ;;  %5271 = vmatprep.mubr.bf16.mxu0 %v17295_v18  ;;  %v14885_v18 = vld [vmem:[%s21581_s1 + $0x1288] ss:$16 sps:$4 sm:$0xff]   ;;  %v14929_v62 = vld [vmem:[%s21581_s1 + $0x13ac] ss:$16 sps:$4 sm:$0xff]  }
 0x284   :  { %5227 = vmatpush2.bf16.msra.mxu1 %v14864_v61  ;;  %v4947_v19 = vpop.f32.mrf.mxu0  ;;  %5241 = vmatprep.subr.bf16.mxu0 %v14875_v0  ;;  %v14926_v61 = vld [vmem:[%s21581_s1 + $0x15ec] ss:$16 sps:$4 sm:$0xff]   ;;  %v14927_v0 = vld [vmem:[%s21581_s1 + $0x13a8] ss:$16 sps:$4 sm:$0xff]  }
 0x285   :  { %5228 = vmatprep.subr.bf16.mxu1 %v14872_v17  ;;  %v4948_v32 = vadd.f32 %v4947_v19, %v4907_v55  ;;  %v14924_v17 = vld [vmem:[%s21581_s1 + $0x15e8] ss:$16 sps:$4 sm:$0xff]   ;;  %v14935_v2 = vld [vmem:[%s21581_s1 + $0x138c] ss:$16 sps:$4 sm:$0xff]  }
 0x286   :  { %v4949_v24 = vpop.f32.mrf.mxu0  ;;  %v14938_v11 = vld [vmem:[%s21581_s1 + $0x15ac] ss:$16 sps:$4 sm:$0xff]   ;;  %v14939_v55 = vld [vmem:[%s21581_s1 + $0x1368] ss:$16 sps:$4 sm:$0xff]  }
 0x287   :  { %5242 = vmatpush1.bf16.msra.mxu0 %v14873_v3  ;;  %v14933_v3 = vld [vmem:[%s21581_s1 + $0x1388] ss:$16 sps:$4 sm:$0xff]   ;;  %v14947_v19 = vld [vmem:[%s21581_s1 + $0x134c] ss:$16 sps:$4 sm:$0xff]  }
 0x288   :  { %5229 = vmatpush2.bf16.msra.mxu1 %v14870_v26  ;;  %5243 = vmatprep.subr.bf16.mxu0 %v14881_v38  ;;  %v4950_v42 = vpop.f32.mrf.mxu0  ;;  %v14930_v26 = vld [vmem:[%s21581_s1 + $0x15c8] ss:$16 sps:$4 sm:$0xff]   ;;  %v14953_v24 = vld [vmem:[%s21581_s1 + $0x132c] ss:$16 sps:$4 sm:$0xff]  }
 0x289   :  { %5280 = vmatprep.subr.bf16.mxu1 %v14878_v12  ;;  %v14941_v12 = vld [vmem:[%s21581_s1 + $0x136c] ss:$16 sps:$4 sm:$0xff]   ;;  %v14936_v38 = vld [vmem:[%s21581_s1 + $0x15a8] ss:$16 sps:$4 sm:$0xff]  }
 0x28a   :  { %v14956_v42 = vld [vmem:[%s21581_s1 + $0x154c] ss:$16 sps:$4 sm:$0xff]  }
 0x28b   :  { %v4986_v34 = vpop.f32.mrf.mxu1  ;;  %5231 = vmatmul.mubr.bf16.vlgmr.msra.gmra.mxu1 %v17497_v5  ;;  %5244 = vmatpush1.bf16.msra.mxu0 %v14879_v22  ;;  %v14888_v5 = vld [vmem:[%s21581_s1 + $0x14a8] ss:$16 sps:$4 sm:$0xff]   ;;  %v14950_v22 = vld [vmem:[%s21581_s1 + $0x156c] ss:$16 sps:$4 sm:$0xff]  }
 0x28c   :  { %v18593_v35 = vadd.f32 %v4986_v34, %v4946_v15  ;;  %5281 = vmatpush1.bf16.msra.mxu1 %v14876_v7  ;;  %5245 = vmatprep.subr.bf16.mxu0 %v14887_v9  ;;  %v14944_v15 = vld [vmem:[%s21581_s1 + $0x158c] ss:$16 sps:$4 sm:$0xff]   ;;  %v14945_v7 = vld [vmem:[%s21581_s1 + $0x1348] ss:$16 sps:$4 sm:$0xff]  }
 0x28d   :  { %v4988_v48 = vpop.f32.mrf.mxu1  ;;  %5282 = vmatprep.subr.bf16.mxu1 %v14884_v58  ;;  %5312 = vmatprep.mubr.bf16.mxu1 %v17515_v16  ;;  %v14897_v16 = vld [vmem:[%s21581_s1 + $0x1248] ss:$16 sps:$4 sm:$0xff]  }
 0x28e   :  { %v18595_v46 = vadd.f32 %v4988_v48, %v4948_v32  ;;  %v14942_v32 = vld [vmem:[%s21581_s1 + $0x1588] ss:$16 sps:$4 sm:$0xff]  }
 0x28f   :  { %v4990_v41 = vpop.f32.mrf.mxu1  ;;  %5246 = vmatpush1.bf16.msra.mxu0 %v14885_v18  ;;  %v14948_v58 = vld [vmem:[%s21581_s1 + $0x1568] ss:$16 sps:$4 sm:$0xff]  }
 0x290   :  { %5283 = vmatpush1.bf16.msra.mxu1 %v14882_v28  ;;  %5247 = vmatprep.subr.bf16.mxu0 %v14893_v31  ;;  %v14951_v9 = vld [vmem:[%s21581_s1 + $0x1328] ss:$16 sps:$4 sm:$0xff]   ;;  %v14959_v28 = vld [vmem:[%s21581_s1 + $0x130c] ss:$16 sps:$4 sm:$0xff]  }
 0x291   :  { %v4991_v45 = vpop.f32.mrf.mxu1  ;;  %5284 = vmatprep.subr.bf16.mxu1 %v14890_v33  ;;  %v14954_v18 = vld [vmem:[%s21581_s1 + $0x1548] ss:$16 sps:$4 sm:$0xff]   ;;  %v14962_v33 = vld [vmem:[%s21581_s1 + $0x152c] ss:$16 sps:$4 sm:$0xff]  }
 0x292   :  { %v14957_v34 = vld [vmem:[%s21581_s1 + $0x1308] ss:$16 sps:$4 sm:$0xff]   ;;  %v14965_v31 = vld [vmem:[%s21583_s3 + $0x74] ss:$8 sps:$4 sm:$0xff]  }
 0x293   :  { %5248 = vmatpush1.bf16.msra.mxu0 %v14891_v30  ;;  %v14960_v48 = vld [vmem:[%s21581_s1 + $0x1528] ss:$16 sps:$4 sm:$0xff]   ;;  %v5363_v30 = vmax.f32 %v18365_v14, 0.0  ;;  %v14968_v41 = vld [vmem:[%s21581_s1 + $0x150c] ss:$16 sps:$4 sm:$0xff]  }
 0x294   :  { %5285 = vmatpush1.bf16.msra.mxu1 %v14888_v5  ;;  %5249 = vmatprep.subr.bf16.mxu0 %v14899_v44  ;;  %v14963_v5 = vld [vmem:[%s21583_s3 + $0x70] ss:$8 sps:$4 sm:$0xff]   ;;  %v14969_v14 = vld [vmem:[%s21583_s3 + $0x60] ss:$8 sps:$4 sm:$0xff]  }
 0x295   :  { %5286 = vmatprep.subr.bf16.mxu1 %v14896_v40  ;;  %v14971_v40 = vld [vmem:[%s21583_s3 + $0x64] ss:$8 sps:$4 sm:$0xff]   ;;  %v14966_v44 = vld [vmem:[%s21581_s1 + $0x1508] ss:$16 sps:$4 sm:$0xff]   ;;  %v5367_v45 = vpack.c.bf16 %v5363_v30, %v5363_v30  ;;  %v15007_v30 = vld [vmem:[%s21583_s3 + $0xb4] ss:$8 sps:$4 sm:$0xff]  }
 0x297   :  { %5250 = vmatpush1.bf16.msra.mxu0 %v14897_v16  ;;  %v14972_v16 = vld [vmem:[%s21581_s1 + $0x160c] ss:$16 sps:$4 sm:$0x7f]  }
 0x298   :  { %5287 = vmatpush1.bf16.msra.mxu1 %v14894_v39  ;;  %5251 = vmatprep.subr.bf16.mxu0 %v14905_v20  ;;  %v14977_v20 = vld [vmem:[%s21583_s3 + $0x54] ss:$8 sps:$4 sm:$0xff]  }
 0x299   :  { %5288 = vmatprep.subr.bf16.mxu1 %v14902_v47  ;;  %v14974_v47 = vld [vmem:[%s21581_s1 + $0x1608] ss:$16 sps:$4 sm:$0x7f]  }
 0x29b   :  { %5252 = vmatpush1.bf16.msra.mxu0 %v14903_v52 }
 0x29c   :  { %5289 = vmatpush1.bf16.msra.mxu1 %v14900_v43  ;;  %5253 = vmatprep.subr.bf16.mxu0 %v14911_v29 }
 0x29d   :  { %5290 = vmatprep.subr.bf16.mxu1 %v14908_v1  ;;  %v14975_v1 = vld [vmem:[%s21583_s3 + $0x50] ss:$8 sps:$4 sm:$0xff]  }
 0x29f   :  { %5254 = vmatpush1.bf16.msra.mxu0 %v14909_v23 }
 0x2a0   :  { %5291 = vmatpush1.bf16.msra.mxu1 %v14906_v53  ;;  %5255 = vmatprep.subr.bf16.mxu0 %v14917_v50  ;;  %v14980_v53 = vld [vmem:[%s21583_s3 + $0x44] ss:$8 sps:$4 sm:$0xff]   ;;  %v14983_v50 = vld [vmem:[%s21583_s3 + $0x34] ss:$8 sps:$4 sm:$0xff]  }
 0x2a1   :  { %5292 = vmatprep.subr.bf16.mxu1 %v14914_v54 }
 0x2a3   :  { %5256 = vmatpush2.bf16.msra.mxu0 %v14915_v56 }
 0x2a4   :  { %5293 = vmatpush1.bf16.msra.mxu1 %v14912_v8  ;;  %5257 = vmatprep.subr.bf16.mxu0 %v14923_v37  ;;  %v14981_v37 = vld [vmem:[%s21583_s3 + $0x30] ss:$8 sps:$4 sm:$0xff]  }
 0x2a5   :  { %5294 = vmatprep.subr.bf16.mxu1 %v14920_v49 }
 0x2a7   :  { %5258 = vmatpush2.bf16.msra.mxu0 %v14921_v60  ;;  %v14986_v60 = vld [vmem:[%s21583_s3 + $0x24] ss:$8 sps:$4 sm:$0xff]  }
 0x2a8   :  { %5295 = vmatpush1.bf16.msra.mxu1 %v14918_v59  ;;  %5259 = vmatprep.subr.bf16.mxu0 %v14929_v62  ;;  %v15019_v62 = vld [vmem:[%s21583_s3 + $0x174] ss:$8 sps:$4 sm:$0xff]  }
 0x2a9   :  { %5296 = vmatprep.subr.bf16.mxu1 %v14926_v61  ;;  %v15017_v61 = vld [vmem:[%s21583_s3 + $0x170] ss:$8 sps:$4 sm:$0xff]  }
 0x2ab   :  { %5260 = vmatpush2.bf16.msra.mxu0 %v14927_v0  ;;  %v14984_v0 = vld [vmem:[%s21583_s3 + $0x20] ss:$8 sps:$4 sm:$0xff]  }
 0x2ac   :  { %5297 = vmatpush2.bf16.msra.mxu1 %v14924_v17  ;;  %5261 = vmatprep.subr.bf16.mxu0 %v14935_v2  ;;  %v15022_v17 = vld [vmem:[%s21583_s3 + $0x164] ss:$8 sps:$4 sm:$0xff]   ;;  %v14989_v2 = vld [vmem:[%s21583_s3 + $0x14] ss:$8 sps:$4 sm:$0xff]  }
 0x2ad   :  { %5298 = vmatprep.subr.bf16.mxu1 %v14932_v21  ;;  %v15020_v21 = vld [vmem:[%s21583_s3 + $0x160] ss:$8 sps:$4 sm:$0xff]  }
 0x2af   :  { %5262 = vmatpush2.bf16.msra.mxu0 %v14933_v3  ;;  %v14992_v3 = vld [vmem:[%s21583_s3 + $0x4] ss:$8 sps:$4 sm:$0xff]  }
 0x2b0   :  { %5299 = vmatpush2.bf16.msra.mxu1 %v14930_v26  ;;  %5263 = vmatprep.subr.bf16.mxu0 %v14941_v12  ;;  %v14987_v26 = vld [vmem:[%s21583_s3 + $0x10] ss:$8 sps:$4 sm:$0xff]   ;;  %v15028_v12 = vld [vmem:[%s21583_s3 + $0x144] ss:$8 sps:$4 sm:$0xff]  }
 0x2b1   :  { %5300 = vmatprep.subr.bf16.mxu1 %v14938_v11  ;;  %v15023_v11 = vld [vmem:[%s21583_s3 + $0x150] ss:$8 sps:$4 sm:$0xff]  }
 0x2b3   :  { %5264 = vmatpush2.bf16.msra.mxu0 %v14939_v55  ;;  %v15026_v55 = vld [vmem:[%s21583_s3 + $0x140] ss:$8 sps:$4 sm:$0xff]  }
 0x2b4   :  { %5301 = vmatpush2.bf16.msra.mxu1 %v14936_v38  ;;  %5265 = vmatprep.subr.bf16.mxu0 %v14947_v19  ;;  %v14990_v38 = vld [vmem:[%s21583_s3] ss:$8 sps:$4 sm:$0xff]   ;;  %v15031_v19 = vld [vmem:[%s21583_s3 + $0x134] ss:$8 sps:$4 sm:$0xff]  }
 0x2b5   :  { %5302 = vmatprep.subr.bf16.mxu1 %v14944_v15  ;;  %v14995_v15 = vld [vmem:[%s21583_s3 + $0xf4] ss:$8 sps:$4 sm:$0xff]  }
 0x2b7   :  { %5266 = vmatpush2.bf16.msra.mxu0 %v14945_v7  ;;  %v15029_v7 = vld [vmem:[%s21583_s3 + $0x130] ss:$8 sps:$4 sm:$0xff]  }
 0x2b8   :  { %5303 = vmatpush2.bf16.msra.mxu1 %v14942_v32  ;;  %5267 = vmatprep.subr.bf16.mxu0 %v14953_v24  ;;  %v14993_v32 = vld [vmem:[%s21583_s3 + $0xf0] ss:$8 sps:$4 sm:$0xff]   ;;  %v15034_v24 = vld [vmem:[%s21583_s3 + $0x124] ss:$8 sps:$4 sm:$0xff]  }
 0x2b9   :  { %5304 = vmatprep.subr.bf16.mxu1 %v14950_v22  ;;  %v14998_v22 = vld [vmem:[%s21583_s3 + $0xe4] ss:$8 sps:$4 sm:$0xff]  }
 0x2bb   :  { %5268 = vmatpush2.bf16.msra.mxu0 %v14951_v9  ;;  %v15032_v9 = vld [vmem:[%s21583_s3 + $0x120] ss:$8 sps:$4 sm:$0xff]  }
 0x2bc   :  { %5305 = vmatpush2.bf16.msra.mxu1 %v14948_v58  ;;  %5269 = vmatprep.subr.bf16.mxu0 %v14959_v28  ;;  %v14996_v58 = vld [vmem:[%s21583_s3 + $0xe0] ss:$8 sps:$4 sm:$0xff]   ;;  %v15037_v28 = vld [vmem:[%s21583_s3 + $0x114] ss:$8 sps:$4 sm:$0xff]  }
 0x2bd   :  { %5306 = vmatprep.subr.bf16.mxu1 %v14956_v42  ;;  %v15001_v42 = vld [vmem:[%s21583_s3 + $0xd4] ss:$8 sps:$4 sm:$0xff]  }
 0x2bf   :  { %5270 = vmatpush2.bf16.msra.mxu0 %v14957_v34  ;;  %v15035_v34 = vld [vmem:[%s21583_s3 + $0x110] ss:$8 sps:$4 sm:$0xff]  }
 0x2c0   :  { %5307 = vmatpush2.bf16.msra.mxu1 %v14954_v18  ;;  %5766 = vmatprep.subr.bf16.mxu0 %v14965_v31  ;;  %v14999_v18 = vld [vmem:[%s21583_s3 + $0xd0] ss:$8 sps:$4 sm:$0xff]   ;;  %v15040_v31 = vld [vmem:[%s21583_s3 + $0x104] ss:$8 sps:$4 sm:$0xff]  }
 0x2c1   :  { %5308 = vmatprep.subr.bf16.mxu1 %v14962_v33  ;;  %v15004_v33 = vld [vmem:[%s21583_s3 + $0xc4] ss:$8 sps:$4 sm:$0xff]  }
 0x2c2   :  { %v5027_v39 = vpop.f32.mrf.mxu0  ;;  %5272 = vmatmul.mubr.bf16.vlgmr.msra.gmra.mxu0 %v17499_v10 }
 0x2c3   :  { %v5028_v43 = vadd.f32 %v5027_v39, %v18593_v35  ;;  %5767 = vmatpush1.bf16.msra.mxu0 %v14963_v5  ;;  %5798 = vmatprep.mubr.bf16.mxu0 %v5367_v45  ;;  %v4373_v35 = vsel %vm4365_vm0, %v14974_v47, 0  ;;  %v15038_v5 = vld [vmem:[%s21583_s3 + $0x100] ss:$8 sps:$4 sm:$0xff]   ;;  %v15046_v45 = vld [vmem:[%s21583_s3 + $0x1e4] ss:$8 sps:$4 sm:$0xff]  }
 0x2c4   :  { %5309 = vmatpush2.bf16.msra.mxu1 %v14960_v48  ;;  %v5029_v52 = vpop.f32.mrf.mxu0  ;;  %5768 = vmatprep.subr.bf16.mxu0 %v14971_v40  ;;  %v15002_v48 = vld [vmem:[%s21583_s3 + $0xc0] ss:$8 sps:$4 sm:$0xff]   ;;  %v15005_v40 = vld [vmem:[%s21583_s3 + $0xb0] ss:$8 sps:$4 sm:$0xff]   ;;  %v15013_v47 = vld [vmem:[%s21583_s3 + $0x94] ss:$8 sps:$4 sm:$0xff]  }
 0x2c5   :  { %5310 = vmatprep.subr.bf16.mxu1 %v14968_v41  ;;  %v5030_v10 = vadd.f32 %v5029_v52, %v18595_v46  ;;  %v14978_v46 = vld [vmem:[%s21583_s3 + $0x40] ss:$8 sps:$4 sm:$0xff]   ;;  %v15043_v41 = vld [vmem:[%s21583_s3 + $0x1f4] ss:$8 sps:$4 sm:$0xff]  }
 0x2c6   :  { %v5031_v29 = vpop.f32.mrf.mxu0  ;;  %v15008_v39 = vld [vmem:[%s21583_s3 + $0xa0] ss:$8 sps:$4 sm:$0xff]  }
 0x2c7   :  { %5769 = vmatpush1.bf16.msra.mxu0 %v14969_v14  ;;  %v15010_v14 = vld [vmem:[%s21583_s3 + $0xa4] ss:$8 sps:$4 sm:$0xff]   ;;  %v15014_v52 = vld [vmem:[%s21583_s3 + $0x80] ss:$8 sps:$4 sm:$0xff]  }
 0x2c8   :  { %5311 = vmatpush2.bf16.msra.mxu1 %v14966_v44  ;;  %5770 = vmatprep.subr.bf16.mxu0 %v14977_v20  ;;  %v5032_v23 = vpop.f32.mrf.mxu0  ;;  %v15041_v44 = vld [vmem:[%s21583_s3 + $0x1f0] ss:$8 sps:$4 sm:$0xff]  }
 0x2c9   :  { %12950 = vmatprep.subr.msk.bf16.mxu1 %vm4365_vm0, %v14972_v16  ;;  %v15044_v16 = vld [vmem:[%s21583_s3 + $0x1e0] ss:$8 sps:$4 sm:$0xff]   ;;  %v15011_v20 = vld [vmem:[%s21583_s3 + $0x90] ss:$8 sps:$4 sm:$0xff]  }
 0x2ca   :  { %v15047_v23 = vld [vmem:[%s21583_s3 + $0x1d0] ss:$8 sps:$4 sm:$0xff]  }
 0x2cb   :  { %v5068_v54 = vpop.f32.mrf.mxu1  ;;  %5313 = vmatmul.mubr.bf16.vlgmr.msra.gmra.mxu1 %v17715_v13  ;;  %5771 = vmatpush1.bf16.msra.mxu0 %v14975_v1 }
 0x2cc   :  { %v18788_v8 = vadd.f32 %v5068_v54, %v5028_v43  ;;  %5336 = vmatpush1.bf16.msra.mxu1 %v4373_v35  ;;  %5772 = vmatprep.subr.bf16.mxu0 %v14980_v53  ;;  %v15016_v43 = vld [vmem:[%s21583_s3 + $0x84] ss:$8 sps:$4 sm:$0xff]   ;;  %v15049_v53 = vld [vmem:[%s21583_s3 + $0x1d4] ss:$8 sps:$4 sm:$0xff]  }
 0x2cd   :  { %v5070_v56 = vpop.f32.mrf.mxu1  ;;  %5353 = vmatprep.mubr.bf16.mxu1 %v16316_v27  ;;  %5807 = vmatprep.subr.bf16.mxu1 %v15019_v62 }
 0x2ce   :  { %v18791_v49 = vadd.f32 %v5070_v56, %v5030_v10  ;;  %v5362_v10 = vmax.f32 %v18348_v51, 0.0  ;;  %v15050_v51 = vld [vmem:[%s21583_s3 + $0x1c0] ss:$8 sps:$4 sm:$0xff]  }
 0x2cf   :  { %v5072_v59 = vpop.f32.mrf.mxu1  ;;  %5773 = vmatpush1.bf16.msra.mxu0 %v14978_v46 }
 0x2d0   :  { %5774 = vmatprep.subr.bf16.mxu0 %v14983_v50  ;;  %v5366_v1 = vpack.c.bf16 %v5362_v10, %v5362_v10  ;;  %v15052_v50 = vld [vmem:[%s21583_s3 + $0x1c4] ss:$8 sps:$4 sm:$0xff]   ;;  %v15055_v59 = vld [vmem:[%s21583_s3 + $0x1b4] ss:$8 sps:$4 sm:$0xff]  }
 0x2d1   :  { %v5073_v13 = vpop.f32.mrf.mxu1 }
 0x2d3   :  { %12951 = vmatmul.mubr.msk.bf16.vlgmr.msra.gmra.mxu1 %vm4361_vm1, %v17537_v36  ;;  %5775 = vmatpush1.bf16.msra.mxu0 %v14981_v37  ;;  %v15025_v36 = vld [vmem:[%s21583_s3 + $0x154] ss:$8 sps:$4 sm:$0xff]  }
 0x2d4   :  { %5808 = vmatpush1.bf16.msra.mxu1 %v15017_v61  ;;  %5776 = vmatprep.subr.bf16.mxu0 %v14986_v60 }
 0x2d5   :  { %5809 = vmatprep.subr.bf16.mxu1 %v15022_v17  ;;  %v15058_v17 = vld [vmem:[%s21583_s3 + $0x1a4] ss:$8 sps:$4 sm:$0xff]  }
 0x2d7   :  { %5777 = vmatpush1.bf16.msra.mxu0 %v14984_v0  ;;  %v15056_v0 = vld [vmem:[%s21583_s3 + $0x1a0] ss:$8 sps:$4 sm:$0xff]  }
 0x2d8   :  { %5810 = vmatpush1.bf16.msra.mxu1 %v15020_v21  ;;  %5778 = vmatprep.subr.bf16.mxu0 %v14989_v2  ;;  %v15061_v2 = vld [vmem:[%s21583_s3 + $0x194] ss:$8 sps:$4 sm:$0xff]  }
 0x2d9   :  { %5811 = vmatprep.subr.bf16.mxu1 %v15025_v36  ;;  %v15059_v36 = vld [vmem:[%s21583_s3 + $0x190] ss:$8 sps:$4 sm:$0xff]  }
 0x2db   :  { %5779 = vmatpush1.bf16.msra.mxu0 %v14987_v26  ;;  %v15064_v26 = vld [vmem:[%s21583_s3 + $0x184] ss:$8 sps:$4 sm:$0xff]  }
 0x2dc   :  { %5812 = vmatpush1.bf16.msra.mxu1 %v15023_v11  ;;  %5780 = vmatprep.subr.bf16.mxu0 %v14992_v3  ;;  %v15062_v3 = vld [vmem:[%s21583_s3 + $0x180] ss:$8 sps:$4 sm:$0xff]  }
 0x2dd   :  { %5813 = vmatprep.subr.bf16.mxu1 %v15028_v12 }
 0x2df   :  { %5781 = vmatpush1.bf16.msra.mxu0 %v14990_v38 }
 0x2e0   :  { %5814 = vmatpush1.bf16.msra.mxu1 %v15026_v55  ;;  %5782 = vmatprep.subr.bf16.mxu0 %v14995_v15 }
 0x2e1   :  { %5815 = vmatprep.subr.bf16.mxu1 %v15031_v19 }
 0x2e3   :  { %5783 = vmatpush2.bf16.msra.mxu0 %v14993_v32 }
 0x2e4   :  { %5816 = vmatpush1.bf16.msra.mxu1 %v15029_v7  ;;  %5784 = vmatprep.subr.bf16.mxu0 %v14998_v22 }
 0x2e5   :  { %5817 = vmatprep.subr.bf16.mxu1 %v15034_v24 }
 0x2e7   :  { %5785 = vmatpush2.bf16.msra.mxu0 %v14996_v58 }
 0x2e8   :  { %5818 = vmatpush1.bf16.msra.mxu1 %v15032_v9  ;;  %5786 = vmatprep.subr.bf16.mxu0 %v15001_v42 }
 0x2e9   :  { %5819 = vmatprep.subr.bf16.mxu1 %v15037_v28 }
 0x2eb   :  { %5787 = vmatpush2.bf16.msra.mxu0 %v14999_v18 }
 0x2ec   :  { %5820 = vmatpush1.bf16.msra.mxu1 %v15035_v34  ;;  %5788 = vmatprep.subr.bf16.mxu0 %v15004_v33 }
 0x2ed   :  { %5821 = vmatprep.subr.bf16.mxu1 %v15040_v31 }
 0x2ef   :  { %5789 = vmatpush2.bf16.msra.mxu0 %v15002_v48 }
 0x2f0   :  { %5822 = vmatpush1.bf16.msra.mxu1 %v15038_v5  ;;  %5790 = vmatprep.subr.bf16.mxu0 %v15007_v30 }
 0x2f1   :  { %5823 = vmatprep.subr.bf16.mxu1 %v15043_v41 }
 0x2f3   :  { %5791 = vmatpush2.bf16.msra.mxu0 %v15005_v40 }
 0x2f4   :  { %5824 = vmatpush2.bf16.msra.mxu1 %v15041_v44  ;;  %5792 = vmatprep.subr.bf16.mxu0 %v15010_v14 }
 0x2f5   :  { %5825 = vmatprep.subr.bf16.mxu1 %v15046_v45 }
 0x2f7   :  { %5793 = vmatpush2.bf16.msra.mxu0 %v15008_v39 }
 0x2f8   :  { %5826 = vmatpush2.bf16.msra.mxu1 %v15044_v16  ;;  %5794 = vmatprep.subr.bf16.mxu0 %v15013_v47 }
 0x2f9   :  { %5827 = vmatprep.subr.bf16.mxu1 %v15049_v53 }
 0x2fb   :  { %5795 = vmatpush2.bf16.msra.mxu0 %v15011_v20 }
 0x2fc   :  { %5796 = vmatprep.subr.bf16.mxu0 %v15016_v43  ;;  %5828 = vmatpush2.bf16.msra.mxu1 %v15047_v23 }
 0x2fd   :  { %5829 = vmatprep.subr.bf16.mxu1 %v15052_v50 }
 0x2ff   :  { %5797 = vmatpush2.bf16.msra.mxu0 %v15014_v52 }
 0x300   :  { %5830 = vmatpush2.bf16.msra.mxu1 %v15050_v51 }
 0x301   :  { %5831 = vmatprep.subr.bf16.mxu1 %v15055_v59 }
 0x302   :  { %v5109_v29 = vpop.f32.mrf.mxu0  ;;  %5799 = vmatmul.mubr.bf16.vlgmr.msra.gmra.mxu0 %v5366_v1 }
 0x303   :  { %v5110_v35 = vadd.f32 %v5109_v29, %v18788_v8 }
 0x304   :  { %v5111_v46 = vpop.f32.mrf.mxu0 }
 0x305   :  { %v5112_v54 = vadd.f32 %v5111_v46, %v18791_v49  ;;  %v15053_v49 = vld [vmem:[%s21583_s3 + $0x1b0] ss:$8 sps:$4 sm:$0xff]  }
 0x306   :  { %v5113_v56 = vpop.f32.mrf.mxu0  ;;  %5832 = vmatpush2.bf16.msra.mxu1 %v15053_v49 }
 0x307   :  { %5833 = vmatprep.subr.bf16.mxu1 %v15058_v17 }
 0x308   :  { %v5114_v8 = vpop.f32.mrf.mxu0 }
 0x30a   :  { %5834 = vmatpush2.bf16.msra.mxu1 %v15056_v0 }
 0x30b   :  { %v5150_v37 = vpop.f32.mrf.mxu1  ;;  %5835 = vmatprep.subr.bf16.mxu1 %v15061_v2 }
 0x30c   :  { %v5151_v13 = vadd.f32 %v5150_v37, %v5110_v35 }
 0x30d   :  { %v5152_v60 = vpop.f32.mrf.mxu1 }
 0x30e   :  { %v5153_v61 = vadd.f32 %v5152_v60, %v5112_v54  ;;  %5836 = vmatpush2.bf16.msra.mxu1 %v15059_v36 }
 0x30f   :  { %v5154_v62 = vpop.f32.mrf.mxu1  ;;  %5837 = vmatprep.subr.bf16.mxu1 %v15064_v26 }
 0x311   :  { %v5155_v21 = vpop.f32.mrf.mxu1 }
 0x312   :  { %5838 = vmatpush2.bf16.msra.mxu1 %v15062_v3 }
 0x313   :  { %21 = vsyncpa [#allocation5], 0  ;;  %v15065_v32 = vld [vmem:[%s21585_s5 + $0x78] sm:$0xff]   ;;  %v15067_v22 = vld [vmem:[%s21585_s5 + $0x70] sm:$0xff]   ;;  %vm6027_vm2 = vcmask 261120  }
 0x314   :  { %v15066_v7 = vld [vmem:[%s21585_s5 + $0x38] sm:$0xff]   ;;  %13838 = vmatprep.subr.bf16.mxu0 %v15065_v32  ;;  %v15068_v9 = vld [vmem:[%s21585_s5 + $0x30] sm:$0xff]   ;;  %v15069_v28 = vld [vmem:[%s21585_s5 + $0x68] sm:$0xff]  }
 0x315   :  { %13839 = vmatpush3.bf16.msra.mxu0 %v15066_v7  ;;  %v15070_v33 = vld [vmem:[%s21585_s5 + $0x28] sm:$0xff]   ;;  %v15071_v48 = vld [vmem:[%s21585_s5 + $0x60] sm:$0xff]   ;;  %v15073_v30 = vld [vmem:[%s21585_s5 + $0x58] sm:$0xff]  }
 0x316   :  { %13840 = vmatprep.subr.bf16.mxu0 %v15067_v22  ;;  %v15072_v5 = vld [vmem:[%s21585_s5 + $0x20] sm:$0xff]   ;;  %v15074_v41 = vld [vmem:[%s21585_s5 + $0x18] sm:$0xff]   ;;  %v15075_v40 = vld [vmem:[%s21585_s5 + $0x50] sm:$0xff]  }
 0x317   :  { %v15076_v44 = vld [vmem:[%s21585_s5 + $0x10] sm:$0xff]   ;;  %v15077_v62 = vld [vmem:[%s21585_s5 + $0x48] sm:$0xff]   ;;  %v15079_v0 = vld [vmem:[%s21585_s5 + $0x40] sm:$0xff]  }
 0x318   :  { %v15078_v17 = vld [vmem:[%s21585_s5 + $0x8] sm:$0xff]   ;;  %v5434_v21 = vld [vmem:[%s21584_s4] sm:$0x3] }
 0x319   :  { %13841 = vmatpush3.bf16.msra.mxu0 %v15068_v9  ;;  %v5439_v2 = vrot.slane %v5434_v21, %v17252_v63  ;;  %v5443_v36 = vrot.slane %v5434_v21, %v17267_v4  ;;  %v15081_v9 = vld [vmem:[%s21587_s7 + $0x10] ss:$8 sps:$4 sm:$0xff]   ;;  %v15101_v21 = vld [vmem:[%s21589_s9 + $0xa4] ss:$16 sps:$4 sm:$0xff]  }
 0x31a   :  { %13842 = vmatprep.subr.bf16.mxu0 %v15069_v28  ;;  %v15084_v28 = vld [vmem:[%s21587_s7] ss:$8 sps:$4 sm:$0xff]  }
 0x31d   :  { %13843 = vmatpush3.bf16.msra.mxu0 %v15070_v33  ;;  %v15092_v33 = vld [vmem:[%s21589_s9 + $0xec] ss:$16 sps:$4 sm:$0xff]  }
 0x31e   :  { %13844 = vmatprep.subr.bf16.mxu0 %v15071_v48  ;;  %v15096_v48 = vld [vmem:[%s21589_s9 + $0xc8] ss:$16 sps:$4 sm:$0xff]  }
 0x321   :  { %13845 = vmatpush3.bf16.msra.mxu0 %v15072_v5  ;;  %v15104_v5 = vld [vmem:[%s21589_s9 + $0xac] ss:$16 sps:$4 sm:$0xff]  }
 0x322   :  { %13846 = vmatprep.subr.bf16.mxu0 %v15073_v30  ;;  %v15102_v30 = vld [vmem:[%s21589_s9 + $0xa8] ss:$16 sps:$4 sm:$0xff]  }
 0x325   :  { %13847 = vmatpush3.bf16.msra.mxu0 %v15074_v41  ;;  %v15110_v41 = vld [vmem:[%s21589_s9 + $0x8c] ss:$16 sps:$4 sm:$0xff]  }
 0x326   :  { %13848 = vmatprep.subr.bf16.mxu0 %v15075_v40  ;;  %v15108_v40 = vld [vmem:[%s21589_s9 + $0x88] ss:$16 sps:$4 sm:$0xff]  }
 0x329   :  { %13849 = vmatpush3.bf16.msra.mxu0 %v15076_v44  ;;  %v15116_v44 = vld [vmem:[%s21589_s9 + $0x6c] ss:$16 sps:$4 sm:$0xff]  }
 0x32a   :  { %13850 = vmatprep.subr.bf16.mxu0 %v15077_v62  ;;  %v15087_v62 = vld [vmem:[%s21589_s9 + $0xe0] ss:$16 sps:$4 sm:$0xff]  }
 0x32d   :  { %13851 = vmatpush3.bf16.msra.mxu0 %v15078_v17 }
 0x32e   :  { %13852 = vmatprep.subr.bf16.mxu0 %v15079_v0  ;;  %v15095_v0 = vld [vmem:[%s21589_s9 + $0xc4] ss:$16 sps:$4 sm:$0xff]  }
 0x342   :  { %v5191_v11 = vpop.f32.mrf.mxu0 }
 0x343   :  { %v5192_v12 = vadd.f32 %v5191_v11, %v5151_v13 }
 0x344   :  { %v5193_v38 = vpop.f32.mrf.mxu0 }
 0x345   :  { %v5194_v55 = vadd.f32 %v5193_v38, %v5153_v61 }
 0x346   :  { %v5195_v15 = vpop.f32.mrf.mxu0 }
 0x348   :  { %v5196_v19 = vpop.f32.mrf.mxu0 }
 0x34b   :  { %v5232_v24 = vpop.f32.mrf.mxu1 }
 0x34c   :  { %v5233_v58 = vadd.f32 %v5232_v24, %v5192_v12 }
 0x34d   :  { %v5234_v42 = vpop.f32.mrf.mxu1 }
 0x34e   :  { %v5235_v18 = vadd.f32 %v5234_v42, %v5194_v55  ;;  %v15086_v42 = vld [vmem:[%s21587_s7 + $0x4] ss:$8 sps:$4 sm:$0xff]  }
 0x34f   :  { %v5236_v34 = vpop.f32.mrf.mxu1 }
 0x350   :  { %v15090_v34 = vld [vmem:[%s21589_s9 + $0xe8] ss:$16 sps:$4 sm:$0xff]  }
 0x351   :  { %v5237_v31 = vpop.f32.mrf.mxu1 }
 0x352   :  { %v15098_v31 = vld [vmem:[%s21589_s9 + $0xcc] ss:$16 sps:$4 sm:$0xff]  }
 0x382   :  { %v5273_v14 = vpop.f32.mrf.mxu0 }
 0x383   :  { %v5274_v52 = vadd.f32 %v5273_v14, %v5233_v58  ;;  %v15083_v58 = vld [vmem:[%s21587_s7 + $0x14] ss:$8 sps:$4 sm:$0xff]   ;;  %v15114_v14 = vld [vmem:[%s21589_s9 + $0x68] ss:$16 sps:$4 sm:$0xff]  }
 0x384   :  { %v5275_v45 = vpop.f32.mrf.mxu0  ;;  %6081 = vmatprep.subr.bf16.mxu1 %v15083_v58  ;;  %v15141_v58 = vld [vmem:[%s21589_s9 + $0x1c0] ss:$16 sps:$4 sm:$0xff]  }
 0x385   :  { %v5276_v1 = vadd.f32 %v5275_v45, %v5235_v18  ;;  %v15089_v18 = vld [vmem:[%s21589_s9 + $0xe4] ss:$16 sps:$4 sm:$0xff]   ;;  %v15122_v45 = vld [vmem:[%s21589_s9 + $0x4c] ss:$16 sps:$4 sm:$0xff]  }
 0x386   :  { %v5277_v39 = vpop.f32.mrf.mxu0 }
 0x387   :  { %v15120_v39 = vld [vmem:[%s21589_s9 + $0x48] ss:$16 sps:$4 sm:$0xff]  }
 0x388   :  { %v5278_v16 = vpop.f32.mrf.mxu0 }
 0x389   :  { %v15128_v16 = vld [vmem:[%s21589_s9 + $0x2c] ss:$16 sps:$4 sm:$0xff]  }
 0x38b   :  { %v5314_v47 = vpop.f32.mrf.mxu1 }
 0x38c   :  { %v5315_v29 = vadd.f32 %v5314_v47, %v5274_v52  ;;  %v15126_v47 = vld [vmem:[%s21589_s9 + $0x28] ss:$16 sps:$4 sm:$0xff]   ;;  %v15140_v52 = vld [vmem:[%s21589_s9 + $0x1ec] ss:$16 sps:$4 sm:$0xff]  }
 0x38d   :  { %v5316_v20 = vpop.f32.mrf.mxu1 }
 0x38e   :  { %v5317_v35 = vadd.f32 %v5316_v20, %v5276_v1  ;;  %v15134_v20 = vld [vmem:[%s21589_s9 + $0xc] ss:$16 sps:$4 sm:$0xff]  }
 0x38f   :  { %v5318_v43 = vpop.f32.mrf.mxu1  ;;  %v15146_v1 = vld [vmem:[%s21589_s9 + $0x1cc] ss:$16 sps:$4 sm:$0xff]  }
 0x390   :  { %v15132_v43 = vld [vmem:[%s21589_s9 + $0x8] ss:$16 sps:$4 sm:$0xff]  }
 0x391   :  { %v5319_v10 = vpop.f32.mrf.mxu1 }
 0x392   :  { %v15138_v10 = vld [vmem:[%s21589_s9 + $0x1e8] ss:$16 sps:$4 sm:$0xff]  }
 0x393   :  { %v5355_v53 = vpop.f32.mrf.mxu1 }
 0x394   :  { %v5356_v23 = vadd.f32 %v5355_v53, %v5315_v29  ;;  %v15144_v29 = vld [vmem:[%s21589_s9 + $0x1c8] ss:$16 sps:$4 sm:$0xff]   ;;  %v15152_v53 = vld [vmem:[%s21589_s9 + $0x1ac] ss:$16 sps:$4 sm:$0xff]  }
 0x395   :  { %v5357_v46 = vpop.f32.mrf.mxu1 }
 0x396   :  { %v5358_v54 = vadd.f32 %v5357_v46, %v5317_v35  ;;  %v5364_v51 = vmax.f32 %v5356_v23, 0.0  ;;  %v15150_v35 = vld [vmem:[%s21589_s9 + $0x1a8] ss:$16 sps:$4 sm:$0xff]   ;;  %v15158_v23 = vld [vmem:[%s21589_s9 + $0x18c] ss:$16 sps:$4 sm:$0xff]  }
 0x397   :  { %v5359_v50 = vpop.f32.mrf.mxu1  ;;  %v15156_v46 = vld [vmem:[%s21589_s9 + $0x188] ss:$16 sps:$4 sm:$0xff]  }
 0x398   :  { %v5365_v56 = vmax.f32 %v5358_v54, 0.0  ;;  %v5368_v59 = vpack.c.bf16 %v5364_v51, %v5364_v51  ;;  %v15164_v54 = vld [vmem:[%s21589_s9 + $0x16c] ss:$16 sps:$4 sm:$0xff]   ;;  %v15162_v51 = vld [vmem:[%s21589_s9 + $0x168] ss:$16 sps:$4 sm:$0xff]  }
 0x399   :  { %v5360_v8 = vpop.f32.mrf.mxu1  ;;  %v15170_v50 = vld [vmem:[%s21589_s9 + $0x14c] ss:$16 sps:$4 sm:$0xff]  }
 0x39a   :  { %v5369_v37 = vpack.c.bf16 %v5365_v56, %v5365_v56  ;;  %v15168_v56 = vld [vmem:[%s21589_s9 + $0x148] ss:$16 sps:$4 sm:$0xff]  }
 0x39c   :  { %5839 = vmatprep.mubr.bf16.mxu1 %v5369_v37  ;;  %v13016_v37 = vld [vmem:[%s21586_s6] ss:$0 sm:$0xff] }
 0x39d   :  { %5840 = vmatmul.mubr.bf16.vlgmr.msra.gmra.mxu1 %v5368_v59 }
 0x39e   :  { %6101 = vmatprep.mubr.bf16.mxu1 %v16316_v27  ;;  %v15080_v27 = vld [vmem:[%s21585_s5] sm:$0xff]   ;;  %6082 = vmatpush1.bf16.msra.mxu1 %v15081_v9 }
 0x39f   :  { %13853 = vmatpush3.bf16.msra.mxu0 %v15080_v27  ;;  %6083 = vmatprep.subr.bf16.mxu1 %v15086_v42  ;;  %v15093_v27 = vld [vmem:[%s21589_s9 + $0xc0] ss:$16 sps:$4 sm:$0xff]   ;;  %v15149_v9 = vld [vmem:[%s21589_s9 + $0x1a4] ss:$16 sps:$4 sm:$0xff]  }
 0x3a0   :  { %6561 = vmatprep.subr.bf16.mxu0 %v15092_v33  ;;  %v15147_v42 = vld [vmem:[%s21589_s9 + $0x1a0] ss:$16 sps:$4 sm:$0xff]  }
 0x3a1   :  { %v15159_v33 = vld [vmem:[%s21589_s9 + $0x160] ss:$16 sps:$4 sm:$0xff]  }
 0x3a2   :  { %6084 = vmatpush1.bf16.msra.mxu1 %v15084_v28  ;;  %v15155_v28 = vld [vmem:[%s21589_s9 + $0x184] ss:$16 sps:$4 sm:$0xff]  }
 0x3a3   :  { %6520 = vmatprep.subr.bf16.mxu1 %v15089_v18  ;;  %v15153_v18 = vld [vmem:[%s21589_s9 + $0x180] ss:$16 sps:$4 sm:$0xff]  }
 0x3c2   :  { %v5800_v13 = vpop.f32.mrf.mxu0 }
 0x3c3   :  { %v5801_v26 = vadd.f32 %v5800_v13, %v5439_v2  ;;  %v15099_v2 = vld [vmem:[%s21589_s9 + $0xa0] ss:$16 sps:$4 sm:$0xff]  }
 0x3c4   :  { %v5802_v49 = vpop.f32.mrf.mxu0 }
 0x3c5   :  { %v5803_v11 = vadd.f32 %v5802_v49, %v5443_v36  ;;  %v15107_v36 = vld [vmem:[%s21589_s9 + $0x84] ss:$16 sps:$4 sm:$0xff]  }
 0x3c6   :  { %v5804_v60 = vpop.f32.mrf.mxu0 }
 0x3c8   :  { %v5805_v61 = vpop.f32.mrf.mxu0 }
 0x45d   :  { %v5841_v3 = vpop.f32.mrf.mxu1 }
 0x45e   :  { %v5842_v12 = vadd.f32 %v5841_v3, %v5801_v26  ;;  %v15105_v26 = vld [vmem:[%s21589_s9 + $0x80] ss:$16 sps:$4 sm:$0xff]   ;;  %v15113_v3 = vld [vmem:[%s21589_s9 + $0x64] ss:$16 sps:$4 sm:$0xff]  }
 0x45f   :  { %v5843_v38 = vpop.f32.mrf.mxu1 }
 0x460   :  { %v5844_v55 = vadd.f32 %v5843_v38, %v5803_v11  ;;  %v5848_v15 = vmax.f32 %v5842_v12, 0.0  ;;  %v15111_v11 = vld [vmem:[%s21589_s9 + $0x60] ss:$16 sps:$4 sm:$0xff]   ;;  %v15119_v12 = vld [vmem:[%s21589_s9 + $0x44] ss:$16 sps:$4 sm:$0xff]  }
 0x461   :  { %v5845_v19 = vpop.f32.mrf.mxu1  ;;  %v15117_v38 = vld [vmem:[%s21589_s9 + $0x40] ss:$16 sps:$4 sm:$0xff]  }
 0x462   :  { %v5849_v32 = vmax.f32 %v5844_v55, 0.0  ;;  %v5850_v24 = vpack.c.bf16 %v5848_v15, %v5848_v15  ;;  %v15125_v55 = vld [vmem:[%s21589_s9 + $0x24] ss:$16 sps:$4 sm:$0xff]   ;;  %v15123_v15 = vld [vmem:[%s21589_s9 + $0x20] ss:$16 sps:$4 sm:$0xff]  }
 0x463   :  { %v5846_v7 = vpop.f32.mrf.mxu1  ;;  %v15131_v19 = vld [vmem:[%s21589_s9 + $0x4] ss:$16 sps:$4 sm:$0xff]  }
 0x464   :  { %v5851_v22 = vpack.c.bf16 %v5849_v32, %v5849_v32  ;;  %v15129_v32 = vld [vmem:[%s21589_s9] ss:$16 sps:$4 sm:$0xff]   ;;  %v15137_v7 = vld [vmem:[%s21589_s9 + $0x1e4] ss:$16 sps:$4 sm:$0xff]  }
 0x466   :  { %6019 = vmatprep.mubr.bf16.mxu0 %v5851_v22  ;;  %v15135_v22 = vld [vmem:[%s21589_s9 + $0x1e0] ss:$16 sps:$4 sm:$0xff]  }
 0x467   :  { %6020 = vmatmul.mubr.bf16.vlgmr.msra.gmra.mxu0 %v5850_v24  ;;  %v15143_v24 = vld [vmem:[%s21589_s9 + $0x1c4] ss:$16 sps:$4 sm:$0xff]  }
 0x468   :  { %6562 = vmatpush1.bf16.msra.mxu0 %v15090_v34  ;;  %v15161_v34 = vld [vmem:[%s21589_s9 + $0x164] ss:$16 sps:$4 sm:$0xff]  }
 0x469   :  { %6563 = vmatprep.subr.bf16.mxu0 %v15098_v31  ;;  %v15167_v31 = vld [vmem:[%s21589_s9 + $0x144] ss:$16 sps:$4 sm:$0xff]  }
 0x46c   :  { %6564 = vmatpush1.bf16.msra.mxu0 %v15096_v48  ;;  %v15165_v48 = vld [vmem:[%s21589_s9 + $0x140] ss:$16 sps:$4 sm:$0xff]  }
 0x46d   :  { %6565 = vmatprep.subr.bf16.mxu0 %v15104_v5  ;;  %v15173_v5 = vld [vmem:[%s21589_s9 + $0x124] ss:$16 sps:$4 sm:$0xff]  }
 0x470   :  { %6566 = vmatpush1.bf16.msra.mxu0 %v15102_v30  ;;  %v15176_v30 = vld [vmem:[%s21589_s9 + $0x12c] ss:$16 sps:$4 sm:$0xff]  }
 0x471   :  { %6567 = vmatprep.subr.bf16.mxu0 %v15110_v41  ;;  %v15171_v41 = vld [vmem:[%s21589_s9 + $0x120] ss:$16 sps:$4 sm:$0xff]  }
 0x474   :  { %6568 = vmatpush1.bf16.msra.mxu0 %v15108_v40  ;;  %v15174_v40 = vld [vmem:[%s21589_s9 + $0x128] ss:$16 sps:$4 sm:$0xff]  }
 0x475   :  { %6569 = vmatprep.subr.bf16.mxu0 %v15116_v44  ;;  %v15179_v44 = vld [vmem:[%s21589_s9 + $0x104] ss:$16 sps:$4 sm:$0xff]  }
 0x478   :  { %6570 = vmatpush1.bf16.msra.mxu0 %v15114_v14  ;;  %v15182_v14 = vld [vmem:[%s21589_s9 + $0x10c] ss:$16 sps:$4 sm:$0xff]  }
 0x479   :  { %6571 = vmatprep.subr.bf16.mxu0 %v15122_v45  ;;  %v15177_v45 = vld [vmem:[%s21589_s9 + $0x100] ss:$16 sps:$4 sm:$0xff]  }
 0x47c   :  { %6572 = vmatpush1.bf16.msra.mxu0 %v15120_v39  ;;  %v15180_v39 = vld [vmem:[%s21589_s9 + $0x108] ss:$16 sps:$4 sm:$0xff]  }
 0x47d   :  { %6573 = vmatprep.subr.bf16.mxu0 %v15128_v16  ;;  %v15185_v16 = vld [vmem:[%s21591_s11 + $0x50c] ss:$92 sps:$4 sm:$0xff]  }
 0x480   :  { %6574 = vmatpush1.bf16.msra.mxu0 %v15126_v47  ;;  %v15188_v47 = vld [vmem:[%s21591_s11 + $0x108c] ss:$92 sps:$4 sm:$0xff]  }
 0x481   :  { %6575 = vmatprep.subr.bf16.mxu0 %v15134_v20  ;;  %v6034_v20 = vld [vmem:[%s21588_s8] sm:$0x3] }
 0x484   :  { %6576 = vmatpush1.bf16.msra.mxu0 %v15132_v43  ;;  %v6039_v43 = vrot.slane %v6034_v20, %v17252_v63 }
 0x485   :  { %6577 = vmatprep.subr.bf16.mxu0 %v15140_v52  ;;  %v6043_v52 = vrot.slane %v6034_v20, %v17267_v4  ;;  %v15257_v20 = vld [vmem:[%s21591_s11 + $0x7ec] ss:$92 sps:$4 sm:$0xff]  }
 0x488   :  { %6578 = vmatpush2.bf16.msra.mxu0 %v15138_v10 }
 0x489   :  { %6579 = vmatprep.subr.bf16.mxu0 %v15146_v1 }
 0x48c   :  { %6580 = vmatpush2.bf16.msra.mxu0 %v15144_v29 }
 0x48d   :  { %6581 = vmatprep.subr.bf16.mxu0 %v15152_v53 }
 0x490   :  { %6582 = vmatpush2.bf16.msra.mxu0 %v15150_v35 }
 0x491   :  { %6583 = vmatprep.subr.bf16.mxu0 %v15158_v23 }
 0x494   :  { %6584 = vmatpush2.bf16.msra.mxu0 %v15156_v46 }
 0x495   :  { %6585 = vmatprep.subr.bf16.mxu0 %v15164_v54 }
 0x498   :  { %6586 = vmatpush2.bf16.msra.mxu0 %v15162_v51 }
 0x499   :  { %6587 = vmatprep.subr.bf16.mxu0 %v15170_v50  ;;  %v15183_v50 = vld [vmem:[%s21591_s11 + $0x508] ss:$92 sps:$4 sm:$0xff]  }
 0x49c   :  { %6588 = vmatpush2.bf16.msra.mxu0 %v15168_v56  ;;  %v15186_v56 = vld [vmem:[%s21591_s11 + $0x1088] ss:$92 sps:$4 sm:$0xff]  }
 0x49d   :  { %6589 = vmatprep.subr.bf16.mxu0 %v15176_v30  ;;  %v15240_v30 = vld [vmem:[%s21591_s11 + $0x1590] ss:$92 sps:$4 sm:$0xff]  }
 0x4a0   :  { %6590 = vmatpush2.bf16.msra.mxu0 %v15174_v40  ;;  %v15248_v40 = vld [vmem:[%s21591_s11 + $0x14dc] ss:$92 sps:$4 sm:$0xff]  }
 0x4a1   :  { %6591 = vmatprep.subr.bf16.mxu0 %v15182_v14  ;;  %v15246_v14 = vld [vmem:[%s21591_s11 + $0x14d8] ss:$92 sps:$4 sm:$0xff]  }
 0x4a4   :  { %6592 = vmatpush2.bf16.msra.mxu0 %v15180_v39  ;;  %v15254_v39 = vld [vmem:[%s21591_s11 + $0x1424] ss:$92 sps:$4 sm:$0xff]  }
 0x4a5   :  { %11248 = vmatprep.subr.bf16.mxu0 %v15188_v47  ;;  %v15252_v47 = vld [vmem:[%s21591_s11 + $0x1420] ss:$92 sps:$4 sm:$0xff]  }
 0x527   :  { %v13854_v8 = vpop.f32.mrf.mxu0 }
 0x529   :  { %v13855_v59 = vpop.f32.mrf.mxu0 }
 0x52a   :  { %v13856_v13 = vadd.f32 %v13855_v59, %v13854_v8  ;;  %v15194_v59 = vld [vmem:[%s21591_s11 + $0xfd4] ss:$92 sps:$4 sm:$0xff]  }
 0x52b   :  { %v13857_v49 = vpop.f32.mrf.mxu0 }
 0x52c   :  { %v6022_v60 = vadd.f32 %v13856_v13, %v13016_v37  ;;  %v15191_v37 = vld [vmem:[%s21591_s11 + $0x454] ss:$92 sps:$4 sm:$0xff]  }
 0x52d   :  { %v13858_v61 = vpop.f32.mrf.mxu0  ;;  %v15189_v13 = vld [vmem:[%s21591_s11 + $0x450] ss:$92 sps:$4 sm:$0xff]  }
 0x52e   :  { %v6029_v17 = vpack.c.bf16 %v6022_v60, %v6022_v60  ;;  %6028 = vst.msk [vmem:[#allocation2] sm:$0xff] %vm6027_vm2, %v6022_v60  ;;  %v15192_v49 = vld [vmem:[%s21591_s11 + $0xfd0] ss:$92 sps:$4 sm:$0xff]   ;;  %v15197_v60 = vld [vmem:[%s21591_s11 + $0x39c] ss:$92 sps:$4 sm:$0xff]  }
 0x52f   :  { %v15200_v61 = vld [vmem:[%s21591_s11 + $0xf1c] ss:$92 sps:$4 sm:$0xff]  }
 0x530   :  { %13037 = vmatmul.mubr.msk.bf16.vlgmr.msra.gmra.mxu1 %vm6027_vm2, %v6029_v17  ;;  %v15198_v17 = vld [vmem:[%s21591_s11 + $0xf18] ss:$92 sps:$4 sm:$0xff]  }
 0x531   :  { %6521 = vmatpush1.bf16.msra.mxu1 %v15087_v62  ;;  %v15195_v62 = vld [vmem:[%s21591_s11 + $0x398] ss:$92 sps:$4 sm:$0xff]  }
 0x532   :  { %6522 = vmatprep.subr.bf16.mxu1 %v15095_v0  ;;  %v15203_v0 = vld [vmem:[%s21591_s11 + $0x2e4] ss:$92 sps:$4 sm:$0xff]  }
 0x535   :  { %6523 = vmatpush1.bf16.msra.mxu1 %v15093_v27  ;;  %v15206_v27 = vld [vmem:[%s21591_s11 + $0xe64] ss:$92 sps:$4 sm:$0xff]  }
 0x536   :  { %6524 = vmatprep.subr.bf16.mxu1 %v15101_v21  ;;  %v15201_v21 = vld [vmem:[%s21591_s11 + $0x2e0] ss:$92 sps:$4 sm:$0xff]  }
 0x539   :  { %6525 = vmatpush1.bf16.msra.mxu1 %v15099_v2  ;;  %v15204_v2 = vld [vmem:[%s21591_s11 + $0xe60] ss:$92 sps:$4 sm:$0xff]  }
 0x53a   :  { %6526 = vmatprep.subr.bf16.mxu1 %v15107_v36  ;;  %v15209_v36 = vld [vmem:[%s21591_s11 + $0x22c] ss:$92 sps:$4 sm:$0xff]  }
 0x53d   :  { %6527 = vmatpush1.bf16.msra.mxu1 %v15105_v26  ;;  %v15212_v26 = vld [vmem:[%s21591_s11 + $0xdac] ss:$92 sps:$4 sm:$0xff]  }
 0x53e   :  { %6528 = vmatprep.subr.bf16.mxu1 %v15113_v3  ;;  %v15207_v3 = vld [vmem:[%s21591_s11 + $0x228] ss:$92 sps:$4 sm:$0xff]  }
 0x541   :  { %6529 = vmatpush1.bf16.msra.mxu1 %v15111_v11  ;;  %v15210_v11 = vld [vmem:[%s21591_s11 + $0xda8] ss:$92 sps:$4 sm:$0xff]  }
 0x542   :  { %6530 = vmatprep.subr.bf16.mxu1 %v15119_v12  ;;  %v15215_v12 = vld [vmem:[%s21591_s11 + $0x174] ss:$92 sps:$4 sm:$0xff]  }
 0x545   :  { %6531 = vmatpush1.bf16.msra.mxu1 %v15117_v38  ;;  %v15218_v38 = vld [vmem:[%s21591_s11 + $0xcf4] ss:$92 sps:$4 sm:$0xff]  }
 0x546   :  { %6532 = vmatprep.subr.bf16.mxu1 %v15125_v55  ;;  %v15213_v55 = vld [vmem:[%s21591_s11 + $0x170] ss:$92 sps:$4 sm:$0xff]  }
 0x549   :  { %6533 = vmatpush1.bf16.msra.mxu1 %v15123_v15  ;;  %v15216_v15 = vld [vmem:[%s21591_s11 + $0xcf0] ss:$92 sps:$4 sm:$0xff]  }
 0x54a   :  { %6534 = vmatprep.subr.bf16.mxu1 %v15131_v19  ;;  %v15221_v19 = vld [vmem:[%s21591_s11 + $0xbc] ss:$92 sps:$4 sm:$0xff]  }
 0x54d   :  { %6535 = vmatpush1.bf16.msra.mxu1 %v15129_v32  ;;  %v15224_v32 = vld [vmem:[%s21591_s11 + $0xc3c] ss:$92 sps:$4 sm:$0xff]  }
 0x54e   :  { %6536 = vmatprep.subr.bf16.mxu1 %v15137_v7  ;;  %v15219_v7 = vld [vmem:[%s21591_s11 + $0xb8] ss:$92 sps:$4 sm:$0xff]  }
 0x551   :  { %6537 = vmatpush2.bf16.msra.mxu1 %v15135_v22  ;;  %v15222_v22 = vld [vmem:[%s21591_s11 + $0xc38] ss:$92 sps:$4 sm:$0xff]  }
 0x552   :  { %6538 = vmatprep.subr.bf16.mxu1 %v15143_v24  ;;  %v15227_v24 = vld [vmem:[%s21591_s11 + $0x4] ss:$92 sps:$4 sm:$0xff]  }
 0x555   :  { %6539 = vmatpush2.bf16.msra.mxu1 %v15141_v58  ;;  %v15230_v58 = vld [vmem:[%s21591_s11 + $0xb84] ss:$92 sps:$4 sm:$0xff]  }
 0x556   :  { %6540 = vmatprep.subr.bf16.mxu1 %v15149_v9  ;;  %v15225_v9 = vld [vmem:[%s21591_s11] ss:$92 sps:$4 sm:$0xff]  }
 0x559   :  { %6541 = vmatpush2.bf16.msra.mxu1 %v15147_v42  ;;  %v15228_v42 = vld [vmem:[%s21591_s11 + $0xb80] ss:$92 sps:$4 sm:$0xff]  }
 0x55a   :  { %6542 = vmatprep.subr.bf16.mxu1 %v15155_v28  ;;  %v15233_v28 = vld [vmem:[%s21591_s11 + $0xacc] ss:$92 sps:$4 sm:$0xff]  }
 0x55d   :  { %6543 = vmatpush2.bf16.msra.mxu1 %v15153_v18  ;;  %v15236_v18 = vld [vmem:[%s21591_s11 + $0x164c] ss:$92 sps:$4 sm:$0xff]  }
 0x55e   :  { %6544 = vmatprep.subr.bf16.mxu1 %v15161_v34  ;;  %v15231_v34 = vld [vmem:[%s21591_s11 + $0xac8] ss:$92 sps:$4 sm:$0xff]  }
 0x561   :  { %6545 = vmatpush2.bf16.msra.mxu1 %v15159_v33  ;;  %v15234_v33 = vld [vmem:[%s21591_s11 + $0x1648] ss:$92 sps:$4 sm:$0xff]  }
 0x562   :  { %6546 = vmatprep.subr.bf16.mxu1 %v15167_v31  ;;  %v15239_v31 = vld [vmem:[%s21591_s11 + $0xa14] ss:$92 sps:$4 sm:$0xff]  }
 0x565   :  { %6547 = vmatpush2.bf16.msra.mxu1 %v15165_v48  ;;  %v15242_v48 = vld [vmem:[%s21591_s11 + $0x1594] ss:$92 sps:$4 sm:$0xff]  }
 0x566   :  { %6548 = vmatprep.subr.bf16.mxu1 %v15173_v5  ;;  %v15237_v5 = vld [vmem:[%s21591_s11 + $0xa10] ss:$92 sps:$4 sm:$0xff]  }
 0x569   :  { %6549 = vmatpush2.bf16.msra.mxu1 %v15171_v41  ;;  %v15245_v41 = vld [vmem:[%s21591_s11 + $0x95c] ss:$92 sps:$4 sm:$0xff]  }
 0x56a   :  { %6550 = vmatprep.subr.bf16.mxu1 %v15179_v44  ;;  %v15243_v44 = vld [vmem:[%s21591_s11 + $0x958] ss:$92 sps:$4 sm:$0xff]  }
 0x56d   :  { %6551 = vmatpush2.bf16.msra.mxu1 %v15177_v45  ;;  %v15251_v45 = vld [vmem:[%s21591_s11 + $0x8a4] ss:$92 sps:$4 sm:$0xff]  }
 0x56e   :  { %11207 = vmatprep.subr.bf16.mxu1 %v15185_v16  ;;  %v15249_v16 = vld [vmem:[%s21591_s11 + $0x8a0] ss:$92 sps:$4 sm:$0xff]  }
 0x5f0   :  { %v6103_v10 = vpop.f32.mrf.mxu1 }
 0x5f1   :  { %v6104_v1 = vadd.f32 %v6103_v10, %v6039_v43  ;;  %v15260_v43 = vld [vmem:[%s21591_s11 + $0x136c] ss:$92 sps:$4 sm:$0xff]  }
 0x5f2   :  { %v6105_v29 = vpop.f32.mrf.mxu1  ;;  %v15258_v10 = vld [vmem:[%s21591_s11 + $0x1368] ss:$92 sps:$4 sm:$0xff]  }
 0x5f3   :  { %v6106_v53 = vadd.f32 %v6105_v29, %v6043_v52  ;;  %v6110_v35 = vmax.f32 %v6104_v1, 0.0  ;;  %v15255_v52 = vld [vmem:[%s21591_s11 + $0x7e8] ss:$92 sps:$4 sm:$0xff]   ;;  %v15263_v1 = vld [vmem:[%s21591_s11 + $0x734] ss:$92 sps:$4 sm:$0xff]  }
 0x5f4   :  { %v6107_v23 = vpop.f32.mrf.mxu1  ;;  %v15266_v29 = vld [vmem:[%s21591_s11 + $0x12b4] ss:$92 sps:$4 sm:$0xff]  }
 0x5f5   :  { %v6111_v46 = vmax.f32 %v6106_v53, 0.0  ;;  %v6112_v8 = vpack.c.bf16 %v6110_v35, %v6110_v35  ;;  %v15261_v53 = vld [vmem:[%s21591_s11 + $0x730] ss:$92 sps:$4 sm:$0xff]   ;;  %v15269_v23 = vld [vmem:[%s21591_s11 + $0x67c] ss:$92 sps:$4 sm:$0xff]  }
 0x5f6   :  { %v6108_v54 = vpop.f32.mrf.mxu1  ;;  %v15264_v35 = vld [vmem:[%s21591_s11 + $0x12b0] ss:$92 sps:$4 sm:$0xff]  }
 0x5f7   :  { %v6113_v51 = vpack.c.bf16 %v6111_v46, %v6111_v46  ;;  %v15272_v46 = vld [vmem:[%s21591_s11 + $0x11fc] ss:$92 sps:$4 sm:$0xff]  }
 0x5f8   :  { %v15267_v54 = vld [vmem:[%s21591_s11 + $0x678] ss:$92 sps:$4 sm:$0xff]  }
 0x5f9   :  { %6552 = vmatprep.mubr.bf16.mxu1 %v6113_v51  ;;  %6593 = vmatprep.mubr.bf16.mxu0 %v6113_v51  ;;  %v15270_v51 = vld [vmem:[%s21591_s11 + $0x11f8] ss:$92 sps:$4 sm:$0xff]  }
 0x5fa   :  { %6553 = vmatmul.mubr.bf16.vlgmr.msra.gmra.mxu1 %v6112_v8  ;;  %6594 = vmatmul.mubr.bf16.vlgmr.msra.gmra.mxu0 %v6112_v8  ;;  %v15273_v8 = vld [vmem:[%s21591_s11 + $0x5c0] ss:$92 sps:$4 sm:$0xff]  }
 0x5fb   :  { %11208 = vmatpush1.bf16.msra.mxu1 %v15183_v50  ;;  %11249 = vmatpush1.bf16.msra.mxu0 %v15186_v56  ;;  %v15275_v50 = vld [vmem:[%s21591_s11 + $0x5c4] ss:$92 sps:$4 sm:$0xff]  }
 0x5fc   :  { %11209 = vmatprep.subr.bf16.mxu1 %v15191_v37  ;;  %11250 = vmatprep.subr.bf16.mxu0 %v15194_v59  ;;  %v15278_v56 = vld [vmem:[%s21591_s11 + $0x1144] ss:$92 sps:$4 sm:$0xff]   ;;  %v15281_v59 = vld [vmem:[%s21591_s11 + $0x514] ss:$92 sps:$4 sm:$0xff]  }
 0x5fd   :  { %v15276_v37 = vld [vmem:[%s21591_s11 + $0x1140] ss:$92 sps:$4 sm:$0xff]  }
 0x5ff   :  { %11210 = vmatpush1.bf16.msra.mxu1 %v15189_v13  ;;  %11251 = vmatpush1.bf16.msra.mxu0 %v15192_v49  ;;  %v15284_v13 = vld [vmem:[%s21591_s11 + $0x1094] ss:$92 sps:$4 sm:$0xff]   ;;  %v6178_v49 = vld [vmem:[%s21590_s10] sm:$0xf] }
 0x600   :  { %11211 = vmatprep.subr.bf16.mxu1 %v15197_v60  ;;  %11252 = vmatprep.subr.bf16.mxu0 %v15200_v61  ;;  %v6183_v60 = vrot.slane %v6178_v49, %v17252_v63  ;;  %v6191_v61 = vrot.slane %v6178_v49, %v18518_v25 }
 0x603   :  { %11212 = vmatpush1.bf16.msra.mxu1 %v15195_v62  ;;  %11253 = vmatpush1.bf16.msra.mxu0 %v15198_v17  ;;  %v6187_v62 = vrot.slane %v6178_v49, %v17267_v4  ;;  %v6195_v17 = vrot.slane %v6178_v49, %v18527_v6  ;;  %v15341_v49 = vld [vmem:[%s21591_s11 + $0x964] ss:$92 sps:$4 sm:$0xff]  }
 0x604   :  { %11213 = vmatprep.subr.bf16.mxu1 %v15203_v0  ;;  %11254 = vmatprep.subr.bf16.mxu0 %v15206_v27 }
 0x607   :  { %11214 = vmatpush1.bf16.msra.mxu1 %v15201_v21  ;;  %11255 = vmatpush1.bf16.msra.mxu0 %v15204_v2 }
 0x608   :  { %11215 = vmatprep.subr.bf16.mxu1 %v15209_v36  ;;  %11256 = vmatprep.subr.bf16.mxu0 %v15212_v26 }
 0x60b   :  { %11216 = vmatpush1.bf16.msra.mxu1 %v15207_v3  ;;  %11257 = vmatpush1.bf16.msra.mxu0 %v15210_v11 }
 0x60c   :  { %11217 = vmatprep.subr.bf16.mxu1 %v15215_v12  ;;  %11258 = vmatprep.subr.bf16.mxu0 %v15218_v38 }
 0x60f   :  { %11218 = vmatpush1.bf16.msra.mxu1 %v15213_v55  ;;  %11259 = vmatpush1.bf16.msra.mxu0 %v15216_v15 }
 0x610   :  { %11219 = vmatprep.subr.bf16.mxu1 %v15221_v19  ;;  %11260 = vmatprep.subr.bf16.mxu0 %v15224_v32  ;;  %v15279_v19 = vld [vmem:[%s21591_s11 + $0x510] ss:$92 sps:$4 sm:$0xff]  }
 0x611   :  { %v15282_v32 = vld [vmem:[%s21591_s11 + $0x1090] ss:$92 sps:$4 sm:$0xff]  }
 0x613   :  { %11220 = vmatpush1.bf16.msra.mxu1 %v15219_v7  ;;  %11261 = vmatpush1.bf16.msra.mxu0 %v15222_v22 }
 0x614   :  { %11221 = vmatprep.subr.bf16.mxu1 %v15227_v24  ;;  %11262 = vmatprep.subr.bf16.mxu0 %v15230_v58 }
 0x617   :  { %11222 = vmatpush1.bf16.msra.mxu1 %v15225_v9  ;;  %11263 = vmatpush1.bf16.msra.mxu0 %v15228_v42  ;;  %v15287_v9 = vld [vmem:[%s21591_s11 + $0x45c] ss:$92 sps:$4 sm:$0xff]  }
 0x618   :  { %11223 = vmatprep.subr.bf16.mxu1 %v15233_v28  ;;  %11264 = vmatprep.subr.bf16.mxu0 %v15236_v18  ;;  %v15290_v42 = vld [vmem:[%s21591_s11 + $0xfdc] ss:$92 sps:$4 sm:$0xff]  }
 0x619   :  { %v15285_v28 = vld [vmem:[%s21591_s11 + $0x458] ss:$92 sps:$4 sm:$0xff]  }
 0x61a   :  { %v15288_v18 = vld [vmem:[%s21591_s11 + $0xfd8] ss:$92 sps:$4 sm:$0xff]  }
 0x61b   :  { %11224 = vmatpush2.bf16.msra.mxu1 %v15231_v34  ;;  %11265 = vmatpush2.bf16.msra.mxu0 %v15234_v33  ;;  %v15293_v34 = vld [vmem:[%s21591_s11 + $0x3a4] ss:$92 sps:$4 sm:$0xff]  }
 0x61c   :  { %11225 = vmatprep.subr.bf16.mxu1 %v15239_v31  ;;  %11266 = vmatprep.subr.bf16.mxu0 %v15242_v48  ;;  %v15296_v33 = vld [vmem:[%s21591_s11 + $0xf24] ss:$92 sps:$4 sm:$0xff]  }
 0x61d   :  { %v15291_v31 = vld [vmem:[%s21591_s11 + $0x3a0] ss:$92 sps:$4 sm:$0xff]  }
 0x61e   :  { %v15294_v48 = vld [vmem:[%s21591_s11 + $0xf20] ss:$92 sps:$4 sm:$0xff]  }
 0x61f   :  { %11226 = vmatpush2.bf16.msra.mxu1 %v15237_v5  ;;  %11267 = vmatpush2.bf16.msra.mxu0 %v15240_v30  ;;  %v15299_v5 = vld [vmem:[%s21591_s11 + $0x2ec] ss:$92 sps:$4 sm:$0xff]  }
 0x620   :  { %11227 = vmatprep.subr.bf16.mxu1 %v15245_v41  ;;  %11268 = vmatprep.subr.bf16.mxu0 %v15248_v40  ;;  %v15302_v30 = vld [vmem:[%s21591_s11 + $0xe6c] ss:$92 sps:$4 sm:$0xff]  }
 0x621   :  { %v15297_v41 = vld [vmem:[%s21591_s11 + $0x2e8] ss:$92 sps:$4 sm:$0xff]  }
 0x622   :  { %v15300_v40 = vld [vmem:[%s21591_s11 + $0xe68] ss:$92 sps:$4 sm:$0xff]  }
 0x623   :  { %11228 = vmatpush2.bf16.msra.mxu1 %v15243_v44  ;;  %11269 = vmatpush2.bf16.msra.mxu0 %v15246_v14  ;;  %v15305_v44 = vld [vmem:[%s21591_s11 + $0x234] ss:$92 sps:$4 sm:$0xff]  }
 0x624   :  { %11229 = vmatprep.subr.bf16.mxu1 %v15251_v45  ;;  %11270 = vmatprep.subr.bf16.mxu0 %v15254_v39  ;;  %v15308_v14 = vld [vmem:[%s21591_s11 + $0xdb4] ss:$92 sps:$4 sm:$0xff]  }
 0x625   :  { %v15303_v45 = vld [vmem:[%s21591_s11 + $0x230] ss:$92 sps:$4 sm:$0xff]  }
 0x626   :  { %v15306_v39 = vld [vmem:[%s21591_s11 + $0xdb0] ss:$92 sps:$4 sm:$0xff]  }
 0x627   :  { %11230 = vmatpush2.bf16.msra.mxu1 %v15249_v16  ;;  %11271 = vmatpush2.bf16.msra.mxu0 %v15252_v47  ;;  %v15311_v16 = vld [vmem:[%s21591_s11 + $0x17c] ss:$92 sps:$4 sm:$0xff]  }
 0x628   :  { %11231 = vmatprep.subr.bf16.mxu1 %v15257_v20  ;;  %11272 = vmatprep.subr.bf16.mxu0 %v15260_v43  ;;  %v15314_v47 = vld [vmem:[%s21591_s11 + $0xcfc] ss:$92 sps:$4 sm:$0xff]  }
 0x629   :  { %v15309_v20 = vld [vmem:[%s21591_s11 + $0x178] ss:$92 sps:$4 sm:$0xff]  }
 0x62a   :  { %v15312_v43 = vld [vmem:[%s21591_s11 + $0xcf8] ss:$92 sps:$4 sm:$0xff]  }
 0x62b   :  { %11232 = vmatpush2.bf16.msra.mxu1 %v15255_v52  ;;  %11273 = vmatpush2.bf16.msra.mxu0 %v15258_v10  ;;  %v15317_v52 = vld [vmem:[%s21591_s11 + $0xc4] ss:$92 sps:$4 sm:$0xff]  }
 0x62c   :  { %11233 = vmatprep.subr.bf16.mxu1 %v15263_v1  ;;  %11274 = vmatprep.subr.bf16.mxu0 %v15266_v29  ;;  %v15320_v10 = vld [vmem:[%s21591_s11 + $0xc44] ss:$92 sps:$4 sm:$0xff]  }
 0x62d   :  { %v15315_v1 = vld [vmem:[%s21591_s11 + $0xc0] ss:$92 sps:$4 sm:$0xff]  }
 0x62e   :  { %v15318_v29 = vld [vmem:[%s21591_s11 + $0xc40] ss:$92 sps:$4 sm:$0xff]  }
 0x62f   :  { %11234 = vmatpush2.bf16.msra.mxu1 %v15261_v53  ;;  %11275 = vmatpush2.bf16.msra.mxu0 %v15264_v35  ;;  %v15323_v53 = vld [vmem:[%s21591_s11 + $0xc] ss:$92 sps:$4 sm:$0xff]  }
 0x630   :  { %11235 = vmatprep.subr.bf16.mxu1 %v15269_v23  ;;  %11276 = vmatprep.subr.bf16.mxu0 %v15272_v46  ;;  %v15326_v35 = vld [vmem:[%s21591_s11 + $0xb8c] ss:$92 sps:$4 sm:$0xff]  }
 0x631   :  { %v15321_v23 = vld [vmem:[%s21591_s11 + $0x8] ss:$92 sps:$4 sm:$0xff]  }
 0x632   :  { %v15324_v46 = vld [vmem:[%s21591_s11 + $0xb88] ss:$92 sps:$4 sm:$0xff]  }
 0x633   :  { %11236 = vmatpush2.bf16.msra.mxu1 %v15267_v54  ;;  %11277 = vmatpush2.bf16.msra.mxu0 %v15270_v51  ;;  %v15329_v54 = vld [vmem:[%s21591_s11 + $0xad4] ss:$92 sps:$4 sm:$0xff]  }
 0x634   :  { %11237 = vmatprep.subr.bf16.mxu1 %v15275_v50  ;;  %11278 = vmatprep.subr.bf16.mxu0 %v15278_v56  ;;  %v15332_v51 = vld [vmem:[%s21591_s11 + $0x1654] ss:$92 sps:$4 sm:$0xff]  }
 0x635   :  { %v15327_v50 = vld [vmem:[%s21591_s11 + $0xad0] ss:$92 sps:$4 sm:$0xff]  }
 0x636   :  { %v15330_v56 = vld [vmem:[%s21591_s11 + $0x1650] ss:$92 sps:$4 sm:$0xff]  }
 0x637   :  { %11238 = vmatpush2.bf16.msra.mxu1 %v15273_v8  ;;  %11279 = vmatpush2.bf16.msra.mxu0 %v15276_v37  ;;  %v15335_v8 = vld [vmem:[%s21591_s11 + $0xa1c] ss:$92 sps:$4 sm:$0xff]  }
 0x638   :  { %11289 = vmatprep.subr.bf16.mxu1 %v15281_v59  ;;  %11330 = vmatprep.subr.bf16.mxu0 %v15284_v13  ;;  %v15338_v37 = vld [vmem:[%s21591_s11 + $0x159c] ss:$92 sps:$4 sm:$0xff]  }
 0x639   :  { %v15333_v59 = vld [vmem:[%s21591_s11 + $0xa18] ss:$92 sps:$4 sm:$0xff]  }
 0x63a   :  { %v15336_v13 = vld [vmem:[%s21591_s11 + $0x1598] ss:$92 sps:$4 sm:$0xff]  }
 0x6ba   :  { %v6554_v0 = vpop.f32.mrf.mxu1  ;;  %v6595_v27 = vpop.f32.mrf.mxu0 }
 0x6bb   :  { %v6555_v21 = vadd.f32 %v6554_v0, %v6183_v60  ;;  %v6596_v2 = vadd.f32 %v6595_v27, %v6191_v61  ;;  %v15344_v60 = vld [vmem:[%s21591_s11 + $0x14e4] ss:$92 sps:$4 sm:$0xff]   ;;  %v15350_v0 = vld [vmem:[%s21591_s11 + $0x142c] ss:$92 sps:$4 sm:$0xff]  }
 0x6bc   :  { %v6556_v36 = vpop.f32.mrf.mxu1  ;;  %v6597_v26 = vpop.f32.mrf.mxu0  ;;  %v15339_v61 = vld [vmem:[%s21591_s11 + $0x960] ss:$92 sps:$4 sm:$0xff]   ;;  %v15345_v27 = vld [vmem:[%s21591_s11 + $0x8a8] ss:$92 sps:$4 sm:$0xff]  }
 0x6bd   :  { %v6557_v3 = vadd.f32 %v6556_v36, %v6187_v62  ;;  %v6598_v11 = vadd.f32 %v6597_v26, %v6195_v17  ;;  %v19444_v7 = vpack.c.bf16 %v6555_v21, %v6555_v21  ;;  %v19446_v22 = vpack.c.bf16 %v6596_v2, %v6596_v2  ;;  %v15342_v62 = vld [vmem:[%s21591_s11 + $0x14e0] ss:$92 sps:$4 sm:$0xff]   ;;  %v15347_v17 = vld [vmem:[%s21591_s11 + $0x8ac] ss:$92 sps:$4 sm:$0xff]   ;;  %v15353_v2 = vld [vmem:[%s21591_s11 + $0x7f4] ss:$92 sps:$4 sm:$0xff]  }
 0x6be   :  { %v6558_v12 = vpop.f32.mrf.mxu1  ;;  %v6599_v38 = vpop.f32.mrf.mxu0  ;;  %v15348_v21 = vld [vmem:[%s21591_s11 + $0x1428] ss:$92 sps:$4 sm:$0xff]   ;;  %v15356_v36 = vld [vmem:[%s21591_s11 + $0x1374] ss:$92 sps:$4 sm:$0xff]  }
 0x6bf   :  { %v19434_v55 = vpack.c.bf16 %v6557_v3, %v6557_v3  ;;  %v19436_v15 = vpack.c.bf16 %v6598_v11, %v6598_v11  ;;  %v15351_v26 = vld [vmem:[%s21591_s11 + $0x7f0] ss:$92 sps:$4 sm:$0xff]   ;;  %v15359_v11 = vld [vmem:[%s21591_s11 + $0x73c] ss:$92 sps:$4 sm:$0xff]  }
 0x6c0   :  { %v6559_v24 = vpop.f32.mrf.mxu1  ;;  %v6600_v58 = vpop.f32.mrf.mxu0  ;;  %v15354_v3 = vld [vmem:[%s21591_s11 + $0x1370] ss:$92 sps:$4 sm:$0xff]   ;;  %v15362_v12 = vld [vmem:[%s21591_s11 + $0x12bc] ss:$92 sps:$4 sm:$0xff]  }
 0x6c1   :  { %11239 = vmatprep.mubr.bf16.mxu1 %v19434_v55  ;;  %11280 = vmatprep.mubr.bf16.mxu0 %v19436_v15  ;;  %v15357_v38 = vld [vmem:[%s21591_s11 + $0x738] ss:$92 sps:$4 sm:$0xff]   ;;  %v15368_v24 = vld [vmem:[%s21591_s11 + $0x1204] ss:$92 sps:$4 sm:$0xff]  }
 0x6c2   :  { %11240 = vmatmul.mubr.bf16.vlgmr.msra.gmra.mxu1 %v19444_v7  ;;  %11281 = vmatmul.mubr.bf16.vlgmr.msra.gmra.mxu0 %v19446_v22  ;;  %v15363_v58 = vld [vmem:[%s21591_s11 + $0x680] ss:$92 sps:$4 sm:$0xff]  }
 0x6c3   :  { %11290 = vmatpush1.bf16.msra.mxu1 %v15279_v19  ;;  %11331 = vmatpush1.bf16.msra.mxu0 %v15282_v32  ;;  %v15360_v19 = vld [vmem:[%s21591_s11 + $0x12b8] ss:$92 sps:$4 sm:$0xff]   ;;  %v15365_v32 = vld [vmem:[%s21591_s11 + $0x684] ss:$92 sps:$4 sm:$0xff]  }
 0x6c4   :  { %11321 = vmatprep.mubr.bf16.mxu1 %v19434_v55  ;;  %11362 = vmatprep.mubr.bf16.mxu0 %v19436_v15 }
 0x6c5   :  { %11291 = vmatprep.subr.bf16.mxu1 %v15287_v9  ;;  %11332 = vmatprep.subr.bf16.mxu0 %v15290_v42  ;;  %v15366_v9 = vld [vmem:[%s21591_s11 + $0x1200] ss:$92 sps:$4 sm:$0xff]   ;;  %v15371_v42 = vld [vmem:[%s21591_s11 + $0x5cc] ss:$92 sps:$4 sm:$0xff]  }
 0x6c7   :  { %11292 = vmatpush1.bf16.msra.mxu1 %v15285_v28  ;;  %11333 = vmatpush1.bf16.msra.mxu0 %v15288_v18  ;;  %v15374_v28 = vld [vmem:[%s21591_s11 + $0x114c] ss:$92 sps:$4 sm:$0xff]  }
 0x6c8   :  { %11293 = vmatprep.subr.bf16.mxu1 %v15293_v34  ;;  %11334 = vmatprep.subr.bf16.mxu0 %v15296_v33  ;;  %v15369_v18 = vld [vmem:[%s21591_s11 + $0x5c8] ss:$92 sps:$4 sm:$0xff]   ;;  %v15377_v33 = vld [vmem:[%s21591_s11 + $0x51c] ss:$92 sps:$4 sm:$0xff]  }
 0x6c9   :  { %v15372_v34 = vld [vmem:[%s21591_s11 + $0x1148] ss:$92 sps:$4 sm:$0xff]  }
 0x6cb   :  { %11294 = vmatpush1.bf16.msra.mxu1 %v15291_v31  ;;  %11335 = vmatpush1.bf16.msra.mxu0 %v15294_v48  ;;  %v15380_v31 = vld [vmem:[%s21591_s11 + $0x109c] ss:$92 sps:$4 sm:$0xff]  }
 0x6cc   :  { %11295 = vmatprep.subr.bf16.mxu1 %v15299_v5  ;;  %11336 = vmatprep.subr.bf16.mxu0 %v15302_v30  ;;  %v15375_v48 = vld [vmem:[%s21591_s11 + $0x518] ss:$92 sps:$4 sm:$0xff]   ;;  %v15383_v30 = vld [vmem:[%s21591_s11 + $0x464] ss:$92 sps:$4 sm:$0xff]  }
 0x6cd   :  { %v15378_v5 = vld [vmem:[%s21591_s11 + $0x1098] ss:$92 sps:$4 sm:$0xff]  }
 0x6cf   :  { %11296 = vmatpush1.bf16.msra.mxu1 %v15297_v41  ;;  %11337 = vmatpush1.bf16.msra.mxu0 %v15300_v40  ;;  %v15386_v41 = vld [vmem:[%s21591_s11 + $0xfe4] ss:$92 sps:$4 sm:$0xff]  }
 0x6d0   :  { %11297 = vmatprep.subr.bf16.mxu1 %v15305_v44  ;;  %11338 = vmatprep.subr.bf16.mxu0 %v15308_v14  ;;  %v15381_v40 = vld [vmem:[%s21591_s11 + $0x460] ss:$92 sps:$4 sm:$0xff]   ;;  %v15389_v14 = vld [vmem:[%s21591_s11 + $0x3ac] ss:$92 sps:$4 sm:$0xff]  }
 0x6d1   :  { %v15384_v44 = vld [vmem:[%s21591_s11 + $0xfe0] ss:$92 sps:$4 sm:$0xff]  }
 0x6d3   :  { %11298 = vmatpush1.bf16.msra.mxu1 %v15303_v45  ;;  %11339 = vmatpush1.bf16.msra.mxu0 %v15306_v39  ;;  %v15392_v45 = vld [vmem:[%s21591_s11 + $0xf2c] ss:$92 sps:$4 sm:$0xff]  }
 0x6d4   :  { %11299 = vmatprep.subr.bf16.mxu1 %v15311_v16  ;;  %11340 = vmatprep.subr.bf16.mxu0 %v15314_v47  ;;  %v15387_v39 = vld [vmem:[%s21591_s11 + $0x3a8] ss:$92 sps:$4 sm:$0xff]   ;;  %v15395_v47 = vld [vmem:[%s21591_s11 + $0x2f4] ss:$92 sps:$4 sm:$0xff]  }
 0x6d5   :  { %v15390_v16 = vld [vmem:[%s21591_s11 + $0xf28] ss:$92 sps:$4 sm:$0xff]  }
 0x6d7   :  { %11300 = vmatpush1.bf16.msra.mxu1 %v15309_v20  ;;  %11341 = vmatpush1.bf16.msra.mxu0 %v15312_v43  ;;  %v15398_v20 = vld [vmem:[%s21591_s11 + $0xe74] ss:$92 sps:$4 sm:$0xff]  }
 0x6d8   :  { %11301 = vmatprep.subr.bf16.mxu1 %v15317_v52  ;;  %11342 = vmatprep.subr.bf16.mxu0 %v15320_v10  ;;  %v15393_v43 = vld [vmem:[%s21591_s11 + $0x2f0] ss:$92 sps:$4 sm:$0xff]   ;;  %v15401_v10 = vld [vmem:[%s21591_s11 + $0x23c] ss:$92 sps:$4 sm:$0xff]  }
 0x6d9   :  { %v15396_v52 = vld [vmem:[%s21591_s11 + $0xe70] ss:$92 sps:$4 sm:$0xff]  }
 0x6db   :  { %11302 = vmatpush1.bf16.msra.mxu1 %v15315_v1  ;;  %11343 = vmatpush1.bf16.msra.mxu0 %v15318_v29  ;;  %v15404_v1 = vld [vmem:[%s21591_s11 + $0xdbc] ss:$92 sps:$4 sm:$0xff]  }
 0x6dc   :  { %11303 = vmatprep.subr.bf16.mxu1 %v15323_v53  ;;  %11344 = vmatprep.subr.bf16.mxu0 %v15326_v35  ;;  %v15399_v29 = vld [vmem:[%s21591_s11 + $0x238] ss:$92 sps:$4 sm:$0xff]   ;;  %v15407_v35 = vld [vmem:[%s21591_s11 + $0x184] ss:$92 sps:$4 sm:$0xff]  }
 0x6dd   :  { %v15402_v53 = vld [vmem:[%s21591_s11 + $0xdb8] ss:$92 sps:$4 sm:$0xff]  }
 0x6df   :  { %11304 = vmatpush1.bf16.msra.mxu1 %v15321_v23  ;;  %11345 = vmatpush1.bf16.msra.mxu0 %v15324_v46  ;;  %v15410_v23 = vld [vmem:[%s21591_s11 + $0xd04] ss:$92 sps:$4 sm:$0xff]  }
 0x6e0   :  { %11305 = vmatprep.subr.bf16.mxu1 %v15329_v54  ;;  %11346 = vmatprep.subr.bf16.mxu0 %v15332_v51  ;;  %v15405_v46 = vld [vmem:[%s21591_s11 + $0x180] ss:$92 sps:$4 sm:$0xff]   ;;  %v15413_v51 = vld [vmem:[%s21591_s11 + $0xcc] ss:$92 sps:$4 sm:$0xff]  }
 0x6e1   :  { %v15408_v54 = vld [vmem:[%s21591_s11 + $0xd00] ss:$92 sps:$4 sm:$0xff]  }
 0x6e3   :  { %11306 = vmatpush2.bf16.msra.mxu1 %v15327_v50  ;;  %11347 = vmatpush2.bf16.msra.mxu0 %v15330_v56  ;;  %v15416_v50 = vld [vmem:[%s21591_s11 + $0xc4c] ss:$92 sps:$4 sm:$0xff]  }
 0x6e4   :  { %11307 = vmatprep.subr.bf16.mxu1 %v15335_v8  ;;  %11348 = vmatprep.subr.bf16.mxu0 %v15338_v37  ;;  %v15411_v56 = vld [vmem:[%s21591_s11 + $0xc8] ss:$92 sps:$4 sm:$0xff]   ;;  %v15419_v37 = vld [vmem:[%s21591_s11 + $0x14] ss:$92 sps:$4 sm:$0xff]  }
 0x6e5   :  { %v15414_v8 = vld [vmem:[%s21591_s11 + $0xc48] ss:$92 sps:$4 sm:$0xff]  }
 0x6e7   :  { %11308 = vmatpush2.bf16.msra.mxu1 %v15333_v59  ;;  %11349 = vmatpush2.bf16.msra.mxu0 %v15336_v13  ;;  %v15422_v59 = vld [vmem:[%s21591_s11 + $0xb94] ss:$92 sps:$4 sm:$0xff]  }
 0x6e8   :  { %11309 = vmatprep.subr.bf16.mxu1 %v15341_v49  ;;  %11350 = vmatprep.subr.bf16.mxu0 %v15344_v60  ;;  %v15417_v13 = vld [vmem:[%s21591_s11 + $0x10] ss:$92 sps:$4 sm:$0xff]   ;;  %v15425_v60 = vld [vmem:[%s21591_s11 + $0xadc] ss:$92 sps:$4 sm:$0xff]  }
 0x6e9   :  { %v15420_v49 = vld [vmem:[%s21591_s11 + $0xb90] ss:$92 sps:$4 sm:$0xff]  }
 0x6eb   :  { %11310 = vmatpush2.bf16.msra.mxu1 %v15339_v61  ;;  %11351 = vmatpush2.bf16.msra.mxu0 %v15342_v62  ;;  %v15428_v61 = vld [vmem:[%s21591_s11 + $0x165c] ss:$92 sps:$4 sm:$0xff]  }
 0x6ec   :  { %11311 = vmatprep.subr.bf16.mxu1 %v15347_v17  ;;  %11352 = vmatprep.subr.bf16.mxu0 %v15350_v0  ;;  %v15423_v62 = vld [vmem:[%s21591_s11 + $0xad8] ss:$92 sps:$4 sm:$0xff]   ;;  %v15431_v0 = vld [vmem:[%s21591_s11 + $0xa24] ss:$92 sps:$4 sm:$0xff]  }
 0x6ed   :  { %v15426_v17 = vld [vmem:[%s21591_s11 + $0x1658] ss:$92 sps:$4 sm:$0xff]  }
 0x6ef   :  { %11312 = vmatpush2.bf16.msra.mxu1 %v15345_v27  ;;  %11353 = vmatpush2.bf16.msra.mxu0 %v15348_v21  ;;  %v15434_v27 = vld [vmem:[%s21591_s11 + $0x15a4] ss:$92 sps:$4 sm:$0xff]  }
 0x6f0   :  { %11313 = vmatprep.subr.bf16.mxu1 %v15353_v2  ;;  %11354 = vmatprep.subr.bf16.mxu0 %v15356_v36  ;;  %v15429_v21 = vld [vmem:[%s21591_s11 + $0xa20] ss:$92 sps:$4 sm:$0xff]   ;;  %v15437_v36 = vld [vmem:[%s21591_s11 + $0x96c] ss:$92 sps:$4 sm:$0xff]  }
 0x6f1   :  { %v15432_v2 = vld [vmem:[%s21591_s11 + $0x15a0] ss:$92 sps:$4 sm:$0xff]  }
 0x6f3   :  { %11314 = vmatpush2.bf16.msra.mxu1 %v15351_v26  ;;  %11355 = vmatpush2.bf16.msra.mxu0 %v15354_v3  ;;  %v15440_v26 = vld [vmem:[%s21591_s11 + $0x14ec] ss:$92 sps:$4 sm:$0xff]  }
 0x6f4   :  { %11315 = vmatprep.subr.bf16.mxu1 %v15359_v11  ;;  %11356 = vmatprep.subr.bf16.mxu0 %v15362_v12  ;;  %v15435_v3 = vld [vmem:[%s21591_s11 + $0x968] ss:$92 sps:$4 sm:$0xff]   ;;  %v15443_v12 = vld [vmem:[%s21591_s11 + $0x8b4] ss:$92 sps:$4 sm:$0xff]  }
 0x6f5   :  { %v15438_v11 = vld [vmem:[%s21591_s11 + $0x14e8] ss:$92 sps:$4 sm:$0xff]  }
 0x6f7   :  { %11316 = vmatpush2.bf16.msra.mxu1 %v15357_v38  ;;  %11357 = vmatpush2.bf16.msra.mxu0 %v15360_v19  ;;  %v15446_v38 = vld [vmem:[%s21591_s11 + $0x1434] ss:$92 sps:$4 sm:$0xff]  }
 0x6f8   :  { %11317 = vmatprep.subr.bf16.mxu1 %v15365_v32  ;;  %11358 = vmatprep.subr.bf16.mxu0 %v15368_v24  ;;  %v15441_v19 = vld [vmem:[%s21591_s11 + $0x8b0] ss:$92 sps:$4 sm:$0xff]   ;;  %v15449_v24 = vld [vmem:[%s21591_s11 + $0x7fc] ss:$92 sps:$4 sm:$0xff]  }
 0x6f9   :  { %v15444_v32 = vld [vmem:[%s21591_s11 + $0x1430] ss:$92 sps:$4 sm:$0xff]  }
 0x6fb   :  { %11318 = vmatpush2.bf16.msra.mxu1 %v15363_v58  ;;  %11359 = vmatpush2.bf16.msra.mxu0 %v15366_v9  ;;  %v15452_v58 = vld [vmem:[%s21591_s11 + $0x137c] ss:$92 sps:$4 sm:$0xff]  }
 0x6fc   :  { %11319 = vmatprep.subr.bf16.mxu1 %v15371_v42  ;;  %11360 = vmatprep.subr.bf16.mxu0 %v15374_v28  ;;  %v15447_v9 = vld [vmem:[%s21591_s11 + $0x7f8] ss:$92 sps:$4 sm:$0xff]   ;;  %v15455_v28 = vld [vmem:[%s21591_s11 + $0x744] ss:$92 sps:$4 sm:$0xff]  }
 0x6fd   :  { %v15450_v42 = vld [vmem:[%s21591_s11 + $0x1378] ss:$92 sps:$4 sm:$0xff]  }
 0x6ff   :  { %11320 = vmatpush2.bf16.msra.mxu1 %v15369_v18  ;;  %11361 = vmatpush2.bf16.msra.mxu0 %v15372_v34  ;;  %v15458_v18 = vld [vmem:[%s21591_s11 + $0x12c4] ss:$92 sps:$4 sm:$0xff]  }
 0x700   :  { %11371 = vmatprep.subr.bf16.mxu1 %v15377_v33  ;;  %11412 = vmatprep.subr.bf16.mxu0 %v15380_v31  ;;  %v15453_v34 = vld [vmem:[%s21591_s11 + $0x740] ss:$92 sps:$4 sm:$0xff]   ;;  %v15461_v31 = vld [vmem:[%s21591_s11 + $0x68c] ss:$92 sps:$4 sm:$0xff]  }
 0x701   :  { %v15456_v33 = vld [vmem:[%s21591_s11 + $0x12c0] ss:$92 sps:$4 sm:$0xff]  }
 0x702   :  { %11322 = vmatmul.mubr.bf16.vlgmr.msra.gmra.mxu1 %v19444_v7  ;;  %11363 = vmatmul.mubr.bf16.vlgmr.msra.gmra.mxu0 %v19446_v22 }
 0x703   :  { %11372 = vmatpush1.bf16.msra.mxu1 %v15375_v48  ;;  %11403 = vmatprep.mubr.bf16.mxu1 %v19434_v55  ;;  %v15464_v48 = vld [vmem:[%s21591_s11 + $0x120c] ss:$92 sps:$4 sm:$0xff]  }
 0x704   :  { %11413 = vmatpush1.bf16.msra.mxu0 %v15378_v5  ;;  %11444 = vmatprep.mubr.bf16.mxu0 %v19436_v15  ;;  %v15459_v5 = vld [vmem:[%s21591_s11 + $0x688] ss:$92 sps:$4 sm:$0xff]  }
 0x705   :  { %11373 = vmatprep.subr.bf16.mxu1 %v15383_v30  ;;  %11414 = vmatprep.subr.bf16.mxu0 %v15386_v41  ;;  %v15462_v30 = vld [vmem:[%s21591_s11 + $0x1208] ss:$92 sps:$4 sm:$0xff]   ;;  %v15467_v41 = vld [vmem:[%s21591_s11 + $0x5d4] ss:$92 sps:$4 sm:$0xff]  }
 0x707   :  { %11374 = vmatpush1.bf16.msra.mxu1 %v15381_v40  ;;  %v15470_v40 = vld [vmem:[%s21591_s11 + $0x1154] ss:$92 sps:$4 sm:$0xff]  }
 0x708   :  { %11415 = vmatpush1.bf16.msra.mxu0 %v15384_v44  ;;  %11375 = vmatprep.subr.bf16.mxu1 %v15389_v14  ;;  %v15465_v44 = vld [vmem:[%s21591_s11 + $0x5d0] ss:$92 sps:$4 sm:$0xff]  }
 0x709   :  { %11416 = vmatprep.subr.bf16.mxu0 %v15392_v45  ;;  %v15468_v14 = vld [vmem:[%s21591_s11 + $0x1150] ss:$92 sps:$4 sm:$0xff]   ;;  %v15473_v45 = vld [vmem:[%s21591_s11 + $0x524] ss:$92 sps:$4 sm:$0xff]  }
 0x70b   :  { %11376 = vmatpush1.bf16.msra.mxu1 %v15387_v39  ;;  %v15476_v39 = vld [vmem:[%s21591_s11 + $0x10a4] ss:$92 sps:$4 sm:$0xff]  }
 0x70c   :  { %11417 = vmatpush1.bf16.msra.mxu0 %v15390_v16  ;;  %11377 = vmatprep.subr.bf16.mxu1 %v15395_v47  ;;  %v15471_v16 = vld [vmem:[%s21591_s11 + $0x520] ss:$92 sps:$4 sm:$0xff]  }
 0x70d   :  { %11418 = vmatprep.subr.bf16.mxu0 %v15398_v20  ;;  %v15474_v47 = vld [vmem:[%s21591_s11 + $0x10a0] ss:$92 sps:$4 sm:$0xff]   ;;  %v15479_v20 = vld [vmem:[%s21591_s11 + $0x46c] ss:$92 sps:$4 sm:$0xff]  }
 0x70f   :  { %11378 = vmatpush1.bf16.msra.mxu1 %v15393_v43  ;;  %v15482_v43 = vld [vmem:[%s21591_s11 + $0xfec] ss:$92 sps:$4 sm:$0xff]  }
 0x710   :  { %11419 = vmatpush1.bf16.msra.mxu0 %v15396_v52  ;;  %11379 = vmatprep.subr.bf16.mxu1 %v15401_v10  ;;  %v15477_v52 = vld [vmem:[%s21591_s11 + $0x468] ss:$92 sps:$4 sm:$0xff]  }
 0x711   :  { %11420 = vmatprep.subr.bf16.mxu0 %v15404_v1  ;;  %v15480_v10 = vld [vmem:[%s21591_s11 + $0xfe8] ss:$92 sps:$4 sm:$0xff]   ;;  %v15485_v1 = vld [vmem:[%s21591_s11 + $0x3b4] ss:$92 sps:$4 sm:$0xff]  }
 0x713   :  { %11380 = vmatpush1.bf16.msra.mxu1 %v15399_v29  ;;  %v15488_v29 = vld [vmem:[%s21591_s11 + $0xf34] ss:$92 sps:$4 sm:$0xff]  }
 0x714   :  { %11421 = vmatpush1.bf16.msra.mxu0 %v15402_v53  ;;  %11381 = vmatprep.subr.bf16.mxu1 %v15407_v35  ;;  %v15483_v53 = vld [vmem:[%s21591_s11 + $0x3b0] ss:$92 sps:$4 sm:$0xff]  }
 0x715   :  { %11422 = vmatprep.subr.bf16.mxu0 %v15410_v23  ;;  %v15486_v35 = vld [vmem:[%s21591_s11 + $0xf30] ss:$92 sps:$4 sm:$0xff]   ;;  %v15491_v23 = vld [vmem:[%s21591_s11 + $0x2fc] ss:$92 sps:$4 sm:$0xff]  }
 0x717   :  { %11382 = vmatpush1.bf16.msra.mxu1 %v15405_v46  ;;  %v15494_v46 = vld [vmem:[%s21591_s11 + $0xe7c] ss:$92 sps:$4 sm:$0xff]  }
 0x718   :  { %11423 = vmatpush1.bf16.msra.mxu0 %v15408_v54  ;;  %11383 = vmatprep.subr.bf16.mxu1 %v15413_v51  ;;  %v15489_v54 = vld [vmem:[%s21591_s11 + $0x2f8] ss:$92 sps:$4 sm:$0xff]  }
 0x719   :  { %11424 = vmatprep.subr.bf16.mxu0 %v15416_v50  ;;  %v15492_v51 = vld [vmem:[%s21591_s11 + $0xe78] ss:$92 sps:$4 sm:$0xff]   ;;  %v15497_v50 = vld [vmem:[%s21591_s11 + $0x244] ss:$92 sps:$4 sm:$0xff]  }
 0x71b   :  { %11384 = vmatpush1.bf16.msra.mxu1 %v15411_v56  ;;  %v15500_v56 = vld [vmem:[%s21591_s11 + $0xdc4] ss:$92 sps:$4 sm:$0xff]  }
 0x71c   :  { %11425 = vmatpush1.bf16.msra.mxu0 %v15414_v8  ;;  %11385 = vmatprep.subr.bf16.mxu1 %v15419_v37  ;;  %v15495_v8 = vld [vmem:[%s21591_s11 + $0x240] ss:$92 sps:$4 sm:$0xff]  }
 0x71d   :  { %11426 = vmatprep.subr.bf16.mxu0 %v15422_v59  ;;  %v15498_v37 = vld [vmem:[%s21591_s11 + $0xdc0] ss:$92 sps:$4 sm:$0xff]   ;;  %v15503_v59 = vld [vmem:[%s21591_s11 + $0x18c] ss:$92 sps:$4 sm:$0xff]  }
 0x71f   :  { %11386 = vmatpush1.bf16.msra.mxu1 %v15417_v13  ;;  %v15506_v13 = vld [vmem:[%s21591_s11 + $0xd0c] ss:$92 sps:$4 sm:$0xff]  }
 0x720   :  { %11427 = vmatpush1.bf16.msra.mxu0 %v15420_v49  ;;  %11387 = vmatprep.subr.bf16.mxu1 %v15425_v60  ;;  %v15501_v49 = vld [vmem:[%s21591_s11 + $0x188] ss:$92 sps:$4 sm:$0xff]  }
 0x721   :  { %11428 = vmatprep.subr.bf16.mxu0 %v15428_v61  ;;  %v15504_v60 = vld [vmem:[%s21591_s11 + $0xd08] ss:$92 sps:$4 sm:$0xff]   ;;  %v15509_v61 = vld [vmem:[%s21591_s11 + $0xd4] ss:$92 sps:$4 sm:$0xff]  }
 0x723   :  { %11388 = vmatpush2.bf16.msra.mxu1 %v15423_v62  ;;  %v15512_v62 = vld [vmem:[%s21591_s11 + $0xc54] ss:$92 sps:$4 sm:$0xff]  }
 0x724   :  { %11429 = vmatpush2.bf16.msra.mxu0 %v15426_v17  ;;  %11389 = vmatprep.subr.bf16.mxu1 %v15431_v0  ;;  %v15507_v17 = vld [vmem:[%s21591_s11 + $0xd0] ss:$92 sps:$4 sm:$0xff]  }
 0x725   :  { %11430 = vmatprep.subr.bf16.mxu0 %v15434_v27  ;;  %v15510_v0 = vld [vmem:[%s21591_s11 + $0xc50] ss:$92 sps:$4 sm:$0xff]   ;;  %v15515_v27 = vld [vmem:[%s21591_s11 + $0x1c] ss:$92 sps:$4 sm:$0xff]  }
 0x727   :  { %11390 = vmatpush2.bf16.msra.mxu1 %v15429_v21  ;;  %v15518_v21 = vld [vmem:[%s21591_s11 + $0xb9c] ss:$92 sps:$4 sm:$0xff]  }
 0x728   :  { %11431 = vmatpush2.bf16.msra.mxu0 %v15432_v2  ;;  %11391 = vmatprep.subr.bf16.mxu1 %v15437_v36  ;;  %v15513_v2 = vld [vmem:[%s21591_s11 + $0x18] ss:$92 sps:$4 sm:$0xff]  }
 0x729   :  { %11432 = vmatprep.subr.bf16.mxu0 %v15440_v26  ;;  %v15516_v36 = vld [vmem:[%s21591_s11 + $0xb98] ss:$92 sps:$4 sm:$0xff]   ;;  %v15521_v26 = vld [vmem:[%s21591_s11 + $0xae4] ss:$92 sps:$4 sm:$0xff]  }
 0x72b   :  { %11392 = vmatpush2.bf16.msra.mxu1 %v15435_v3  ;;  %v15524_v3 = vld [vmem:[%s21591_s11 + $0x1664] ss:$92 sps:$4 sm:$0xff]  }
 0x72c   :  { %11433 = vmatpush2.bf16.msra.mxu0 %v15438_v11  ;;  %11393 = vmatprep.subr.bf16.mxu1 %v15443_v12  ;;  %v15519_v11 = vld [vmem:[%s21591_s11 + $0xae0] ss:$92 sps:$4 sm:$0xff]  }
 0x72d   :  { %11434 = vmatprep.subr.bf16.mxu0 %v15446_v38  ;;  %v15522_v12 = vld [vmem:[%s21591_s11 + $0x1660] ss:$92 sps:$4 sm:$0xff]   ;;  %v15527_v38 = vld [vmem:[%s21591_s11 + $0xa2c] ss:$92 sps:$4 sm:$0xff]  }
 0x72f   :  { %11394 = vmatpush2.bf16.msra.mxu1 %v15441_v19  ;;  %v15530_v19 = vld [vmem:[%s21591_s11 + $0x15ac] ss:$92 sps:$4 sm:$0xff]  }
 0x730   :  { %11435 = vmatpush2.bf16.msra.mxu0 %v15444_v32  ;;  %11395 = vmatprep.subr.bf16.mxu1 %v15449_v24  ;;  %v15525_v32 = vld [vmem:[%s21591_s11 + $0xa28] ss:$92 sps:$4 sm:$0xff]  }
 0x731   :  { %11436 = vmatprep.subr.bf16.mxu0 %v15452_v58  ;;  %v15528_v24 = vld [vmem:[%s21591_s11 + $0x15a8] ss:$92 sps:$4 sm:$0xff]   ;;  %v15533_v58 = vld [vmem:[%s21591_s11 + $0x974] ss:$92 sps:$4 sm:$0xff]  }
 0x733   :  { %11396 = vmatpush2.bf16.msra.mxu1 %v15447_v9  ;;  %v15536_v9 = vld [vmem:[%s21591_s11 + $0x14f4] ss:$92 sps:$4 sm:$0xff]  }
 0x734   :  { %11437 = vmatpush2.bf16.msra.mxu0 %v15450_v42  ;;  %11397 = vmatprep.subr.bf16.mxu1 %v15455_v28  ;;  %v15531_v42 = vld [vmem:[%s21591_s11 + $0x970] ss:$92 sps:$4 sm:$0xff]  }
 0x735   :  { %11438 = vmatprep.subr.bf16.mxu0 %v15458_v18  ;;  %v15534_v28 = vld [vmem:[%s21591_s11 + $0x14f0] ss:$92 sps:$4 sm:$0xff]   ;;  %v15539_v18 = vld [vmem:[%s21591_s11 + $0x8bc] ss:$92 sps:$4 sm:$0xff]  }
 0x737   :  { %11398 = vmatpush2.bf16.msra.mxu1 %v15453_v34  ;;  %v15542_v34 = vld [vmem:[%s21591_s11 + $0x143c] ss:$92 sps:$4 sm:$0xff]  }
 0x738   :  { %11439 = vmatpush2.bf16.msra.mxu0 %v15456_v33  ;;  %11399 = vmatprep.subr.bf16.mxu1 %v15461_v31  ;;  %v15537_v33 = vld [vmem:[%s21591_s11 + $0x8b8] ss:$92 sps:$4 sm:$0xff]  }
 0x739   :  { %11440 = vmatprep.subr.bf16.mxu0 %v15464_v48  ;;  %v15540_v31 = vld [vmem:[%s21591_s11 + $0x1438] ss:$92 sps:$4 sm:$0xff]   ;;  %v15545_v48 = vld [vmem:[%s21591_s11 + $0x804] ss:$92 sps:$4 sm:$0xff]  }
 0x73b   :  { %11400 = vmatpush2.bf16.msra.mxu1 %v15459_v5  ;;  %v15548_v5 = vld [vmem:[%s21591_s11 + $0x1384] ss:$92 sps:$4 sm:$0xff]  }
 0x73c   :  { %11441 = vmatpush2.bf16.msra.mxu0 %v15462_v30  ;;  %11401 = vmatprep.subr.bf16.mxu1 %v15467_v41  ;;  %v15543_v30 = vld [vmem:[%s21591_s11 + $0x800] ss:$92 sps:$4 sm:$0xff]  }
 0x73d   :  { %11442 = vmatprep.subr.bf16.mxu0 %v15470_v40  ;;  %v15546_v41 = vld [vmem:[%s21591_s11 + $0x1380] ss:$92 sps:$4 sm:$0xff]   ;;  %v15551_v40 = vld [vmem:[%s21591_s11 + $0x74c] ss:$92 sps:$4 sm:$0xff]  }
 0x73f   :  { %11402 = vmatpush2.bf16.msra.mxu1 %v15465_v44  ;;  %v15554_v44 = vld [vmem:[%s21591_s11 + $0x12cc] ss:$92 sps:$4 sm:$0xff]  }
 0x740   :  { %11443 = vmatpush2.bf16.msra.mxu0 %v15468_v14  ;;  %11453 = vmatprep.subr.bf16.mxu1 %v15473_v45  ;;  %v15549_v14 = vld [vmem:[%s21591_s11 + $0x748] ss:$92 sps:$4 sm:$0xff]  }
 0x741   :  { %11494 = vmatprep.subr.bf16.mxu0 %v15476_v39  ;;  %v15552_v45 = vld [vmem:[%s21591_s11 + $0x12c8] ss:$92 sps:$4 sm:$0xff]   ;;  %v15557_v39 = vld [vmem:[%s21591_s11 + $0x694] ss:$92 sps:$4 sm:$0xff]  }
 0x742   :  { %11404 = vmatmul.mubr.bf16.vlgmr.msra.gmra.mxu1 %v19444_v7 }
 0x743   :  { %11445 = vmatmul.mubr.bf16.vlgmr.msra.gmra.mxu0 %v19446_v22  ;;  %11454 = vmatpush1.bf16.msra.mxu1 %v15471_v16  ;;  %v15560_v16 = vld [vmem:[%s21591_s11 + $0x1214] ss:$92 sps:$4 sm:$0xff]  }
 0x744   :  { %11485 = vmatprep.mubr.bf16.mxu1 %v19434_v55  ;;  %11495 = vmatpush1.bf16.msra.mxu0 %v15474_v47  ;;  %v15555_v47 = vld [vmem:[%s21591_s11 + $0x690] ss:$92 sps:$4 sm:$0xff]  }
 0x745   :  { %11526 = vmatprep.mubr.bf16.mxu0 %v19436_v15  ;;  %11455 = vmatprep.subr.bf16.mxu1 %v15479_v20  ;;  %v15558_v20 = vld [vmem:[%s21591_s11 + $0x1210] ss:$92 sps:$4 sm:$0xff]  }
 0x746   :  { %11496 = vmatprep.subr.bf16.mxu0 %v15482_v43  ;;  %v15563_v43 = vld [vmem:[%s21591_s11 + $0x5dc] ss:$92 sps:$4 sm:$0xff]  }
 0x747   :  { %11456 = vmatpush1.bf16.msra.mxu1 %v15477_v52  ;;  %v15566_v52 = vld [vmem:[%s21591_s11 + $0x115c] ss:$92 sps:$4 sm:$0xff]  }
 0x748   :  { %11497 = vmatpush1.bf16.msra.mxu0 %v15480_v10  ;;  %11457 = vmatprep.subr.bf16.mxu1 %v15485_v1  ;;  %v15561_v10 = vld [vmem:[%s21591_s11 + $0x5d8] ss:$92 sps:$4 sm:$0xff]  }
 0x749   :  { %11498 = vmatprep.subr.bf16.mxu0 %v15488_v29  ;;  %v15564_v1 = vld [vmem:[%s21591_s11 + $0x1158] ss:$92 sps:$4 sm:$0xff]   ;;  %v15569_v29 = vld [vmem:[%s21591_s11 + $0x52c] ss:$92 sps:$4 sm:$0xff]  }
 0x74b   :  { %11458 = vmatpush1.bf16.msra.mxu1 %v15483_v53  ;;  %v20032_v53 = vld [vmem:[%s21592_s12] sm:$0xff] }
 0x74c   :  { %11499 = vmatpush1.bf16.msra.mxu0 %v15486_v35  ;;  %11459 = vmatprep.subr.bf16.mxu1 %v15491_v23  ;;  %v15572_v35 = vld [vmem:[%s21591_s11 + $0x10ac] ss:$92 sps:$4 sm:$0xff]  }
 0x74d   :  { %11500 = vmatprep.subr.bf16.mxu0 %v15494_v46  ;;  %v15567_v23 = vld [vmem:[%s21591_s11 + $0x528] ss:$92 sps:$4 sm:$0xff]   ;;  %v7383_v46 = vrot.slane %v20032_v53, %v17252_v63 }
 0x74f   :  { %11460 = vmatpush1.bf16.msra.mxu1 %v15489_v54  ;;  %v15570_v54 = vld [vmem:[%s21591_s11 + $0x10a8] ss:$92 sps:$4 sm:$0xff]  }
 0x750   :  { %11501 = vmatpush1.bf16.msra.mxu0 %v15492_v51  ;;  %11461 = vmatprep.subr.bf16.mxu1 %v15497_v50  ;;  %v7387_v51 = vrot.slane %v20032_v53, %v17267_v4  ;;  %v15575_v50 = vld [vmem:[%s21591_s11 + $0x474] ss:$92 sps:$4 sm:$0xff]  }
 0x751   :  { %11502 = vmatprep.subr.bf16.mxu0 %v15500_v56 }
 0x753   :  { %11462 = vmatpush1.bf16.msra.mxu1 %v15495_v8 }
 0x754   :  { %11503 = vmatpush1.bf16.msra.mxu0 %v15498_v37  ;;  %11463 = vmatprep.subr.bf16.mxu1 %v15503_v59  ;;  %v15578_v37 = vld [vmem:[%s21591_s11 + $0xff4] ss:$92 sps:$4 sm:$0xff]  }
 0x755   :  { %11504 = vmatprep.subr.bf16.mxu0 %v15506_v13  ;;  %v15573_v13 = vld [vmem:[%s21591_s11 + $0x470] ss:$92 sps:$4 sm:$0xff]  }
 0x757   :  { %11464 = vmatpush1.bf16.msra.mxu1 %v15501_v49 }
 0x758   :  { %11505 = vmatpush1.bf16.msra.mxu0 %v15504_v60  ;;  %11465 = vmatprep.subr.bf16.mxu1 %v15509_v61  ;;  %v15576_v61 = vld [vmem:[%s21591_s11 + $0xff0] ss:$92 sps:$4 sm:$0xff]  }
 0x759   :  { %11506 = vmatprep.subr.bf16.mxu0 %v15512_v62  ;;  %v15581_v62 = vld [vmem:[%s21591_s11 + $0x3bc] ss:$92 sps:$4 sm:$0xff]  }
 0x75b   :  { %11466 = vmatpush1.bf16.msra.mxu1 %v15507_v17 }
 0x75c   :  { %11507 = vmatpush1.bf16.msra.mxu0 %v15510_v0  ;;  %11467 = vmatprep.subr.bf16.mxu1 %v15515_v27  ;;  %v15584_v27 = vld [vmem:[%s21591_s11 + $0xf3c] ss:$92 sps:$4 sm:$0xff]  }
 0x75d   :  { %11508 = vmatprep.subr.bf16.mxu0 %v15518_v21 }
 0x75f   :  { %11468 = vmatpush1.bf16.msra.mxu1 %v15513_v2 }
 0x760   :  { %11509 = vmatpush1.bf16.msra.mxu0 %v15516_v36  ;;  %11469 = vmatprep.subr.bf16.mxu1 %v15521_v26  ;;  %v15579_v26 = vld [vmem:[%s21591_s11 + $0x3b8] ss:$92 sps:$4 sm:$0xff]  }
 0x761   :  { %11510 = vmatprep.subr.bf16.mxu0 %v15524_v3 }
 0x763   :  { %11470 = vmatpush2.bf16.msra.mxu1 %v15519_v11 }
 0x764   :  { %11511 = vmatpush2.bf16.msra.mxu0 %v15522_v12  ;;  %11471 = vmatprep.subr.bf16.mxu1 %v15527_v38  ;;  %v15582_v12 = vld [vmem:[%s21591_s11 + $0xf38] ss:$92 sps:$4 sm:$0xff]   ;;  %v15587_v38 = vld [vmem:[%s21591_s11 + $0x304] ss:$92 sps:$4 sm:$0xff]  }
 0x765   :  { %11512 = vmatprep.subr.bf16.mxu0 %v15530_v19  ;;  %v15590_v19 = vld [vmem:[%s21591_s11 + $0xe84] ss:$92 sps:$4 sm:$0xff]  }
 0x767   :  { %11472 = vmatpush2.bf16.msra.mxu1 %v15525_v32  ;;  %v15585_v32 = vld [vmem:[%s21591_s11 + $0x300] ss:$92 sps:$4 sm:$0xff]  }
 0x768   :  { %11513 = vmatpush2.bf16.msra.mxu0 %v15528_v24  ;;  %11473 = vmatprep.subr.bf16.mxu1 %v15533_v58  ;;  %v15588_v24 = vld [vmem:[%s21591_s11 + $0xe80] ss:$92 sps:$4 sm:$0xff]   ;;  %v15593_v58 = vld [vmem:[%s21591_s11 + $0x24c] ss:$92 sps:$4 sm:$0xff]  }
 0x769   :  { %11514 = vmatprep.subr.bf16.mxu0 %v15536_v9  ;;  %v15596_v9 = vld [vmem:[%s21591_s11 + $0xdcc] ss:$92 sps:$4 sm:$0xff]  }
 0x76b   :  { %11474 = vmatpush2.bf16.msra.mxu1 %v15531_v42  ;;  %v15591_v42 = vld [vmem:[%s21591_s11 + $0x248] ss:$92 sps:$4 sm:$0xff]  }
 0x76c   :  { %11515 = vmatpush2.bf16.msra.mxu0 %v15534_v28  ;;  %11475 = vmatprep.subr.bf16.mxu1 %v15539_v18  ;;  %v15594_v28 = vld [vmem:[%s21591_s11 + $0xdc8] ss:$92 sps:$4 sm:$0xff]   ;;  %v15599_v18 = vld [vmem:[%s21591_s11 + $0x194] ss:$92 sps:$4 sm:$0xff]  }
 0x76d   :  { %11516 = vmatprep.subr.bf16.mxu0 %v15542_v34  ;;  %v15602_v34 = vld [vmem:[%s21591_s11 + $0xd14] ss:$92 sps:$4 sm:$0xff]  }
 0x76f   :  { %11476 = vmatpush2.bf16.msra.mxu1 %v15537_v33  ;;  %v15597_v33 = vld [vmem:[%s21591_s11 + $0x190] ss:$92 sps:$4 sm:$0xff]  }
 0x770   :  { %11517 = vmatpush2.bf16.msra.mxu0 %v15540_v31  ;;  %11477 = vmatprep.subr.bf16.mxu1 %v15545_v48  ;;  %v15600_v31 = vld [vmem:[%s21591_s11 + $0xd10] ss:$92 sps:$4 sm:$0xff]   ;;  %v15605_v48 = vld [vmem:[%s21591_s11 + $0xdc] ss:$92 sps:$4 sm:$0xff]  }
 0x771   :  { %11518 = vmatprep.subr.bf16.mxu0 %v15548_v5  ;;  %v15608_v5 = vld [vmem:[%s21591_s11 + $0xc5c] ss:$92 sps:$4 sm:$0xff]  }
 0x773   :  { %11478 = vmatpush2.bf16.msra.mxu1 %v15543_v30  ;;  %v15603_v30 = vld [vmem:[%s21591_s11 + $0xd8] ss:$92 sps:$4 sm:$0xff]  }
 0x774   :  { %11519 = vmatpush2.bf16.msra.mxu0 %v15546_v41  ;;  %11479 = vmatprep.subr.bf16.mxu1 %v15551_v40  ;;  %v15606_v41 = vld [vmem:[%s21591_s11 + $0xc58] ss:$92 sps:$4 sm:$0xff]   ;;  %v15611_v40 = vld [vmem:[%s21591_s11 + $0x24] ss:$92 sps:$4 sm:$0xff]  }
 0x775   :  { %11520 = vmatprep.subr.bf16.mxu0 %v15554_v44  ;;  %v15614_v44 = vld [vmem:[%s21591_s11 + $0xba4] ss:$92 sps:$4 sm:$0xff]  }
 0x777   :  { %11480 = vmatpush2.bf16.msra.mxu1 %v15549_v14  ;;  %v15609_v14 = vld [vmem:[%s21591_s11 + $0x20] ss:$92 sps:$4 sm:$0xff]  }
 0x778   :  { %11521 = vmatpush2.bf16.msra.mxu0 %v15552_v45  ;;  %11481 = vmatprep.subr.bf16.mxu1 %v15557_v39  ;;  %v15612_v45 = vld [vmem:[%s21591_s11 + $0xba0] ss:$92 sps:$4 sm:$0xff]   ;;  %v15617_v39 = vld [vmem:[%s21591_s11 + $0xaec] ss:$92 sps:$4 sm:$0xff]  }
 0x779   :  { %11522 = vmatprep.subr.bf16.mxu0 %v15560_v16  ;;  %v15620_v16 = vld [vmem:[%s21591_s11 + $0x166c] ss:$92 sps:$4 sm:$0xff]  }
 0x77b   :  { %11482 = vmatpush2.bf16.msra.mxu1 %v15555_v47  ;;  %v15615_v47 = vld [vmem:[%s21591_s11 + $0xae8] ss:$92 sps:$4 sm:$0xff]  }
 0x77c   :  { %11523 = vmatpush2.bf16.msra.mxu0 %v15558_v20  ;;  %11483 = vmatprep.subr.bf16.mxu1 %v15563_v43  ;;  %v15618_v20 = vld [vmem:[%s21591_s11 + $0x1668] ss:$92 sps:$4 sm:$0xff]   ;;  %v15623_v43 = vld [vmem:[%s21591_s11 + $0xa34] ss:$92 sps:$4 sm:$0xff]  }
 0x77d   :  { %11524 = vmatprep.subr.bf16.mxu0 %v15566_v52  ;;  %v15626_v52 = vld [vmem:[%s21591_s11 + $0x15b4] ss:$92 sps:$4 sm:$0xff]  }
 0x77f   :  { %11484 = vmatpush2.bf16.msra.mxu1 %v15561_v10  ;;  %v15621_v10 = vld [vmem:[%s21591_s11 + $0xa30] ss:$92 sps:$4 sm:$0xff]  }
 0x780   :  { %11525 = vmatpush2.bf16.msra.mxu0 %v15564_v1  ;;  %11535 = vmatprep.subr.bf16.mxu1 %v15569_v29  ;;  %v15624_v1 = vld [vmem:[%s21591_s11 + $0x15b0] ss:$92 sps:$4 sm:$0xff]   ;;  %v15629_v29 = vld [vmem:[%s21591_s11 + $0x97c] ss:$92 sps:$4 sm:$0xff]  }
 0x781   :  { %11576 = vmatprep.subr.bf16.mxu0 %v15572_v35  ;;  %v15632_v35 = vld [vmem:[%s21591_s11 + $0x14fc] ss:$92 sps:$4 sm:$0xff]  }
 0x782   :  { %11486 = vmatmul.mubr.bf16.vlgmr.msra.gmra.mxu1 %v19444_v7  ;;  %v11241_v56 = vpop.f32.mrf.mxu1  ;;  %v11282_v8 = vpop.f32.mrf.mxu0 }
 0x783   :  { %11527 = vmatmul.mubr.bf16.vlgmr.msra.gmra.mxu0 %v19446_v22  ;;  %v11242_v59 = vadd.f32 %v11241_v56, %v7383_v46  ;;  %11536 = vmatpush1.bf16.msra.mxu1 %v15567_v23  ;;  %v15627_v23 = vld [vmem:[%s21591_s11 + $0x978] ss:$92 sps:$4 sm:$0xff]   ;;  %v15636_v56 = vld [vmem:[%s21591_s11 + $0x1440] ss:$92 sps:$4 sm:$0xff]  }
 0x784   :  { %11567 = vmatprep.mubr.bf16.mxu1 %v19434_v55  ;;  %11577 = vmatpush1.bf16.msra.mxu0 %v15570_v54  ;;  %v11243_v49 = vpop.f32.mrf.mxu1  ;;  %v11284_v60 = vpop.f32.mrf.mxu0  ;;  %v15630_v46 = vld [vmem:[%s21591_s11 + $0x14f8] ss:$92 sps:$4 sm:$0xff]   ;;  %v15635_v54 = vld [vmem:[%s21591_s11 + $0x8c4] ss:$92 sps:$4 sm:$0xff]  }
 0x785   :  { %v11283_v17 = vadd.f32 %v11282_v8, %v11242_v59  ;;  %11608 = vmatprep.mubr.bf16.mxu0 %v19436_v15  ;;  %v11244_v0 = vadd.f32 %v11243_v49, %v7387_v51  ;;  %11537 = vmatprep.subr.bf16.mxu1 %v15575_v50  ;;  %v15638_v51 = vld [vmem:[%s21591_s11 + $0x1444] ss:$92 sps:$4 sm:$0xff]   ;;  %v15641_v8 = vld [vmem:[%s21591_s11 + $0x80c] ss:$92 sps:$4 sm:$0xff]   ;;  %v15647_v49 = vld [vmem:[%s21591_s11 + $0x754] ss:$92 sps:$4 sm:$0xff]  }
 0x786   :  { %11578 = vmatprep.subr.bf16.mxu0 %v15578_v37  ;;  %v11245_v21 = vpop.f32.mrf.mxu1  ;;  %v11286_v2 = vpop.f32.mrf.mxu0  ;;  %v15633_v50 = vld [vmem:[%s21591_s11 + $0x8c0] ss:$92 sps:$4 sm:$0xff]   ;;  %v15644_v37 = vld [vmem:[%s21591_s11 + $0x138c] ss:$92 sps:$4 sm:$0xff]  }
 0x787   :  { %12189 = vst [vmem:[#allocation4] sm:$0xff] %v11283_v17  ;;  %v11285_v36 = vadd.f32 %v11284_v60, %v11244_v0  ;;  %11538 = vmatpush1.bf16.msra.mxu1 %v15573_v13  ;;  %v15639_v59 = vld [vmem:[%s21591_s11 + $0x808] ss:$92 sps:$4 sm:$0xff]   ;;  %v15650_v60 = vld [vmem:[%s21591_s11 + $0x12d4] ss:$92 sps:$4 sm:$0xff]  }
 0x788   :  { %11579 = vmatpush1.bf16.msra.mxu0 %v15576_v61  ;;  %v11246_v3 = vpop.f32.mrf.mxu1  ;;  %v11287_v11 = vpop.f32.mrf.mxu0  ;;  %11539 = vmatprep.subr.bf16.mxu1 %v15581_v62  ;;  %v15642_v13 = vld [vmem:[%s21591_s11 + $0x1388] ss:$92 sps:$4 sm:$0xff]   ;;  %v15645_v61 = vld [vmem:[%s21591_s11 + $0x750] ss:$92 sps:$4 sm:$0xff]   ;;  %v15653_v17 = vld [vmem:[%s21591_s11 + $0x69c] ss:$92 sps:$4 sm:$0xff]  }
 0x789   :  { %12190 = vst [vmem:[#allocation4 + $0x8] sm:$0xff] %v11285_v36  ;;  %11580 = vmatprep.subr.bf16.mxu0 %v15584_v27  ;;  %v15648_v62 = vld [vmem:[%s21591_s11 + $0x12d0] ss:$92 sps:$4 sm:$0xff]   ;;  %v15656_v0 = vld [vmem:[%s21591_s11 + $0x121c] ss:$92 sps:$4 sm:$0xff]  }
 0x78a   :  { %v15651_v27 = vld [vmem:[%s21591_s11 + $0x698] ss:$92 sps:$4 sm:$0xff]   ;;  %v15659_v2 = vld [vmem:[%s21591_s11 + $0x5e4] ss:$92 sps:$4 sm:$0xff]  }
 0x78b   :  { %11540 = vmatpush1.bf16.msra.mxu1 %v15579_v26  ;;  %v15654_v21 = vld [vmem:[%s21591_s11 + $0x1218] ss:$92 sps:$4 sm:$0xff]   ;;  %v15662_v36 = vld [vmem:[%s21591_s11 + $0x1164] ss:$92 sps:$4 sm:$0xff]  }
 0x78c   :  { %11581 = vmatpush1.bf16.msra.mxu0 %v15582_v12  ;;  %11541 = vmatprep.subr.bf16.mxu1 %v15587_v38  ;;  %v15657_v26 = vld [vmem:[%s21591_s11 + $0x5e0] ss:$92 sps:$4 sm:$0xff]   ;;  %v15665_v11 = vld [vmem:[%s21591_s11 + $0x534] ss:$92 sps:$4 sm:$0xff]   ;;  %v7391_v38 = vrot.slane %v20032_v53, %v18518_v25 }
 0x78d   :  { %11582 = vmatprep.subr.bf16.mxu0 %v15590_v19  ;;  %v15660_v3 = vld [vmem:[%s21591_s11 + $0x1160] ss:$92 sps:$4 sm:$0xff]   ;;  %v15668_v12 = vld [vmem:[%s21591_s11 + $0x10b4] ss:$92 sps:$4 sm:$0xff]  }
 0x78e   :  { %v15663_v19 = vld [vmem:[%s21591_s11 + $0x530] ss:$92 sps:$4 sm:$0xff]  }
 0x78f   :  { %11542 = vmatpush1.bf16.msra.mxu1 %v15585_v32  ;;  %v15666_v32 = vld [vmem:[%s21591_s11 + $0x10b0] ss:$92 sps:$4 sm:$0xff]  }
 0x790   :  { %11583 = vmatpush1.bf16.msra.mxu0 %v15588_v24  ;;  %11543 = vmatprep.subr.bf16.mxu1 %v15593_v58  ;;  %v7395_v24 = vrot.slane %v20032_v53, %v18527_v6  ;;  %v15671_v58 = vld [vmem:[%s21591_s11 + $0x47c] ss:$92 sps:$4 sm:$0xff]  }
 0x791   :  { %11584 = vmatprep.subr.bf16.mxu0 %v15596_v9 }
 0x793   :  { %11544 = vmatpush1.bf16.msra.mxu1 %v15591_v42 }
 0x794   :  { %11585 = vmatpush1.bf16.msra.mxu0 %v15594_v28  ;;  %11545 = vmatprep.subr.bf16.mxu1 %v15599_v18  ;;  %v15674_v28 = vld [vmem:[%s21591_s11 + $0xffc] ss:$92 sps:$4 sm:$0xff]  }
 0x795   :  { %11586 = vmatprep.subr.bf16.mxu0 %v15602_v34  ;;  %v15669_v34 = vld [vmem:[%s21591_s11 + $0x478] ss:$92 sps:$4 sm:$0xff]  }
 0x797   :  { %11546 = vmatpush1.bf16.msra.mxu1 %v15597_v33 }
 0x798   :  { %11587 = vmatpush1.bf16.msra.mxu0 %v15600_v31  ;;  %11547 = vmatprep.subr.bf16.mxu1 %v15605_v48  ;;  %v15672_v48 = vld [vmem:[%s21591_s11 + $0xff8] ss:$92 sps:$4 sm:$0xff]  }
 0x799   :  { %11588 = vmatprep.subr.bf16.mxu0 %v15608_v5  ;;  %v15677_v5 = vld [vmem:[%s21591_s11 + $0x3c4] ss:$92 sps:$4 sm:$0xff]  }
 0x79b   :  { %11548 = vmatpush1.bf16.msra.mxu1 %v15603_v30 }
 0x79c   :  { %11589 = vmatpush1.bf16.msra.mxu0 %v15606_v41  ;;  %11549 = vmatprep.subr.bf16.mxu1 %v15611_v40  ;;  %v15680_v40 = vld [vmem:[%s21591_s11 + $0xf44] ss:$92 sps:$4 sm:$0xff]  }
 0x79d   :  { %11590 = vmatprep.subr.bf16.mxu0 %v15614_v44 }
 0x79f   :  { %11550 = vmatpush1.bf16.msra.mxu1 %v15609_v14 }
 0x7a0   :  { %11591 = vmatpush1.bf16.msra.mxu0 %v15612_v45  ;;  %11551 = vmatprep.subr.bf16.mxu1 %v15617_v39  ;;  %v15675_v39 = vld [vmem:[%s21591_s11 + $0x3c0] ss:$92 sps:$4 sm:$0xff]  }
 0x7a1   :  { %11592 = vmatprep.subr.bf16.mxu0 %v15620_v16 }
 0x7a3   :  { %11552 = vmatpush2.bf16.msra.mxu1 %v15615_v47 }
 0x7a4   :  { %11593 = vmatpush2.bf16.msra.mxu0 %v15618_v20  ;;  %11553 = vmatprep.subr.bf16.mxu1 %v15623_v43  ;;  %v15678_v20 = vld [vmem:[%s21591_s11 + $0xf40] ss:$92 sps:$4 sm:$0xff]   ;;  %v15683_v43 = vld [vmem:[%s21591_s11 + $0x30c] ss:$92 sps:$4 sm:$0xff]  }
 0x7a5   :  { %11594 = vmatprep.subr.bf16.mxu0 %v15626_v52  ;;  %v15686_v52 = vld [vmem:[%s21591_s11 + $0xe8c] ss:$92 sps:$4 sm:$0xff]  }
 0x7a7   :  { %11554 = vmatpush2.bf16.msra.mxu1 %v15621_v10  ;;  %v15681_v10 = vld [vmem:[%s21591_s11 + $0x308] ss:$92 sps:$4 sm:$0xff]  }
 0x7a8   :  { %11595 = vmatpush2.bf16.msra.mxu0 %v15624_v1  ;;  %11555 = vmatprep.subr.bf16.mxu1 %v15629_v29  ;;  %v15684_v1 = vld [vmem:[%s21591_s11 + $0xe88] ss:$92 sps:$4 sm:$0xff]   ;;  %v15689_v29 = vld [vmem:[%s21591_s11 + $0x254] ss:$92 sps:$4 sm:$0xff]  }
 0x7a9   :  { %11596 = vmatprep.subr.bf16.mxu0 %v15632_v35  ;;  %v15692_v35 = vld [vmem:[%s21591_s11 + $0xdd4] ss:$92 sps:$4 sm:$0xff]  }
 0x7ab   :  { %11556 = vmatpush2.bf16.msra.mxu1 %v15627_v23  ;;  %v15687_v23 = vld [vmem:[%s21591_s11 + $0x250] ss:$92 sps:$4 sm:$0xff]  }
 0x7ac   :  { %11597 = vmatpush2.bf16.msra.mxu0 %v15630_v46  ;;  %11557 = vmatprep.subr.bf16.mxu1 %v15635_v54  ;;  %v15690_v46 = vld [vmem:[%s21591_s11 + $0xdd0] ss:$92 sps:$4 sm:$0xff]   ;;  %v15695_v54 = vld [vmem:[%s21591_s11 + $0x19c] ss:$92 sps:$4 sm:$0xff]  }
 0x7ad   :  { %11598 = vmatprep.subr.bf16.mxu0 %v15638_v51  ;;  %v15698_v51 = vld [vmem:[%s21591_s11 + $0xd1c] ss:$92 sps:$4 sm:$0xff]  }
 0x7af   :  { %11558 = vmatpush2.bf16.msra.mxu1 %v15633_v50  ;;  %v15693_v50 = vld [vmem:[%s21591_s11 + $0x198] ss:$92 sps:$4 sm:$0xff]  }
 0x7b0   :  { %11599 = vmatpush2.bf16.msra.mxu0 %v15636_v56  ;;  %11559 = vmatprep.subr.bf16.mxu1 %v15641_v8  ;;  %v15696_v56 = vld [vmem:[%s21591_s11 + $0xd18] ss:$92 sps:$4 sm:$0xff]   ;;  %v15701_v8 = vld [vmem:[%s21591_s11 + $0xe4] ss:$92 sps:$4 sm:$0xff]  }
 0x7b1   :  { %11600 = vmatprep.subr.bf16.mxu0 %v15644_v37  ;;  %v15704_v37 = vld [vmem:[%s21591_s11 + $0xc64] ss:$92 sps:$4 sm:$0xff]  }
 0x7b3   :  { %11560 = vmatpush2.bf16.msra.mxu1 %v15639_v59  ;;  %v15699_v59 = vld [vmem:[%s21591_s11 + $0xe0] ss:$92 sps:$4 sm:$0xff]  }
 0x7b4   :  { %11601 = vmatpush2.bf16.msra.mxu0 %v15642_v13  ;;  %11561 = vmatprep.subr.bf16.mxu1 %v15647_v49  ;;  %v15702_v13 = vld [vmem:[%s21591_s11 + $0xc60] ss:$92 sps:$4 sm:$0xff]   ;;  %v15707_v49 = vld [vmem:[%s21591_s11 + $0x2c] ss:$92 sps:$4 sm:$0xff]  }
 0x7b5   :  { %11602 = vmatprep.subr.bf16.mxu0 %v15650_v60  ;;  %v15710_v60 = vld [vmem:[%s21591_s11 + $0xbac] ss:$92 sps:$4 sm:$0xff]  }
 0x7b7   :  { %11562 = vmatpush2.bf16.msra.mxu1 %v15645_v61  ;;  %v15705_v61 = vld [vmem:[%s21591_s11 + $0x28] ss:$92 sps:$4 sm:$0xff]  }
 0x7b8   :  { %11603 = vmatpush2.bf16.msra.mxu0 %v15648_v62  ;;  %11563 = vmatprep.subr.bf16.mxu1 %v15653_v17  ;;  %v15708_v62 = vld [vmem:[%s21591_s11 + $0xba8] ss:$92 sps:$4 sm:$0xff]   ;;  %v15713_v17 = vld [vmem:[%s21591_s11 + $0xaf4] ss:$92 sps:$4 sm:$0xff]  }
 0x7b9   :  { %11604 = vmatprep.subr.bf16.mxu0 %v15656_v0  ;;  %v15716_v0 = vld [vmem:[%s21591_s11 + $0x1674] ss:$92 sps:$4 sm:$0xff]  }
 0x7bb   :  { %11564 = vmatpush2.bf16.msra.mxu1 %v15651_v27  ;;  %v15711_v27 = vld [vmem:[%s21591_s11 + $0xaf0] ss:$92 sps:$4 sm:$0xff]  }
 0x7bc   :  { %11605 = vmatpush2.bf16.msra.mxu0 %v15654_v21  ;;  %11565 = vmatprep.subr.bf16.mxu1 %v15659_v2  ;;  %v15714_v21 = vld [vmem:[%s21591_s11 + $0x1670] ss:$92 sps:$4 sm:$0xff]   ;;  %v15719_v2 = vld [vmem:[%s21591_s11 + $0xa3c] ss:$92 sps:$4 sm:$0xff]  }
 0x7bd   :  { %11606 = vmatprep.subr.bf16.mxu0 %v15662_v36  ;;  %v15722_v36 = vld [vmem:[%s21591_s11 + $0x15bc] ss:$92 sps:$4 sm:$0xff]  }
 0x7bf   :  { %11566 = vmatpush2.bf16.msra.mxu1 %v15657_v26  ;;  %v15717_v26 = vld [vmem:[%s21591_s11 + $0xa38] ss:$92 sps:$4 sm:$0xff]  }
 0x7c0   :  { %11607 = vmatpush2.bf16.msra.mxu0 %v15660_v3  ;;  %11617 = vmatprep.subr.bf16.mxu1 %v15665_v11  ;;  %v15720_v3 = vld [vmem:[%s21591_s11 + $0x15b8] ss:$92 sps:$4 sm:$0xff]   ;;  %v15725_v11 = vld [vmem:[%s21591_s11 + $0x984] ss:$92 sps:$4 sm:$0xff]  }
 0x7c1   :  { %11658 = vmatprep.subr.bf16.mxu0 %v15668_v12  ;;  %v15728_v12 = vld [vmem:[%s21591_s11 + $0x1504] ss:$92 sps:$4 sm:$0xff]  }
 0x7c2   :  { %v11323_v9 = vpop.f32.mrf.mxu1  ;;  %v11364_v42 = vpop.f32.mrf.mxu0  ;;  %11568 = vmatmul.mubr.bf16.vlgmr.msra.gmra.mxu1 %v19444_v7 }
 0x7c3   :  { %v11324_v18 = vadd.f32 %v11323_v9, %v7391_v38  ;;  %11609 = vmatmul.mubr.bf16.vlgmr.msra.gmra.mxu0 %v19446_v22  ;;  %11618 = vmatpush1.bf16.msra.mxu1 %v15663_v19  ;;  %v15723_v38 = vld [vmem:[%s21591_s11 + $0x980] ss:$92 sps:$4 sm:$0xff]   ;;  %v15732_v9 = vld [vmem:[%s21591_s11 + $0x1448] ss:$92 sps:$4 sm:$0xff]  }
 0x7c4   :  { %11649 = vmatprep.mubr.bf16.mxu1 %v19434_v55  ;;  %11659 = vmatpush1.bf16.msra.mxu0 %v15666_v32  ;;  %v11325_v33 = vpop.f32.mrf.mxu1  ;;  %v11366_v31 = vpop.f32.mrf.mxu0  ;;  %v15726_v19 = vld [vmem:[%s21591_s11 + $0x1500] ss:$92 sps:$4 sm:$0xff]   ;;  %v15731_v32 = vld [vmem:[%s21591_s11 + $0x8cc] ss:$92 sps:$4 sm:$0xff]  }
 0x7c5   :  { %v11365_v30 = vadd.f32 %v11364_v42, %v11324_v18  ;;  %11690 = vmatprep.mubr.bf16.mxu0 %v19436_v15  ;;  %v11326_v41 = vadd.f32 %v11325_v33, %v7395_v24  ;;  %11619 = vmatprep.subr.bf16.mxu1 %v15671_v58  ;;  %v15734_v24 = vld [vmem:[%s21591_s11 + $0x144c] ss:$92 sps:$4 sm:$0xff]   ;;  %v15737_v42 = vld [vmem:[%s21591_s11 + $0x814] ss:$92 sps:$4 sm:$0xff]   ;;  %v15743_v33 = vld [vmem:[%s21591_s11 + $0x75c] ss:$92 sps:$4 sm:$0xff]  }
 0x7c6   :  { %v11327_v44 = vpop.f32.mrf.mxu1  ;;  %v11368_v14 = vpop.f32.mrf.mxu0  ;;  %11660 = vmatprep.subr.bf16.mxu0 %v15674_v28  ;;  %v15729_v58 = vld [vmem:[%s21591_s11 + $0x8c8] ss:$92 sps:$4 sm:$0xff]   ;;  %v15740_v28 = vld [vmem:[%s21591_s11 + $0x1394] ss:$92 sps:$4 sm:$0xff]  }
 0x7c7   :  { %12191 = vst [vmem:[#allocation4 + $0x10] sm:$0xff] %v11365_v30  ;;  %v11367_v45 = vadd.f32 %v11366_v31, %v11326_v41  ;;  %11620 = vmatpush1.bf16.msra.mxu1 %v15669_v34  ;;  %v15735_v18 = vld [vmem:[%s21591_s11 + $0x810] ss:$92 sps:$4 sm:$0xff]   ;;  %v15746_v31 = vld [vmem:[%s21591_s11 + $0x12dc] ss:$92 sps:$4 sm:$0xff]  }
 0x7c8   :  { %11661 = vmatpush1.bf16.msra.mxu0 %v15672_v48  ;;  %v11328_v16 = vpop.f32.mrf.mxu1  ;;  %v11369_v47 = vpop.f32.mrf.mxu0  ;;  %11621 = vmatprep.subr.bf16.mxu1 %v15677_v5  ;;  %v15738_v34 = vld [vmem:[%s21591_s11 + $0x1390] ss:$92 sps:$4 sm:$0xff]   ;;  %v15741_v48 = vld [vmem:[%s21591_s11 + $0x758] ss:$92 sps:$4 sm:$0xff]   ;;  %v15749_v30 = vld [vmem:[%s21591_s11 + $0x6a4] ss:$92 sps:$4 sm:$0xff]  }
 0x7c9   :  { %12192 = vst [vmem:[#allocation4 + $0x18] sm:$0xff] %v11367_v45  ;;  %11662 = vmatprep.subr.bf16.mxu0 %v15680_v40  ;;  %v15744_v5 = vld [vmem:[%s21591_s11 + $0x12d8] ss:$92 sps:$4 sm:$0xff]   ;;  %v15752_v41 = vld [vmem:[%s21591_s11 + $0x1224] ss:$92 sps:$4 sm:$0xff]   ;;  %v20429_v16 = vsub.s32 4, %v17234_v57 }
 0x7ca   :  { %v15747_v40 = vld [vmem:[%s21591_s11 + $0x6a0] ss:$92 sps:$4 sm:$0xff]   ;;  %v15755_v14 = vld [vmem:[%s21591_s11 + $0x5ec] ss:$92 sps:$4 sm:$0xff]  }
 0x7cb   :  { %11622 = vmatpush1.bf16.msra.mxu1 %v15675_v39  ;;  %v15750_v44 = vld [vmem:[%s21591_s11 + $0x1220] ss:$92 sps:$4 sm:$0xff]   ;;  %v15758_v45 = vld [vmem:[%s21591_s11 + $0x116c] ss:$92 sps:$4 sm:$0xff]  }
 0x7cc   :  { %11663 = vmatpush1.bf16.msra.mxu0 %v15678_v20  ;;  %11623 = vmatprep.subr.bf16.mxu1 %v15683_v43  ;;  %v15753_v39 = vld [vmem:[%s21591_s11 + $0x5e8] ss:$92 sps:$4 sm:$0xff]   ;;  %v15761_v20 = vld [vmem:[%s21591_s11 + $0x53c] ss:$92 sps:$4 sm:$0xff]  }
 0x7cd   :  { %11664 = vmatprep.subr.bf16.mxu0 %v15686_v52  ;;  %v15756_v47 = vld [vmem:[%s21591_s11 + $0x1168] ss:$92 sps:$4 sm:$0xff]   ;;  %v15764_v43 = vld [vmem:[%s21591_s11 + $0x10bc] ss:$92 sps:$4 sm:$0xff]   ;;  %v20441_v52 = vsub.s32 5, %v17234_v57 }
 0x7cf   :  { %11624 = vmatpush1.bf16.msra.mxu1 %v15681_v10  ;;  %v7399_v10 = vrot.slane %v20032_v53, %v20429_v16 }
 0x7d0   :  { %11665 = vmatpush1.bf16.msra.mxu0 %v15684_v1  ;;  %11625 = vmatprep.subr.bf16.mxu1 %v15689_v29  ;;  %v15759_v1 = vld [vmem:[%s21591_s11 + $0x538] ss:$92 sps:$4 sm:$0xff]  }
 0x7d1   :  { %11666 = vmatprep.subr.bf16.mxu0 %v15692_v35  ;;  %v15762_v29 = vld [vmem:[%s21591_s11 + $0x10b8] ss:$92 sps:$4 sm:$0xff]   ;;  %v7403_v35 = vrot.slane %v20032_v53, %v20441_v52 }
 0x7d3   :  { %11626 = vmatpush1.bf16.msra.mxu1 %v15687_v23  ;;  %v15767_v23 = vld [vmem:[%s21591_s11 + $0x484] ss:$92 sps:$4 sm:$0xff]  }
 0x7d4   :  { %11667 = vmatpush1.bf16.msra.mxu0 %v15690_v46  ;;  %11627 = vmatprep.subr.bf16.mxu1 %v15695_v54  ;;  %v15770_v54 = vld [vmem:[%s21591_s11 + $0x1004] ss:$92 sps:$4 sm:$0xff]  }
 0x7d5   :  { %11668 = vmatprep.subr.bf16.mxu0 %v15698_v51 }
 0x7d7   :  { %11628 = vmatpush1.bf16.msra.mxu1 %v15693_v50 }
 0x7d8   :  { %11669 = vmatpush1.bf16.msra.mxu0 %v15696_v56  ;;  %11629 = vmatprep.subr.bf16.mxu1 %v15701_v8  ;;  %v15765_v56 = vld [vmem:[%s21591_s11 + $0x480] ss:$92 sps:$4 sm:$0xff]  }
 0x7d9   :  { %11670 = vmatprep.subr.bf16.mxu0 %v15704_v37  ;;  %v15768_v37 = vld [vmem:[%s21591_s11 + $0x1000] ss:$92 sps:$4 sm:$0xff]  }
 0x7db   :  { %11630 = vmatpush1.bf16.msra.mxu1 %v15699_v59  ;;  %v15773_v59 = vld [vmem:[%s21591_s11 + $0x3cc] ss:$92 sps:$4 sm:$0xff]  }
 0x7dc   :  { %11671 = vmatpush1.bf16.msra.mxu0 %v15702_v13  ;;  %11631 = vmatprep.subr.bf16.mxu1 %v15707_v49 }
 0x7dd   :  { %11672 = vmatprep.subr.bf16.mxu0 %v15710_v60 }
 0x7df   :  { %11632 = vmatpush1.bf16.msra.mxu1 %v15705_v61  ;;  %v15776_v61 = vld [vmem:[%s21591_s11 + $0xf4c] ss:$92 sps:$4 sm:$0xff]  }
 0x7e0   :  { %11673 = vmatpush1.bf16.msra.mxu0 %v15708_v62  ;;  %11633 = vmatprep.subr.bf16.mxu1 %v15713_v17 }
 0x7e1   :  { %11674 = vmatprep.subr.bf16.mxu0 %v15716_v0 }
 0x7e3   :  { %11634 = vmatpush2.bf16.msra.mxu1 %v15711_v27  ;;  %v15771_v27 = vld [vmem:[%s21591_s11 + $0x3c8] ss:$92 sps:$4 sm:$0xff]  }
 0x7e4   :  { %11675 = vmatpush2.bf16.msra.mxu0 %v15714_v21  ;;  %11635 = vmatprep.subr.bf16.mxu1 %v15719_v2  ;;  %v15774_v2 = vld [vmem:[%s21591_s11 + $0xf48] ss:$92 sps:$4 sm:$0xff]  }
 0x7e5   :  { %11676 = vmatprep.subr.bf16.mxu0 %v15722_v36  ;;  %v15779_v36 = vld [vmem:[%s21591_s11 + $0x314] ss:$92 sps:$4 sm:$0xff]  }
 0x7e7   :  { %11636 = vmatpush2.bf16.msra.mxu1 %v15717_v26 }
 0x7e8   :  { %11677 = vmatpush2.bf16.msra.mxu0 %v15720_v3  ;;  %11637 = vmatprep.subr.bf16.mxu1 %v15725_v11  ;;  %v15782_v3 = vld [vmem:[%s21591_s11 + $0xe94] ss:$92 sps:$4 sm:$0xff]  }
 0x7e9   :  { %11678 = vmatprep.subr.bf16.mxu0 %v15728_v12  ;;  %v15777_v11 = vld [vmem:[%s21591_s11 + $0x310] ss:$92 sps:$4 sm:$0xff]  }
 0x7ea   :  { %v15780_v12 = vld [vmem:[%s21591_s11 + $0xe90] ss:$92 sps:$4 sm:$0xff]  }
 0x7eb   :  { %11638 = vmatpush2.bf16.msra.mxu1 %v15723_v38  ;;  %v15785_v38 = vld [vmem:[%s21591_s11 + $0x25c] ss:$92 sps:$4 sm:$0xff]  }
 0x7ec   :  { %11679 = vmatpush2.bf16.msra.mxu0 %v15726_v19  ;;  %11639 = vmatprep.subr.bf16.mxu1 %v15731_v32  ;;  %v15788_v19 = vld [vmem:[%s21591_s11 + $0xddc] ss:$92 sps:$4 sm:$0xff]  }
 0x7ed   :  { %11680 = vmatprep.subr.bf16.mxu0 %v15734_v24  ;;  %v15783_v32 = vld [vmem:[%s21591_s11 + $0x258] ss:$92 sps:$4 sm:$0xff]  }
 0x7ee   :  { %v15786_v24 = vld [vmem:[%s21591_s11 + $0xdd8] ss:$92 sps:$4 sm:$0xff]  }
 0x7ef   :  { %11640 = vmatpush2.bf16.msra.mxu1 %v15729_v58  ;;  %v15791_v58 = vld [vmem:[%s21591_s11 + $0x1a4] ss:$92 sps:$4 sm:$0xff]  }
 0x7f0   :  { %11681 = vmatpush2.bf16.msra.mxu0 %v15732_v9  ;;  %11641 = vmatprep.subr.bf16.mxu1 %v15737_v42  ;;  %v15794_v9 = vld [vmem:[%s21591_s11 + $0xd24] ss:$92 sps:$4 sm:$0xff]  }
 0x7f1   :  { %11682 = vmatprep.subr.bf16.mxu0 %v15740_v28  ;;  %v15789_v42 = vld [vmem:[%s21591_s11 + $0x1a0] ss:$92 sps:$4 sm:$0xff]  }
 0x7f2   :  { %v15792_v28 = vld [vmem:[%s21591_s11 + $0xd20] ss:$92 sps:$4 sm:$0xff]  }
 0x7f3   :  { %11642 = vmatpush2.bf16.msra.mxu1 %v15735_v18  ;;  %v15797_v18 = vld [vmem:[%s21591_s11 + $0xec] ss:$92 sps:$4 sm:$0xff]  }
 0x7f4   :  { %11683 = vmatpush2.bf16.msra.mxu0 %v15738_v34  ;;  %11643 = vmatprep.subr.bf16.mxu1 %v15743_v33  ;;  %v15800_v34 = vld [vmem:[%s21591_s11 + $0xc6c] ss:$92 sps:$4 sm:$0xff]  }
 0x7f5   :  { %11684 = vmatprep.subr.bf16.mxu0 %v15746_v31  ;;  %v15795_v33 = vld [vmem:[%s21591_s11 + $0xe8] ss:$92 sps:$4 sm:$0xff]  }
 0x7f6   :  { %v15798_v31 = vld [vmem:[%s21591_s11 + $0xc68] ss:$92 sps:$4 sm:$0xff]  }
 0x7f7   :  { %11644 = vmatpush2.bf16.msra.mxu1 %v15741_v48  ;;  %v15803_v48 = vld [vmem:[%s21591_s11 + $0x34] ss:$92 sps:$4 sm:$0xff]  }
 0x7f8   :  { %11685 = vmatpush2.bf16.msra.mxu0 %v15744_v5  ;;  %11645 = vmatprep.subr.bf16.mxu1 %v15749_v30  ;;  %v15806_v5 = vld [vmem:[%s21591_s11 + $0xbb4] ss:$92 sps:$4 sm:$0xff]  }
 0x7f9   :  { %11686 = vmatprep.subr.bf16.mxu0 %v15752_v41  ;;  %v15801_v30 = vld [vmem:[%s21591_s11 + $0x30] ss:$92 sps:$4 sm:$0xff]  }
 0x7fa   :  { %v15804_v41 = vld [vmem:[%s21591_s11 + $0xbb0] ss:$92 sps:$4 sm:$0xff]  }
 0x7fb   :  { %11646 = vmatpush2.bf16.msra.mxu1 %v15747_v40  ;;  %v15809_v40 = vld [vmem:[%s21591_s11 + $0xafc] ss:$92 sps:$4 sm:$0xff]  }
 0x7fc   :  { %11687 = vmatpush2.bf16.msra.mxu0 %v15750_v44  ;;  %11647 = vmatprep.subr.bf16.mxu1 %v15755_v14  ;;  %v15812_v44 = vld [vmem:[%s21591_s11 + $0x167c] ss:$92 sps:$4 sm:$0xff]  }
 0x7fd   :  { %11688 = vmatprep.subr.bf16.mxu0 %v15758_v45  ;;  %v15807_v14 = vld [vmem:[%s21591_s11 + $0xaf8] ss:$92 sps:$4 sm:$0xff]  }
 0x7fe   :  { %v15810_v45 = vld [vmem:[%s21591_s11 + $0x1678] ss:$92 sps:$4 sm:$0xff]  }
 0x7ff   :  { %11648 = vmatpush2.bf16.msra.mxu1 %v15753_v39  ;;  %v15815_v39 = vld [vmem:[%s21591_s11 + $0xa44] ss:$92 sps:$4 sm:$0xff]  }
 0x800   :  { %11689 = vmatpush2.bf16.msra.mxu0 %v15756_v47  ;;  %11699 = vmatprep.subr.bf16.mxu1 %v15761_v20  ;;  %v15818_v47 = vld [vmem:[%s21591_s11 + $0x15c4] ss:$92 sps:$4 sm:$0xff]  }
 0x801   :  { %11740 = vmatprep.subr.bf16.mxu0 %v15764_v43  ;;  %v15813_v20 = vld [vmem:[%s21591_s11 + $0xa40] ss:$92 sps:$4 sm:$0xff]  }
 0x802   :  { %v11405_v46 = vpop.f32.mrf.mxu1  ;;  %11650 = vmatmul.mubr.bf16.vlgmr.msra.gmra.mxu1 %v19444_v7  ;;  %v15816_v43 = vld [vmem:[%s21591_s11 + $0x15c0] ss:$92 sps:$4 sm:$0xff]  }
 0x803   :  { %v11406_v51 = vadd.f32 %v11405_v46, %v7399_v10  ;;  %v11446_v50 = vpop.f32.mrf.mxu0  ;;  %11691 = vmatmul.mubr.bf16.vlgmr.msra.gmra.mxu0 %v19446_v22  ;;  %11700 = vmatpush1.bf16.msra.mxu1 %v15759_v1  ;;  %v15821_v10 = vld [vmem:[%s21591_s11 + $0x98c] ss:$92 sps:$4 sm:$0xff]   ;;  %v15830_v46 = vld [vmem:[%s21591_s11 + $0x1454] ss:$92 sps:$4 sm:$0xff]  }
 0x804   :  { %11731 = vmatprep.mubr.bf16.mxu1 %v19434_v55  ;;  %11741 = vmatpush1.bf16.msra.mxu0 %v15762_v29  ;;  %v11407_v8 = vpop.f32.mrf.mxu1  ;;  %v15824_v1 = vld [vmem:[%s21591_s11 + $0x150c] ss:$92 sps:$4 sm:$0xff]  }
 0x805   :  { %v11447_v13 = vadd.f32 %v11446_v50, %v11406_v51  ;;  %11772 = vmatprep.mubr.bf16.mxu0 %v19436_v15  ;;  %v11408_v49 = vadd.f32 %v11407_v8, %v7403_v35  ;;  %v11448_v60 = vpop.f32.mrf.mxu0  ;;  %11701 = vmatprep.subr.bf16.mxu1 %v15767_v23  ;;  %v15819_v29 = vld [vmem:[%s21591_s11 + $0x988] ss:$92 sps:$4 sm:$0xff]   ;;  %v15827_v23 = vld [vmem:[%s21591_s11 + $0x8d4] ss:$92 sps:$4 sm:$0xff]   ;;  %v15833_v50 = vld [vmem:[%s21591_s11 + $0x81c] ss:$92 sps:$4 sm:$0xff]  }
 0x806   :  { %v11409_v62 = vpop.f32.mrf.mxu1  ;;  %11742 = vmatprep.subr.bf16.mxu0 %v15770_v54  ;;  %v15822_v35 = vld [vmem:[%s21591_s11 + $0x1508] ss:$92 sps:$4 sm:$0xff]   ;;  %v15825_v54 = vld [vmem:[%s21591_s11 + $0x8d0] ss:$92 sps:$4 sm:$0xff]   ;;  %v15831_v8 = vld [vmem:[%s21591_s11 + $0x818] ss:$92 sps:$4 sm:$0xff]  }
 0x807   :  { %12193 = vst [vmem:[#allocation4 + $0x20] sm:$0xff] %v11447_v13  ;;  %v11449_v17 = vadd.f32 %v11448_v60, %v11408_v49  ;;  %v11450_v0 = vpop.f32.mrf.mxu0  ;;  %11702 = vmatpush1.bf16.msra.mxu1 %v15765_v56  ;;  %v15828_v51 = vld [vmem:[%s21591_s11 + $0x1450] ss:$92 sps:$4 sm:$0xff]   ;;  %v15836_v56 = vld [vmem:[%s21591_s11 + $0x139c] ss:$92 sps:$4 sm:$0xff]  }
 0x808   :  { %11743 = vmatpush1.bf16.msra.mxu0 %v15768_v37  ;;  %v11410_v21 = vpop.f32.mrf.mxu1  ;;  %11703 = vmatprep.subr.bf16.mxu1 %v15773_v59  ;;  %v15834_v37 = vld [vmem:[%s21591_s11 + $0x1398] ss:$92 sps:$4 sm:$0xff]   ;;  %v15839_v59 = vld [vmem:[%s21591_s11 + $0x764] ss:$92 sps:$4 sm:$0xff]   ;;  %v15848_v62 = vld [vmem:[%s21591_s11 + $0x122c] ss:$92 sps:$4 sm:$0xff]  }
 0x809   :  { %12194 = vst [vmem:[#allocation4 + $0x28] sm:$0xff] %v11449_v17  ;;  %v11451_v26 = vpop.f32.mrf.mxu0  ;;  %11744 = vmatprep.subr.bf16.mxu0 %v15776_v61  ;;  %v15842_v13 = vld [vmem:[%s21591_s11 + $0x12e4] ss:$92 sps:$4 sm:$0xff]   ;;  %v15845_v61 = vld [vmem:[%s21591_s11 + $0x6ac] ss:$92 sps:$4 sm:$0xff]  }
 0x80a   :  { %v15837_v49 = vld [vmem:[%s21591_s11 + $0x760] ss:$92 sps:$4 sm:$0xff]   ;;  %v15843_v17 = vld [vmem:[%s21591_s11 + $0x6a8] ss:$92 sps:$4 sm:$0xff]   ;;  %v15854_v21 = vld [vmem:[%s21591_s11 + $0x1174] ss:$92 sps:$4 sm:$0xff]  }
 0x80b   :  { %11704 = vmatpush1.bf16.msra.mxu1 %v15771_v27  ;;  %v15840_v60 = vld [vmem:[%s21591_s11 + $0x12e0] ss:$92 sps:$4 sm:$0xff]   ;;  %v15846_v0 = vld [vmem:[%s21591_s11 + $0x1228] ss:$92 sps:$4 sm:$0xff]   ;;  %v15851_v27 = vld [vmem:[%s21591_s11 + $0x5f4] ss:$92 sps:$4 sm:$0xff]  }
 0x80c   :  { %11745 = vmatpush1.bf16.msra.mxu0 %v15774_v2  ;;  %11705 = vmatprep.subr.bf16.mxu1 %v15779_v36  ;;  %v15849_v2 = vld [vmem:[%s21591_s11 + $0x5f0] ss:$92 sps:$4 sm:$0xff]   ;;  %v20635_v36 = vsub.s32 6, %v17234_v57 }
 0x80d   :  { %11746 = vmatprep.subr.bf16.mxu0 %v15782_v3  ;;  %v15852_v26 = vld [vmem:[%s21591_s11 + $0x1170] ss:$92 sps:$4 sm:$0xff]   ;;  %v15857_v3 = vld [vmem:[%s21591_s11 + $0x544] ss:$92 sps:$4 sm:$0xff]  }
 0x80f   :  { %11706 = vmatpush1.bf16.msra.mxu1 %v15777_v11  ;;  %v15860_v11 = vld [vmem:[%s21591_s11 + $0x10c4] ss:$92 sps:$4 sm:$0xff]  }
 0x810   :  { %11747 = vmatpush1.bf16.msra.mxu0 %v15780_v12  ;;  %11707 = vmatprep.subr.bf16.mxu1 %v15785_v38  ;;  %v7410_v12 = vsub.s32 7, %v17234_v57  ;;  %v7407_v38 = vrot.slane %v20032_v53, %v20635_v36  ;;  %v16245_v57 = vld [vmem:[%s21591_s11 + $0x4a8] ss:$92 sps:$4 sm:$0xff]  }
 0x811   :  { %11748 = vmatprep.subr.bf16.mxu0 %v15788_v19  ;;  %v15855_v19 = vld [vmem:[%s21591_s11 + $0x540] ss:$92 sps:$4 sm:$0xff]  }
 0x813   :  { %11708 = vmatpush1.bf16.msra.mxu1 %v15783_v32  ;;  %v15858_v32 = vld [vmem:[%s21591_s11 + $0x10c0] ss:$92 sps:$4 sm:$0xff]  }
 0x814   :  { %11749 = vmatpush1.bf16.msra.mxu0 %v15786_v24  ;;  %11709 = vmatprep.subr.bf16.mxu1 %v15791_v58  ;;  %v7411_v24 = vrot.slane %v20032_v53, %v7410_v12  ;;  %v15863_v58 = vld [vmem:[%s21591_s11 + $0x48c] ss:$92 sps:$4 sm:$0xff]  }
 0x815   :  { %11750 = vmatprep.subr.bf16.mxu0 %v15794_v9  ;;  %v15861_v53 = vld [vmem:[%s21591_s11 + $0x488] ss:$92 sps:$4 sm:$0xff]  }
 0x817   :  { %11710 = vmatpush1.bf16.msra.mxu1 %v15789_v42  ;;  %v15866_v42 = vld [vmem:[%s21591_s11 + $0x100c] ss:$92 sps:$4 sm:$0xff]  }
 0x818   :  { %11751 = vmatpush1.bf16.msra.mxu0 %v15792_v28  ;;  %11711 = vmatprep.subr.bf16.mxu1 %v15797_v18 }
 0x819   :  { %11752 = vmatprep.subr.bf16.mxu0 %v15800_v34 }
 0x81b   :  { %11712 = vmatpush1.bf16.msra.mxu1 %v15795_v33  ;;  %v15864_v33 = vld [vmem:[%s21591_s11 + $0x1008] ss:$92 sps:$4 sm:$0xff]  }
 0x81c   :  { %11753 = vmatpush1.bf16.msra.mxu0 %v15798_v31  ;;  %11713 = vmatprep.subr.bf16.mxu1 %v15803_v48  ;;  %v15869_v31 = vld [vmem:[%s21591_s11 + $0x3d4] ss:$92 sps:$4 sm:$0xff]  }
 0x81d   :  { %11754 = vmatprep.subr.bf16.mxu0 %v15806_v5 }
 0x81f   :  { %11714 = vmatpush1.bf16.msra.mxu1 %v15801_v30 }
 0x820   :  { %11755 = vmatpush1.bf16.msra.mxu0 %v15804_v41  ;;  %11715 = vmatprep.subr.bf16.mxu1 %v15809_v40  ;;  %v15872_v41 = vld [vmem:[%s21591_s11 + $0xf54] ss:$92 sps:$4 sm:$0xff]  }
 0x821   :  { %11756 = vmatprep.subr.bf16.mxu0 %v15812_v44 }
 0x823   :  { %11716 = vmatpush2.bf16.msra.mxu1 %v15807_v14 }
 0x824   :  { %11757 = vmatpush2.bf16.msra.mxu0 %v15810_v45  ;;  %11717 = vmatprep.subr.bf16.mxu1 %v15815_v39  ;;  %v15867_v45 = vld [vmem:[%s21591_s11 + $0x3d0] ss:$92 sps:$4 sm:$0xff]  }
 0x825   :  { %11758 = vmatprep.subr.bf16.mxu0 %v15818_v47  ;;  %v15870_v47 = vld [vmem:[%s21591_s11 + $0xf50] ss:$92 sps:$4 sm:$0xff]  }
 0x827   :  { %11718 = vmatpush2.bf16.msra.mxu1 %v15813_v20  ;;  %v15875_v20 = vld [vmem:[%s21591_s11 + $0x31c] ss:$92 sps:$4 sm:$0xff]  }
 0x828   :  { %11759 = vmatpush2.bf16.msra.mxu0 %v15816_v43  ;;  %11719 = vmatprep.subr.bf16.mxu1 %v15821_v10  ;;  %v15878_v10 = vld [vmem:[%s21591_s11 + $0xe9c] ss:$92 sps:$4 sm:$0xff]  }
 0x829   :  { %11760 = vmatprep.subr.bf16.mxu0 %v15824_v1  ;;  %v15873_v1 = vld [vmem:[%s21591_s11 + $0x318] ss:$92 sps:$4 sm:$0xff]  }
 0x82b   :  { %11720 = vmatpush2.bf16.msra.mxu1 %v15819_v29  ;;  %v15876_v29 = vld [vmem:[%s21591_s11 + $0xe98] ss:$92 sps:$4 sm:$0xff]  }
 0x82c   :  { %11761 = vmatpush2.bf16.msra.mxu0 %v15822_v35  ;;  %11721 = vmatprep.subr.bf16.mxu1 %v15827_v23  ;;  %v15881_v35 = vld [vmem:[%s21591_s11 + $0x264] ss:$92 sps:$4 sm:$0xff]  }
 0x82d   :  { %11762 = vmatprep.subr.bf16.mxu0 %v15830_v46  ;;  %v15884_v23 = vld [vmem:[%s21591_s11 + $0xde4] ss:$92 sps:$4 sm:$0xff]  }
 0x82e   :  { %v15879_v46 = vld [vmem:[%s21591_s11 + $0x260] ss:$92 sps:$4 sm:$0xff]  }
 0x82f   :  { %11722 = vmatpush2.bf16.msra.mxu1 %v15825_v54  ;;  %v15882_v54 = vld [vmem:[%s21591_s11 + $0xde0] ss:$92 sps:$4 sm:$0xff]  }
 0x830   :  { %11763 = vmatpush2.bf16.msra.mxu0 %v15828_v51  ;;  %11723 = vmatprep.subr.bf16.mxu1 %v15833_v50  ;;  %v15887_v51 = vld [vmem:[%s21591_s11 + $0x1ac] ss:$92 sps:$4 sm:$0xff]  }
 0x831   :  { %11764 = vmatprep.subr.bf16.mxu0 %v15836_v56  ;;  %v15890_v50 = vld [vmem:[%s21591_s11 + $0xd2c] ss:$92 sps:$4 sm:$0xff]  }
 0x832   :  { %v15885_v56 = vld [vmem:[%s21591_s11 + $0x1a8] ss:$92 sps:$4 sm:$0xff]  }
 0x833   :  { %11724 = vmatpush2.bf16.msra.mxu1 %v15831_v8  ;;  %v15888_v8 = vld [vmem:[%s21591_s11 + $0xd28] ss:$92 sps:$4 sm:$0xff]  }
 0x834   :  { %11765 = vmatpush2.bf16.msra.mxu0 %v15834_v37  ;;  %11725 = vmatprep.subr.bf16.mxu1 %v15839_v59  ;;  %v15893_v37 = vld [vmem:[%s21591_s11 + $0xf4] ss:$92 sps:$4 sm:$0xff]  }
 0x835   :  { %11766 = vmatprep.subr.bf16.mxu0 %v15842_v13  ;;  %v15896_v59 = vld [vmem:[%s21591_s11 + $0xc74] ss:$92 sps:$4 sm:$0xff]  }
 0x836   :  { %v15891_v13 = vld [vmem:[%s21591_s11 + $0xf0] ss:$92 sps:$4 sm:$0xff]  }
 0x837   :  { %11726 = vmatpush2.bf16.msra.mxu1 %v15837_v49  ;;  %v15894_v49 = vld [vmem:[%s21591_s11 + $0xc70] ss:$92 sps:$4 sm:$0xff]  }
 0x838   :  { %11767 = vmatpush2.bf16.msra.mxu0 %v15840_v60  ;;  %11727 = vmatprep.subr.bf16.mxu1 %v15845_v61  ;;  %v15899_v60 = vld [vmem:[%s21591_s11 + $0x3c] ss:$92 sps:$4 sm:$0xff]  }
 0x839   :  { %11768 = vmatprep.subr.bf16.mxu0 %v15848_v62  ;;  %v15902_v61 = vld [vmem:[%s21591_s11 + $0xbbc] ss:$92 sps:$4 sm:$0xff]  }
 0x83a   :  { %v15897_v62 = vld [vmem:[%s21591_s11 + $0x38] ss:$92 sps:$4 sm:$0xff]  }
 0x83b   :  { %11728 = vmatpush2.bf16.msra.mxu1 %v15843_v17  ;;  %v15900_v17 = vld [vmem:[%s21591_s11 + $0xbb8] ss:$92 sps:$4 sm:$0xff]  }
 0x83c   :  { %11769 = vmatpush2.bf16.msra.mxu0 %v15846_v0  ;;  %11729 = vmatprep.subr.bf16.mxu1 %v15851_v27  ;;  %v15905_v0 = vld [vmem:[%s21591_s11 + $0xb04] ss:$92 sps:$4 sm:$0xff]  }
 0x83d   :  { %11770 = vmatprep.subr.bf16.mxu0 %v15854_v21  ;;  %v15908_v27 = vld [vmem:[%s21591_s11 + $0x1684] ss:$92 sps:$4 sm:$0xff]  }
 0x83e   :  { %v15903_v21 = vld [vmem:[%s21591_s11 + $0xb00] ss:$92 sps:$4 sm:$0xff]  }
 0x83f   :  { %11730 = vmatpush2.bf16.msra.mxu1 %v15849_v2  ;;  %v15906_v2 = vld [vmem:[%s21591_s11 + $0x1680] ss:$92 sps:$4 sm:$0xff]  }
 0x840   :  { %11771 = vmatpush2.bf16.msra.mxu0 %v15852_v26  ;;  %11781 = vmatprep.subr.bf16.mxu1 %v15857_v3  ;;  %v15911_v26 = vld [vmem:[%s21591_s11 + $0xa4c] ss:$92 sps:$4 sm:$0xff]  }
 0x841   :  { %11822 = vmatprep.subr.bf16.mxu0 %v15860_v11  ;;  %v15914_v3 = vld [vmem:[%s21591_s11 + $0x15cc] ss:$92 sps:$4 sm:$0xff]  }
 0x842   :  { %v11487_v9 = vpop.f32.mrf.mxu1  ;;  %11732 = vmatmul.mubr.bf16.vlgmr.msra.gmra.mxu1 %v19444_v7  ;;  %v15909_v11 = vld [vmem:[%s21591_s11 + $0xa48] ss:$92 sps:$4 sm:$0xff]  }
 0x843   :  { %v11488_v28 = vadd.f32 %v11487_v9, %v7407_v38  ;;  %v11528_v18 = vpop.f32.mrf.mxu0  ;;  %11773 = vmatmul.mubr.bf16.vlgmr.msra.gmra.mxu0 %v19446_v22  ;;  %11782 = vmatpush1.bf16.msra.mxu1 %v15855_v19  ;;  %v15912_v38 = vld [vmem:[%s21591_s11 + $0x15c8] ss:$92 sps:$4 sm:$0xff]   ;;  %v15917_v19 = vld [vmem:[%s21591_s11 + $0x994] ss:$92 sps:$4 sm:$0xff]   ;;  %v15923_v9 = vld [vmem:[%s21591_s11 + $0x8dc] ss:$92 sps:$4 sm:$0xff]  }
 0x844   :  { %11813 = vmatprep.mubr.bf16.mxu1 %v19434_v55  ;;  %11823 = vmatpush1.bf16.msra.mxu0 %v15858_v32  ;;  %v11489_v34 = vpop.f32.mrf.mxu1  ;;  %v15920_v32 = vld [vmem:[%s21591_s11 + $0x1514] ss:$92 sps:$4 sm:$0xff]  }
 0x845   :  { %v11529_v48 = vadd.f32 %v11528_v18, %v11488_v28  ;;  %11854 = vmatprep.mubr.bf16.mxu0 %v19436_v15  ;;  %v11490_v5 = vadd.f32 %v11489_v34, %v7411_v24  ;;  %v11530_v30 = vpop.f32.mrf.mxu0  ;;  %11783 = vmatprep.subr.bf16.mxu1 %v15863_v58  ;;  %v15915_v24 = vld [vmem:[%s21591_s11 + $0x990] ss:$92 sps:$4 sm:$0xff]   ;;  %v15921_v28 = vld [vmem:[%s21591_s11 + $0x8d8] ss:$92 sps:$4 sm:$0xff]   ;;  %v15932_v34 = vld [vmem:[%s21591_s11 + $0x13a4] ss:$92 sps:$4 sm:$0xff]  }
 0x846   :  { %v11491_v40 = vpop.f32.mrf.mxu1  ;;  %11824 = vmatprep.subr.bf16.mxu0 %v15866_v42  ;;  %v15918_v58 = vld [vmem:[%s21591_s11 + $0x1510] ss:$92 sps:$4 sm:$0xff]   ;;  %v15926_v42 = vld [vmem:[%s21591_s11 + $0x145c] ss:$92 sps:$4 sm:$0xff]  }
 0x847   :  { %12195 = vst [vmem:[#allocation4 + $0x30] sm:$0xff] %v11529_v48  ;;  %v11531_v44 = vadd.f32 %v11530_v30, %v11490_v5  ;;  %v11532_v14 = vpop.f32.mrf.mxu0  ;;  %11784 = vmatpush1.bf16.msra.mxu1 %v15861_v53  ;;  %v15924_v18 = vld [vmem:[%s21591_s11 + $0x1458] ss:$92 sps:$4 sm:$0xff]   ;;  %v15929_v53 = vld [vmem:[%s21591_s11 + $0x824] ss:$92 sps:$4 sm:$0xff]  }
 0x848   :  { %11825 = vmatpush1.bf16.msra.mxu0 %v15864_v33  ;;  %v11492_v39 = vpop.f32.mrf.mxu1  ;;  %11785 = vmatprep.subr.bf16.mxu1 %v15869_v31  ;;  %v15927_v33 = vld [vmem:[%s21591_s11 + $0x820] ss:$92 sps:$4 sm:$0xff]   ;;  %v15935_v48 = vld [vmem:[%s21591_s11 + $0x76c] ss:$92 sps:$4 sm:$0xff]   ;;  %v15941_v40 = vld [vmem:[%s21591_s11 + $0x6b4] ss:$92 sps:$4 sm:$0xff]  }
 0x849   :  { %12196 = vst [vmem:[#allocation4 + $0x38] sm:$0xff] %v11531_v44  ;;  %v11533_v43 = vpop.f32.mrf.mxu0  ;;  %11826 = vmatprep.subr.bf16.mxu0 %v15872_v41  ;;  %v15930_v31 = vld [vmem:[%s21591_s11 + $0x13a0] ss:$92 sps:$4 sm:$0xff]   ;;  %v15938_v5 = vld [vmem:[%s21591_s11 + $0x12ec] ss:$92 sps:$4 sm:$0xff]  }
 0x84a   :  { %v15933_v30 = vld [vmem:[%s21591_s11 + $0x768] ss:$92 sps:$4 sm:$0xff]   ;;  %v15944_v44 = vld [vmem:[%s21591_s11 + $0x1234] ss:$92 sps:$4 sm:$0xff]   ;;  %v15947_v39 = vld [vmem:[%s21591_s11 + $0x5fc] ss:$92 sps:$4 sm:$0xff]  }
 0x84b   :  { %11786 = vmatpush1.bf16.msra.mxu1 %v15867_v45  ;;  %v15936_v41 = vld [vmem:[%s21591_s11 + $0x12e8] ss:$92 sps:$4 sm:$0xff]   ;;  %v15939_v14 = vld [vmem:[%s21591_s11 + $0x6b0] ss:$92 sps:$4 sm:$0xff]   ;;  %v15948_v43 = vld [vmem:[%s21591_s11 + $0x1178] ss:$92 sps:$4 sm:$0xff]  }
 0x84c   :  { %11827 = vmatpush1.bf16.msra.mxu0 %v15870_v47  ;;  %11787 = vmatprep.subr.bf16.mxu1 %v15875_v20  ;;  %v15942_v45 = vld [vmem:[%s21591_s11 + $0x1230] ss:$92 sps:$4 sm:$0xff]   ;;  %v15950_v47 = vld [vmem:[%s21591_s11 + $0x117c] ss:$92 sps:$4 sm:$0xff]  }
 0x84d   :  { %11828 = vmatprep.subr.bf16.mxu0 %v15878_v10  ;;  %v15945_v20 = vld [vmem:[%s21591_s11 + $0x5f8] ss:$92 sps:$4 sm:$0xff]   ;;  %v20845_v10 = vld [vmem:[%s21592_s12 + $0x8] sm:$0xff] }
 0x84f   :  { %11788 = vmatpush1.bf16.msra.mxu1 %v15873_v1  ;;  %v15953_v1 = vld [vmem:[%s21591_s11 + $0x54c] ss:$92 sps:$4 sm:$0xff]  }
 0x850   :  { %11829 = vmatpush1.bf16.msra.mxu0 %v15876_v29  ;;  %11789 = vmatprep.subr.bf16.mxu1 %v15881_v35  ;;  %v15956_v29 = vld [vmem:[%s21591_s11 + $0x10cc] ss:$92 sps:$4 sm:$0xff]   ;;  %v7415_v35 = vrot.slane %v20845_v10, %v17252_v63 }
 0x851   :  { %11830 = vmatprep.subr.bf16.mxu0 %v15884_v23  ;;  %v15951_v23 = vld [vmem:[%s21591_s11 + $0x548] ss:$92 sps:$4 sm:$0xff]  }
 0x853   :  { %11790 = vmatpush1.bf16.msra.mxu1 %v15879_v46  ;;  %v15954_v46 = vld [vmem:[%s21591_s11 + $0x10c8] ss:$92 sps:$4 sm:$0xff]  }
 0x854   :  { %11831 = vmatpush1.bf16.msra.mxu0 %v15882_v54  ;;  %11791 = vmatprep.subr.bf16.mxu1 %v15887_v51  ;;  %v7419_v54 = vrot.slane %v20845_v10, %v17267_v4  ;;  %v15959_v51 = vld [vmem:[%s21591_s11 + $0x494] ss:$92 sps:$4 sm:$0xff]  }
 0x855   :  { %11832 = vmatprep.subr.bf16.mxu0 %v15890_v50 }
 0x857   :  { %11792 = vmatpush1.bf16.msra.mxu1 %v15885_v56  ;;  %v15962_v56 = vld [vmem:[%s21591_s11 + $0x1014] ss:$92 sps:$4 sm:$0xff]  }
 0x858   :  { %11833 = vmatpush1.bf16.msra.mxu0 %v15888_v8  ;;  %11793 = vmatprep.subr.bf16.mxu1 %v15893_v37 }
 0x859   :  { %11834 = vmatprep.subr.bf16.mxu0 %v15896_v59  ;;  %v15957_v59 = vld [vmem:[%s21591_s11 + $0x490] ss:$92 sps:$4 sm:$0xff]  }
 0x85b   :  { %11794 = vmatpush1.bf16.msra.mxu1 %v15891_v13 }
 0x85c   :  { %11835 = vmatpush1.bf16.msra.mxu0 %v15894_v49  ;;  %11795 = vmatprep.subr.bf16.mxu1 %v15899_v60  ;;  %v15960_v49 = vld [vmem:[%s21591_s11 + $0x1010] ss:$92 sps:$4 sm:$0xff]   ;;  %v15965_v60 = vld [vmem:[%s21591_s11 + $0x3dc] ss:$92 sps:$4 sm:$0xff]  }
 0x85d   :  { %11836 = vmatprep.subr.bf16.mxu0 %v15902_v61 }
 0x85f   :  { %11796 = vmatpush1.bf16.msra.mxu1 %v15897_v62 }
 0x860   :  { %11837 = vmatpush1.bf16.msra.mxu0 %v15900_v17  ;;  %11797 = vmatprep.subr.bf16.mxu1 %v15905_v0  ;;  %v15968_v0 = vld [vmem:[%s21591_s11 + $0xf5c] ss:$92 sps:$4 sm:$0xff]  }
 0x861   :  { %11838 = vmatprep.subr.bf16.mxu0 %v15908_v27 }
 0x863   :  { %11798 = vmatpush2.bf16.msra.mxu1 %v15903_v21 }
 0x864   :  { %11839 = vmatpush2.bf16.msra.mxu0 %v15906_v2  ;;  %11799 = vmatprep.subr.bf16.mxu1 %v15911_v26  ;;  %v15963_v26 = vld [vmem:[%s21591_s11 + $0x3d8] ss:$92 sps:$4 sm:$0xff]  }
 0x865   :  { %11840 = vmatprep.subr.bf16.mxu0 %v15914_v3 }
 0x867   :  { %11800 = vmatpush2.bf16.msra.mxu1 %v15909_v11  ;;  %v15966_v11 = vld [vmem:[%s21591_s11 + $0xf58] ss:$92 sps:$4 sm:$0xff]  }
 0x868   :  { %11841 = vmatpush2.bf16.msra.mxu0 %v15912_v38  ;;  %11801 = vmatprep.subr.bf16.mxu1 %v15917_v19  ;;  %v15971_v38 = vld [vmem:[%s21591_s11 + $0x324] ss:$92 sps:$4 sm:$0xff]  }
 0x869   :  { %11842 = vmatprep.subr.bf16.mxu0 %v15920_v32  ;;  %v15974_v32 = vld [vmem:[%s21591_s11 + $0xea4] ss:$92 sps:$4 sm:$0xff]  }
 0x86b   :  { %11802 = vmatpush2.bf16.msra.mxu1 %v15915_v24  ;;  %v15969_v24 = vld [vmem:[%s21591_s11 + $0x320] ss:$92 sps:$4 sm:$0xff]  }
 0x86c   :  { %11843 = vmatpush2.bf16.msra.mxu0 %v15918_v58  ;;  %11803 = vmatprep.subr.bf16.mxu1 %v15923_v9  ;;  %v15972_v58 = vld [vmem:[%s21591_s11 + $0xea0] ss:$92 sps:$4 sm:$0xff]   ;;  %v15977_v9 = vld [vmem:[%s21591_s11 + $0x26c] ss:$92 sps:$4 sm:$0xff]  }
 0x86d   :  { %11844 = vmatprep.subr.bf16.mxu0 %v15926_v42  ;;  %v15980_v42 = vld [vmem:[%s21591_s11 + $0xdec] ss:$92 sps:$4 sm:$0xff]  }
 0x86f   :  { %11804 = vmatpush2.bf16.msra.mxu1 %v15921_v28  ;;  %v15975_v28 = vld [vmem:[%s21591_s11 + $0x268] ss:$92 sps:$4 sm:$0xff]  }
 0x870   :  { %11845 = vmatpush2.bf16.msra.mxu0 %v15924_v18  ;;  %11805 = vmatprep.subr.bf16.mxu1 %v15929_v53  ;;  %v15978_v18 = vld [vmem:[%s21591_s11 + $0xde8] ss:$92 sps:$4 sm:$0xff]   ;;  %v15983_v53 = vld [vmem:[%s21591_s11 + $0x1b4] ss:$92 sps:$4 sm:$0xff]  }
 0x871   :  { %11846 = vmatprep.subr.bf16.mxu0 %v15932_v34  ;;  %v15986_v34 = vld [vmem:[%s21591_s11 + $0xd34] ss:$92 sps:$4 sm:$0xff]  }
 0x873   :  { %11806 = vmatpush2.bf16.msra.mxu1 %v15927_v33  ;;  %v15981_v33 = vld [vmem:[%s21591_s11 + $0x1b0] ss:$92 sps:$4 sm:$0xff]  }
 0x874   :  { %11847 = vmatpush2.bf16.msra.mxu0 %v15930_v31  ;;  %11807 = vmatprep.subr.bf16.mxu1 %v15935_v48  ;;  %v15984_v31 = vld [vmem:[%s21591_s11 + $0xd30] ss:$92 sps:$4 sm:$0xff]   ;;  %v15989_v48 = vld [vmem:[%s21591_s11 + $0xfc] ss:$92 sps:$4 sm:$0xff]  }
 0x875   :  { %11848 = vmatprep.subr.bf16.mxu0 %v15938_v5  ;;  %v15992_v5 = vld [vmem:[%s21591_s11 + $0xc7c] ss:$92 sps:$4 sm:$0xff]  }
 0x877   :  { %11808 = vmatpush2.bf16.msra.mxu1 %v15933_v30  ;;  %v15987_v30 = vld [vmem:[%s21591_s11 + $0xf8] ss:$92 sps:$4 sm:$0xff]  }
 0x878   :  { %11849 = vmatpush2.bf16.msra.mxu0 %v15936_v41  ;;  %11809 = vmatprep.subr.bf16.mxu1 %v15941_v40  ;;  %v15990_v41 = vld [vmem:[%s21591_s11 + $0xc78] ss:$92 sps:$4 sm:$0xff]   ;;  %v15995_v40 = vld [vmem:[%s21591_s11 + $0x44] ss:$92 sps:$4 sm:$0xff]  }
 0x879   :  { %11850 = vmatprep.subr.bf16.mxu0 %v15944_v44  ;;  %v15998_v44 = vld [vmem:[%s21591_s11 + $0xbc4] ss:$92 sps:$4 sm:$0xff]  }
 0x87b   :  { %11810 = vmatpush2.bf16.msra.mxu1 %v15939_v14  ;;  %v15993_v14 = vld [vmem:[%s21591_s11 + $0x40] ss:$92 sps:$4 sm:$0xff]  }
 0x87c   :  { %11851 = vmatpush2.bf16.msra.mxu0 %v15942_v45  ;;  %11811 = vmatprep.subr.bf16.mxu1 %v15947_v39  ;;  %v15996_v45 = vld [vmem:[%s21591_s11 + $0xbc0] ss:$92 sps:$4 sm:$0xff]   ;;  %v16001_v39 = vld [vmem:[%s21591_s11 + $0xb0c] ss:$92 sps:$4 sm:$0xff]  }
 0x87d   :  { %11852 = vmatprep.subr.bf16.mxu0 %v15950_v47  ;;  %v16004_v47 = vld [vmem:[%s21591_s11 + $0x168c] ss:$92 sps:$4 sm:$0xff]  }
 0x87f   :  { %11812 = vmatpush2.bf16.msra.mxu1 %v15945_v20  ;;  %v15999_v20 = vld [vmem:[%s21591_s11 + $0xb08] ss:$92 sps:$4 sm:$0xff]  }
 0x880   :  { %11853 = vmatpush2.bf16.msra.mxu0 %v15948_v43  ;;  %11863 = vmatprep.subr.bf16.mxu1 %v15953_v1  ;;  %v16002_v43 = vld [vmem:[%s21591_s11 + $0x1688] ss:$92 sps:$4 sm:$0xff]   ;;  %v16007_v1 = vld [vmem:[%s21591_s11 + $0xa54] ss:$92 sps:$4 sm:$0xff]  }
 0x881   :  { %11904 = vmatprep.subr.bf16.mxu0 %v15956_v29  ;;  %v16010_v29 = vld [vmem:[%s21591_s11 + $0x15d4] ss:$92 sps:$4 sm:$0xff]  }
 0x882   :  { %v11569_v50 = vpop.f32.mrf.mxu1  ;;  %11814 = vmatmul.mubr.bf16.vlgmr.msra.gmra.mxu1 %v19444_v7 }
 0x883   :  { %v11570_v8 = vadd.f32 %v11569_v50, %v7415_v35  ;;  %v11610_v37 = vpop.f32.mrf.mxu0  ;;  %11855 = vmatmul.mubr.bf16.vlgmr.msra.gmra.mxu0 %v19446_v22  ;;  %11864 = vmatpush1.bf16.msra.mxu1 %v15951_v23  ;;  %v16005_v35 = vld [vmem:[%s21591_s11 + $0xa50] ss:$92 sps:$4 sm:$0xff]   ;;  %v16014_v50 = vld [vmem:[%s21591_s11 + $0x1518] ss:$92 sps:$4 sm:$0xff]  }
 0x884   :  { %11895 = vmatprep.mubr.bf16.mxu1 %v19434_v55  ;;  %11905 = vmatpush1.bf16.msra.mxu0 %v15954_v46  ;;  %v11571_v13 = vpop.f32.mrf.mxu1  ;;  %v16008_v23 = vld [vmem:[%s21591_s11 + $0x15d0] ss:$92 sps:$4 sm:$0xff]   ;;  %v16013_v46 = vld [vmem:[%s21591_s11 + $0x99c] ss:$92 sps:$4 sm:$0xff]  }
 0x885   :  { %v11611_v61 = vadd.f32 %v11610_v37, %v11570_v8  ;;  %11936 = vmatprep.mubr.bf16.mxu0 %v19436_v15  ;;  %v11572_v62 = vadd.f32 %v11571_v13, %v7419_v54  ;;  %v11612_v17 = vpop.f32.mrf.mxu0  ;;  %11865 = vmatprep.subr.bf16.mxu1 %v15959_v51  ;;  %v16016_v54 = vld [vmem:[%s21591_s11 + $0x151c] ss:$92 sps:$4 sm:$0xff]   ;;  %v16022_v8 = vld [vmem:[%s21591_s11 + $0x1464] ss:$92 sps:$4 sm:$0xff]   ;;  %v16025_v13 = vld [vmem:[%s21591_s11 + $0x82c] ss:$92 sps:$4 sm:$0xff]  }
 0x886   :  { %v11573_v27 = vpop.f32.mrf.mxu1  ;;  %11906 = vmatprep.subr.bf16.mxu0 %v15962_v56  ;;  %v16011_v51 = vld [vmem:[%s21591_s11 + $0x998] ss:$92 sps:$4 sm:$0xff]   ;;  %v16019_v56 = vld [vmem:[%s21591_s11 + $0x8e4] ss:$92 sps:$4 sm:$0xff]  }
 0x887   :  { %12197 = vst [vmem:[#allocation4 + $0x40] sm:$0xff] %v11611_v61  ;;  %v11613_v21 = vadd.f32 %v11612_v17, %v11572_v62  ;;  %v11614_v2 = vpop.f32.mrf.mxu0  ;;  %11866 = vmatpush1.bf16.msra.mxu1 %v15957_v59  ;;  %v16017_v37 = vld [vmem:[%s21591_s11 + $0x8e0] ss:$92 sps:$4 sm:$0xff]   ;;  %v16026_v61 = vld [vmem:[%s21591_s11 + $0x13a8] ss:$92 sps:$4 sm:$0xff]  }
 0x888   :  { %11907 = vmatpush1.bf16.msra.mxu0 %v15960_v49  ;;  %v11574_v3 = vpop.f32.mrf.mxu1  ;;  %11867 = vmatprep.subr.bf16.mxu1 %v15965_v60  ;;  %v16020_v59 = vld [vmem:[%s21591_s11 + $0x1460] ss:$92 sps:$4 sm:$0xff]   ;;  %v16028_v49 = vld [vmem:[%s21591_s11 + $0x13ac] ss:$92 sps:$4 sm:$0xff]   ;;  %v16031_v62 = vld [vmem:[%s21591_s11 + $0x774] ss:$92 sps:$4 sm:$0xff]  }
 0x889   :  { %12198 = vst [vmem:[#allocation4 + $0x48] sm:$0xff] %v11613_v21  ;;  %v11615_v19 = vpop.f32.mrf.mxu0  ;;  %11908 = vmatprep.subr.bf16.mxu0 %v15968_v0  ;;  %v16023_v60 = vld [vmem:[%s21591_s11 + $0x828] ss:$92 sps:$4 sm:$0xff]   ;;  %v16034_v17 = vld [vmem:[%s21591_s11 + $0x12f4] ss:$92 sps:$4 sm:$0xff]  }
 0x88a   :  { %v16029_v0 = vld [vmem:[%s21591_s11 + $0x770] ss:$92 sps:$4 sm:$0xff]   ;;  %v16037_v21 = vld [vmem:[%s21591_s11 + $0x6bc] ss:$92 sps:$4 sm:$0xff]  }
 0x88b   :  { %11868 = vmatpush1.bf16.msra.mxu1 %v15963_v26  ;;  %v16032_v27 = vld [vmem:[%s21591_s11 + $0x12f0] ss:$92 sps:$4 sm:$0xff]   ;;  %v16040_v2 = vld [vmem:[%s21591_s11 + $0x123c] ss:$92 sps:$4 sm:$0xff]  }
 0x88c   :  { %11909 = vmatpush1.bf16.msra.mxu0 %v15966_v11  ;;  %11869 = vmatprep.subr.bf16.mxu1 %v15971_v38  ;;  %v16035_v26 = vld [vmem:[%s21591_s11 + $0x6b8] ss:$92 sps:$4 sm:$0xff]   ;;  %v16043_v11 = vld [vmem:[%s21591_s11 + $0x604] ss:$92 sps:$4 sm:$0xff]  }
 0x88d   :  { %11910 = vmatprep.subr.bf16.mxu0 %v15974_v32  ;;  %v16038_v3 = vld [vmem:[%s21591_s11 + $0x1238] ss:$92 sps:$4 sm:$0xff]   ;;  %v16046_v38 = vld [vmem:[%s21591_s11 + $0x1184] ss:$92 sps:$4 sm:$0xff]  }
 0x88e   :  { %v16041_v19 = vld [vmem:[%s21591_s11 + $0x600] ss:$92 sps:$4 sm:$0xff]  }
 0x88f   :  { %11870 = vmatpush1.bf16.msra.mxu1 %v15969_v24  ;;  %v16044_v32 = vld [vmem:[%s21591_s11 + $0x1180] ss:$92 sps:$4 sm:$0xff]   ;;  %v16049_v24 = vld [vmem:[%s21591_s11 + $0x554] ss:$92 sps:$4 sm:$0xff]  }
 0x890   :  { %11911 = vmatpush1.bf16.msra.mxu0 %v15972_v58  ;;  %11871 = vmatprep.subr.bf16.mxu1 %v15977_v9  ;;  %v16052_v58 = vld [vmem:[%s21591_s11 + $0x10d4] ss:$92 sps:$4 sm:$0xff]   ;;  %v7423_v9 = vrot.slane %v20845_v10, %v18518_v25 }
 0x891   :  { %11912 = vmatprep.subr.bf16.mxu0 %v15980_v42  ;;  %v16047_v42 = vld [vmem:[%s21591_s11 + $0x550] ss:$92 sps:$4 sm:$0xff]  }
 0x893   :  { %11872 = vmatpush1.bf16.msra.mxu1 %v15975_v28  ;;  %v16050_v28 = vld [vmem:[%s21591_s11 + $0x10d0] ss:$92 sps:$4 sm:$0xff]  }
 0x894   :  { %11913 = vmatpush1.bf16.msra.mxu0 %v15978_v18  ;;  %11873 = vmatprep.subr.bf16.mxu1 %v15983_v53  ;;  %v7427_v18 = vrot.slane %v20845_v10, %v18527_v6  ;;  %v16055_v53 = vld [vmem:[%s21591_s11 + $0x49c] ss:$92 sps:$4 sm:$0xff]  }
 0x895   :  { %11914 = vmatprep.subr.bf16.mxu0 %v15986_v34 }
 0x897   :  { %11874 = vmatpush1.bf16.msra.mxu1 %v15981_v33  ;;  %v16058_v33 = vld [vmem:[%s21591_s11 + $0x101c] ss:$92 sps:$4 sm:$0xff]  }
 0x898   :  { %11915 = vmatpush1.bf16.msra.mxu0 %v15984_v31  ;;  %11875 = vmatprep.subr.bf16.mxu1 %v15989_v48 }
 0x899   :  { %11916 = vmatprep.subr.bf16.mxu0 %v15992_v5  ;;  %v16053_v5 = vld [vmem:[%s21591_s11 + $0x498] ss:$92 sps:$4 sm:$0xff]  }
 0x89b   :  { %11876 = vmatpush1.bf16.msra.mxu1 %v15987_v30 }
 0x89c   :  { %11917 = vmatpush1.bf16.msra.mxu0 %v15990_v41  ;;  %11877 = vmatprep.subr.bf16.mxu1 %v15995_v40  ;;  %v16056_v41 = vld [vmem:[%s21591_s11 + $0x1018] ss:$92 sps:$4 sm:$0xff]   ;;  %v16061_v40 = vld [vmem:[%s21591_s11 + $0x3e4] ss:$92 sps:$4 sm:$0xff]  }
 0x89d   :  { %11918 = vmatprep.subr.bf16.mxu0 %v15998_v44 }
 0x89f   :  { %11878 = vmatpush1.bf16.msra.mxu1 %v15993_v14 }
 0x8a0   :  { %11919 = vmatpush1.bf16.msra.mxu0 %v15996_v45  ;;  %11879 = vmatprep.subr.bf16.mxu1 %v16001_v39  ;;  %v16064_v39 = vld [vmem:[%s21591_s11 + $0xf64] ss:$92 sps:$4 sm:$0xff]  }
 0x8a1   :  { %11920 = vmatprep.subr.bf16.mxu0 %v16004_v47 }
 0x8a3   :  { %11880 = vmatpush2.bf16.msra.mxu1 %v15999_v20 }
 0x8a4   :  { %11921 = vmatpush2.bf16.msra.mxu0 %v16002_v43  ;;  %11881 = vmatprep.subr.bf16.mxu1 %v16007_v1  ;;  %v16059_v1 = vld [vmem:[%s21591_s11 + $0x3e0] ss:$92 sps:$4 sm:$0xff]  }
 0x8a5   :  { %11922 = vmatprep.subr.bf16.mxu0 %v16010_v29 }
 0x8a7   :  { %11882 = vmatpush2.bf16.msra.mxu1 %v16005_v35  ;;  %v16062_v35 = vld [vmem:[%s21591_s11 + $0xf60] ss:$92 sps:$4 sm:$0xff]  }
 0x8a8   :  { %11923 = vmatpush2.bf16.msra.mxu0 %v16008_v23  ;;  %11883 = vmatprep.subr.bf16.mxu1 %v16013_v46  ;;  %v16067_v23 = vld [vmem:[%s21591_s11 + $0x32c] ss:$92 sps:$4 sm:$0xff]  }
 0x8a9   :  { %11924 = vmatprep.subr.bf16.mxu0 %v16016_v54  ;;  %v16070_v54 = vld [vmem:[%s21591_s11 + $0xeac] ss:$92 sps:$4 sm:$0xff]  }
 0x8ab   :  { %11884 = vmatpush2.bf16.msra.mxu1 %v16011_v51  ;;  %v16065_v51 = vld [vmem:[%s21591_s11 + $0x328] ss:$92 sps:$4 sm:$0xff]  }
 0x8ac   :  { %11925 = vmatpush2.bf16.msra.mxu0 %v16014_v50  ;;  %11885 = vmatprep.subr.bf16.mxu1 %v16019_v56  ;;  %v16068_v50 = vld [vmem:[%s21591_s11 + $0xea8] ss:$92 sps:$4 sm:$0xff]   ;;  %v16073_v56 = vld [vmem:[%s21591_s11 + $0x274] ss:$92 sps:$4 sm:$0xff]  }
 0x8ad   :  { %11926 = vmatprep.subr.bf16.mxu0 %v16022_v8  ;;  %v16076_v8 = vld [vmem:[%s21591_s11 + $0xdf4] ss:$92 sps:$4 sm:$0xff]  }
 0x8af   :  { %11886 = vmatpush2.bf16.msra.mxu1 %v16017_v37  ;;  %v16071_v37 = vld [vmem:[%s21591_s11 + $0x270] ss:$92 sps:$4 sm:$0xff]  }
 0x8b0   :  { %11927 = vmatpush2.bf16.msra.mxu0 %v16020_v59  ;;  %11887 = vmatprep.subr.bf16.mxu1 %v16025_v13  ;;  %v16074_v59 = vld [vmem:[%s21591_s11 + $0xdf0] ss:$92 sps:$4 sm:$0xff]   ;;  %v16079_v13 = vld [vmem:[%s21591_s11 + $0x1bc] ss:$92 sps:$4 sm:$0xff]  }
 0x8b1   :  { %11928 = vmatprep.subr.bf16.mxu0 %v16028_v49  ;;  %v16082_v49 = vld [vmem:[%s21591_s11 + $0xd3c] ss:$92 sps:$4 sm:$0xff]  }
 0x8b3   :  { %11888 = vmatpush2.bf16.msra.mxu1 %v16023_v60  ;;  %v16077_v60 = vld [vmem:[%s21591_s11 + $0x1b8] ss:$92 sps:$4 sm:$0xff]  }
 0x8b4   :  { %11929 = vmatpush2.bf16.msra.mxu0 %v16026_v61  ;;  %11889 = vmatprep.subr.bf16.mxu1 %v16031_v62  ;;  %v16080_v61 = vld [vmem:[%s21591_s11 + $0xd38] ss:$92 sps:$4 sm:$0xff]   ;;  %v16085_v62 = vld [vmem:[%s21591_s11 + $0x104] ss:$92 sps:$4 sm:$0xff]  }
 0x8b5   :  { %11930 = vmatprep.subr.bf16.mxu0 %v16034_v17  ;;  %v16088_v17 = vld [vmem:[%s21591_s11 + $0xc84] ss:$92 sps:$4 sm:$0xff]  }
 0x8b7   :  { %11890 = vmatpush2.bf16.msra.mxu1 %v16029_v0  ;;  %v16083_v0 = vld [vmem:[%s21591_s11 + $0x100] ss:$92 sps:$4 sm:$0xff]  }
 0x8b8   :  { %11931 = vmatpush2.bf16.msra.mxu0 %v16032_v27  ;;  %11891 = vmatprep.subr.bf16.mxu1 %v16037_v21  ;;  %v16086_v27 = vld [vmem:[%s21591_s11 + $0xc80] ss:$92 sps:$4 sm:$0xff]   ;;  %v16091_v21 = vld [vmem:[%s21591_s11 + $0x4c] ss:$92 sps:$4 sm:$0xff]  }
 0x8b9   :  { %11932 = vmatprep.subr.bf16.mxu0 %v16040_v2  ;;  %v16094_v2 = vld [vmem:[%s21591_s11 + $0xbcc] ss:$92 sps:$4 sm:$0xff]  }
 0x8bb   :  { %11892 = vmatpush2.bf16.msra.mxu1 %v16035_v26  ;;  %v16089_v26 = vld [vmem:[%s21591_s11 + $0x48] ss:$92 sps:$4 sm:$0xff]  }
 0x8bc   :  { %11933 = vmatpush2.bf16.msra.mxu0 %v16038_v3  ;;  %11893 = vmatprep.subr.bf16.mxu1 %v16043_v11  ;;  %v16092_v3 = vld [vmem:[%s21591_s11 + $0xbc8] ss:$92 sps:$4 sm:$0xff]   ;;  %v16097_v11 = vld [vmem:[%s21591_s11 + $0xb14] ss:$92 sps:$4 sm:$0xff]  }
 0x8bd   :  { %11934 = vmatprep.subr.bf16.mxu0 %v16046_v38  ;;  %v16100_v38 = vld [vmem:[%s21591_s11 + $0x1694] ss:$92 sps:$4 sm:$0xff]  }
 0x8bf   :  { %11894 = vmatpush2.bf16.msra.mxu1 %v16041_v19  ;;  %v16095_v19 = vld [vmem:[%s21591_s11 + $0xb10] ss:$92 sps:$4 sm:$0xff]  }
 0x8c0   :  { %11935 = vmatpush2.bf16.msra.mxu0 %v16044_v32  ;;  %11945 = vmatprep.subr.bf16.mxu1 %v16049_v24  ;;  %v16098_v32 = vld [vmem:[%s21591_s11 + $0x1690] ss:$92 sps:$4 sm:$0xff]   ;;  %v16103_v24 = vld [vmem:[%s21591_s11 + $0xa5c] ss:$92 sps:$4 sm:$0xff]  }
 0x8c1   :  { %11986 = vmatprep.subr.bf16.mxu0 %v16052_v58  ;;  %v16106_v58 = vld [vmem:[%s21591_s11 + $0x15dc] ss:$92 sps:$4 sm:$0xff]  }
 0x8c2   :  { %v11651_v34 = vpop.f32.mrf.mxu1  ;;  %11896 = vmatmul.mubr.bf16.vlgmr.msra.gmra.mxu1 %v19444_v7 }
 0x8c3   :  { %v11652_v31 = vadd.f32 %v11651_v34, %v7423_v9  ;;  %v11692_v48 = vpop.f32.mrf.mxu0  ;;  %11937 = vmatmul.mubr.bf16.vlgmr.msra.gmra.mxu0 %v19446_v22  ;;  %11946 = vmatpush1.bf16.msra.mxu1 %v16047_v42  ;;  %v16101_v9 = vld [vmem:[%s21591_s11 + $0xa58] ss:$92 sps:$4 sm:$0xff]   ;;  %v16110_v34 = vld [vmem:[%s21591_s11 + $0x1520] ss:$92 sps:$4 sm:$0xff]  }
 0x8c4   :  { %11977 = vmatprep.mubr.bf16.mxu1 %v19434_v55  ;;  %11987 = vmatpush1.bf16.msra.mxu0 %v16050_v28  ;;  %v11653_v30 = vpop.f32.mrf.mxu1  ;;  %v16104_v42 = vld [vmem:[%s21591_s11 + $0x15d8] ss:$92 sps:$4 sm:$0xff]   ;;  %v16109_v28 = vld [vmem:[%s21591_s11 + $0x9a4] ss:$92 sps:$4 sm:$0xff]  }
 0x8c5   :  { %v11693_v44 = vadd.f32 %v11692_v48, %v11652_v31  ;;  %12018 = vmatprep.mubr.bf16.mxu0 %v19436_v15  ;;  %v11654_v14 = vadd.f32 %v11653_v30, %v7427_v18  ;;  %v11694_v45 = vpop.f32.mrf.mxu0  ;;  %11947 = vmatprep.subr.bf16.mxu1 %v16055_v53  ;;  %v16112_v18 = vld [vmem:[%s21591_s11 + $0x1524] ss:$92 sps:$4 sm:$0xff]   ;;  %v16118_v31 = vld [vmem:[%s21591_s11 + $0x146c] ss:$92 sps:$4 sm:$0xff]   ;;  %v16121_v30 = vld [vmem:[%s21591_s11 + $0x834] ss:$92 sps:$4 sm:$0xff]  }
 0x8c6   :  { %v11655_v47 = vpop.f32.mrf.mxu1  ;;  %11988 = vmatprep.subr.bf16.mxu0 %v16058_v33  ;;  %v16107_v53 = vld [vmem:[%s21591_s11 + $0x9a0] ss:$92 sps:$4 sm:$0xff]   ;;  %v16115_v33 = vld [vmem:[%s21591_s11 + $0x8ec] ss:$92 sps:$4 sm:$0xff]  }
 0x8c7   :  { %12199 = vst [vmem:[#allocation4 + $0x50] sm:$0xff] %v11693_v44  ;;  %v11695_v20 = vadd.f32 %v11694_v45, %v11654_v14  ;;  %v11696_v43 = vpop.f32.mrf.mxu0  ;;  %11948 = vmatpush1.bf16.msra.mxu1 %v16053_v5  ;;  %v16113_v48 = vld [vmem:[%s21591_s11 + $0x8e8] ss:$92 sps:$4 sm:$0xff]   ;;  %v16122_v44 = vld [vmem:[%s21591_s11 + $0x13b0] ss:$92 sps:$4 sm:$0xff]  }
 0x8c8   :  { %11989 = vmatpush1.bf16.msra.mxu0 %v16056_v41  ;;  %v11656_v29 = vpop.f32.mrf.mxu1  ;;  %11949 = vmatprep.subr.bf16.mxu1 %v16061_v40  ;;  %v16116_v5 = vld [vmem:[%s21591_s11 + $0x1468] ss:$92 sps:$4 sm:$0xff]   ;;  %v16124_v41 = vld [vmem:[%s21591_s11 + $0x13b4] ss:$92 sps:$4 sm:$0xff]   ;;  %v16127_v14 = vld [vmem:[%s21591_s11 + $0x77c] ss:$92 sps:$4 sm:$0xff]  }
 0x8c9   :  { %12200 = vst [vmem:[#allocation4 + $0x58] sm:$0xff] %v11695_v20  ;;  %v11697_v46 = vpop.f32.mrf.mxu0  ;;  %11990 = vmatprep.subr.bf16.mxu0 %v16064_v39  ;;  %v16119_v40 = vld [vmem:[%s21591_s11 + $0x830] ss:$92 sps:$4 sm:$0xff]   ;;  %v16130_v45 = vld [vmem:[%s21591_s11 + $0x12fc] ss:$92 sps:$4 sm:$0xff]  }
 0x8ca   :  { %v16125_v39 = vld [vmem:[%s21591_s11 + $0x778] ss:$92 sps:$4 sm:$0xff]   ;;  %v16133_v20 = vld [vmem:[%s21591_s11 + $0x6c4] ss:$92 sps:$4 sm:$0xff]  }
 0x8cb   :  { %11950 = vmatpush1.bf16.msra.mxu1 %v16059_v1  ;;  %v16128_v47 = vld [vmem:[%s21591_s11 + $0x12f8] ss:$92 sps:$4 sm:$0xff]   ;;  %v16136_v43 = vld [vmem:[%s21591_s11 + $0x1244] ss:$92 sps:$4 sm:$0xff]  }
 0x8cc   :  { %11991 = vmatpush1.bf16.msra.mxu0 %v16062_v35  ;;  %11951 = vmatprep.subr.bf16.mxu1 %v16067_v23  ;;  %v16131_v1 = vld [vmem:[%s21591_s11 + $0x6c0] ss:$92 sps:$4 sm:$0xff]   ;;  %v16139_v35 = vld [vmem:[%s21591_s11 + $0x60c] ss:$92 sps:$4 sm:$0xff]  }
 0x8cd   :  { %11992 = vmatprep.subr.bf16.mxu0 %v16070_v54  ;;  %v16134_v29 = vld [vmem:[%s21591_s11 + $0x1240] ss:$92 sps:$4 sm:$0xff]   ;;  %v16142_v23 = vld [vmem:[%s21591_s11 + $0x118c] ss:$92 sps:$4 sm:$0xff]  }
 0x8ce   :  { %v16137_v46 = vld [vmem:[%s21591_s11 + $0x608] ss:$92 sps:$4 sm:$0xff]  }
 0x8cf   :  { %11952 = vmatpush1.bf16.msra.mxu1 %v16065_v51  ;;  %v16140_v54 = vld [vmem:[%s21591_s11 + $0x1188] ss:$92 sps:$4 sm:$0xff]   ;;  %v16145_v51 = vld [vmem:[%s21591_s11 + $0x55c] ss:$92 sps:$4 sm:$0xff]  }
 0x8d0   :  { %11993 = vmatpush1.bf16.msra.mxu0 %v16068_v50  ;;  %11953 = vmatprep.subr.bf16.mxu1 %v16073_v56  ;;  %v16148_v50 = vld [vmem:[%s21591_s11 + $0x10dc] ss:$92 sps:$4 sm:$0xff]   ;;  %v7431_v56 = vrot.slane %v20845_v10, %v20429_v16 }
 0x8d1   :  { %11994 = vmatprep.subr.bf16.mxu0 %v16076_v8  ;;  %v16143_v8 = vld [vmem:[%s21591_s11 + $0x558] ss:$92 sps:$4 sm:$0xff]  }
 0x8d3   :  { %11954 = vmatpush1.bf16.msra.mxu1 %v16071_v37  ;;  %v16146_v37 = vld [vmem:[%s21591_s11 + $0x10d8] ss:$92 sps:$4 sm:$0xff]  }
 0x8d4   :  { %11995 = vmatpush1.bf16.msra.mxu0 %v16074_v59  ;;  %11955 = vmatprep.subr.bf16.mxu1 %v16079_v13  ;;  %v7435_v59 = vrot.slane %v20845_v10, %v20441_v52  ;;  %v16151_v13 = vld [vmem:[%s21591_s11 + $0x4a4] ss:$92 sps:$4 sm:$0xff]  }
 0x8d5   :  { %11996 = vmatprep.subr.bf16.mxu0 %v16082_v49 }
 0x8d7   :  { %11956 = vmatpush1.bf16.msra.mxu1 %v16077_v60  ;;  %v16154_v60 = vld [vmem:[%s21591_s11 + $0x1024] ss:$92 sps:$4 sm:$0xff]  }
 0x8d8   :  { %11997 = vmatpush1.bf16.msra.mxu0 %v16080_v61  ;;  %11957 = vmatprep.subr.bf16.mxu1 %v16085_v62 }
 0x8d9   :  { %11998 = vmatprep.subr.bf16.mxu0 %v16088_v17  ;;  %v16149_v17 = vld [vmem:[%s21591_s11 + $0x4a0] ss:$92 sps:$4 sm:$0xff]  }
 0x8db   :  { %11958 = vmatpush1.bf16.msra.mxu1 %v16083_v0 }
 0x8dc   :  { %11999 = vmatpush1.bf16.msra.mxu0 %v16086_v27  ;;  %11959 = vmatprep.subr.bf16.mxu1 %v16091_v21  ;;  %v16152_v27 = vld [vmem:[%s21591_s11 + $0x1020] ss:$92 sps:$4 sm:$0xff]   ;;  %v16157_v21 = vld [vmem:[%s21591_s11 + $0x3ec] ss:$92 sps:$4 sm:$0xff]  }
 0x8dd   :  { %12000 = vmatprep.subr.bf16.mxu0 %v16094_v2 }
 0x8df   :  { %11960 = vmatpush1.bf16.msra.mxu1 %v16089_v26 }
 0x8e0   :  { %12001 = vmatpush1.bf16.msra.mxu0 %v16092_v3  ;;  %11961 = vmatprep.subr.bf16.mxu1 %v16097_v11  ;;  %v16160_v11 = vld [vmem:[%s21591_s11 + $0xf6c] ss:$92 sps:$4 sm:$0xff]  }
 0x8e1   :  { %12002 = vmatprep.subr.bf16.mxu0 %v16100_v38 }
 0x8e3   :  { %11962 = vmatpush2.bf16.msra.mxu1 %v16095_v19 }
 0x8e4   :  { %12003 = vmatpush2.bf16.msra.mxu0 %v16098_v32  ;;  %11963 = vmatprep.subr.bf16.mxu1 %v16103_v24  ;;  %v16155_v24 = vld [vmem:[%s21591_s11 + $0x3e8] ss:$92 sps:$4 sm:$0xff]  }
 0x8e5   :  { %12004 = vmatprep.subr.bf16.mxu0 %v16106_v58 }
 0x8e7   :  { %11964 = vmatpush2.bf16.msra.mxu1 %v16101_v9  ;;  %v16158_v9 = vld [vmem:[%s21591_s11 + $0xf68] ss:$92 sps:$4 sm:$0xff]  }
 0x8e8   :  { %12005 = vmatpush2.bf16.msra.mxu0 %v16104_v42  ;;  %11965 = vmatprep.subr.bf16.mxu1 %v16109_v28  ;;  %v16163_v42 = vld [vmem:[%s21591_s11 + $0x334] ss:$92 sps:$4 sm:$0xff]  }
 0x8e9   :  { %12006 = vmatprep.subr.bf16.mxu0 %v16112_v18  ;;  %v16166_v18 = vld [vmem:[%s21591_s11 + $0xeb4] ss:$92 sps:$4 sm:$0xff]  }
 0x8eb   :  { %11966 = vmatpush2.bf16.msra.mxu1 %v16107_v53  ;;  %v16161_v53 = vld [vmem:[%s21591_s11 + $0x330] ss:$92 sps:$4 sm:$0xff]  }
 0x8ec   :  { %12007 = vmatpush2.bf16.msra.mxu0 %v16110_v34  ;;  %11967 = vmatprep.subr.bf16.mxu1 %v16115_v33  ;;  %v16164_v34 = vld [vmem:[%s21591_s11 + $0xeb0] ss:$92 sps:$4 sm:$0xff]   ;;  %v16169_v33 = vld [vmem:[%s21591_s11 + $0x27c] ss:$92 sps:$4 sm:$0xff]  }
 0x8ed   :  { %12008 = vmatprep.subr.bf16.mxu0 %v16118_v31  ;;  %v16172_v31 = vld [vmem:[%s21591_s11 + $0xdfc] ss:$92 sps:$4 sm:$0xff]  }
 0x8ef   :  { %11968 = vmatpush2.bf16.msra.mxu1 %v16113_v48  ;;  %v16167_v48 = vld [vmem:[%s21591_s11 + $0x278] ss:$92 sps:$4 sm:$0xff]  }
 0x8f0   :  { %12009 = vmatpush2.bf16.msra.mxu0 %v16116_v5  ;;  %11969 = vmatprep.subr.bf16.mxu1 %v16121_v30  ;;  %v16170_v5 = vld [vmem:[%s21591_s11 + $0xdf8] ss:$92 sps:$4 sm:$0xff]   ;;  %v16175_v30 = vld [vmem:[%s21591_s11 + $0x1c4] ss:$92 sps:$4 sm:$0xff]  }
 0x8f1   :  { %12010 = vmatprep.subr.bf16.mxu0 %v16124_v41  ;;  %v16178_v41 = vld [vmem:[%s21591_s11 + $0xd44] ss:$92 sps:$4 sm:$0xff]  }
 0x8f3   :  { %11970 = vmatpush2.bf16.msra.mxu1 %v16119_v40  ;;  %v16173_v40 = vld [vmem:[%s21591_s11 + $0x1c0] ss:$92 sps:$4 sm:$0xff]  }
 0x8f4   :  { %12011 = vmatpush2.bf16.msra.mxu0 %v16122_v44  ;;  %11971 = vmatprep.subr.bf16.mxu1 %v16127_v14  ;;  %v16176_v44 = vld [vmem:[%s21591_s11 + $0xd40] ss:$92 sps:$4 sm:$0xff]   ;;  %v16181_v14 = vld [vmem:[%s21591_s11 + $0x10c] ss:$92 sps:$4 sm:$0xff]  }
 0x8f5   :  { %12012 = vmatprep.subr.bf16.mxu0 %v16130_v45  ;;  %v16184_v45 = vld [vmem:[%s21591_s11 + $0xc8c] ss:$92 sps:$4 sm:$0xff]  }
 0x8f7   :  { %11972 = vmatpush2.bf16.msra.mxu1 %v16125_v39  ;;  %v16179_v39 = vld [vmem:[%s21591_s11 + $0x108] ss:$92 sps:$4 sm:$0xff]  }
 0x8f8   :  { %12013 = vmatpush2.bf16.msra.mxu0 %v16128_v47  ;;  %11973 = vmatprep.subr.bf16.mxu1 %v16133_v20  ;;  %v16182_v47 = vld [vmem:[%s21591_s11 + $0xc88] ss:$92 sps:$4 sm:$0xff]   ;;  %v16187_v20 = vld [vmem:[%s21591_s11 + $0x54] ss:$92 sps:$4 sm:$0xff]  }
 0x8f9   :  { %12014 = vmatprep.subr.bf16.mxu0 %v16136_v43  ;;  %v16190_v43 = vld [vmem:[%s21591_s11 + $0xbd4] ss:$92 sps:$4 sm:$0xff]  }
 0x8fb   :  { %11974 = vmatpush2.bf16.msra.mxu1 %v16131_v1  ;;  %v16185_v1 = vld [vmem:[%s21591_s11 + $0x50] ss:$92 sps:$4 sm:$0xff]  }
 0x8fc   :  { %12015 = vmatpush2.bf16.msra.mxu0 %v16134_v29  ;;  %11975 = vmatprep.subr.bf16.mxu1 %v16139_v35  ;;  %v16188_v29 = vld [vmem:[%s21591_s11 + $0xbd0] ss:$92 sps:$4 sm:$0xff]   ;;  %v16193_v35 = vld [vmem:[%s21591_s11 + $0xb1c] ss:$92 sps:$4 sm:$0xff]  }
 0x8fd   :  { %12016 = vmatprep.subr.bf16.mxu0 %v16142_v23  ;;  %v16196_v23 = vld [vmem:[%s21591_s11 + $0x169c] ss:$92 sps:$4 sm:$0xff]  }
 0x8ff   :  { %11976 = vmatpush2.bf16.msra.mxu1 %v16137_v46  ;;  %v16191_v46 = vld [vmem:[%s21591_s11 + $0xb18] ss:$92 sps:$4 sm:$0xff]  }
 0x900   :  { %12017 = vmatpush2.bf16.msra.mxu0 %v16140_v54  ;;  %12027 = vmatprep.subr.bf16.mxu1 %v16145_v51  ;;  %v16194_v54 = vld [vmem:[%s21591_s11 + $0x1698] ss:$92 sps:$4 sm:$0xff]   ;;  %v16199_v51 = vld [vmem:[%s21591_s11 + $0xa64] ss:$92 sps:$4 sm:$0xff]  }
 0x901   :  { %12068 = vmatprep.subr.bf16.mxu0 %v16148_v50  ;;  %v16202_v50 = vld [vmem:[%s21591_s11 + $0x15e4] ss:$92 sps:$4 sm:$0xff]  }
 0x902   :  { %v11733_v49 = vpop.f32.mrf.mxu1  ;;  %11978 = vmatmul.mubr.bf16.vlgmr.msra.gmra.mxu1 %v19444_v7 }
 0x903   :  { %v11734_v61 = vadd.f32 %v11733_v49, %v7431_v56  ;;  %v11774_v62 = vpop.f32.mrf.mxu0  ;;  %12019 = vmatmul.mubr.bf16.vlgmr.msra.gmra.mxu0 %v19446_v22  ;;  %12028 = vmatpush1.bf16.msra.mxu1 %v16143_v8  ;;  %v16197_v56 = vld [vmem:[%s21591_s11 + $0xa60] ss:$92 sps:$4 sm:$0xff]   ;;  %v16206_v49 = vld [vmem:[%s21591_s11 + $0x1528] ss:$92 sps:$4 sm:$0xff]  }
 0x904   :  { %12059 = vmatprep.mubr.bf16.mxu1 %v19434_v55  ;;  %12069 = vmatpush1.bf16.msra.mxu0 %v16146_v37  ;;  %v11735_v0 = vpop.f32.mrf.mxu1  ;;  %v16200_v8 = vld [vmem:[%s21591_s11 + $0x15e0] ss:$92 sps:$4 sm:$0xff]   ;;  %v16205_v37 = vld [vmem:[%s21591_s11 + $0x9ac] ss:$92 sps:$4 sm:$0xff]  }
 0x905   :  { %v11775_v2 = vadd.f32 %v11774_v62, %v11734_v61  ;;  %12100 = vmatprep.mubr.bf16.mxu0 %v19436_v15  ;;  %v11736_v26 = vadd.f32 %v11735_v0, %v7435_v59  ;;  %v11776_v3 = vpop.f32.mrf.mxu0  ;;  %12029 = vmatprep.subr.bf16.mxu1 %v16151_v13  ;;  %v16208_v59 = vld [vmem:[%s21591_s11 + $0x152c] ss:$92 sps:$4 sm:$0xff]   ;;  %v16214_v61 = vld [vmem:[%s21591_s11 + $0x1474] ss:$92 sps:$4 sm:$0xff]   ;;  %v16217_v0 = vld [vmem:[%s21591_s11 + $0x83c] ss:$92 sps:$4 sm:$0xff]  }
 0x906   :  { %v11737_v38 = vpop.f32.mrf.mxu1  ;;  %12070 = vmatprep.subr.bf16.mxu0 %v16154_v60  ;;  %v16203_v13 = vld [vmem:[%s21591_s11 + $0x9a8] ss:$92 sps:$4 sm:$0xff]   ;;  %v16211_v60 = vld [vmem:[%s21591_s11 + $0x8f4] ss:$92 sps:$4 sm:$0xff]  }
 0x907   :  { %12201 = vst [vmem:[#allocation4 + $0x60] sm:$0xff] %v11775_v2  ;;  %v11777_v19 = vadd.f32 %v11776_v3, %v11736_v26  ;;  %v11778_v32 = vpop.f32.mrf.mxu0  ;;  %12030 = vmatpush1.bf16.msra.mxu1 %v16149_v17  ;;  %v16209_v62 = vld [vmem:[%s21591_s11 + $0x8f0] ss:$92 sps:$4 sm:$0xff]   ;;  %v16218_v2 = vld [vmem:[%s21591_s11 + $0x13b8] ss:$92 sps:$4 sm:$0xff]  }
 0x908   :  { %12071 = vmatpush1.bf16.msra.mxu0 %v16152_v27  ;;  %v11738_v58 = vpop.f32.mrf.mxu1  ;;  %12031 = vmatprep.subr.bf16.mxu1 %v16157_v21  ;;  %v16212_v17 = vld [vmem:[%s21591_s11 + $0x1470] ss:$92 sps:$4 sm:$0xff]   ;;  %v16220_v27 = vld [vmem:[%s21591_s11 + $0x13bc] ss:$92 sps:$4 sm:$0xff]   ;;  %v16223_v26 = vld [vmem:[%s21591_s11 + $0x784] ss:$92 sps:$4 sm:$0xff]  }
 0x909   :  { %12202 = vst [vmem:[#allocation4 + $0x68] sm:$0xff] %v11777_v19  ;;  %v11779_v28 = vpop.f32.mrf.mxu0  ;;  %12072 = vmatprep.subr.bf16.mxu0 %v16160_v11  ;;  %v16215_v21 = vld [vmem:[%s21591_s11 + $0x838] ss:$92 sps:$4 sm:$0xff]   ;;  %v16226_v3 = vld [vmem:[%s21591_s11 + $0x1304] ss:$92 sps:$4 sm:$0xff]  }
 0x90a   :  { %v16221_v11 = vld [vmem:[%s21591_s11 + $0x780] ss:$92 sps:$4 sm:$0xff]   ;;  %v16229_v19 = vld [vmem:[%s21591_s11 + $0x6cc] ss:$92 sps:$4 sm:$0xff]  }
 0x90b   :  { %12032 = vmatpush1.bf16.msra.mxu1 %v16155_v24  ;;  %v16224_v38 = vld [vmem:[%s21591_s11 + $0x1300] ss:$92 sps:$4 sm:$0xff]   ;;  %v16232_v32 = vld [vmem:[%s21591_s11 + $0x124c] ss:$92 sps:$4 sm:$0xff]  }
 0x90c   :  { %12073 = vmatpush1.bf16.msra.mxu0 %v16158_v9  ;;  %12033 = vmatprep.subr.bf16.mxu1 %v16163_v42  ;;  %v16227_v24 = vld [vmem:[%s21591_s11 + $0x6c8] ss:$92 sps:$4 sm:$0xff]   ;;  %v16235_v9 = vld [vmem:[%s21591_s11 + $0x614] ss:$92 sps:$4 sm:$0xff]  }
 0x90d   :  { %12074 = vmatprep.subr.bf16.mxu0 %v16166_v18  ;;  %v16230_v58 = vld [vmem:[%s21591_s11 + $0x1248] ss:$92 sps:$4 sm:$0xff]   ;;  %v16238_v42 = vld [vmem:[%s21591_s11 + $0x1194] ss:$92 sps:$4 sm:$0xff]  }
 0x90e   :  { %v16233_v28 = vld [vmem:[%s21591_s11 + $0x610] ss:$92 sps:$4 sm:$0xff]  }
 0x90f   :  { %12034 = vmatpush1.bf16.msra.mxu1 %v16161_v53  ;;  %v16236_v18 = vld [vmem:[%s21591_s11 + $0x1190] ss:$92 sps:$4 sm:$0xff]   ;;  %v16239_v53 = vld [vmem:[%s21591_s11 + $0xb20] ss:$92 sps:$4 sm:$0xff]  }
 0x910   :  { %12075 = vmatpush1.bf16.msra.mxu0 %v16164_v34  ;;  %12035 = vmatprep.subr.bf16.mxu1 %v16169_v33  ;;  %v16240_v34 = vld [vmem:[%s21591_s11 + $0x16a0] ss:$92 sps:$4 sm:$0xff]   ;;  %v7439_v33 = vrot.slane %v20845_v10, %v20635_v36 }
 0x911   :  { %12076 = vmatprep.subr.bf16.mxu0 %v16172_v31  ;;  %v16241_v31 = vld [vmem:[%s21591_s11 + $0x560] ss:$92 sps:$4 sm:$0xff]  }
 0x913   :  { %12036 = vmatpush1.bf16.msra.mxu1 %v16167_v48  ;;  %v16242_v48 = vld [vmem:[%s21591_s11 + $0x10e0] ss:$92 sps:$4 sm:$0xff]  }
 0x914   :  { %12077 = vmatpush1.bf16.msra.mxu0 %v16170_v5  ;;  %12037 = vmatprep.subr.bf16.mxu1 %v16175_v30  ;;  %v7443_v5 = vrot.slane %v20845_v10, %v7410_v12  ;;  %v16243_v30 = vld [vmem:[%s21591_s11 + $0xa68] ss:$92 sps:$4 sm:$0xff]  }
 0x915   :  { %12078 = vmatprep.subr.bf16.mxu0 %v16178_v41  ;;  %v16246_v10 = vld [vmem:[%s21591_s11 + $0x1028] ss:$92 sps:$4 sm:$0xff]  }
 0x917   :  { %12038 = vmatpush1.bf16.msra.mxu1 %v16173_v40  ;;  %v16244_v40 = vld [vmem:[%s21591_s11 + $0x15e8] ss:$92 sps:$4 sm:$0xff]  }
 0x918   :  { %12079 = vmatpush1.bf16.msra.mxu0 %v16176_v44  ;;  %12039 = vmatprep.subr.bf16.mxu1 %v16181_v14 }
 0x919   :  { %12080 = vmatprep.subr.bf16.mxu0 %v16184_v45  ;;  %v16247_v45 = vld [vmem:[%s21591_s11 + $0x9b0] ss:$92 sps:$4 sm:$0xff]  }
 0x91b   :  { %12040 = vmatpush1.bf16.msra.mxu1 %v16179_v39 }
 0x91c   :  { %12081 = vmatpush1.bf16.msra.mxu0 %v16182_v47  ;;  %12041 = vmatprep.subr.bf16.mxu1 %v16187_v20 }
 0x91d   :  { %12082 = vmatprep.subr.bf16.mxu0 %v16190_v43 }
 0x91f   :  { %12042 = vmatpush1.bf16.msra.mxu1 %v16185_v1 }
 0x920   :  { %12083 = vmatpush1.bf16.msra.mxu0 %v16188_v29  ;;  %12043 = vmatprep.subr.bf16.mxu1 %v16193_v35  ;;  %v16249_v35 = vld [vmem:[%s21591_s11 + $0x3f0] ss:$92 sps:$4 sm:$0xff]  }
 0x921   :  { %12084 = vmatprep.subr.bf16.mxu0 %v16196_v23 }
 0x923   :  { %12044 = vmatpush2.bf16.msra.mxu1 %v16191_v46  ;;  %v16251_v46 = vld [vmem:[%s21591_s11 + $0x8f8] ss:$92 sps:$4 sm:$0xff]  }
 0x924   :  { %12085 = vmatpush2.bf16.msra.mxu0 %v16194_v54  ;;  %12045 = vmatprep.subr.bf16.mxu1 %v16199_v51  ;;  %v16252_v51 = vld [vmem:[%s21591_s11 + $0x1478] ss:$92 sps:$4 sm:$0xff]  }
 0x925   :  { %12086 = vmatprep.subr.bf16.mxu0 %v16202_v50  ;;  %v16253_v50 = vld [vmem:[%s21591_s11 + $0x338] ss:$92 sps:$4 sm:$0xff]  }
 0x927   :  { %12046 = vmatpush2.bf16.msra.mxu1 %v16197_v56  ;;  %v16254_v56 = vld [vmem:[%s21591_s11 + $0xeb8] ss:$92 sps:$4 sm:$0xff]  }
 0x928   :  { %12087 = vmatpush2.bf16.msra.mxu0 %v16200_v8  ;;  %12047 = vmatprep.subr.bf16.mxu1 %v16205_v37  ;;  %v16255_v8 = vld [vmem:[%s21591_s11 + $0x840] ss:$92 sps:$4 sm:$0xff]  }
 0x929   :  { %12088 = vmatprep.subr.bf16.mxu0 %v16208_v59  ;;  %v16256_v37 = vld [vmem:[%s21591_s11 + $0x13c0] ss:$92 sps:$4 sm:$0xff]  }
 0x92a   :  { %v16257_v59 = vld [vmem:[%s21591_s11 + $0x280] ss:$92 sps:$4 sm:$0xff]  }
 0x92b   :  { %12048 = vmatpush2.bf16.msra.mxu1 %v16203_v13  ;;  %v16258_v13 = vld [vmem:[%s21591_s11 + $0xe00] ss:$92 sps:$4 sm:$0xff]  }
 0x92c   :  { %12089 = vmatpush2.bf16.msra.mxu0 %v16206_v49  ;;  %12049 = vmatprep.subr.bf16.mxu1 %v16211_v60  ;;  %v16259_v49 = vld [vmem:[%s21591_s11 + $0x788] ss:$92 sps:$4 sm:$0xff]  }
 0x92d   :  { %12090 = vmatprep.subr.bf16.mxu0 %v16214_v61  ;;  %v16260_v60 = vld [vmem:[%s21591_s11 + $0x1308] ss:$92 sps:$4 sm:$0xff]  }
 0x92e   :  { %v16261_v61 = vld [vmem:[%s21591_s11 + $0x1c8] ss:$92 sps:$4 sm:$0xff]  }
 0x92f   :  { %12050 = vmatpush2.bf16.msra.mxu1 %v16209_v62  ;;  %v16262_v62 = vld [vmem:[%s21591_s11 + $0xd48] ss:$92 sps:$4 sm:$0xff]  }
 0x930   :  { %12091 = vmatpush2.bf16.msra.mxu0 %v16212_v17  ;;  %12051 = vmatprep.subr.bf16.mxu1 %v16217_v0  ;;  %v16263_v17 = vld [vmem:[%s21591_s11 + $0x6d0] ss:$92 sps:$4 sm:$0xff]  }
 0x931   :  { %12092 = vmatprep.subr.bf16.mxu0 %v16220_v27  ;;  %v16264_v0 = vld [vmem:[%s21591_s11 + $0x1250] ss:$92 sps:$4 sm:$0xff]  }
 0x932   :  { %v16265_v27 = vld [vmem:[%s21591_s11 + $0x110] ss:$92 sps:$4 sm:$0xff]  }
 0x933   :  { %12052 = vmatpush2.bf16.msra.mxu1 %v16215_v21  ;;  %v16266_v21 = vld [vmem:[%s21591_s11 + $0xc90] ss:$92 sps:$4 sm:$0xff]  }
 0x934   :  { %12093 = vmatpush2.bf16.msra.mxu0 %v16218_v2  ;;  %12053 = vmatprep.subr.bf16.mxu1 %v16223_v26  ;;  %v16267_v2 = vld [vmem:[%s21591_s11 + $0x618] ss:$92 sps:$4 sm:$0xff]  }
 0x935   :  { %12094 = vmatprep.subr.bf16.mxu0 %v16226_v3  ;;  %v16268_v26 = vld [vmem:[%s21591_s11 + $0x1198] ss:$92 sps:$4 sm:$0xff]  }
 0x936   :  { %v16269_v3 = vld [vmem:[%s21591_s11 + $0x58] ss:$92 sps:$4 sm:$0xff]  }
 0x937   :  { %12054 = vmatpush2.bf16.msra.mxu1 %v16221_v11  ;;  %v16270_v11 = vld [vmem:[%s21591_s11 + $0xbd8] ss:$92 sps:$4 sm:$0xff]  }
 0x938   :  { %12095 = vmatpush2.bf16.msra.mxu0 %v16224_v38  ;;  %12055 = vmatprep.subr.bf16.mxu1 %v16229_v19  ;;  %v21557_v38 = vld [vmem:[%s21592_s12 + $0x10] sm:$0x7f] }
 0x939   :  { %12096 = vmatprep.subr.bf16.mxu0 %v16232_v32  ;;  %v7447_v19 = vrot.slane %v21557_v38, %v17252_v63  ;;  %v7451_v32 = vrot.slane %v21557_v38, %v17267_v4 }
 0x93b   :  { %12056 = vmatpush2.bf16.msra.mxu1 %v16227_v24 }
 0x93c   :  { %12097 = vmatpush2.bf16.msra.mxu0 %v16230_v58  ;;  %12057 = vmatprep.subr.bf16.mxu1 %v16235_v9 }
 0x93d   :  { %12098 = vmatprep.subr.bf16.mxu0 %v16238_v42 }
 0x93f   :  { %12058 = vmatpush2.bf16.msra.mxu1 %v16233_v28 }
 0x940   :  { %12099 = vmatpush2.bf16.msra.mxu0 %v16236_v18  ;;  %13860 = vmatprep.subr.bf16.mxu1 %v16239_v53 }
 0x941   :  { %13882 = vmatprep.subr.bf16.mxu0 %v16240_v34 }
 0x942   :  { %v11815_v41 = vpop.f32.mrf.mxu1  ;;  %12060 = vmatmul.mubr.bf16.vlgmr.msra.gmra.mxu1 %v19444_v7 }
 0x943   :  { %v11816_v44 = vadd.f32 %v11815_v41, %v7439_v33  ;;  %v11856_v14 = vpop.f32.mrf.mxu0  ;;  %12101 = vmatmul.mubr.bf16.vlgmr.msra.gmra.mxu0 %v19446_v22  ;;  %13861 = vmatpush3.bf16.msra.mxu1 %v16241_v31 }
 0x944   :  { %12141 = vmatprep.mubr.bf16.mxu1 %v19434_v55  ;;  %13883 = vmatpush3.bf16.msra.mxu0 %v16242_v48  ;;  %v11817_v12 = vpop.f32.mrf.mxu1  ;;  %v16248_v55 = vld [vmem:[%s21591_s11 + $0x1530] ss:$92 sps:$4 sm:$0xff]  }
 0x945   :  { %v11857_v39 = vadd.f32 %v11856_v14, %v11816_v44  ;;  %12181 = vmatprep.mubr.bf16.mxu0 %v19436_v15  ;;  %v11818_v47 = vadd.f32 %v11817_v12, %v7443_v5  ;;  %v11858_v20 = vpop.f32.mrf.mxu0  ;;  %13862 = vmatprep.subr.bf16.mxu1 %v16243_v30  ;;  %v16250_v15 = vld [vmem:[%s21591_s11 + $0xf70] ss:$92 sps:$4 sm:$0xff]   ;;  %s16317_s11 = smov [#allocation2]  }
 0x946   :  { %v11819_v43 = vpop.f32.mrf.mxu1  ;;  %13884 = vmatprep.subr.bf16.mxu0 %v16244_v40  ;;  %s12218_s12 = sshll.u32 %s16317_s11, 4  ;;  %s12219_s12 = int_to_ptr.vmem [resolvable:$true] %s12218_s12 }
 0x947   :  { %12203 = vst [vmem:[#allocation4 + $0x70] sm:$0xff] %v11857_v39  ;;  %v11859_v1 = vadd.f32 %v11858_v20, %v11818_v47  ;;  %v11860_v29 = vpop.f32.mrf.mxu0  ;;  %13863 = vmatpush3.bf16.msra.mxu1 %v16245_v57  ;;  %s16272_s16 = scalar_lea.vmem %s12219_s12, 128  ;;  %p16277_p1 = scmp.lt.s32.totalorder %s12219_s12, %s12219_s12 }
 0x948   :  { %13885 = vmatpush3.bf16.msra.mxu0 %v16246_v10  ;;  %v11820_v23 = vpop.f32.mrf.mxu1  ;;  %13864 = vmatprep.subr.bf16.mxu1 %v16247_v45  ;;  %p16273_p0 = scmp.ne.s32.totalorder %s12219_s12, %s16272_s16  ;;  %p16278_p2 = scmp.lt.s32.totalorder %s16272_s16, %s16272_s16 }
 0x949   :  { %12204 = vst [vmem:[#allocation4 + $0x78] sm:$0xff] %v11859_v1  ;;  %v11861_v54 = vpop.f32.mrf.mxu0  ;;  %13886 = vmatprep.subr.bf16.mxu0 %v16248_v55 }
 0x94a   :  { %p16279_p3 = por %p16278_p2, %p16277_p1 }
 0x94b   :  { %13865 = vmatpush3.bf16.msra.mxu1 %v16249_v35 }
 0x94c   :  { %13887 = vmatpush3.bf16.msra.mxu0 %v16250_v15  ;;  %13866 = vmatprep.subr.bf16.mxu1 %v16251_v46  ;;  %p16280_p4 = pnand %p16279_p3, %p16273_p0 }
 0x94d   :  { %13888 = vmatprep.subr.bf16.mxu0 %v16252_v51 }
 0x94f   :  { %13867 = vmatpush3.bf16.msra.mxu1 %v16253_v50 }
 0x950   :  { %13889 = vmatpush3.bf16.msra.mxu0 %v16254_v56  ;;  %13868 = vmatprep.subr.bf16.mxu1 %v16255_v8 }
 0x951   :  { %13890 = vmatprep.subr.bf16.mxu0 %v16256_v37 }
 0x953   :  { %13869 = vmatpush3.bf16.msra.mxu1 %v16257_v59 }
 0x954   :  { %13891 = vmatpush3.bf16.msra.mxu0 %v16258_v13  ;;  %13870 = vmatprep.subr.bf16.mxu1 %v16259_v49 }
 0x955   :  { %13892 = vmatprep.subr.bf16.mxu0 %v16260_v60 }
 0x957   :  { %13871 = vmatpush3.bf16.msra.mxu1 %v16261_v61 }
 0x958   :  { %13893 = vmatpush3.bf16.msra.mxu0 %v16262_v62  ;;  %13872 = vmatprep.subr.bf16.mxu1 %v16263_v17 }
 0x959   :  { %13894 = vmatprep.subr.bf16.mxu0 %v16264_v0 }
 0x95b   :  { %13873 = vmatpush3.bf16.msra.mxu1 %v16265_v27 }
 0x95c   :  { %13895 = vmatpush3.bf16.msra.mxu0 %v16266_v21  ;;  %13874 = vmatprep.subr.bf16.mxu1 %v16267_v2 }
 0x95d   :  { %13896 = vmatprep.subr.bf16.mxu0 %v16268_v26 }
 0x95f   :  { %13875 = vmatpush3.bf16.msra.mxu1 %v16269_v3 }
 0x960   :  { %13897 = vmatpush3.bf16.msra.mxu0 %v16270_v11 }
 0x962   :  { %12142 = vmatmul.mubr.bf16.vlgmr.msra.gmra.mxu1 %v19444_v7 }
 0x963   :  { %12182 = vmatmul.mubr.bf16.vlgmr.msra.gmra.mxu0 %v19446_v22 }
 0x982   :  { %v11897_v24 = vpop.f32.mrf.mxu1 }
 0x983   :  { %v11898_v58 = vadd.f32 %v11897_v24, %v7447_v19  ;;  %v11938_v9 = vpop.f32.mrf.mxu0 }
 0x984   :  { %v11899_v42 = vpop.f32.mrf.mxu1 }
 0x985   :  { %v11939_v28 = vadd.f32 %v11938_v9, %v11898_v58  ;;  %v11900_v18 = vadd.f32 %v11899_v42, %v7451_v32  ;;  %v11940_v7 = vpop.f32.mrf.mxu0 }
 0x986   :  { %v11901_v53 = vpop.f32.mrf.mxu1 }
 0x987   :  { %12205 = vst [vmem:[#allocation4 + $0x80] sm:$0xff] %v11939_v28  ;;  %v11941_v22 = vadd.f32 %v11940_v7, %v11900_v18  ;;  %v11942_v34 = vpop.f32.mrf.mxu0 }
 0x988   :  { %v11902_v33 = vpop.f32.mrf.mxu1 }
 0x989   :  { %12206 = vst [vmem:[#allocation4 + $0x88] sm:$0xff] %v11941_v22  ;;  %v11943_v31 = vpop.f32.mrf.mxu0 }
 0x98a   :  { %16283 = shalt.err (!%p16280_p4)
}
 0x98b   :  { %12221 = dma.vmem_to_hbm [thread:$0]  %s12219_s12, 128, %s21593_s13, [#allocation3]   ;;  %v7455_v63 = vrot.slane %v21557_v38, %v18518_v25  ;;  %v7459_v4 = vrot.slane %v21557_v38, %v18527_v6  ;;  %v7463_v25 = vrot.slane %v21557_v38, %v20429_v16  ;;  %v7467_v6 = vrot.slane %v21557_v38, %v20441_v52 }
 0x98c   :  { %v7471_v16 = vrot.slane %v21557_v38, %v20635_v36  ;;  %s16318_s13 = smov [#allocation4]  }
 0x98d   :  { %s12228_s0 = sshll.u32 %s16318_s13, 4  ;;  %s12229_s0 = int_to_ptr.vmem [resolvable:$true] %s12228_s0 }
 0x98e   :  { %s16292_s10 = scalar_lea.vmem %s12229_s0, 2944  ;;  %p16297_p6 = scmp.lt.s32.totalorder %s12229_s0, %s12229_s0 }
 0x98f   :  { %p16293_p5 = scmp.ne.s32.totalorder %s12229_s0, %s16292_s10  ;;  %p16298_p7 = scmp.lt.s32.totalorder %s16292_s10, %s16292_s10 }
 0x991   :  { %p16299_p8 = por %p16298_p7, %p16297_p6 }
 0x993   :  { %p16300_p9 = pnand %p16299_p8, %p16293_p5 }
 0x9c2   :  { %v11979_v48 = vpop.f32.mrf.mxu1 }
 0x9c3   :  { %v11980_v5 = vadd.f32 %v11979_v48, %v7455_v63  ;;  %v12020_v30 = vpop.f32.mrf.mxu0 }
 0x9c4   :  { %v11981_v41 = vpop.f32.mrf.mxu1 }
 0x9c5   :  { %v12021_v40 = vadd.f32 %v12020_v30, %v11980_v5  ;;  %v11982_v44 = vadd.f32 %v11981_v41, %v7459_v4  ;;  %v12022_v14 = vpop.f32.mrf.mxu0 }
 0x9c6   :  { %v11983_v57 = vpop.f32.mrf.mxu1 }
 0x9c7   :  { %12207 = vst [vmem:[#allocation4 + $0x90] sm:$0xff] %v12021_v40  ;;  %v12023_v12 = vadd.f32 %v12022_v14, %v11982_v44  ;;  %v12024_v10 = vpop.f32.mrf.mxu0 }
 0x9c8   :  { %v11984_v45 = vpop.f32.mrf.mxu1 }
 0x9c9   :  { %12208 = vst [vmem:[#allocation4 + $0x98] sm:$0xff] %v12023_v12  ;;  %v12025_v39 = vpop.f32.mrf.mxu0 }
 0xa02   :  { %v12061_v47 = vpop.f32.mrf.mxu1 }
 0xa03   :  { %v12062_v20 = vadd.f32 %v12061_v47, %v7463_v25  ;;  %v12102_v55 = vpop.f32.mrf.mxu0 }
 0xa04   :  { %v12063_v43 = vpop.f32.mrf.mxu1 }
 0xa05   :  { %v12103_v1 = vadd.f32 %v12102_v55, %v12062_v20  ;;  %v12064_v29 = vadd.f32 %v12063_v43, %v7467_v6  ;;  %v12104_v35 = vpop.f32.mrf.mxu0 }
 0xa06   :  { %v12065_v23 = vpop.f32.mrf.mxu1 }
 0xa07   :  { %12209 = vst [vmem:[#allocation4 + $0xa0] sm:$0xff] %v12103_v1  ;;  %v12105_v15 = vadd.f32 %v12104_v35, %v12064_v29  ;;  %v12106_v46 = vpop.f32.mrf.mxu0 }
 0xa08   :  { %v12066_v54 = vpop.f32.mrf.mxu1 }
 0xa09   :  { %12210 = vst [vmem:[#allocation4 + $0xa8] sm:$0xff] %v12105_v15  ;;  %v12107_v51 = vpop.f32.mrf.mxu0 }
 0xa22   :  { %v13876_v50 = vpop.f32.mrf.mxu1 }
 0xa23   :  { %v13898_v56 = vpop.f32.mrf.mxu0 }
 0xa24   :  { %v13877_v52 = vpop.f32.mrf.mxu1 }
 0xa25   :  { %v13878_v8 = vadd.f32 %v13877_v52, %v13876_v50  ;;  %v13899_v37 = vpop.f32.mrf.mxu0 }
 0xa26   :  { %v13879_v59 = vpop.f32.mrf.mxu1  ;;  %v13900_v49 = vadd.f32 %v13899_v37, %v13898_v56 }
 0xa27   :  { %v12144_v13 = vadd.f32 %v13878_v8, %v7471_v16  ;;  %v13901_v60 = vpop.f32.mrf.mxu0 }
 0xa28   :  { %v13880_v61 = vpop.f32.mrf.mxu1 }
 0xa29   :  { %v12184_v62 = vadd.f32 %v13900_v49, %v12144_v13  ;;  %v13902_v17 = vpop.f32.mrf.mxu0 }
 0xa2b   :  { %12211 = vst.msk [vmem:[#allocation4 + $0xb0] sm:$0xff] %vm4361_vm1, %v12184_v62 }
 0xa2c   :  { %16303 = shalt.err (!%p16300_p9)
}
 0xa2d   :  { %12231 = dma.vmem_to_hbm [thread:$0]  %s12229_s0, 2944, %s21594_s14, [#allocation5]  }
 0xa2e   :  { %16312 = dma.done.wait [#allocation3], 128  }
 0xa2f   :  { %16313 = vsyncadd [#allocation3], 4294967168 }
 0xa30   :  { %16314 = dma.done.wait [#allocation5], 2944  }
 0xa31   :  { %16315 = vsyncadd [#allocation5], 4294964352 }
 0xa32   :  { %12238 = vsyncpa [#allocation3], 1 }
 0xa33   :  { %12239 = vsyncpa [#allocation5], 1 }

</bundles_post_ra>
